<compile_context>
chip_gen: v7x
topology: tpu7x:2x2x1
jax: 0.10.0
libtpu: 0.0.40
codegen_flags: <defaults>
</compile_context>

<pallas_src>
import functools

import jax
import jax.numpy as jnp
from jax.experimental import pallas as pl
from jax.experimental.pallas import tpu as pltpu

# Fixed architecture constants of DummyImgFeat.
C_IN = 3
C1 = 64
C2 = 128
FC_IN = 2560            # = C2 * (H//4) * (W//4)

CONV1_CHUNK = 160       # rows per conv1 im2col dot (keeps live vregs low)
FC1_K = 512             # fc1 contraction chunk (fills the 256-deep v6e/v7x MXU)


# ----------------------------------------------------------------------------
# Fused kernel
# ----------------------------------------------------------------------------
def _fused_kernel(x_ref, w1_ref, b1_ref, w2_ref, b2_ref,
                  fc1w_hbm, fc1b_ref, fc2w_hbm, fc2b_ref,
                  out_ref,
                  buf1, pbuf, c2out, fc1w_v, fc2w_v, sem,
                  *, B, H, W, PAD):
    H2, W2 = H // 2, W // 2
    H4, W4 = H // 4, W // 4
    W2P = W2 + 2                  # padded row stride on the pooled grid
    GP = (H2 + 2) * W2P           # padded rows per image on the pooled grid
    HW = H * W
    R = B * HW

    # Kick off the big fc-weight fetches immediately so the HBM traffic
    # overlaps the conv/pool compute below.
    cp1 = pltpu.make_async_copy(fc1w_hbm, fc1w_v, sem.at[0])
    cp2 = pltpu.make_async_copy(fc2w_hbm, fc2w_v, sem.at[1])
    cp1.start()
    cp2.start()

    # Zero ONLY the padded pool1 grid: its zero guard ring is read by the
    # conv2 taps.  buf1 / c2out are fully written before they are read.
    pbuf[...] = jnp.zeros_like(pbuf)

    # ---- conv1 + ReLU: chunked im2col dots (K = 27) -------------------------
    bias1 = b1_ref[...]
    for c0 in range(0, R, CONV1_CHUNK):
        cs = min(CONV1_CHUNK, R - c0)
        y = jnp.dot(x_ref[c0:c0 + cs, :], w1_ref[...],
                    preferred_element_type=jnp.float32)
        buf1[c0:c0 + cs, :] = jnp.maximum(y + bias1, 0.0)

    # ---- pool1 (2x2 / stride 2), compacted into the zero-padded conv2 grid --
    # Each (b, i) group reads the 4 pool corners with stride-2 row slices and
    # writes W2 contiguous rows into the interior of the padded grid.
    for b in range(B):
        for i in range(H2):
            s = b * HW + (2 * i) * W
            d = PAD + b * GP + (i + 1) * W2P + 1
            r00 = buf1[pl.ds(s, W2, stride=2), :]
            r01 = buf1[pl.ds(s + 1, W2, stride=2), :]
            r10 = buf1[pl.ds(s + W, W2, stride=2), :]
            r11 = buf1[pl.ds(s + W + 1, W2, stride=2), :]
            pbuf[d:d + W2, :] = jnp.maximum(jnp.maximum(r00, r01),
                                            jnp.maximum(r10, r11))

    # ---- conv2 + ReLU: 9 static-offset taps per image chunk (no masks) ------
    # We compute all GP padded rows per image; border rows hold finite junk
    # that pool2 never reads.  Valid rows only ever read inside their own
    # image's zero-padded block, so there is no cross-image contamination.
    bias2 = b2_ref[...]
    for b in range(B):
        s0 = PAD + b * GP
        acc = None
        for t in range(9):
            di, dj = t // 3 - 1, t % 3 - 1
            off = di * W2P + dj
            patch = pbuf[s0 + off:s0 + off + GP, :].astype(jnp.bfloat16)
            y = jnp.dot(patch, w2_ref[t], preferred_element_type=jnp.float32)
            acc = y if acc is None else acc + y
        c2out[b * GP:(b + 1) * GP, :] = jnp.maximum(acc + bias2, 0.0)

    # fc weights must be VMEM-resident from here on.
    cp1.wait()
    cp2.wait()

    # ---- pool2 gathered straight into the lane-major (B, 2560) fc1 input ----
    # For each of the H4*W4 spatial positions, the 4 pool corners for all B
    # images are picked with stride-GP row reads; the concat of the 20
    # (B, 128) pieces (at 128-aligned lane offsets) is the fc1 activation.
    pieces = []
    for i2 in range(H4):
        for j2 in range(W4):
            base = (2 * i2 + 1) * W2P + (2 * j2 + 1)
            p00 = c2out[pl.ds(base, B, stride=GP), :]
            p01 = c2out[pl.ds(base + 1, B, stride=GP), :]
            p10 = c2out[pl.ds(base + W2P, B, stride=GP), :]
            p11 = c2out[pl.ds(base + W2P + 1, B, stride=GP), :]
            pieces.append(jnp.maximum(jnp.maximum(p00, p01),
                                      jnp.maximum(p10, p11)))
    fc_act = jnp.concatenate(pieces, axis=1).astype(jnp.bfloat16)   # (B, FC_IN)

    # ---- fc1 (+ReLU) as K=512 chunks, fc2 as a single dot -------------------
    kin = fc_act.shape[1]
    acc = None
    for k0 in range(0, kin, FC1_K):
        ks = min(FC1_K, kin - k0)
        y = jnp.dot(fc_act[:, k0:k0 + ks], fc1w_v[k0:k0 + ks, :],
                    preferred_element_type=jnp.float32)
        acc = y if acc is None else acc + y
    h1 = jnp.maximum(acc + fc1b_ref[...], 0.0).astype(jnp.bfloat16)  # (B, 512)
    out = jnp.dot(h1, fc2w_v[...],
                  preferred_element_type=jnp.float32) + fc2b_ref[...]
    out_ref[...] = out.astype(out_ref.dtype)


# ----------------------------------------------------------------------------
# Parameters: PyTorch-layout init + one-time kernel-ready re-layout (bf16).
# ----------------------------------------------------------------------------
def init_params(key, output_dim: int = 512):
    ks = jax.random.split(key, 8)

    def rnd(k, shape, fan_in):
        return jax.random.normal(k, shape, jnp.float32) / jnp.sqrt(float(fan_in))

    return {
        # PyTorch Conv2d weight layout: (Cout, Cin, KH, KW)
        "conv1_w": rnd(ks[0], (C1, C_IN, 3, 3), C_IN * 9),
        "conv1_b": rnd(ks[1], (C1,), C_IN * 9),
        "conv2_w": rnd(ks[2], (C2, C1, 3, 3), C1 * 9),
        "conv2_b": rnd(ks[3], (C2,), C1 * 9),
        # PyTorch Linear weight layout: (out, in)
        "fc1_w": rnd(ks[4], (512, FC_IN), FC_IN),
        "fc1_b": rnd(ks[5], (512,), FC_IN),
        "fc2_w": rnd(ks[6], (output_dim, 512), 512),
        "fc2_b": rnd(ks[7], (512,), 512),
    }


def prepare_params(params):
    """One-time weight re-layout + bf16 cast (hoisted out of the hot path)."""
    hidden, fin = params["fc1_w"].shape        # (512, 2560)
    npos = fin // C2                           # 20 spatial positions
    # PyTorch flatten index = c*npos + pos; kernel lane index = pos*C2 + c.
    w1 = params["fc1_w"].reshape(hidden, C2, npos)
    w1 = jnp.transpose(w1, (2, 1, 0)).reshape(fin, hidden)
    return {
        # conv weights -> (tap = ki*3+kj, cin, cout)
        "conv1_w": jnp.transpose(params["conv1_w"], (2, 3, 1, 0))
                      .reshape(9 * C_IN, C1).astype(jnp.bfloat16),
        "conv1_b": params["conv1_b"].reshape(1, -1).astype(jnp.float32),
        "conv2_w": jnp.transpose(params["conv2_w"], (2, 3, 1, 0))
                      .reshape(9, C1, C2).astype(jnp.bfloat16),
        "conv2_b": params["conv2_b"].reshape(1, -1).astype(jnp.float32),
        "fc1_w": w1.astype(jnp.bfloat16),                                     # (2560, 512)
        "fc1_b": params["fc1_b"].reshape(1, -1).astype(jnp.float32),
        "fc2_w": jnp.transpose(params["fc2_w"], (1, 0)).astype(jnp.bfloat16),  # (512, out)
        "fc2_b": params["fc2_b"].reshape(1, -1).astype(jnp.float32),
    }


# ----------------------------------------------------------------------------
# Forward wrapper
# ----------------------------------------------------------------------------
def dummy_img_feat_forward(pp, x_nchw):
    """x_nchw: (B, 3, H, W) f32 with (H//4)*(W//4)*128 == 2560.  Returns (B, out_dim)."""
    B, C, H, W = x_nchw.shape
    assert C == C_IN, C
    assert H % 4 == 0 and W % 4 == 0 and (H // 4) * (W // 4) * C2 == FC_IN, (H, W)
    H2, W2 = H // 2, W // 2
    W2P = W2 + 2
    GP = (H2 + 2) * W2P
    PAD = ((W2P + 1 + 7) // 8) * 8            # >= max |tap offset|, sublane aligned
    R = B * H * W
    out_dim = pp["fc2_w"].shape[1]

    # ---- layout glue only (all FLOPs happen in the kernel) ----
    # conv1 im2col: 9 shifted copies of the zero-padded 3-channel input,
    # tap-major / channel-minor -> (R, 27) bf16 patch matrix.
    x = jnp.transpose(x_nchw, (0, 2, 3, 1)).astype(jnp.float32)      # (B,H,W,3)
    xp = jnp.pad(x, ((0, 0), (1, 1), (1, 1), (0, 0)))
    taps = [xp[:, ki:ki + H, kj:kj + W, :]
            for ki in range(3) for kj in range(3)]
    patches = jnp.concatenate(taps, axis=-1).reshape(R, 9 * C_IN)
    patches = patches.astype(jnp.bfloat16)

    vmem = lambda: pl.BlockSpec(memory_space=pltpu.MemorySpace.VMEM)
    hbm = lambda: pl.BlockSpec(memory_space=pl.ANY)

    kernel = functools.partial(_fused_kernel, B=B, H=H, W=W, PAD=PAD)
    return pl.pallas_call(
        kernel,
        out_shape=jax.ShapeDtypeStruct((B, out_dim), jnp.float32),
        in_specs=[vmem(),                              # conv1 im2col patches
                  vmem(), vmem(), vmem(), vmem(),      # conv1_w/b, conv2_w/b
                  hbm(), vmem(), hbm(), vmem()],       # fc1_w(HBM), fc1_b, fc2_w(HBM), fc2_b
        out_specs=pl.BlockSpec(memory_space=pltpu.MemorySpace.VMEM),
        scratch_shapes=[
            pltpu.VMEM((R, C1), jnp.float32),                    # conv1 output
            pltpu.VMEM((2 * PAD + B * GP, C1), jnp.float32),     # zero-padded pool1 grid
            pltpu.VMEM((B * GP, C2), jnp.float32),               # conv2 output
            pltpu.VMEM(pp["fc1_w"].shape, jnp.bfloat16),         # fc1 weight (DMA target)
            pltpu.VMEM(pp["fc2_w"].shape, jnp.bfloat16),         # fc2 weight (DMA target)
            pltpu.SemaphoreType.DMA((2,)),
        ],
    )(patches, pp["conv1_w"], pp["conv1_b"], pp["conv2_w"], pp["conv2_b"],
      pp["fc1_w"], pp["fc1_b"], pp["fc2_w"], pp["fc2_b"])


# ----------------------------------------------------------------------------
# Pure-JAX f32 reference (for a tolerance check against the bf16-MXU kernel).
# ----------------------------------------------------------------------------
def _reference_forward(params, x):
    dn = ("NCHW", "OIHW", "NCHW")
    y = jax.lax.conv_general_dilated(x, params["conv1_w"], (1, 1), "SAME",
                                     dimension_numbers=dn)
    y = jax.nn.relu(y + params["conv1_b"][None, :, None, None])
    y = jax.lax.reduce_window(y, -jnp.inf, jax.lax.max,
                              (1, 1, 2, 2), (1, 1, 2, 2), "VALID")
    y = jax.lax.conv_general_dilated(y, params["conv2_w"], (1, 1), "SAME",
                                     dimension_numbers=dn)
    y = jax.nn.relu(y + params["conv2_b"][None, :, None, None])
    y = jax.lax.reduce_window(y, -jnp.inf, jax.lax.max,
                              (1, 1, 2, 2), (1, 1, 2, 2), "VALID")
    flat = y.reshape(y.shape[0], -1)
    h = jax.nn.relu(flat @ params["fc1_w"].T + params["fc1_b"])
    return h @ params["fc2_w"].T + params["fc2_b"]


if __name__ == "__main__":
    key = jax.random.PRNGKey(0)
    pkey, xkey = jax.random.split(key)

    params = init_params(pkey, output_dim=512)
    pp = prepare_params(params)   # one-time weight re-layout, not in the hot path

    # (H/4)*(W/4) must be 20 so the flatten dim is 2560 -> H=16, W=20.
    B, C, H, W = 2, 3, 16, 20
    x = jax.random.normal(xkey, (B, C, H, W), jnp.float32)

    fwd = jax.jit(dummy_img_feat_forward)
    out = jax.block_until_ready(fwd(pp, x))

    assert out.shape == (B, 512), out.shape
    assert out.dtype == jnp.float32, out.dtype
    assert bool(jnp.all(jnp.isfinite(out)))

    ref = _reference_forward(params, x)
    err = float(jnp.max(jnp.abs(out - ref)))
    assert err < 1e-1, f"max abs err vs f32 reference: {err}"

    print("KERNEL_OK")
</pallas_src>

<mosaic_0001>
module attributes {stable_mosaic.version = 11 : i64} {
  func.func @_fused_kernel(%arg0: memref<640x27xbf16, #tpu.memory_space<vmem>>, %arg1: memref<27x64xbf16, #tpu.memory_space<vmem>>, %arg2: memref<1x64xf32, #tpu.memory_space<vmem>>, %arg3: memref<9x64x128xbf16, #tpu.memory_space<vmem>>, %arg4: memref<1x128xf32, #tpu.memory_space<vmem>>, %arg5: memref<2560x512xbf16, #tpu.memory_space<any>>, %arg6: memref<1x512xf32, #tpu.memory_space<vmem>>, %arg7: memref<512x512xbf16, #tpu.memory_space<any>>, %arg8: memref<1x512xf32, #tpu.memory_space<vmem>>, %arg9: memref<2x512xf32, #tpu.memory_space<vmem>>, %arg10: memref<640x64xf32, #tpu.memory_space<vmem>>, %arg11: memref<272x64xf32, #tpu.memory_space<vmem>>, %arg12: memref<240x128xf32, #tpu.memory_space<vmem>>, %arg13: memref<2560x512xbf16, #tpu.memory_space<vmem>>, %arg14: memref<512x512xbf16, #tpu.memory_space<vmem>>, %arg15: memref<2x!tpu.dma_semaphore, #tpu.memory_space<semaphore_mem>>) attributes {dimension_semantics = [], scalar_prefetch = 0 : i64, scratch_operands = 6 : i64, tpu.core_type = #tpu.core_type<tc>} {
    %c0_i32 = arith.constant 0 : i32
    %0 = tpu.memref_slice %arg15[%c0_i32] : memref<2x!tpu.dma_semaphore, #tpu.memory_space<semaphore_mem>> -> memref<1x!tpu.dma_semaphore, #tpu.memory_space<semaphore_mem>>
    %1 = tpu.memref_squeeze %0 : memref<1x!tpu.dma_semaphore, #tpu.memory_space<semaphore_mem>> -> memref<!tpu.dma_semaphore, #tpu.memory_space<semaphore_mem>>
    tpu.enqueue_dma source(%arg5 : memref<2560x512xbf16, #tpu.memory_space<any>>) target(%arg13 : memref<2560x512xbf16, #tpu.memory_space<vmem>>) target_semaphore(%1 : memref<!tpu.dma_semaphore, #tpu.memory_space<semaphore_mem>>)
    %c1_i32 = arith.constant 1 : i32
    %2 = tpu.memref_slice %arg15[%c1_i32] : memref<2x!tpu.dma_semaphore, #tpu.memory_space<semaphore_mem>> -> memref<1x!tpu.dma_semaphore, #tpu.memory_space<semaphore_mem>>
    %3 = tpu.memref_squeeze %2 : memref<1x!tpu.dma_semaphore, #tpu.memory_space<semaphore_mem>> -> memref<!tpu.dma_semaphore, #tpu.memory_space<semaphore_mem>>
    tpu.enqueue_dma source(%arg7 : memref<512x512xbf16, #tpu.memory_space<any>>) target(%arg14 : memref<512x512xbf16, #tpu.memory_space<vmem>>) target_semaphore(%3 : memref<!tpu.dma_semaphore, #tpu.memory_space<semaphore_mem>>)
    %cst = arith.constant 0.000000e+00 : f32
    %4 = vector.broadcast %cst : f32 to vector<272x64xf32>
    %c0 = arith.constant 0 : index
    %c0_0 = arith.constant 0 : index
    %5 = vector.load %arg11[%c0, %c0_0] : memref<272x64xf32, #tpu.memory_space<vmem>>, vector<272x64xf32>
    tpu.vector_store %arg11[%c0, %c0_0], %4 {strides = array<i32>} : memref<272x64xf32, #tpu.memory_space<vmem>>, vector<272x64xf32>,
    %c0_1 = arith.constant 0 : index
    %c0_2 = arith.constant 0 : index
    %6 = vector.load %arg2[%c0_1, %c0_2] : memref<1x64xf32, #tpu.memory_space<vmem>>, vector<1x64xf32>
    %c0_3 = arith.constant 0 : index
    %c0_4 = arith.constant 0 : index
    %7 = vector.load %arg0[%c0_3, %c0_4] : memref<640x27xbf16, #tpu.memory_space<vmem>>, vector<160x27xbf16>
    %c0_5 = arith.constant 0 : index
    %c0_6 = arith.constant 0 : index
    %8 = vector.load %arg1[%c0_5, %c0_6] : memref<27x64xbf16, #tpu.memory_space<vmem>>, vector<27x64xbf16>
    %cst_7 = arith.constant dense<0.000000e+00> : vector<160x64xf32>
    %9 = tpu.matmul %7, %8, %cst_7 {dimension_numbers = #tpu.dot_dimension_numbers<[1], [0], [0], [1], [0, 0, 1, 1], [], []>} : vector<160x27xbf16>, vector<27x64xbf16>, vector<160x64xf32> -> vector<160x64xf32>
    %10 = vector.broadcast %6 : vector<1x64xf32> to vector<160x64xf32>
    %11 = arith.addf %9, %10 : vector<160x64xf32>
    %cst_8 = arith.constant 0.000000e+00 : f32
    %12 = vector.broadcast %cst_8 : f32 to vector<160x64xf32>
    %13 = arith.maximumf %11, %12 : vector<160x64xf32>
    %c0_9 = arith.constant 0 : index
    %c0_10 = arith.constant 0 : index
    %14 = vector.load %arg10[%c0_9, %c0_10] : memref<640x64xf32, #tpu.memory_space<vmem>>, vector<160x64xf32>
    tpu.vector_store %arg10[%c0_9, %c0_10], %13 {strides = array<i32>} : memref<640x64xf32, #tpu.memory_space<vmem>>, vector<160x64xf32>,
    %c160 = arith.constant 160 : index
    %c0_11 = arith.constant 0 : index
    %15 = vector.load %arg0[%c160, %c0_11] : memref<640x27xbf16, #tpu.memory_space<vmem>>, vector<160x27xbf16>
    %c0_12 = arith.constant 0 : index
    %c0_13 = arith.constant 0 : index
    %16 = vector.load %arg1[%c0_12, %c0_13] : memref<27x64xbf16, #tpu.memory_space<vmem>>, vector<27x64xbf16>
    %cst_14 = arith.constant dense<0.000000e+00> : vector<160x64xf32>
    %17 = tpu.matmul %15, %16, %cst_14 {dimension_numbers = #tpu.dot_dimension_numbers<[1], [0], [0], [1], [0, 0, 1, 1], [], []>} : vector<160x27xbf16>, vector<27x64xbf16>, vector<160x64xf32> -> vector<160x64xf32>
    %18 = vector.broadcast %6 : vector<1x64xf32> to vector<160x64xf32>
    %19 = arith.addf %17, %18 : vector<160x64xf32>
    %cst_15 = arith.constant 0.000000e+00 : f32
    %20 = vector.broadcast %cst_15 : f32 to vector<160x64xf32>
    %21 = arith.maximumf %19, %20 : vector<160x64xf32>
    %c160_16 = arith.constant 160 : index
    %c0_17 = arith.constant 0 : index
    %22 = vector.load %arg10[%c160_16, %c0_17] : memref<640x64xf32, #tpu.memory_space<vmem>>, vector<160x64xf32>
    tpu.vector_store %arg10[%c160_16, %c0_17], %21 {strides = array<i32>} : memref<640x64xf32, #tpu.memory_space<vmem>>, vector<160x64xf32>,
    %c320 = arith.constant 320 : index
    %c0_18 = arith.constant 0 : index
    %23 = vector.load %arg0[%c320, %c0_18] : memref<640x27xbf16, #tpu.memory_space<vmem>>, vector<160x27xbf16>
    %c0_19 = arith.constant 0 : index
    %c0_20 = arith.constant 0 : index
    %24 = vector.load %arg1[%c0_19, %c0_20] : memref<27x64xbf16, #tpu.memory_space<vmem>>, vector<27x64xbf16>
    %cst_21 = arith.constant dense<0.000000e+00> : vector<160x64xf32>
    %25 = tpu.matmul %23, %24, %cst_21 {dimension_numbers = #tpu.dot_dimension_numbers<[1], [0], [0], [1], [0, 0, 1, 1], [], []>} : vector<160x27xbf16>, vector<27x64xbf16>, vector<160x64xf32> -> vector<160x64xf32>
    %26 = vector.broadcast %6 : vector<1x64xf32> to vector<160x64xf32>
    %27 = arith.addf %25, %26 : vector<160x64xf32>
    %cst_22 = arith.constant 0.000000e+00 : f32
    %28 = vector.broadcast %cst_22 : f32 to vector<160x64xf32>
    %29 = arith.maximumf %27, %28 : vector<160x64xf32>
    %c320_23 = arith.constant 320 : index
    %c0_24 = arith.constant 0 : index
    %30 = vector.load %arg10[%c320_23, %c0_24] : memref<640x64xf32, #tpu.memory_space<vmem>>, vector<160x64xf32>
    tpu.vector_store %arg10[%c320_23, %c0_24], %29 {strides = array<i32>} : memref<640x64xf32, #tpu.memory_space<vmem>>, vector<160x64xf32>,
    %c480 = arith.constant 480 : index
    %c0_25 = arith.constant 0 : index
    %31 = vector.load %arg0[%c480, %c0_25] : memref<640x27xbf16, #tpu.memory_space<vmem>>, vector<160x27xbf16>
    %c0_26 = arith.constant 0 : index
    %c0_27 = arith.constant 0 : index
    %32 = vector.load %arg1[%c0_26, %c0_27] : memref<27x64xbf16, #tpu.memory_space<vmem>>, vector<27x64xbf16>
    %cst_28 = arith.constant dense<0.000000e+00> : vector<160x64xf32>
    %33 = tpu.matmul %31, %32, %cst_28 {dimension_numbers = #tpu.dot_dimension_numbers<[1], [0], [0], [1], [0, 0, 1, 1], [], []>} : vector<160x27xbf16>, vector<27x64xbf16>, vector<160x64xf32> -> vector<160x64xf32>
    %34 = vector.broadcast %6 : vector<1x64xf32> to vector<160x64xf32>
    %35 = arith.addf %33, %34 : vector<160x64xf32>
    %cst_29 = arith.constant 0.000000e+00 : f32
    %36 = vector.broadcast %cst_29 : f32 to vector<160x64xf32>
    %37 = arith.maximumf %35, %36 : vector<160x64xf32>
    %c480_30 = arith.constant 480 : index
    %c0_31 = arith.constant 0 : index
    %38 = vector.load %arg10[%c480_30, %c0_31] : memref<640x64xf32, #tpu.memory_space<vmem>>, vector<160x64xf32>
    tpu.vector_store %arg10[%c480_30, %c0_31], %37 {strides = array<i32>} : memref<640x64xf32, #tpu.memory_space<vmem>>, vector<160x64xf32>,
    %c0_32 = arith.constant 0 : index
    %c0_33 = arith.constant 0 : index
    %39 = tpu.strided_load %arg10[%c0_32, %c0_33] {strides = array<i32: 2, 1>} : memref<640x64xf32, #tpu.memory_space<vmem>>, vector<10x64xf32>
    %c1 = arith.constant 1 : index
    %c0_34 = arith.constant 0 : index
    %40 = tpu.strided_load %arg10[%c1, %c0_34] {strides = array<i32: 2, 1>} : memref<640x64xf32, #tpu.memory_space<vmem>>, vector<10x64xf32>
    %c20 = arith.constant 20 : index
    %c0_35 = arith.constant 0 : index
    %41 = tpu.strided_load %arg10[%c20, %c0_35] {strides = array<i32: 2, 1>} : memref<640x64xf32, #tpu.memory_space<vmem>>, vector<10x64xf32>
    %c21 = arith.constant 21 : index
    %c0_36 = arith.constant 0 : index
    %42 = tpu.strided_load %arg10[%c21, %c0_36] {strides = array<i32: 2, 1>} : memref<640x64xf32, #tpu.memory_space<vmem>>, vector<10x64xf32>
    %43 = arith.maximumf %39, %40 : vector<10x64xf32>
    %44 = arith.maximumf %41, %42 : vector<10x64xf32>
    %45 = arith.maximumf %43, %44 : vector<10x64xf32>
    %c29 = arith.constant 29 : index
    %c0_37 = arith.constant 0 : index
    %46 = vector.load %arg11[%c29, %c0_37] : memref<272x64xf32, #tpu.memory_space<vmem>>, vector<10x64xf32>
    tpu.vector_store %arg11[%c29, %c0_37], %45 {strides = array<i32>} : memref<272x64xf32, #tpu.memory_space<vmem>>, vector<10x64xf32>,
    %c40 = arith.constant 40 : index
    %c0_38 = arith.constant 0 : index
    %47 = tpu.strided_load %arg10[%c40, %c0_38] {strides = array<i32: 2, 1>} : memref<640x64xf32, #tpu.memory_space<vmem>>, vector<10x64xf32>
    %c41 = arith.constant 41 : index
    %c0_39 = arith.constant 0 : index
    %48 = tpu.strided_load %arg10[%c41, %c0_39] {strides = array<i32: 2, 1>} : memref<640x64xf32, #tpu.memory_space<vmem>>, vector<10x64xf32>
    %c60 = arith.constant 60 : index
    %c0_40 = arith.constant 0 : index
    %49 = tpu.strided_load %arg10[%c60, %c0_40] {strides = array<i32: 2, 1>} : memref<640x64xf32, #tpu.memory_space<vmem>>, vector<10x64xf32>
    %c61 = arith.constant 61 : index
    %c0_41 = arith.constant 0 : index
    %50 = tpu.strided_load %arg10[%c61, %c0_41] {strides = array<i32: 2, 1>} : memref<640x64xf32, #tpu.memory_space<vmem>>, vector<10x64xf32>
    %51 = arith.maximumf %47, %48 : vector<10x64xf32>
    %52 = arith.maximumf %49, %50 : vector<10x64xf32>
    %53 = arith.maximumf %51, %52 : vector<10x64xf32>
    %c41_42 = arith.constant 41 : index
    %c0_43 = arith.constant 0 : index
    %54 = vector.load %arg11[%c41_42, %c0_43] : memref<272x64xf32, #tpu.memory_space<vmem>>, vector<10x64xf32>
    tpu.vector_store %arg11[%c41_42, %c0_43], %53 {strides = array<i32>} : memref<272x64xf32, #tpu.memory_space<vmem>>, vector<10x64xf32>,
    %c80 = arith.constant 80 : index
    %c0_44 = arith.constant 0 : index
    %55 = tpu.strided_load %arg10[%c80, %c0_44] {strides = array<i32: 2, 1>} : memref<640x64xf32, #tpu.memory_space<vmem>>, vector<10x64xf32>
    %c81 = arith.constant 81 : index
    %c0_45 = arith.constant 0 : index
    %56 = tpu.strided_load %arg10[%c81, %c0_45] {strides = array<i32: 2, 1>} : memref<640x64xf32, #tpu.memory_space<vmem>>, vector<10x64xf32>
    %c100 = arith.constant 100 : index
    %c0_46 = arith.constant 0 : index
    %57 = tpu.strided_load %arg10[%c100, %c0_46] {strides = array<i32: 2, 1>} : memref<640x64xf32, #tpu.memory_space<vmem>>, vector<10x64xf32>
    %c101 = arith.constant 101 : index
    %c0_47 = arith.constant 0 : index
    %58 = tpu.strided_load %arg10[%c101, %c0_47] {strides = array<i32: 2, 1>} : memref<640x64xf32, #tpu.memory_space<vmem>>, vector<10x64xf32>
    %59 = arith.maximumf %55, %56 : vector<10x64xf32>
    %60 = arith.maximumf %57, %58 : vector<10x64xf32>
    %61 = arith.maximumf %59, %60 : vector<10x64xf32>
    %c53 = arith.constant 53 : index
    %c0_48 = arith.constant 0 : index
    %62 = vector.load %arg11[%c53, %c0_48] : memref<272x64xf32, #tpu.memory_space<vmem>>, vector<10x64xf32>
    tpu.vector_store %arg11[%c53, %c0_48], %61 {strides = array<i32>} : memref<272x64xf32, #tpu.memory_space<vmem>>, vector<10x64xf32>,
    %c120 = arith.constant 120 : index
    %c0_49 = arith.constant 0 : index
    %63 = tpu.strided_load %arg10[%c120, %c0_49] {strides = array<i32: 2, 1>} : memref<640x64xf32, #tpu.memory_space<vmem>>, vector<10x64xf32>
    %c121 = arith.constant 121 : index
    %c0_50 = arith.constant 0 : index
    %64 = tpu.strided_load %arg10[%c121, %c0_50] {strides = array<i32: 2, 1>} : memref<640x64xf32, #tpu.memory_space<vmem>>, vector<10x64xf32>
    %c140 = arith.constant 140 : index
    %c0_51 = arith.constant 0 : index
    %65 = tpu.strided_load %arg10[%c140, %c0_51] {strides = array<i32: 2, 1>} : memref<640x64xf32, #tpu.memory_space<vmem>>, vector<10x64xf32>
    %c141 = arith.constant 141 : index
    %c0_52 = arith.constant 0 : index
    %66 = tpu.strided_load %arg10[%c141, %c0_52] {strides = array<i32: 2, 1>} : memref<640x64xf32, #tpu.memory_space<vmem>>, vector<10x64xf32>
    %67 = arith.maximumf %63, %64 : vector<10x64xf32>
    %68 = arith.maximumf %65, %66 : vector<10x64xf32>
    %69 = arith.maximumf %67, %68 : vector<10x64xf32>
    %c65 = arith.constant 65 : index
    %c0_53 = arith.constant 0 : index
    %70 = vector.load %arg11[%c65, %c0_53] : memref<272x64xf32, #tpu.memory_space<vmem>>, vector<10x64xf32>
    tpu.vector_store %arg11[%c65, %c0_53], %69 {strides = array<i32>} : memref<272x64xf32, #tpu.memory_space<vmem>>, vector<10x64xf32>,
    %c160_54 = arith.constant 160 : index
    %c0_55 = arith.constant 0 : index
    %71 = tpu.strided_load %arg10[%c160_54, %c0_55] {strides = array<i32: 2, 1>} : memref<640x64xf32, #tpu.memory_space<vmem>>, vector<10x64xf32>
    %c161 = arith.constant 161 : index
    %c0_56 = arith.constant 0 : index
    %72 = tpu.strided_load %arg10[%c161, %c0_56] {strides = array<i32: 2, 1>} : memref<640x64xf32, #tpu.memory_space<vmem>>, vector<10x64xf32>
    %c180 = arith.constant 180 : index
    %c0_57 = arith.constant 0 : index
    %73 = tpu.strided_load %arg10[%c180, %c0_57] {strides = array<i32: 2, 1>} : memref<640x64xf32, #tpu.memory_space<vmem>>, vector<10x64xf32>
    %c181 = arith.constant 181 : index
    %c0_58 = arith.constant 0 : index
    %74 = tpu.strided_load %arg10[%c181, %c0_58] {strides = array<i32: 2, 1>} : memref<640x64xf32, #tpu.memory_space<vmem>>, vector<10x64xf32>
    %75 = arith.maximumf %71, %72 : vector<10x64xf32>
    %76 = arith.maximumf %73, %74 : vector<10x64xf32>
    %77 = arith.maximumf %75, %76 : vector<10x64xf32>
    %c77 = arith.constant 77 : index
    %c0_59 = arith.constant 0 : index
    %78 = vector.load %arg11[%c77, %c0_59] : memref<272x64xf32, #tpu.memory_space<vmem>>, vector<10x64xf32>
    tpu.vector_store %arg11[%c77, %c0_59], %77 {strides = array<i32>} : memref<272x64xf32, #tpu.memory_space<vmem>>, vector<10x64xf32>,
    %c200 = arith.constant 200 : index
    %c0_60 = arith.constant 0 : index
    %79 = tpu.strided_load %arg10[%c200, %c0_60] {strides = array<i32: 2, 1>} : memref<640x64xf32, #tpu.memory_space<vmem>>, vector<10x64xf32>
    %c201 = arith.constant 201 : index
    %c0_61 = arith.constant 0 : index
    %80 = tpu.strided_load %arg10[%c201, %c0_61] {strides = array<i32: 2, 1>} : memref<640x64xf32, #tpu.memory_space<vmem>>, vector<10x64xf32>
    %c220 = arith.constant 220 : index
    %c0_62 = arith.constant 0 : index
    %81 = tpu.strided_load %arg10[%c220, %c0_62] {strides = array<i32: 2, 1>} : memref<640x64xf32, #tpu.memory_space<vmem>>, vector<10x64xf32>
    %c221 = arith.constant 221 : index
    %c0_63 = arith.constant 0 : index
    %82 = tpu.strided_load %arg10[%c221, %c0_63] {strides = array<i32: 2, 1>} : memref<640x64xf32, #tpu.memory_space<vmem>>, vector<10x64xf32>
    %83 = arith.maximumf %79, %80 : vector<10x64xf32>
    %84 = arith.maximumf %81, %82 : vector<10x64xf32>
    %85 = arith.maximumf %83, %84 : vector<10x64xf32>
    %c89 = arith.constant 89 : index
    %c0_64 = arith.constant 0 : index
    %86 = vector.load %arg11[%c89, %c0_64] : memref<272x64xf32, #tpu.memory_space<vmem>>, vector<10x64xf32>
    tpu.vector_store %arg11[%c89, %c0_64], %85 {strides = array<i32>} : memref<272x64xf32, #tpu.memory_space<vmem>>, vector<10x64xf32>,
    %c240 = arith.constant 240 : index
    %c0_65 = arith.constant 0 : index
    %87 = tpu.strided_load %arg10[%c240, %c0_65] {strides = array<i32: 2, 1>} : memref<640x64xf32, #tpu.memory_space<vmem>>, vector<10x64xf32>
    %c241 = arith.constant 241 : index
    %c0_66 = arith.constant 0 : index
    %88 = tpu.strided_load %arg10[%c241, %c0_66] {strides = array<i32: 2, 1>} : memref<640x64xf32, #tpu.memory_space<vmem>>, vector<10x64xf32>
    %c260 = arith.constant 260 : index
    %c0_67 = arith.constant 0 : index
    %89 = tpu.strided_load %arg10[%c260, %c0_67] {strides = array<i32: 2, 1>} : memref<640x64xf32, #tpu.memory_space<vmem>>, vector<10x64xf32>
    %c261 = arith.constant 261 : index
    %c0_68 = arith.constant 0 : index
    %90 = tpu.strided_load %arg10[%c261, %c0_68] {strides = array<i32: 2, 1>} : memref<640x64xf32, #tpu.memory_space<vmem>>, vector<10x64xf32>
    %91 = arith.maximumf %87, %88 : vector<10x64xf32>
    %92 = arith.maximumf %89, %90 : vector<10x64xf32>
    %93 = arith.maximumf %91, %92 : vector<10x64xf32>
    %c101_69 = arith.constant 101 : index
    %c0_70 = arith.constant 0 : index
    %94 = vector.load %arg11[%c101_69, %c0_70] : memref<272x64xf32, #tpu.memory_space<vmem>>, vector<10x64xf32>
    tpu.vector_store %arg11[%c101_69, %c0_70], %93 {strides = array<i32>} : memref<272x64xf32, #tpu.memory_space<vmem>>, vector<10x64xf32>,
    %c280 = arith.constant 280 : index
    %c0_71 = arith.constant 0 : index
    %95 = tpu.strided_load %arg10[%c280, %c0_71] {strides = array<i32: 2, 1>} : memref<640x64xf32, #tpu.memory_space<vmem>>, vector<10x64xf32>
    %c281 = arith.constant 281 : index
    %c0_72 = arith.constant 0 : index
    %96 = tpu.strided_load %arg10[%c281, %c0_72] {strides = array<i32: 2, 1>} : memref<640x64xf32, #tpu.memory_space<vmem>>, vector<10x64xf32>
    %c300 = arith.constant 300 : index
    %c0_73 = arith.constant 0 : index
    %97 = tpu.strided_load %arg10[%c300, %c0_73] {strides = array<i32: 2, 1>} : memref<640x64xf32, #tpu.memory_space<vmem>>, vector<10x64xf32>
    %c301 = arith.constant 301 : index
    %c0_74 = arith.constant 0 : index
    %98 = tpu.strided_load %arg10[%c301, %c0_74] {strides = array<i32: 2, 1>} : memref<640x64xf32, #tpu.memory_space<vmem>>, vector<10x64xf32>
    %99 = arith.maximumf %95, %96 : vector<10x64xf32>
    %100 = arith.maximumf %97, %98 : vector<10x64xf32>
    %101 = arith.maximumf %99, %100 : vector<10x64xf32>
    %c113 = arith.constant 113 : index
    %c0_75 = arith.constant 0 : index
    %102 = vector.load %arg11[%c113, %c0_75] : memref<272x64xf32, #tpu.memory_space<vmem>>, vector<10x64xf32>
    tpu.vector_store %arg11[%c113, %c0_75], %101 {strides = array<i32>} : memref<272x64xf32, #tpu.memory_space<vmem>>, vector<10x64xf32>,
    %c320_76 = arith.constant 320 : index
    %c0_77 = arith.constant 0 : index
    %103 = tpu.strided_load %arg10[%c320_76, %c0_77] {strides = array<i32: 2, 1>} : memref<640x64xf32, #tpu.memory_space<vmem>>, vector<10x64xf32>
    %c321 = arith.constant 321 : index
    %c0_78 = arith.constant 0 : index
    %104 = tpu.strided_load %arg10[%c321, %c0_78] {strides = array<i32: 2, 1>} : memref<640x64xf32, #tpu.memory_space<vmem>>, vector<10x64xf32>
    %c340 = arith.constant 340 : index
    %c0_79 = arith.constant 0 : index
    %105 = tpu.strided_load %arg10[%c340, %c0_79] {strides = array<i32: 2, 1>} : memref<640x64xf32, #tpu.memory_space<vmem>>, vector<10x64xf32>
    %c341 = arith.constant 341 : index
    %c0_80 = arith.constant 0 : index
    %106 = tpu.strided_load %arg10[%c341, %c0_80] {strides = array<i32: 2, 1>} : memref<640x64xf32, #tpu.memory_space<vmem>>, vector<10x64xf32>
    %107 = arith.maximumf %103, %104 : vector<10x64xf32>
    %108 = arith.maximumf %105, %106 : vector<10x64xf32>
    %109 = arith.maximumf %107, %108 : vector<10x64xf32>
    %c149 = arith.constant 149 : index
    %c0_81 = arith.constant 0 : index
    %110 = vector.load %arg11[%c149, %c0_81] : memref<272x64xf32, #tpu.memory_space<vmem>>, vector<10x64xf32>
    tpu.vector_store %arg11[%c149, %c0_81], %109 {strides = array<i32>} : memref<272x64xf32, #tpu.memory_space<vmem>>, vector<10x64xf32>,
    %c360 = arith.constant 360 : index
    %c0_82 = arith.constant 0 : index
    %111 = tpu.strided_load %arg10[%c360, %c0_82] {strides = array<i32: 2, 1>} : memref<640x64xf32, #tpu.memory_space<vmem>>, vector<10x64xf32>
    %c361 = arith.constant 361 : index
    %c0_83 = arith.constant 0 : index
    %112 = tpu.strided_load %arg10[%c361, %c0_83] {strides = array<i32: 2, 1>} : memref<640x64xf32, #tpu.memory_space<vmem>>, vector<10x64xf32>
    %c380 = arith.constant 380 : index
    %c0_84 = arith.constant 0 : index
    %113 = tpu.strided_load %arg10[%c380, %c0_84] {strides = array<i32: 2, 1>} : memref<640x64xf32, #tpu.memory_space<vmem>>, vector<10x64xf32>
    %c381 = arith.constant 381 : index
    %c0_85 = arith.constant 0 : index
    %114 = tpu.strided_load %arg10[%c381, %c0_85] {strides = array<i32: 2, 1>} : memref<640x64xf32, #tpu.memory_space<vmem>>, vector<10x64xf32>
    %115 = arith.maximumf %111, %112 : vector<10x64xf32>
    %116 = arith.maximumf %113, %114 : vector<10x64xf32>
    %117 = arith.maximumf %115, %116 : vector<10x64xf32>
    %c161_86 = arith.constant 161 : index
    %c0_87 = arith.constant 0 : index
    %118 = vector.load %arg11[%c161_86, %c0_87] : memref<272x64xf32, #tpu.memory_space<vmem>>, vector<10x64xf32>
    tpu.vector_store %arg11[%c161_86, %c0_87], %117 {strides = array<i32>} : memref<272x64xf32, #tpu.memory_space<vmem>>, vector<10x64xf32>,
    %c400 = arith.constant 400 : index
    %c0_88 = arith.constant 0 : index
    %119 = tpu.strided_load %arg10[%c400, %c0_88] {strides = array<i32: 2, 1>} : memref<640x64xf32, #tpu.memory_space<vmem>>, vector<10x64xf32>
    %c401 = arith.constant 401 : index
    %c0_89 = arith.constant 0 : index
    %120 = tpu.strided_load %arg10[%c401, %c0_89] {strides = array<i32: 2, 1>} : memref<640x64xf32, #tpu.memory_space<vmem>>, vector<10x64xf32>
    %c420 = arith.constant 420 : index
    %c0_90 = arith.constant 0 : index
    %121 = tpu.strided_load %arg10[%c420, %c0_90] {strides = array<i32: 2, 1>} : memref<640x64xf32, #tpu.memory_space<vmem>>, vector<10x64xf32>
    %c421 = arith.constant 421 : index
    %c0_91 = arith.constant 0 : index
    %122 = tpu.strided_load %arg10[%c421, %c0_91] {strides = array<i32: 2, 1>} : memref<640x64xf32, #tpu.memory_space<vmem>>, vector<10x64xf32>
    %123 = arith.maximumf %119, %120 : vector<10x64xf32>
    %124 = arith.maximumf %121, %122 : vector<10x64xf32>
    %125 = arith.maximumf %123, %124 : vector<10x64xf32>
    %c173 = arith.constant 173 : index
    %c0_92 = arith.constant 0 : index
    %126 = vector.load %arg11[%c173, %c0_92] : memref<272x64xf32, #tpu.memory_space<vmem>>, vector<10x64xf32>
    tpu.vector_store %arg11[%c173, %c0_92], %125 {strides = array<i32>} : memref<272x64xf32, #tpu.memory_space<vmem>>, vector<10x64xf32>,
    %c440 = arith.constant 440 : index
    %c0_93 = arith.constant 0 : index
    %127 = tpu.strided_load %arg10[%c440, %c0_93] {strides = array<i32: 2, 1>} : memref<640x64xf32, #tpu.memory_space<vmem>>, vector<10x64xf32>
    %c441 = arith.constant 441 : index
    %c0_94 = arith.constant 0 : index
    %128 = tpu.strided_load %arg10[%c441, %c0_94] {strides = array<i32: 2, 1>} : memref<640x64xf32, #tpu.memory_space<vmem>>, vector<10x64xf32>
    %c460 = arith.constant 460 : index
    %c0_95 = arith.constant 0 : index
    %129 = tpu.strided_load %arg10[%c460, %c0_95] {strides = array<i32: 2, 1>} : memref<640x64xf32, #tpu.memory_space<vmem>>, vector<10x64xf32>
    %c461 = arith.constant 461 : index
    %c0_96 = arith.constant 0 : index
    %130 = tpu.strided_load %arg10[%c461, %c0_96] {strides = array<i32: 2, 1>} : memref<640x64xf32, #tpu.memory_space<vmem>>, vector<10x64xf32>
    %131 = arith.maximumf %127, %128 : vector<10x64xf32>
    %132 = arith.maximumf %129, %130 : vector<10x64xf32>
    %133 = arith.maximumf %131, %132 : vector<10x64xf32>
    %c185 = arith.constant 185 : index
    %c0_97 = arith.constant 0 : index
    %134 = vector.load %arg11[%c185, %c0_97] : memref<272x64xf32, #tpu.memory_space<vmem>>, vector<10x64xf32>
    tpu.vector_store %arg11[%c185, %c0_97], %133 {strides = array<i32>} : memref<272x64xf32, #tpu.memory_space<vmem>>, vector<10x64xf32>,
    %c480_98 = arith.constant 480 : index
    %c0_99 = arith.constant 0 : index
    %135 = tpu.strided_load %arg10[%c480_98, %c0_99] {strides = array<i32: 2, 1>} : memref<640x64xf32, #tpu.memory_space<vmem>>, vector<10x64xf32>
    %c481 = arith.constant 481 : index
    %c0_100 = arith.constant 0 : index
    %136 = tpu.strided_load %arg10[%c481, %c0_100] {strides = array<i32: 2, 1>} : memref<640x64xf32, #tpu.memory_space<vmem>>, vector<10x64xf32>
    %c500 = arith.constant 500 : index
    %c0_101 = arith.constant 0 : index
    %137 = tpu.strided_load %arg10[%c500, %c0_101] {strides = array<i32: 2, 1>} : memref<640x64xf32, #tpu.memory_space<vmem>>, vector<10x64xf32>
    %c501 = arith.constant 501 : index
    %c0_102 = arith.constant 0 : index
    %138 = tpu.strided_load %arg10[%c501, %c0_102] {strides = array<i32: 2, 1>} : memref<640x64xf32, #tpu.memory_space<vmem>>, vector<10x64xf32>
    %139 = arith.maximumf %135, %136 : vector<10x64xf32>
    %140 = arith.maximumf %137, %138 : vector<10x64xf32>
    %141 = arith.maximumf %139, %140 : vector<10x64xf32>
    %c197 = arith.constant 197 : index
    %c0_103 = arith.constant 0 : index
    %142 = vector.load %arg11[%c197, %c0_103] : memref<272x64xf32, #tpu.memory_space<vmem>>, vector<10x64xf32>
    tpu.vector_store %arg11[%c197, %c0_103], %141 {strides = array<i32>} : memref<272x64xf32, #tpu.memory_space<vmem>>, vector<10x64xf32>,
    %c520 = arith.constant 520 : index
    %c0_104 = arith.constant 0 : index
    %143 = tpu.strided_load %arg10[%c520, %c0_104] {strides = array<i32: 2, 1>} : memref<640x64xf32, #tpu.memory_space<vmem>>, vector<10x64xf32>
    %c521 = arith.constant 521 : index
    %c0_105 = arith.constant 0 : index
    %144 = tpu.strided_load %arg10[%c521, %c0_105] {strides = array<i32: 2, 1>} : memref<640x64xf32, #tpu.memory_space<vmem>>, vector<10x64xf32>
    %c540 = arith.constant 540 : index
    %c0_106 = arith.constant 0 : index
    %145 = tpu.strided_load %arg10[%c540, %c0_106] {strides = array<i32: 2, 1>} : memref<640x64xf32, #tpu.memory_space<vmem>>, vector<10x64xf32>
    %c541 = arith.constant 541 : index
    %c0_107 = arith.constant 0 : index
    %146 = tpu.strided_load %arg10[%c541, %c0_107] {strides = array<i32: 2, 1>} : memref<640x64xf32, #tpu.memory_space<vmem>>, vector<10x64xf32>
    %147 = arith.maximumf %143, %144 : vector<10x64xf32>
    %148 = arith.maximumf %145, %146 : vector<10x64xf32>
    %149 = arith.maximumf %147, %148 : vector<10x64xf32>
    %c209 = arith.constant 209 : index
    %c0_108 = arith.constant 0 : index
    %150 = vector.load %arg11[%c209, %c0_108] : memref<272x64xf32, #tpu.memory_space<vmem>>, vector<10x64xf32>
    tpu.vector_store %arg11[%c209, %c0_108], %149 {strides = array<i32>} : memref<272x64xf32, #tpu.memory_space<vmem>>, vector<10x64xf32>,
    %c560 = arith.constant 560 : index
    %c0_109 = arith.constant 0 : index
    %151 = tpu.strided_load %arg10[%c560, %c0_109] {strides = array<i32: 2, 1>} : memref<640x64xf32, #tpu.memory_space<vmem>>, vector<10x64xf32>
    %c561 = arith.constant 561 : index
    %c0_110 = arith.constant 0 : index
    %152 = tpu.strided_load %arg10[%c561, %c0_110] {strides = array<i32: 2, 1>} : memref<640x64xf32, #tpu.memory_space<vmem>>, vector<10x64xf32>
    %c580 = arith.constant 580 : index
    %c0_111 = arith.constant 0 : index
    %153 = tpu.strided_load %arg10[%c580, %c0_111] {strides = array<i32: 2, 1>} : memref<640x64xf32, #tpu.memory_space<vmem>>, vector<10x64xf32>
    %c581 = arith.constant 581 : index
    %c0_112 = arith.constant 0 : index
    %154 = tpu.strided_load %arg10[%c581, %c0_112] {strides = array<i32: 2, 1>} : memref<640x64xf32, #tpu.memory_space<vmem>>, vector<10x64xf32>
    %155 = arith.maximumf %151, %152 : vector<10x64xf32>
    %156 = arith.maximumf %153, %154 : vector<10x64xf32>
    %157 = arith.maximumf %155, %156 : vector<10x64xf32>
    %c221_113 = arith.constant 221 : index
    %c0_114 = arith.constant 0 : index
    %158 = vector.load %arg11[%c221_113, %c0_114] : memref<272x64xf32, #tpu.memory_space<vmem>>, vector<10x64xf32>
    tpu.vector_store %arg11[%c221_113, %c0_114], %157 {strides = array<i32>} : memref<272x64xf32, #tpu.memory_space<vmem>>, vector<10x64xf32>,
    %c600 = arith.constant 600 : index
    %c0_115 = arith.constant 0 : index
    %159 = tpu.strided_load %arg10[%c600, %c0_115] {strides = array<i32: 2, 1>} : memref<640x64xf32, #tpu.memory_space<vmem>>, vector<10x64xf32>
    %c601 = arith.constant 601 : index
    %c0_116 = arith.constant 0 : index
    %160 = tpu.strided_load %arg10[%c601, %c0_116] {strides = array<i32: 2, 1>} : memref<640x64xf32, #tpu.memory_space<vmem>>, vector<10x64xf32>
    %c620 = arith.constant 620 : index
    %c0_117 = arith.constant 0 : index
    %161 = tpu.strided_load %arg10[%c620, %c0_117] {strides = array<i32: 2, 1>} : memref<640x64xf32, #tpu.memory_space<vmem>>, vector<10x64xf32>
    %c621 = arith.constant 621 : index
    %c0_118 = arith.constant 0 : index
    %162 = tpu.strided_load %arg10[%c621, %c0_118] {strides = array<i32: 2, 1>} : memref<640x64xf32, #tpu.memory_space<vmem>>, vector<10x64xf32>
    %163 = arith.maximumf %159, %160 : vector<10x64xf32>
    %164 = arith.maximumf %161, %162 : vector<10x64xf32>
    %165 = arith.maximumf %163, %164 : vector<10x64xf32>
    %c233 = arith.constant 233 : index
    %c0_119 = arith.constant 0 : index
    %166 = vector.load %arg11[%c233, %c0_119] : memref<272x64xf32, #tpu.memory_space<vmem>>, vector<10x64xf32>
    tpu.vector_store %arg11[%c233, %c0_119], %165 {strides = array<i32>} : memref<272x64xf32, #tpu.memory_space<vmem>>, vector<10x64xf32>,
    %c0_120 = arith.constant 0 : index
    %c0_121 = arith.constant 0 : index
    %167 = vector.load %arg4[%c0_120, %c0_121] : memref<1x128xf32, #tpu.memory_space<vmem>>, vector<1x128xf32>
    %c3 = arith.constant 3 : index
    %c0_122 = arith.constant 0 : index
    %168 = vector.load %arg11[%c3, %c0_122] : memref<272x64xf32, #tpu.memory_space<vmem>>, vector<120x64xf32>
    %169 = arith.truncf %168 : vector<120x64xf32> to vector<120x64xbf16>
    %c0_123 = arith.constant 0 : index
    %c0_124 = arith.constant 0 : index
    %c0_125 = arith.constant 0 : index
    %170 = vector.load %arg3[%c0_123, %c0_124, %c0_125] : memref<9x64x128xbf16, #tpu.memory_space<vmem>>, vector<1x64x128xbf16>
    %171 = vector.shape_cast %170 : vector<1x64x128xbf16> to vector<64x128xbf16>
    %cst_126 = arith.constant dense<0.000000e+00> : vector<120x128xf32>
    %172 = tpu.matmul %169, %171, %cst_126 {dimension_numbers = #tpu.dot_dimension_numbers<[1], [0], [0], [1], [0, 0, 1, 1], [], []>} : vector<120x64xbf16>, vector<64x128xbf16>, vector<120x128xf32> -> vector<120x128xf32>
    %c4 = arith.constant 4 : index
    %c0_127 = arith.constant 0 : index
    %173 = vector.load %arg11[%c4, %c0_127] : memref<272x64xf32, #tpu.memory_space<vmem>>, vector<120x64xf32>
    %174 = arith.truncf %173 : vector<120x64xf32> to vector<120x64xbf16>
    %c1_128 = arith.constant 1 : index
    %c0_129 = arith.constant 0 : index
    %c0_130 = arith.constant 0 : index
    %175 = vector.load %arg3[%c1_128, %c0_129, %c0_130] : memref<9x64x128xbf16, #tpu.memory_space<vmem>>, vector<1x64x128xbf16>
    %176 = vector.shape_cast %175 : vector<1x64x128xbf16> to vector<64x128xbf16>
    %cst_131 = arith.constant dense<0.000000e+00> : vector<120x128xf32>
    %177 = tpu.matmul %174, %176, %cst_131 {dimension_numbers = #tpu.dot_dimension_numbers<[1], [0], [0], [1], [0, 0, 1, 1], [], []>} : vector<120x64xbf16>, vector<64x128xbf16>, vector<120x128xf32> -> vector<120x128xf32>
    %178 = arith.addf %172, %177 : vector<120x128xf32>
    %c5 = arith.constant 5 : index
    %c0_132 = arith.constant 0 : index
    %179 = vector.load %arg11[%c5, %c0_132] : memref<272x64xf32, #tpu.memory_space<vmem>>, vector<120x64xf32>
    %180 = arith.truncf %179 : vector<120x64xf32> to vector<120x64xbf16>
    %c2 = arith.constant 2 : index
    %c0_133 = arith.constant 0 : index
    %c0_134 = arith.constant 0 : index
    %181 = vector.load %arg3[%c2, %c0_133, %c0_134] : memref<9x64x128xbf16, #tpu.memory_space<vmem>>, vector<1x64x128xbf16>
    %182 = vector.shape_cast %181 : vector<1x64x128xbf16> to vector<64x128xbf16>
    %cst_135 = arith.constant dense<0.000000e+00> : vector<120x128xf32>
    %183 = tpu.matmul %180, %182, %cst_135 {dimension_numbers = #tpu.dot_dimension_numbers<[1], [0], [0], [1], [0, 0, 1, 1], [], []>} : vector<120x64xbf16>, vector<64x128xbf16>, vector<120x128xf32> -> vector<120x128xf32>
    %184 = arith.addf %178, %183 : vector<120x128xf32>
    %c15 = arith.constant 15 : index
    %c0_136 = arith.constant 0 : index
    %185 = vector.load %arg11[%c15, %c0_136] : memref<272x64xf32, #tpu.memory_space<vmem>>, vector<120x64xf32>
    %186 = arith.truncf %185 : vector<120x64xf32> to vector<120x64xbf16>
    %c3_137 = arith.constant 3 : index
    %c0_138 = arith.constant 0 : index
    %c0_139 = arith.constant 0 : index
    %187 = vector.load %arg3[%c3_137, %c0_138, %c0_139] : memref<9x64x128xbf16, #tpu.memory_space<vmem>>, vector<1x64x128xbf16>
    %188 = vector.shape_cast %187 : vector<1x64x128xbf16> to vector<64x128xbf16>
    %cst_140 = arith.constant dense<0.000000e+00> : vector<120x128xf32>
    %189 = tpu.matmul %186, %188, %cst_140 {dimension_numbers = #tpu.dot_dimension_numbers<[1], [0], [0], [1], [0, 0, 1, 1], [], []>} : vector<120x64xbf16>, vector<64x128xbf16>, vector<120x128xf32> -> vector<120x128xf32>
    %190 = arith.addf %184, %189 : vector<120x128xf32>
    %c16 = arith.constant 16 : index
    %c0_141 = arith.constant 0 : index
    %191 = vector.load %arg11[%c16, %c0_141] : memref<272x64xf32, #tpu.memory_space<vmem>>, vector<120x64xf32>
    %192 = arith.truncf %191 : vector<120x64xf32> to vector<120x64xbf16>
    %c4_142 = arith.constant 4 : index
    %c0_143 = arith.constant 0 : index
    %c0_144 = arith.constant 0 : index
    %193 = vector.load %arg3[%c4_142, %c0_143, %c0_144] : memref<9x64x128xbf16, #tpu.memory_space<vmem>>, vector<1x64x128xbf16>
    %194 = vector.shape_cast %193 : vector<1x64x128xbf16> to vector<64x128xbf16>
    %cst_145 = arith.constant dense<0.000000e+00> : vector<120x128xf32>
    %195 = tpu.matmul %192, %194, %cst_145 {dimension_numbers = #tpu.dot_dimension_numbers<[1], [0], [0], [1], [0, 0, 1, 1], [], []>} : vector<120x64xbf16>, vector<64x128xbf16>, vector<120x128xf32> -> vector<120x128xf32>
    %196 = arith.addf %190, %195 : vector<120x128xf32>
    %c17 = arith.constant 17 : index
    %c0_146 = arith.constant 0 : index
    %197 = vector.load %arg11[%c17, %c0_146] : memref<272x64xf32, #tpu.memory_space<vmem>>, vector<120x64xf32>
    %198 = arith.truncf %197 : vector<120x64xf32> to vector<120x64xbf16>
    %c5_147 = arith.constant 5 : index
    %c0_148 = arith.constant 0 : index
    %c0_149 = arith.constant 0 : index
    %199 = vector.load %arg3[%c5_147, %c0_148, %c0_149] : memref<9x64x128xbf16, #tpu.memory_space<vmem>>, vector<1x64x128xbf16>
    %200 = vector.shape_cast %199 : vector<1x64x128xbf16> to vector<64x128xbf16>
    %cst_150 = arith.constant dense<0.000000e+00> : vector<120x128xf32>
    %201 = tpu.matmul %198, %200, %cst_150 {dimension_numbers = #tpu.dot_dimension_numbers<[1], [0], [0], [1], [0, 0, 1, 1], [], []>} : vector<120x64xbf16>, vector<64x128xbf16>, vector<120x128xf32> -> vector<120x128xf32>
    %202 = arith.addf %196, %201 : vector<120x128xf32>
    %c27 = arith.constant 27 : index
    %c0_151 = arith.constant 0 : index
    %203 = vector.load %arg11[%c27, %c0_151] : memref<272x64xf32, #tpu.memory_space<vmem>>, vector<120x64xf32>
    %204 = arith.truncf %203 : vector<120x64xf32> to vector<120x64xbf16>
    %c6 = arith.constant 6 : index
    %c0_152 = arith.constant 0 : index
    %c0_153 = arith.constant 0 : index
    %205 = vector.load %arg3[%c6, %c0_152, %c0_153] : memref<9x64x128xbf16, #tpu.memory_space<vmem>>, vector<1x64x128xbf16>
    %206 = vector.shape_cast %205 : vector<1x64x128xbf16> to vector<64x128xbf16>
    %cst_154 = arith.constant dense<0.000000e+00> : vector<120x128xf32>
    %207 = tpu.matmul %204, %206, %cst_154 {dimension_numbers = #tpu.dot_dimension_numbers<[1], [0], [0], [1], [0, 0, 1, 1], [], []>} : vector<120x64xbf16>, vector<64x128xbf16>, vector<120x128xf32> -> vector<120x128xf32>
    %208 = arith.addf %202, %207 : vector<120x128xf32>
    %c28 = arith.constant 28 : index
    %c0_155 = arith.constant 0 : index
    %209 = vector.load %arg11[%c28, %c0_155] : memref<272x64xf32, #tpu.memory_space<vmem>>, vector<120x64xf32>
    %210 = arith.truncf %209 : vector<120x64xf32> to vector<120x64xbf16>
    %c7 = arith.constant 7 : index
    %c0_156 = arith.constant 0 : index
    %c0_157 = arith.constant 0 : index
    %211 = vector.load %arg3[%c7, %c0_156, %c0_157] : memref<9x64x128xbf16, #tpu.memory_space<vmem>>, vector<1x64x128xbf16>
    %212 = vector.shape_cast %211 : vector<1x64x128xbf16> to vector<64x128xbf16>
    %cst_158 = arith.constant dense<0.000000e+00> : vector<120x128xf32>
    %213 = tpu.matmul %210, %212, %cst_158 {dimension_numbers = #tpu.dot_dimension_numbers<[1], [0], [0], [1], [0, 0, 1, 1], [], []>} : vector<120x64xbf16>, vector<64x128xbf16>, vector<120x128xf32> -> vector<120x128xf32>
    %214 = arith.addf %208, %213 : vector<120x128xf32>
    %c29_159 = arith.constant 29 : index
    %c0_160 = arith.constant 0 : index
    %215 = vector.load %arg11[%c29_159, %c0_160] : memref<272x64xf32, #tpu.memory_space<vmem>>, vector<120x64xf32>
    %216 = arith.truncf %215 : vector<120x64xf32> to vector<120x64xbf16>
    %c8 = arith.constant 8 : index
    %c0_161 = arith.constant 0 : index
    %c0_162 = arith.constant 0 : index
    %217 = vector.load %arg3[%c8, %c0_161, %c0_162] : memref<9x64x128xbf16, #tpu.memory_space<vmem>>, vector<1x64x128xbf16>
    %218 = vector.shape_cast %217 : vector<1x64x128xbf16> to vector<64x128xbf16>
    %cst_163 = arith.constant dense<0.000000e+00> : vector<120x128xf32>
    %219 = tpu.matmul %216, %218, %cst_163 {dimension_numbers = #tpu.dot_dimension_numbers<[1], [0], [0], [1], [0, 0, 1, 1], [], []>} : vector<120x64xbf16>, vector<64x128xbf16>, vector<120x128xf32> -> vector<120x128xf32>
    %220 = arith.addf %214, %219 : vector<120x128xf32>
    %221 = vector.broadcast %167 : vector<1x128xf32> to vector<120x128xf32>
    %222 = arith.addf %220, %221 : vector<120x128xf32>
    %cst_164 = arith.constant 0.000000e+00 : f32
    %223 = vector.broadcast %cst_164 : f32 to vector<120x128xf32>
    %224 = arith.maximumf %222, %223 : vector<120x128xf32>
    %c0_165 = arith.constant 0 : index
    %c0_166 = arith.constant 0 : index
    %225 = vector.load %arg12[%c0_165, %c0_166] : memref<240x128xf32, #tpu.memory_space<vmem>>, vector<120x128xf32>
    tpu.vector_store %arg12[%c0_165, %c0_166], %224 {strides = array<i32>} : memref<240x128xf32, #tpu.memory_space<vmem>>, vector<120x128xf32>,
    %c123 = arith.constant 123 : index
    %c0_167 = arith.constant 0 : index
    %226 = vector.load %arg11[%c123, %c0_167] : memref<272x64xf32, #tpu.memory_space<vmem>>, vector<120x64xf32>
    %227 = arith.truncf %226 : vector<120x64xf32> to vector<120x64xbf16>
    %c0_168 = arith.constant 0 : index
    %c0_169 = arith.constant 0 : index
    %c0_170 = arith.constant 0 : index
    %228 = vector.load %arg3[%c0_168, %c0_169, %c0_170] : memref<9x64x128xbf16, #tpu.memory_space<vmem>>, vector<1x64x128xbf16>
    %229 = vector.shape_cast %228 : vector<1x64x128xbf16> to vector<64x128xbf16>
    %cst_171 = arith.constant dense<0.000000e+00> : vector<120x128xf32>
    %230 = tpu.matmul %227, %229, %cst_171 {dimension_numbers = #tpu.dot_dimension_numbers<[1], [0], [0], [1], [0, 0, 1, 1], [], []>} : vector<120x64xbf16>, vector<64x128xbf16>, vector<120x128xf32> -> vector<120x128xf32>
    %c124 = arith.constant 124 : index
    %c0_172 = arith.constant 0 : index
    %231 = vector.load %arg11[%c124, %c0_172] : memref<272x64xf32, #tpu.memory_space<vmem>>, vector<120x64xf32>
    %232 = arith.truncf %231 : vector<120x64xf32> to vector<120x64xbf16>
    %c1_173 = arith.constant 1 : index
    %c0_174 = arith.constant 0 : index
    %c0_175 = arith.constant 0 : index
    %233 = vector.load %arg3[%c1_173, %c0_174, %c0_175] : memref<9x64x128xbf16, #tpu.memory_space<vmem>>, vector<1x64x128xbf16>
    %234 = vector.shape_cast %233 : vector<1x64x128xbf16> to vector<64x128xbf16>
    %cst_176 = arith.constant dense<0.000000e+00> : vector<120x128xf32>
    %235 = tpu.matmul %232, %234, %cst_176 {dimension_numbers = #tpu.dot_dimension_numbers<[1], [0], [0], [1], [0, 0, 1, 1], [], []>} : vector<120x64xbf16>, vector<64x128xbf16>, vector<120x128xf32> -> vector<120x128xf32>
    %236 = arith.addf %230, %235 : vector<120x128xf32>
    %c125 = arith.constant 125 : index
    %c0_177 = arith.constant 0 : index
    %237 = vector.load %arg11[%c125, %c0_177] : memref<272x64xf32, #tpu.memory_space<vmem>>, vector<120x64xf32>
    %238 = arith.truncf %237 : vector<120x64xf32> to vector<120x64xbf16>
    %c2_178 = arith.constant 2 : index
    %c0_179 = arith.constant 0 : index
    %c0_180 = arith.constant 0 : index
    %239 = vector.load %arg3[%c2_178, %c0_179, %c0_180] : memref<9x64x128xbf16, #tpu.memory_space<vmem>>, vector<1x64x128xbf16>
    %240 = vector.shape_cast %239 : vector<1x64x128xbf16> to vector<64x128xbf16>
    %cst_181 = arith.constant dense<0.000000e+00> : vector<120x128xf32>
    %241 = tpu.matmul %238, %240, %cst_181 {dimension_numbers = #tpu.dot_dimension_numbers<[1], [0], [0], [1], [0, 0, 1, 1], [], []>} : vector<120x64xbf16>, vector<64x128xbf16>, vector<120x128xf32> -> vector<120x128xf32>
    %242 = arith.addf %236, %241 : vector<120x128xf32>
    %c135 = arith.constant 135 : index
    %c0_182 = arith.constant 0 : index
    %243 = vector.load %arg11[%c135, %c0_182] : memref<272x64xf32, #tpu.memory_space<vmem>>, vector<120x64xf32>
    %244 = arith.truncf %243 : vector<120x64xf32> to vector<120x64xbf16>
    %c3_183 = arith.constant 3 : index
    %c0_184 = arith.constant 0 : index
    %c0_185 = arith.constant 0 : index
    %245 = vector.load %arg3[%c3_183, %c0_184, %c0_185] : memref<9x64x128xbf16, #tpu.memory_space<vmem>>, vector<1x64x128xbf16>
    %246 = vector.shape_cast %245 : vector<1x64x128xbf16> to vector<64x128xbf16>
    %cst_186 = arith.constant dense<0.000000e+00> : vector<120x128xf32>
    %247 = tpu.matmul %244, %246, %cst_186 {dimension_numbers = #tpu.dot_dimension_numbers<[1], [0], [0], [1], [0, 0, 1, 1], [], []>} : vector<120x64xbf16>, vector<64x128xbf16>, vector<120x128xf32> -> vector<120x128xf32>
    %248 = arith.addf %242, %247 : vector<120x128xf32>
    %c136 = arith.constant 136 : index
    %c0_187 = arith.constant 0 : index
    %249 = vector.load %arg11[%c136, %c0_187] : memref<272x64xf32, #tpu.memory_space<vmem>>, vector<120x64xf32>
    %250 = arith.truncf %249 : vector<120x64xf32> to vector<120x64xbf16>
    %c4_188 = arith.constant 4 : index
    %c0_189 = arith.constant 0 : index
    %c0_190 = arith.constant 0 : index
    %251 = vector.load %arg3[%c4_188, %c0_189, %c0_190] : memref<9x64x128xbf16, #tpu.memory_space<vmem>>, vector<1x64x128xbf16>
    %252 = vector.shape_cast %251 : vector<1x64x128xbf16> to vector<64x128xbf16>
    %cst_191 = arith.constant dense<0.000000e+00> : vector<120x128xf32>
    %253 = tpu.matmul %250, %252, %cst_191 {dimension_numbers = #tpu.dot_dimension_numbers<[1], [0], [0], [1], [0, 0, 1, 1], [], []>} : vector<120x64xbf16>, vector<64x128xbf16>, vector<120x128xf32> -> vector<120x128xf32>
    %254 = arith.addf %248, %253 : vector<120x128xf32>
    %c137 = arith.constant 137 : index
    %c0_192 = arith.constant 0 : index
    %255 = vector.load %arg11[%c137, %c0_192] : memref<272x64xf32, #tpu.memory_space<vmem>>, vector<120x64xf32>
    %256 = arith.truncf %255 : vector<120x64xf32> to vector<120x64xbf16>
    %c5_193 = arith.constant 5 : index
    %c0_194 = arith.constant 0 : index
    %c0_195 = arith.constant 0 : index
    %257 = vector.load %arg3[%c5_193, %c0_194, %c0_195] : memref<9x64x128xbf16, #tpu.memory_space<vmem>>, vector<1x64x128xbf16>
    %258 = vector.shape_cast %257 : vector<1x64x128xbf16> to vector<64x128xbf16>
    %cst_196 = arith.constant dense<0.000000e+00> : vector<120x128xf32>
    %259 = tpu.matmul %256, %258, %cst_196 {dimension_numbers = #tpu.dot_dimension_numbers<[1], [0], [0], [1], [0, 0, 1, 1], [], []>} : vector<120x64xbf16>, vector<64x128xbf16>, vector<120x128xf32> -> vector<120x128xf32>
    %260 = arith.addf %254, %259 : vector<120x128xf32>
    %c147 = arith.constant 147 : index
    %c0_197 = arith.constant 0 : index
    %261 = vector.load %arg11[%c147, %c0_197] : memref<272x64xf32, #tpu.memory_space<vmem>>, vector<120x64xf32>
    %262 = arith.truncf %261 : vector<120x64xf32> to vector<120x64xbf16>
    %c6_198 = arith.constant 6 : index
    %c0_199 = arith.constant 0 : index
    %c0_200 = arith.constant 0 : index
    %263 = vector.load %arg3[%c6_198, %c0_199, %c0_200] : memref<9x64x128xbf16, #tpu.memory_space<vmem>>, vector<1x64x128xbf16>
    %264 = vector.shape_cast %263 : vector<1x64x128xbf16> to vector<64x128xbf16>
    %cst_201 = arith.constant dense<0.000000e+00> : vector<120x128xf32>
    %265 = tpu.matmul %262, %264, %cst_201 {dimension_numbers = #tpu.dot_dimension_numbers<[1], [0], [0], [1], [0, 0, 1, 1], [], []>} : vector<120x64xbf16>, vector<64x128xbf16>, vector<120x128xf32> -> vector<120x128xf32>
    %266 = arith.addf %260, %265 : vector<120x128xf32>
    %c148 = arith.constant 148 : index
    %c0_202 = arith.constant 0 : index
    %267 = vector.load %arg11[%c148, %c0_202] : memref<272x64xf32, #tpu.memory_space<vmem>>, vector<120x64xf32>
    %268 = arith.truncf %267 : vector<120x64xf32> to vector<120x64xbf16>
    %c7_203 = arith.constant 7 : index
    %c0_204 = arith.constant 0 : index
    %c0_205 = arith.constant 0 : index
    %269 = vector.load %arg3[%c7_203, %c0_204, %c0_205] : memref<9x64x128xbf16, #tpu.memory_space<vmem>>, vector<1x64x128xbf16>
    %270 = vector.shape_cast %269 : vector<1x64x128xbf16> to vector<64x128xbf16>
    %cst_206 = arith.constant dense<0.000000e+00> : vector<120x128xf32>
    %271 = tpu.matmul %268, %270, %cst_206 {dimension_numbers = #tpu.dot_dimension_numbers<[1], [0], [0], [1], [0, 0, 1, 1], [], []>} : vector<120x64xbf16>, vector<64x128xbf16>, vector<120x128xf32> -> vector<120x128xf32>
    %272 = arith.addf %266, %271 : vector<120x128xf32>
    %c149_207 = arith.constant 149 : index
    %c0_208 = arith.constant 0 : index
    %273 = vector.load %arg11[%c149_207, %c0_208] : memref<272x64xf32, #tpu.memory_space<vmem>>, vector<120x64xf32>
    %274 = arith.truncf %273 : vector<120x64xf32> to vector<120x64xbf16>
    %c8_209 = arith.constant 8 : index
    %c0_210 = arith.constant 0 : index
    %c0_211 = arith.constant 0 : index
    %275 = vector.load %arg3[%c8_209, %c0_210, %c0_211] : memref<9x64x128xbf16, #tpu.memory_space<vmem>>, vector<1x64x128xbf16>
    %276 = vector.shape_cast %275 : vector<1x64x128xbf16> to vector<64x128xbf16>
    %cst_212 = arith.constant dense<0.000000e+00> : vector<120x128xf32>
    %277 = tpu.matmul %274, %276, %cst_212 {dimension_numbers = #tpu.dot_dimension_numbers<[1], [0], [0], [1], [0, 0, 1, 1], [], []>} : vector<120x64xbf16>, vector<64x128xbf16>, vector<120x128xf32> -> vector<120x128xf32>
    %278 = arith.addf %272, %277 : vector<120x128xf32>
    %279 = vector.broadcast %167 : vector<1x128xf32> to vector<120x128xf32>
    %280 = arith.addf %278, %279 : vector<120x128xf32>
    %cst_213 = arith.constant 0.000000e+00 : f32
    %281 = vector.broadcast %cst_213 : f32 to vector<120x128xf32>
    %282 = arith.maximumf %280, %281 : vector<120x128xf32>
    %c120_214 = arith.constant 120 : index
    %c0_215 = arith.constant 0 : index
    %283 = vector.load %arg12[%c120_214, %c0_215] : memref<240x128xf32, #tpu.memory_space<vmem>>, vector<120x128xf32>
    tpu.vector_store %arg12[%c120_214, %c0_215], %282 {strides = array<i32>} : memref<240x128xf32, #tpu.memory_space<vmem>>, vector<120x128xf32>,
    %c0_i32_216 = arith.constant 0 : i32
    %284 = tpu.memref_slice %arg15[%c0_i32_216] : memref<2x!tpu.dma_semaphore, #tpu.memory_space<semaphore_mem>> -> memref<1x!tpu.dma_semaphore, #tpu.memory_space<semaphore_mem>>
    %285 = tpu.memref_squeeze %284 : memref<1x!tpu.dma_semaphore, #tpu.memory_space<semaphore_mem>> -> memref<!tpu.dma_semaphore, #tpu.memory_space<semaphore_mem>>
    tpu.wait_dma2 semaphore(%285 : memref<!tpu.dma_semaphore, #tpu.memory_space<semaphore_mem>>) src(%arg5 : memref<2560x512xbf16, #tpu.memory_space<any>>) dst(%arg13 : memref<2560x512xbf16, #tpu.memory_space<vmem>>)
    %c1_i32_217 = arith.constant 1 : i32
    %286 = tpu.memref_slice %arg15[%c1_i32_217] : memref<2x!tpu.dma_semaphore, #tpu.memory_space<semaphore_mem>> -> memref<1x!tpu.dma_semaphore, #tpu.memory_space<semaphore_mem>>
    %287 = tpu.memref_squeeze %286 : memref<1x!tpu.dma_semaphore, #tpu.memory_space<semaphore_mem>> -> memref<!tpu.dma_semaphore, #tpu.memory_space<semaphore_mem>>
    tpu.wait_dma2 semaphore(%287 : memref<!tpu.dma_semaphore, #tpu.memory_space<semaphore_mem>>) src(%arg7 : memref<512x512xbf16, #tpu.memory_space<any>>) dst(%arg14 : memref<512x512xbf16, #tpu.memory_space<vmem>>)
    %c13 = arith.constant 13 : index
    %c0_218 = arith.constant 0 : index
    %288 = tpu.strided_load %arg12[%c13, %c0_218] {strides = array<i32: 120, 1>} : memref<240x128xf32, #tpu.memory_space<vmem>>, vector<2x128xf32>
    %c14 = arith.constant 14 : index
    %c0_219 = arith.constant 0 : index
    %289 = tpu.strided_load %arg12[%c14, %c0_219] {strides = array<i32: 120, 1>} : memref<240x128xf32, #tpu.memory_space<vmem>>, vector<2x128xf32>
    %c25 = arith.constant 25 : index
    %c0_220 = arith.constant 0 : index
    %290 = tpu.strided_load %arg12[%c25, %c0_220] {strides = array<i32: 120, 1>} : memref<240x128xf32, #tpu.memory_space<vmem>>, vector<2x128xf32>
    %c26 = arith.constant 26 : index
    %c0_221 = arith.constant 0 : index
    %291 = tpu.strided_load %arg12[%c26, %c0_221] {strides = array<i32: 120, 1>} : memref<240x128xf32, #tpu.memory_space<vmem>>, vector<2x128xf32>
    %292 = arith.maximumf %288, %289 : vector<2x128xf32>
    %293 = arith.maximumf %290, %291 : vector<2x128xf32>
    %294 = arith.maximumf %292, %293 : vector<2x128xf32>
    %c15_222 = arith.constant 15 : index
    %c0_223 = arith.constant 0 : index
    %295 = tpu.strided_load %arg12[%c15_222, %c0_223] {strides = array<i32: 120, 1>} : memref<240x128xf32, #tpu.memory_space<vmem>>, vector<2x128xf32>
    %c16_224 = arith.constant 16 : index
    %c0_225 = arith.constant 0 : index
    %296 = tpu.strided_load %arg12[%c16_224, %c0_225] {strides = array<i32: 120, 1>} : memref<240x128xf32, #tpu.memory_space<vmem>>, vector<2x128xf32>
    %c27_226 = arith.constant 27 : index
    %c0_227 = arith.constant 0 : index
    %297 = tpu.strided_load %arg12[%c27_226, %c0_227] {strides = array<i32: 120, 1>} : memref<240x128xf32, #tpu.memory_space<vmem>>, vector<2x128xf32>
    %c28_228 = arith.constant 28 : index
    %c0_229 = arith.constant 0 : index
    %298 = tpu.strided_load %arg12[%c28_228, %c0_229] {strides = array<i32: 120, 1>} : memref<240x128xf32, #tpu.memory_space<vmem>>, vector<2x128xf32>
    %299 = arith.maximumf %295, %296 : vector<2x128xf32>
    %300 = arith.maximumf %297, %298 : vector<2x128xf32>
    %301 = arith.maximumf %299, %300 : vector<2x128xf32>
    %c17_230 = arith.constant 17 : index
    %c0_231 = arith.constant 0 : index
    %302 = tpu.strided_load %arg12[%c17_230, %c0_231] {strides = array<i32: 120, 1>} : memref<240x128xf32, #tpu.memory_space<vmem>>, vector<2x128xf32>
    %c18 = arith.constant 18 : index
    %c0_232 = arith.constant 0 : index
    %303 = tpu.strided_load %arg12[%c18, %c0_232] {strides = array<i32: 120, 1>} : memref<240x128xf32, #tpu.memory_space<vmem>>, vector<2x128xf32>
    %c29_233 = arith.constant 29 : index
    %c0_234 = arith.constant 0 : index
    %304 = tpu.strided_load %arg12[%c29_233, %c0_234] {strides = array<i32: 120, 1>} : memref<240x128xf32, #tpu.memory_space<vmem>>, vector<2x128xf32>
    %c30 = arith.constant 30 : index
    %c0_235 = arith.constant 0 : index
    %305 = tpu.strided_load %arg12[%c30, %c0_235] {strides = array<i32: 120, 1>} : memref<240x128xf32, #tpu.memory_space<vmem>>, vector<2x128xf32>
    %306 = arith.maximumf %302, %303 : vector<2x128xf32>
    %307 = arith.maximumf %304, %305 : vector<2x128xf32>
    %308 = arith.maximumf %306, %307 : vector<2x128xf32>
    %c19 = arith.constant 19 : index
    %c0_236 = arith.constant 0 : index
    %309 = tpu.strided_load %arg12[%c19, %c0_236] {strides = array<i32: 120, 1>} : memref<240x128xf32, #tpu.memory_space<vmem>>, vector<2x128xf32>
    %c20_237 = arith.constant 20 : index
    %c0_238 = arith.constant 0 : index
    %310 = tpu.strided_load %arg12[%c20_237, %c0_238] {strides = array<i32: 120, 1>} : memref<240x128xf32, #tpu.memory_space<vmem>>, vector<2x128xf32>
    %c31 = arith.constant 31 : index
    %c0_239 = arith.constant 0 : index
    %311 = tpu.strided_load %arg12[%c31, %c0_239] {strides = array<i32: 120, 1>} : memref<240x128xf32, #tpu.memory_space<vmem>>, vector<2x128xf32>
    %c32 = arith.constant 32 : index
    %c0_240 = arith.constant 0 : index
    %312 = tpu.strided_load %arg12[%c32, %c0_240] {strides = array<i32: 120, 1>} : memref<240x128xf32, #tpu.memory_space<vmem>>, vector<2x128xf32>
    %313 = arith.maximumf %309, %310 : vector<2x128xf32>
    %314 = arith.maximumf %311, %312 : vector<2x128xf32>
    %315 = arith.maximumf %313, %314 : vector<2x128xf32>
    %c21_241 = arith.constant 21 : index
    %c0_242 = arith.constant 0 : index
    %316 = tpu.strided_load %arg12[%c21_241, %c0_242] {strides = array<i32: 120, 1>} : memref<240x128xf32, #tpu.memory_space<vmem>>, vector<2x128xf32>
    %c22 = arith.constant 22 : index
    %c0_243 = arith.constant 0 : index
    %317 = tpu.strided_load %arg12[%c22, %c0_243] {strides = array<i32: 120, 1>} : memref<240x128xf32, #tpu.memory_space<vmem>>, vector<2x128xf32>
    %c33 = arith.constant 33 : index
    %c0_244 = arith.constant 0 : index
    %318 = tpu.strided_load %arg12[%c33, %c0_244] {strides = array<i32: 120, 1>} : memref<240x128xf32, #tpu.memory_space<vmem>>, vector<2x128xf32>
    %c34 = arith.constant 34 : index
    %c0_245 = arith.constant 0 : index
    %319 = tpu.strided_load %arg12[%c34, %c0_245] {strides = array<i32: 120, 1>} : memref<240x128xf32, #tpu.memory_space<vmem>>, vector<2x128xf32>
    %320 = arith.maximumf %316, %317 : vector<2x128xf32>
    %321 = arith.maximumf %318, %319 : vector<2x128xf32>
    %322 = arith.maximumf %320, %321 : vector<2x128xf32>
    %c37 = arith.constant 37 : index
    %c0_246 = arith.constant 0 : index
    %323 = tpu.strided_load %arg12[%c37, %c0_246] {strides = array<i32: 120, 1>} : memref<240x128xf32, #tpu.memory_space<vmem>>, vector<2x128xf32>
    %c38 = arith.constant 38 : index
    %c0_247 = arith.constant 0 : index
    %324 = tpu.strided_load %arg12[%c38, %c0_247] {strides = array<i32: 120, 1>} : memref<240x128xf32, #tpu.memory_space<vmem>>, vector<2x128xf32>
    %c49 = arith.constant 49 : index
    %c0_248 = arith.constant 0 : index
    %325 = tpu.strided_load %arg12[%c49, %c0_248] {strides = array<i32: 120, 1>} : memref<240x128xf32, #tpu.memory_space<vmem>>, vector<2x128xf32>
    %c50 = arith.constant 50 : index
    %c0_249 = arith.constant 0 : index
    %326 = tpu.strided_load %arg12[%c50, %c0_249] {strides = array<i32: 120, 1>} : memref<240x128xf32, #tpu.memory_space<vmem>>, vector<2x128xf32>
    %327 = arith.maximumf %323, %324 : vector<2x128xf32>
    %328 = arith.maximumf %325, %326 : vector<2x128xf32>
    %329 = arith.maximumf %327, %328 : vector<2x128xf32>
    %c39 = arith.constant 39 : index
    %c0_250 = arith.constant 0 : index
    %330 = tpu.strided_load %arg12[%c39, %c0_250] {strides = array<i32: 120, 1>} : memref<240x128xf32, #tpu.memory_space<vmem>>, vector<2x128xf32>
    %c40_251 = arith.constant 40 : index
    %c0_252 = arith.constant 0 : index
    %331 = tpu.strided_load %arg12[%c40_251, %c0_252] {strides = array<i32: 120, 1>} : memref<240x128xf32, #tpu.memory_space<vmem>>, vector<2x128xf32>
    %c51 = arith.constant 51 : index
    %c0_253 = arith.constant 0 : index
    %332 = tpu.strided_load %arg12[%c51, %c0_253] {strides = array<i32: 120, 1>} : memref<240x128xf32, #tpu.memory_space<vmem>>, vector<2x128xf32>
    %c52 = arith.constant 52 : index
    %c0_254 = arith.constant 0 : index
    %333 = tpu.strided_load %arg12[%c52, %c0_254] {strides = array<i32: 120, 1>} : memref<240x128xf32, #tpu.memory_space<vmem>>, vector<2x128xf32>
    %334 = arith.maximumf %330, %331 : vector<2x128xf32>
    %335 = arith.maximumf %332, %333 : vector<2x128xf32>
    %336 = arith.maximumf %334, %335 : vector<2x128xf32>
    %c41_255 = arith.constant 41 : index
    %c0_256 = arith.constant 0 : index
    %337 = tpu.strided_load %arg12[%c41_255, %c0_256] {strides = array<i32: 120, 1>} : memref<240x128xf32, #tpu.memory_space<vmem>>, vector<2x128xf32>
    %c42 = arith.constant 42 : index
    %c0_257 = arith.constant 0 : index
    %338 = tpu.strided_load %arg12[%c42, %c0_257] {strides = array<i32: 120, 1>} : memref<240x128xf32, #tpu.memory_space<vmem>>, vector<2x128xf32>
    %c53_258 = arith.constant 53 : index
    %c0_259 = arith.constant 0 : index
    %339 = tpu.strided_load %arg12[%c53_258, %c0_259] {strides = array<i32: 120, 1>} : memref<240x128xf32, #tpu.memory_space<vmem>>, vector<2x128xf32>
    %c54 = arith.constant 54 : index
    %c0_260 = arith.constant 0 : index
    %340 = tpu.strided_load %arg12[%c54, %c0_260] {strides = array<i32: 120, 1>} : memref<240x128xf32, #tpu.memory_space<vmem>>, vector<2x128xf32>
    %341 = arith.maximumf %337, %338 : vector<2x128xf32>
    %342 = arith.maximumf %339, %340 : vector<2x128xf32>
    %343 = arith.maximumf %341, %342 : vector<2x128xf32>
    %c43 = arith.constant 43 : index
    %c0_261 = arith.constant 0 : index
    %344 = tpu.strided_load %arg12[%c43, %c0_261] {strides = array<i32: 120, 1>} : memref<240x128xf32, #tpu.memory_space<vmem>>, vector<2x128xf32>
    %c44 = arith.constant 44 : index
    %c0_262 = arith.constant 0 : index
    %345 = tpu.strided_load %arg12[%c44, %c0_262] {strides = array<i32: 120, 1>} : memref<240x128xf32, #tpu.memory_space<vmem>>, vector<2x128xf32>
    %c55 = arith.constant 55 : index
    %c0_263 = arith.constant 0 : index
    %346 = tpu.strided_load %arg12[%c55, %c0_263] {strides = array<i32: 120, 1>} : memref<240x128xf32, #tpu.memory_space<vmem>>, vector<2x128xf32>
    %c56 = arith.constant 56 : index
    %c0_264 = arith.constant 0 : index
    %347 = tpu.strided_load %arg12[%c56, %c0_264] {strides = array<i32: 120, 1>} : memref<240x128xf32, #tpu.memory_space<vmem>>, vector<2x128xf32>
    %348 = arith.maximumf %344, %345 : vector<2x128xf32>
    %349 = arith.maximumf %346, %347 : vector<2x128xf32>
    %350 = arith.maximumf %348, %349 : vector<2x128xf32>
    %c45 = arith.constant 45 : index
    %c0_265 = arith.constant 0 : index
    %351 = tpu.strided_load %arg12[%c45, %c0_265] {strides = array<i32: 120, 1>} : memref<240x128xf32, #tpu.memory_space<vmem>>, vector<2x128xf32>
    %c46 = arith.constant 46 : index
    %c0_266 = arith.constant 0 : index
    %352 = tpu.strided_load %arg12[%c46, %c0_266] {strides = array<i32: 120, 1>} : memref<240x128xf32, #tpu.memory_space<vmem>>, vector<2x128xf32>
    %c57 = arith.constant 57 : index
    %c0_267 = arith.constant 0 : index
    %353 = tpu.strided_load %arg12[%c57, %c0_267] {strides = array<i32: 120, 1>} : memref<240x128xf32, #tpu.memory_space<vmem>>, vector<2x128xf32>
    %c58 = arith.constant 58 : index
    %c0_268 = arith.constant 0 : index
    %354 = tpu.strided_load %arg12[%c58, %c0_268] {strides = array<i32: 120, 1>} : memref<240x128xf32, #tpu.memory_space<vmem>>, vector<2x128xf32>
    %355 = arith.maximumf %351, %352 : vector<2x128xf32>
    %356 = arith.maximumf %353, %354 : vector<2x128xf32>
    %357 = arith.maximumf %355, %356 : vector<2x128xf32>
    %c61_269 = arith.constant 61 : index
    %c0_270 = arith.constant 0 : index
    %358 = tpu.strided_load %arg12[%c61_269, %c0_270] {strides = array<i32: 120, 1>} : memref<240x128xf32, #tpu.memory_space<vmem>>, vector<2x128xf32>
    %c62 = arith.constant 62 : index
    %c0_271 = arith.constant 0 : index
    %359 = tpu.strided_load %arg12[%c62, %c0_271] {strides = array<i32: 120, 1>} : memref<240x128xf32, #tpu.memory_space<vmem>>, vector<2x128xf32>
    %c73 = arith.constant 73 : index
    %c0_272 = arith.constant 0 : index
    %360 = tpu.strided_load %arg12[%c73, %c0_272] {strides = array<i32: 120, 1>} : memref<240x128xf32, #tpu.memory_space<vmem>>, vector<2x128xf32>
    %c74 = arith.constant 74 : index
    %c0_273 = arith.constant 0 : index
    %361 = tpu.strided_load %arg12[%c74, %c0_273] {strides = array<i32: 120, 1>} : memref<240x128xf32, #tpu.memory_space<vmem>>, vector<2x128xf32>
    %362 = arith.maximumf %358, %359 : vector<2x128xf32>
    %363 = arith.maximumf %360, %361 : vector<2x128xf32>
    %364 = arith.maximumf %362, %363 : vector<2x128xf32>
    %c63 = arith.constant 63 : index
    %c0_274 = arith.constant 0 : index
    %365 = tpu.strided_load %arg12[%c63, %c0_274] {strides = array<i32: 120, 1>} : memref<240x128xf32, #tpu.memory_space<vmem>>, vector<2x128xf32>
    %c64 = arith.constant 64 : index
    %c0_275 = arith.constant 0 : index
    %366 = tpu.strided_load %arg12[%c64, %c0_275] {strides = array<i32: 120, 1>} : memref<240x128xf32, #tpu.memory_space<vmem>>, vector<2x128xf32>
    %c75 = arith.constant 75 : index
    %c0_276 = arith.constant 0 : index
    %367 = tpu.strided_load %arg12[%c75, %c0_276] {strides = array<i32: 120, 1>} : memref<240x128xf32, #tpu.memory_space<vmem>>, vector<2x128xf32>
    %c76 = arith.constant 76 : index
    %c0_277 = arith.constant 0 : index
    %368 = tpu.strided_load %arg12[%c76, %c0_277] {strides = array<i32: 120, 1>} : memref<240x128xf32, #tpu.memory_space<vmem>>, vector<2x128xf32>
    %369 = arith.maximumf %365, %366 : vector<2x128xf32>
    %370 = arith.maximumf %367, %368 : vector<2x128xf32>
    %371 = arith.maximumf %369, %370 : vector<2x128xf32>
    %c65_278 = arith.constant 65 : index
    %c0_279 = arith.constant 0 : index
    %372 = tpu.strided_load %arg12[%c65_278, %c0_279] {strides = array<i32: 120, 1>} : memref<240x128xf32, #tpu.memory_space<vmem>>, vector<2x128xf32>
    %c66 = arith.constant 66 : index
    %c0_280 = arith.constant 0 : index
    %373 = tpu.strided_load %arg12[%c66, %c0_280] {strides = array<i32: 120, 1>} : memref<240x128xf32, #tpu.memory_space<vmem>>, vector<2x128xf32>
    %c77_281 = arith.constant 77 : index
    %c0_282 = arith.constant 0 : index
    %374 = tpu.strided_load %arg12[%c77_281, %c0_282] {strides = array<i32: 120, 1>} : memref<240x128xf32, #tpu.memory_space<vmem>>, vector<2x128xf32>
    %c78 = arith.constant 78 : index
    %c0_283 = arith.constant 0 : index
    %375 = tpu.strided_load %arg12[%c78, %c0_283] {strides = array<i32: 120, 1>} : memref<240x128xf32, #tpu.memory_space<vmem>>, vector<2x128xf32>
    %376 = arith.maximumf %372, %373 : vector<2x128xf32>
    %377 = arith.maximumf %374, %375 : vector<2x128xf32>
    %378 = arith.maximumf %376, %377 : vector<2x128xf32>
    %c67 = arith.constant 67 : index
    %c0_284 = arith.constant 0 : index
    %379 = tpu.strided_load %arg12[%c67, %c0_284] {strides = array<i32: 120, 1>} : memref<240x128xf32, #tpu.memory_space<vmem>>, vector<2x128xf32>
    %c68 = arith.constant 68 : index
    %c0_285 = arith.constant 0 : index
    %380 = tpu.strided_load %arg12[%c68, %c0_285] {strides = array<i32: 120, 1>} : memref<240x128xf32, #tpu.memory_space<vmem>>, vector<2x128xf32>
    %c79 = arith.constant 79 : index
    %c0_286 = arith.constant 0 : index
    %381 = tpu.strided_load %arg12[%c79, %c0_286] {strides = array<i32: 120, 1>} : memref<240x128xf32, #tpu.memory_space<vmem>>, vector<2x128xf32>
    %c80_287 = arith.constant 80 : index
    %c0_288 = arith.constant 0 : index
    %382 = tpu.strided_load %arg12[%c80_287, %c0_288] {strides = array<i32: 120, 1>} : memref<240x128xf32, #tpu.memory_space<vmem>>, vector<2x128xf32>
    %383 = arith.maximumf %379, %380 : vector<2x128xf32>
    %384 = arith.maximumf %381, %382 : vector<2x128xf32>
    %385 = arith.maximumf %383, %384 : vector<2x128xf32>
    %c69 = arith.constant 69 : index
    %c0_289 = arith.constant 0 : index
    %386 = tpu.strided_load %arg12[%c69, %c0_289] {strides = array<i32: 120, 1>} : memref<240x128xf32, #tpu.memory_space<vmem>>, vector<2x128xf32>
    %c70 = arith.constant 70 : index
    %c0_290 = arith.constant 0 : index
    %387 = tpu.strided_load %arg12[%c70, %c0_290] {strides = array<i32: 120, 1>} : memref<240x128xf32, #tpu.memory_space<vmem>>, vector<2x128xf32>
    %c81_291 = arith.constant 81 : index
    %c0_292 = arith.constant 0 : index
    %388 = tpu.strided_load %arg12[%c81_291, %c0_292] {strides = array<i32: 120, 1>} : memref<240x128xf32, #tpu.memory_space<vmem>>, vector<2x128xf32>
    %c82 = arith.constant 82 : index
    %c0_293 = arith.constant 0 : index
    %389 = tpu.strided_load %arg12[%c82, %c0_293] {strides = array<i32: 120, 1>} : memref<240x128xf32, #tpu.memory_space<vmem>>, vector<2x128xf32>
    %390 = arith.maximumf %386, %387 : vector<2x128xf32>
    %391 = arith.maximumf %388, %389 : vector<2x128xf32>
    %392 = arith.maximumf %390, %391 : vector<2x128xf32>
    %c85 = arith.constant 85 : index
    %c0_294 = arith.constant 0 : index
    %393 = tpu.strided_load %arg12[%c85, %c0_294] {strides = array<i32: 120, 1>} : memref<240x128xf32, #tpu.memory_space<vmem>>, vector<2x128xf32>
    %c86 = arith.constant 86 : index
    %c0_295 = arith.constant 0 : index
    %394 = tpu.strided_load %arg12[%c86, %c0_295] {strides = array<i32: 120, 1>} : memref<240x128xf32, #tpu.memory_space<vmem>>, vector<2x128xf32>
    %c97 = arith.constant 97 : index
    %c0_296 = arith.constant 0 : index
    %395 = tpu.strided_load %arg12[%c97, %c0_296] {strides = array<i32: 120, 1>} : memref<240x128xf32, #tpu.memory_space<vmem>>, vector<2x128xf32>
    %c98 = arith.constant 98 : index
    %c0_297 = arith.constant 0 : index
    %396 = tpu.strided_load %arg12[%c98, %c0_297] {strides = array<i32: 120, 1>} : memref<240x128xf32, #tpu.memory_space<vmem>>, vector<2x128xf32>
    %397 = arith.maximumf %393, %394 : vector<2x128xf32>
    %398 = arith.maximumf %395, %396 : vector<2x128xf32>
    %399 = arith.maximumf %397, %398 : vector<2x128xf32>
    %c87 = arith.constant 87 : index
    %c0_298 = arith.constant 0 : index
    %400 = tpu.strided_load %arg12[%c87, %c0_298] {strides = array<i32: 120, 1>} : memref<240x128xf32, #tpu.memory_space<vmem>>, vector<2x128xf32>
    %c88 = arith.constant 88 : index
    %c0_299 = arith.constant 0 : index
    %401 = tpu.strided_load %arg12[%c88, %c0_299] {strides = array<i32: 120, 1>} : memref<240x128xf32, #tpu.memory_space<vmem>>, vector<2x128xf32>
    %c99 = arith.constant 99 : index
    %c0_300 = arith.constant 0 : index
    %402 = tpu.strided_load %arg12[%c99, %c0_300] {strides = array<i32: 120, 1>} : memref<240x128xf32, #tpu.memory_space<vmem>>, vector<2x128xf32>
    %c100_301 = arith.constant 100 : index
    %c0_302 = arith.constant 0 : index
    %403 = tpu.strided_load %arg12[%c100_301, %c0_302] {strides = array<i32: 120, 1>} : memref<240x128xf32, #tpu.memory_space<vmem>>, vector<2x128xf32>
    %404 = arith.maximumf %400, %401 : vector<2x128xf32>
    %405 = arith.maximumf %402, %403 : vector<2x128xf32>
    %406 = arith.maximumf %404, %405 : vector<2x128xf32>
    %c89_303 = arith.constant 89 : index
    %c0_304 = arith.constant 0 : index
    %407 = tpu.strided_load %arg12[%c89_303, %c0_304] {strides = array<i32: 120, 1>} : memref<240x128xf32, #tpu.memory_space<vmem>>, vector<2x128xf32>
    %c90 = arith.constant 90 : index
    %c0_305 = arith.constant 0 : index
    %408 = tpu.strided_load %arg12[%c90, %c0_305] {strides = array<i32: 120, 1>} : memref<240x128xf32, #tpu.memory_space<vmem>>, vector<2x128xf32>
    %c101_306 = arith.constant 101 : index
    %c0_307 = arith.constant 0 : index
    %409 = tpu.strided_load %arg12[%c101_306, %c0_307] {strides = array<i32: 120, 1>} : memref<240x128xf32, #tpu.memory_space<vmem>>, vector<2x128xf32>
    %c102 = arith.constant 102 : index
    %c0_308 = arith.constant 0 : index
    %410 = tpu.strided_load %arg12[%c102, %c0_308] {strides = array<i32: 120, 1>} : memref<240x128xf32, #tpu.memory_space<vmem>>, vector<2x128xf32>
    %411 = arith.maximumf %407, %408 : vector<2x128xf32>
    %412 = arith.maximumf %409, %410 : vector<2x128xf32>
    %413 = arith.maximumf %411, %412 : vector<2x128xf32>
    %c91 = arith.constant 91 : index
    %c0_309 = arith.constant 0 : index
    %414 = tpu.strided_load %arg12[%c91, %c0_309] {strides = array<i32: 120, 1>} : memref<240x128xf32, #tpu.memory_space<vmem>>, vector<2x128xf32>
    %c92 = arith.constant 92 : index
    %c0_310 = arith.constant 0 : index
    %415 = tpu.strided_load %arg12[%c92, %c0_310] {strides = array<i32: 120, 1>} : memref<240x128xf32, #tpu.memory_space<vmem>>, vector<2x128xf32>
    %c103 = arith.constant 103 : index
    %c0_311 = arith.constant 0 : index
    %416 = tpu.strided_load %arg12[%c103, %c0_311] {strides = array<i32: 120, 1>} : memref<240x128xf32, #tpu.memory_space<vmem>>, vector<2x128xf32>
    %c104 = arith.constant 104 : index
    %c0_312 = arith.constant 0 : index
    %417 = tpu.strided_load %arg12[%c104, %c0_312] {strides = array<i32: 120, 1>} : memref<240x128xf32, #tpu.memory_space<vmem>>, vector<2x128xf32>
    %418 = arith.maximumf %414, %415 : vector<2x128xf32>
    %419 = arith.maximumf %416, %417 : vector<2x128xf32>
    %420 = arith.maximumf %418, %419 : vector<2x128xf32>
    %c93 = arith.constant 93 : index
    %c0_313 = arith.constant 0 : index
    %421 = tpu.strided_load %arg12[%c93, %c0_313] {strides = array<i32: 120, 1>} : memref<240x128xf32, #tpu.memory_space<vmem>>, vector<2x128xf32>
    %c94 = arith.constant 94 : index
    %c0_314 = arith.constant 0 : index
    %422 = tpu.strided_load %arg12[%c94, %c0_314] {strides = array<i32: 120, 1>} : memref<240x128xf32, #tpu.memory_space<vmem>>, vector<2x128xf32>
    %c105 = arith.constant 105 : index
    %c0_315 = arith.constant 0 : index
    %423 = tpu.strided_load %arg12[%c105, %c0_315] {strides = array<i32: 120, 1>} : memref<240x128xf32, #tpu.memory_space<vmem>>, vector<2x128xf32>
    %c106 = arith.constant 106 : index
    %c0_316 = arith.constant 0 : index
    %424 = tpu.strided_load %arg12[%c106, %c0_316] {strides = array<i32: 120, 1>} : memref<240x128xf32, #tpu.memory_space<vmem>>, vector<2x128xf32>
    %425 = arith.maximumf %421, %422 : vector<2x128xf32>
    %426 = arith.maximumf %423, %424 : vector<2x128xf32>
    %427 = arith.maximumf %425, %426 : vector<2x128xf32>
    %428 = tpu.concatenate %294, %301, %308, %315, %322, %329, %336, %343, %350, %357, %364, %371, %378, %385, %392, %399 in 1 : vector<2x128xf32>, vector<2x128xf32>, vector<2x128xf32>, vector<2x128xf32>, vector<2x128xf32>, vector<2x128xf32>, vector<2x128xf32>, vector<2x128xf32>, vector<2x128xf32>, vector<2x128xf32>, vector<2x128xf32>, vector<2x128xf32>, vector<2x128xf32>, vector<2x128xf32>, vector<2x128xf32>, vector<2x128xf32> -> vector<2x2048xf32>
    %429 = tpu.concatenate %406, %413, %420, %427 in 1 : vector<2x128xf32>, vector<2x128xf32>, vector<2x128xf32>, vector<2x128xf32> -> vector<2x512xf32>
    %430 = tpu.concatenate %428, %429 in 1 : vector<2x2048xf32>, vector<2x512xf32> -> vector<2x2560xf32>
    %431 = arith.truncf %430 : vector<2x2560xf32> to vector<2x2560xbf16>
    %432 = vector.extract_strided_slice %431 {offsets = [0, 0], sizes = [2, 512], strides = [1, 1]} : vector<2x2560xbf16> to vector<2x512xbf16>
    %c0_317 = arith.constant 0 : index
    %c0_318 = arith.constant 0 : index
    %433 = vector.load %arg13[%c0_317, %c0_318] : memref<2560x512xbf16, #tpu.memory_space<vmem>>, vector<512x512xbf16>
    %cst_319 = arith.constant dense<0.000000e+00> : vector<2x512xf32>
    %434 = tpu.matmul %432, %433, %cst_319 {dimension_numbers = #tpu.dot_dimension_numbers<[1], [0], [0], [1], [0, 0, 1, 1], [], []>} : vector<2x512xbf16>, vector<512x512xbf16>, vector<2x512xf32> -> vector<2x512xf32>
    %435 = vector.extract_strided_slice %431 {offsets = [0, 512], sizes = [2, 512], strides = [1, 1]} : vector<2x2560xbf16> to vector<2x512xbf16>
    %c512 = arith.constant 512 : index
    %c0_320 = arith.constant 0 : index
    %436 = vector.load %arg13[%c512, %c0_320] : memref<2560x512xbf16, #tpu.memory_space<vmem>>, vector<512x512xbf16>
    %cst_321 = arith.constant dense<0.000000e+00> : vector<2x512xf32>
    %437 = tpu.matmul %435, %436, %cst_321 {dimension_numbers = #tpu.dot_dimension_numbers<[1], [0], [0], [1], [0, 0, 1, 1], [], []>} : vector<2x512xbf16>, vector<512x512xbf16>, vector<2x512xf32> -> vector<2x512xf32>
    %438 = arith.addf %434, %437 : vector<2x512xf32>
    %439 = vector.extract_strided_slice %431 {offsets = [0, 1024], sizes = [2, 512], strides = [1, 1]} : vector<2x2560xbf16> to vector<2x512xbf16>
    %c1024 = arith.constant 1024 : index
    %c0_322 = arith.constant 0 : index
    %440 = vector.load %arg13[%c1024, %c0_322] : memref<2560x512xbf16, #tpu.memory_space<vmem>>, vector<512x512xbf16>
    %cst_323 = arith.constant dense<0.000000e+00> : vector<2x512xf32>
    %441 = tpu.matmul %439, %440, %cst_323 {dimension_numbers = #tpu.dot_dimension_numbers<[1], [0], [0], [1], [0, 0, 1, 1], [], []>} : vector<2x512xbf16>, vector<512x512xbf16>, vector<2x512xf32> -> vector<2x512xf32>
    %442 = arith.addf %438, %441 : vector<2x512xf32>
    %443 = vector.extract_strided_slice %431 {offsets = [0, 1536], sizes = [2, 512], strides = [1, 1]} : vector<2x2560xbf16> to vector<2x512xbf16>
    %c1536 = arith.constant 1536 : index
    %c0_324 = arith.constant 0 : index
    %444 = vector.load %arg13[%c1536, %c0_324] : memref<2560x512xbf16, #tpu.memory_space<vmem>>, vector<512x512xbf16>
    %cst_325 = arith.constant dense<0.000000e+00> : vector<2x512xf32>
    %445 = tpu.matmul %443, %444, %cst_325 {dimension_numbers = #tpu.dot_dimension_numbers<[1], [0], [0], [1], [0, 0, 1, 1], [], []>} : vector<2x512xbf16>, vector<512x512xbf16>, vector<2x512xf32> -> vector<2x512xf32>
    %446 = arith.addf %442, %445 : vector<2x512xf32>
    %447 = vector.extract_strided_slice %431 {offsets = [0, 2048], sizes = [2, 512], strides = [1, 1]} : vector<2x2560xbf16> to vector<2x512xbf16>
    %c2048 = arith.constant 2048 : index
    %c0_326 = arith.constant 0 : index
    %448 = vector.load %arg13[%c2048, %c0_326] : memref<2560x512xbf16, #tpu.memory_space<vmem>>, vector<512x512xbf16>
    %cst_327 = arith.constant dense<0.000000e+00> : vector<2x512xf32>
    %449 = tpu.matmul %447, %448, %cst_327 {dimension_numbers = #tpu.dot_dimension_numbers<[1], [0], [0], [1], [0, 0, 1, 1], [], []>} : vector<2x512xbf16>, vector<512x512xbf16>, vector<2x512xf32> -> vector<2x512xf32>
    %450 = arith.addf %446, %449 : vector<2x512xf32>
    %c0_328 = arith.constant 0 : index
    %c0_329 = arith.constant 0 : index
    %451 = vector.load %arg6[%c0_328, %c0_329] : memref<1x512xf32, #tpu.memory_space<vmem>>, vector<1x512xf32>
    %452 = vector.broadcast %451 : vector<1x512xf32> to vector<2x512xf32>
    %453 = arith.addf %450, %452 : vector<2x512xf32>
    %cst_330 = arith.constant 0.000000e+00 : f32
    %454 = vector.broadcast %cst_330 : f32 to vector<2x512xf32>
    %455 = arith.maximumf %453, %454 : vector<2x512xf32>
    %456 = arith.truncf %455 : vector<2x512xf32> to vector<2x512xbf16>
    %c0_331 = arith.constant 0 : index
    %c0_332 = arith.constant 0 : index
    %457 = vector.load %arg14[%c0_331, %c0_332] : memref<512x512xbf16, #tpu.memory_space<vmem>>, vector<512x512xbf16>
    %cst_333 = arith.constant dense<0.000000e+00> : vector<2x512xf32>
    %458 = tpu.matmul %456, %457, %cst_333 {dimension_numbers = #tpu.dot_dimension_numbers<[1], [0], [0], [1], [0, 0, 1, 1], [], []>} : vector<2x512xbf16>, vector<512x512xbf16>, vector<2x512xf32> -> vector<2x512xf32>
    %c0_334 = arith.constant 0 : index
    %c0_335 = arith.constant 0 : index
    %459 = vector.load %arg8[%c0_334, %c0_335] : memref<1x512xf32, #tpu.memory_space<vmem>>, vector<1x512xf32>
    %460 = vector.broadcast %459 : vector<1x512xf32> to vector<2x512xf32>
    %461 = arith.addf %458, %460 : vector<2x512xf32>
    %c0_336 = arith.constant 0 : index
    %c0_337 = arith.constant 0 : index
    %462 = vector.load %arg9[%c0_336, %c0_337] : memref<2x512xf32, #tpu.memory_space<vmem>>, vector<2x512xf32>
    tpu.vector_store %arg9[%c0_336, %c0_337], %461 {strides = array<i32>} : memref<2x512xf32, #tpu.memory_space<vmem>>, vector<2x512xf32>,
    return
  }
}

</mosaic_0001>

<bundles_post_ra>
// kernel: dummy_img_feat_forward.1
= control target key start
LH: loop header
LB: loop body
LE: loop exit
PB: predicated region body
PF: predicated region fallthrough
CT: control target
= control target key end

     0   :  { %14 = vsyncpa [#allocation9], 0  ;;  %s10031_s0 = inlined_call_operand.vmem [shape: bf16[640,27], index: 0, kind: input, shape index: {}]   ;;  %s10032_s1 = inlined_call_operand.hbm [shape: bf16[27,64], index: 1, kind: input, shape index: {}]   ;;  %s10033_s2 = inlined_call_operand.hbm [shape: f32[1,64], index: 2, kind: input, shape index: {}]   ;;  %s10034_s3 = inlined_call_operand.hbm [shape: bf16[9,64,128], index: 3, kind: input, shape index: {}]   ;;  %s10035_s4 = inlined_call_operand.hbm [shape: f32[1,128], index: 4, kind: input, shape index: {}]   ;;  %s10036_s5 = inlined_call_operand.hbm [shape: bf16[2560,512], index: 5, kind: input, shape index: {}]   ;;  %s10037_s6 = inlined_call_operand.hbm [shape: f32[1,512], index: 6, kind: input, shape index: {}]   ;;  %s10038_s7 = inlined_call_operand.hbm [shape: bf16[512,512], index: 7, kind: input, shape index: {}]   ;;  %s10039_s8 = inlined_call_operand.hbm [shape: f32[1,512], index: 8, kind: input, shape index: {}]   ;;  %s10040_s9 = inlined_call_operand.hbm [shape: f32[2,512], index: 9, kind: output, shape index: {}]  }
   0x1   :  { %15 = vsyncpa [#allocation12], 0 }
   0x2   :  { %16 = vsyncpa [#allocation15], 0 }
   0x3   :  { %17 = vsyncpa [#allocation18], 0 }
   0x4   :  { %18 = vsyncpa [#allocation10], 0  ;;  %s8895_s30 = smov [#allocation11]   ;;  %s8896_s11 = smov [#allocation14]  }
   0x5   :  { %s39_s10 = sshll.u32 %s8895_s30, 4  ;;  %s61_s12 = sshll.u32 %s8896_s11, 4  ;;  %s40_s10 = int_to_ptr.vmem [resolvable:$true] %s39_s10  ;;  %s62_s12 = int_to_ptr.vmem [resolvable:$true] %s61_s12 }
   0x6   :  { %s8727_s15 = scalar_lea.hbm %s10033_s2, 16 }
   0x7   :  { %p8728_p0 = scmp.ne.s32.totalorder %s10033_s2, %s8727_s15  ;;  %p8731_p1 = scmp.lt.u32.totalorder %s8727_s15, %s10033_s2 }
   0x9   :  { %p8733_p2 = pnand %p8731_p1, %p8728_p0 }
   0xb   :  { %8736 = shalt.err (!%p8733_p2)
}
   0xc   :  { %s8737_s20 = scalar_lea.vmem %s40_s10, 16  ;;  %s8741_s21 = scalar_lea.vmem %s40_s10, 32 }
   0xd   :  { %p8738_p3 = scmp.ne.s32.totalorder %s40_s10, %s8737_s20  ;;  %p8742_p4 = scmp.lt.s32.totalorder %s40_s10, %s40_s10 }
   0xe   :  { %p8743_p5 = scmp.lt.s32.totalorder %s8741_s21, %s8737_s20 }
  0x10   :  { %p8744_p6 = por %p8743_p5, %p8742_p4 }
  0x12   :  { %p8745_p7 = pnand %p8744_p6, %p8738_p3 }
  0x14   :  { %8748 = shalt.err (!%p8745_p7)
}
  0x15   :  { %42 = dma.hbm_to_vmem [thread:$0]  %s10033_s2, 16, %s40_s10, [#allocation12]  }
  0x16   :  { %s8749_s26 = scalar_lea.hbm %s10035_s4, 16 }
  0x17   :  { %p8750_p8 = scmp.ne.s32.totalorder %s10035_s4, %s8749_s26  ;;  %p8753_p9 = scmp.lt.u32.totalorder %s8749_s26, %s10035_s4 }
  0x19   :  { %p8755_p10 = pnand %p8753_p9, %p8750_p8 }
  0x1b   :  { %8758 = shalt.err (!%p8755_p10)
}
  0x1c   :  { %s8759_s11 = scalar_lea.vmem %s62_s12, 16  ;;  %s8763_s13 = scalar_lea.vmem %s62_s12, 32 }
  0x1d   :  { %p8760_p11 = scmp.ne.s32.totalorder %s62_s12, %s8759_s11  ;;  %p8764_p12 = scmp.lt.s32.totalorder %s62_s12, %s62_s12 }
  0x1e   :  { %p8765_p13 = scmp.lt.s32.totalorder %s8763_s13, %s8759_s11 }
  0x20   :  { %p8766_p0 = por %p8765_p13, %p8764_p12 }
  0x22   :  { %p8767_p1 = pnand %p8766_p0, %p8760_p11 }
  0x24   :  { %8770 = shalt.err (!%p8767_p1)
}
  0x25   :  { %64 = dma.hbm_to_vmem [thread:$0]  %s10035_s4, 16, %s62_s12, [#allocation15]  }
  0x26   :  { %s8897_s14 = smov [#allocation8]   ;;  %s8771_s18 = scalar_lea.hbm %s10032_s1, 256 }
  0x27   :  { %s26_s15 = sshll.u32 %s8897_s14, 4  ;;  %p8772_p2 = scmp.ne.s32.totalorder %s10032_s1, %s8771_s18  ;;  %s27_s15 = int_to_ptr.vmem [resolvable:$true] %s26_s15 }
  0x28   :  { %p8775_p3 = scmp.lt.u32.totalorder %s8771_s18, %s10032_s1 }
  0x2a   :  { %p8777_p4 = pnand %p8775_p3, %p8772_p2 }
  0x2c   :  { %8780 = shalt.err (!%p8777_p4)
}
  0x2d   :  { %s8781_s23 = scalar_lea.vmem %s27_s15, 256  ;;  %p8786_p6 = scmp.lt.s32.totalorder %s27_s15, %s27_s15 }
  0x2e   :  { %p8782_p5 = scmp.ne.s32.totalorder %s27_s15, %s8781_s23  ;;  %p8787_p7 = scmp.lt.s32.totalorder %s8781_s23, %s8781_s23 }
  0x30   :  { %p8788_p8 = por %p8787_p7, %p8786_p6 }
  0x32   :  { %p8789_p9 = pnand %p8788_p8, %p8782_p5 }
  0x34   :  { %8792 = shalt.err (!%p8789_p9)
}
  0x35   :  { %s8898_s4 = smov 64   ;;  %s8899_s12 = smov 4  }
  0x36   :  { %32 = dma.hbm_to_vmem [thread:$0]  %s10032_s1, 256, %s27_s15, [#allocation9], %s8898_s4, %s8898_s4, %s8899_s12  }
  0x37   :  { %s8900_s26 = smov [#allocation13]   ;;  %s8901_s28 = smov [#allocation16]  }
  0x38   :  { %s48_s27 = sshll.u32 %s8900_s26, 4  ;;  %s71_s29 = sshll.u32 %s8901_s28, 4  ;;  %s49_s27 = int_to_ptr.vmem [resolvable:$true] %s48_s27  ;;  %s72_s29 = int_to_ptr.vmem [resolvable:$true] %s71_s29 }
  0x39   :  { %s8793_s13 = scalar_lea.hbm %s10034_s3, 4608 }
  0x3a   :  { %p8794_p10 = scmp.ne.s32.totalorder %s10034_s3, %s8793_s13  ;;  %p8797_p11 = scmp.lt.u32.totalorder %s8793_s13, %s10034_s3 }
  0x3c   :  { %p8799_p12 = pnand %p8797_p11, %p8794_p10 }
  0x3e   :  { %8802 = shalt.err (!%p8799_p12)
}
  0x3f   :  { %s8803_s1 = scalar_lea.vmem %s49_s27, 4608  ;;  %p8808_p0 = scmp.lt.s32.totalorder %s49_s27, %s49_s27 }
  0x40   :  { %p8804_p13 = scmp.ne.s32.totalorder %s49_s27, %s8803_s1  ;;  %p8809_p1 = scmp.lt.s32.totalorder %s8803_s1, %s8803_s1 }
  0x42   :  { %p8810_p2 = por %p8809_p1, %p8808_p0 }
  0x44   :  { %p8811_p3 = pnand %p8810_p2, %p8804_p13 }
  0x46   :  { %8814 = shalt.err (!%p8811_p3)
}
  0x47   :  { %54 = dma.hbm_to_vmem [thread:$0]  %s10034_s3, 4608, %s49_s27, [#allocation12], %s8898_s4, %s8898_s4, %s8899_s12  }
  0x48   :  { %s8815_s20 = scalar_lea.hbm %s10037_s6, 64 }
  0x49   :  { %p8816_p4 = scmp.ne.s32.totalorder %s10037_s6, %s8815_s20  ;;  %p8819_p5 = scmp.lt.u32.totalorder %s8815_s20, %s10037_s6 }
  0x4b   :  { %p8821_p6 = pnand %p8819_p5, %p8816_p4 }
  0x4d   :  { %8824 = shalt.err (!%p8821_p6)
}
  0x4e   :  { %s8825_s25 = scalar_lea.vmem %s72_s29, 64  ;;  %p8830_p8 = scmp.lt.s32.totalorder %s72_s29, %s72_s29 }
  0x4f   :  { %p8826_p7 = scmp.ne.s32.totalorder %s72_s29, %s8825_s25  ;;  %p8831_p9 = scmp.lt.s32.totalorder %s8825_s25, %s8825_s25 }
  0x51   :  { %p8832_p10 = por %p8831_p9, %p8830_p8 }
  0x53   :  { %p8833_p11 = pnand %p8832_p10, %p8826_p7 }
  0x55   :  { %8836 = shalt.err (!%p8833_p11)
}
  0x56   :  { %74 = dma.hbm_to_vmem [thread:$0]  %s10037_s6, 64, %s72_s29, [#allocation15]  }
  0x57   :  { %s8902_s27 = smov [#allocation17]   ;;  %s8837_s13 = scalar_lea.hbm %s10039_s8, 64 }
  0x58   :  { %s81_s28 = sshll.u32 %s8902_s27, 4  ;;  %p8838_p12 = scmp.ne.s32.totalorder %s10039_s8, %s8837_s13  ;;  %s82_s28 = int_to_ptr.vmem [resolvable:$true] %s81_s28 }
  0x59   :  { %p8841_p13 = scmp.lt.u32.totalorder %s8837_s13, %s10039_s8 }
  0x5b   :  { %p8843_p0 = pnand %p8841_p13, %p8838_p12 }
  0x5d   :  { %8846 = shalt.err (!%p8843_p0)
}
  0x5e   :  { %s8847_s1 = scalar_lea.vmem %s82_s28, 64  ;;  %p8852_p2 = scmp.lt.s32.totalorder %s82_s28, %s82_s28 }
  0x5f   :  { %p8848_p1 = scmp.ne.s32.totalorder %s82_s28, %s8847_s1  ;;  %p8853_p3 = scmp.lt.s32.totalorder %s8847_s1, %s8847_s1 }
  0x61   :  { %p8854_p4 = por %p8853_p3, %p8852_p2 }
  0x63   :  { %p8855_p5 = pnand %p8854_p4, %p8848_p1 }
  0x65   :  { %8858 = shalt.err (!%p8855_p5)
}
  0x66   :  { %84 = dma.hbm_to_vmem [thread:$0]  %s10039_s8, 64, %s82_s28, [#allocation18]  }
  0x67   :  { %8881 = dma.done.wait [#allocation9], 256  }
  0x68   :  { %8882 = vsyncadd [#allocation9], 4294967040 }
  0x69   :  { %8883 = dma.done.wait [#allocation12], 4624  }
  0x6a   :  { %8884 = vsyncadd [#allocation12], 4294962672 }
  0x6b   :  { %8885 = dma.done.wait [#allocation15], 80  }
  0x6c   :  { %8886 = vsyncadd [#allocation15], 4294967216 }
  0x6d   :  { %8887 = dma.done.wait [#allocation18], 64  }
  0x6e   :  { %8888 = vsyncadd [#allocation18], 4294967232  ;;  %s108_s15 = sld [smem:[#allocation0]]   ;;  %124 = sst [smem:[#allocation21 + $0x2]] %s8899_s12  ;;  %vm332_vm0 = vcmask 1044480   ;;  %vm333_vm1 = vcmask 1045504  }
  0x6f   :  { %126 = sst [smem:[#allocation21 + $0x3]] %s8898_s4  ;;  %s8903_s17 = smov [#allocation5]   ;;  %v8913_v0 = vmov 65535   ;;  %vm301_vm2 = vcmask 220160   ;;  %vm174_vm3 = vcmask 523264   ;;  %v8914_v58 = vmov 0.0  }
  0x70   :  { %s116_s18 = sshll.u32 %s8903_s17, 4  ;;  %134 = sst [smem:[#allocation21 + $0x7]] %s8898_s4  ;;  %v334_v1 = vsel %vm332_vm0, 4294967295, %v8913_v0  ;;  %vm1327_vm4 = vcmask 517120   ;;  %s117_s18 = int_to_ptr.vmem [resolvable:$true] %s116_s18 }
  0x71   :  { %136 = sst [smem:[#allocation21 + $0x8]] %s8899_s12  ;;  %s8904_s8 = smov 512   ;;  %v335_v4 = vsel %vm333_vm1, %v334_v1, 0 }
  0x72   :  { %120 = sst [smem:[#allocation21]] %s8904_s8  ;;  %s8905_s20 = smov 128  }
  0x73   :  { %122 = sst [smem:[#allocation21 + $0x1]] %s8904_s8  ;;  %s8906_s22 = smov 2  }
  0x74   :  { %s7276_s19 = sshll.u32 %s108_s15, 26  ;;  %128 = sst [smem:[#allocation21 + $0x4]] %s8905_s20 }
  0x75   :  { %s7277_s21 = sadd.s32 134217728, %s7276_s19  ;;  %130 = sst [smem:[#allocation21 + $0x5]] %s8906_s22 }
  0x76   :  { %s8907_s23 = smov 256   ;;  %s8908_s24 = smov [#allocation7]  }
  0x77   :  { %132 = sst [smem:[#allocation21 + $0x6]] %s8907_s23  ;;  %s8909_s25 = smov [#allocation20]  }
  0x78   :  { %138 = dma.general %s10036_s5, 81920, %s117_s18, %s8908_s24, %s8909_s25, [#allocation21], %s7277_s21, 0  }
  0x79   :  { %155 = sst [smem:[#allocation23]] %s8904_s8  ;;  %s8910_s27 = smov [#allocation6]  }
  0x7a   :  { %157 = sst [smem:[#allocation23 + $0x1]] %s8904_s8  ;;  %s151_s28 = sshll.u32 %s8910_s27, 4  ;;  %s152_s28 = int_to_ptr.vmem [resolvable:$true] %s151_s28 }
  0x7b   :  { %159 = sst [smem:[#allocation23 + $0x2]] %s8899_s12  ;;  %s8911_s30 = smov [#allocation7 + $0x1]  }
  0x7c   :  { %161 = sst [smem:[#allocation23 + $0x3]] %s8898_s4  ;;  %s8912_s11 = smov [#allocation22]  }
  0x7d   :  { %163 = sst [smem:[#allocation23 + $0x4]] %s8905_s20 }
  0x7e   :  { %165 = sst [smem:[#allocation23 + $0x5]] %s8906_s22 }
  0x7f   :  { %167 = sst [smem:[#allocation23 + $0x6]] %s8907_s23 }
  0x80   :  { %169 = sst [smem:[#allocation23 + $0x7]] %s8898_s4 }
  0x81   :  { %171 = sst [smem:[#allocation23 + $0x8]] %s8899_s12 }
  0x82   :  { %173 = dma.general %s10038_s7, 16384, %s152_s28, %s8911_s30, %s8912_s11, [#allocation23], %s7277_s21, 0  }
  0x83   :  { %v8606_v2 = vld [vmem:[#allocation8] sm:$0xff]   ;;  %v8608_v5 = vld [vmem:[#allocation8 + $0x8] sm:$0x3f]   ;;  %v8611_v10 = vld [vmem:[%s10031_s0 + $0x50] sm:$0xff]   ;;  %175 = vst.msk [vmem:[#allocation3] sm:$0xff] %vm174_vm3, %v8914_v58 }
  0x84   :  { %v8607_v3 = vld [vmem:[#allocation8] sm:$0xff]   ;;  %7852 = vmatprep.subr.bf16.mxu0 %v8606_v2  ;;  %v8609_v6 = vld [vmem:[#allocation8 + $0x8] sm:$0x3f]   ;;  %v337_v7 = vand.u32 %v8608_v5, %v335_v4  ;;  %v8613_v12 = vld [vmem:[%s10031_s0 + $0x58] sm:$0xff]   ;;  %7880 = vmatprep.mubr.msk.bf16.mxu1 %vm301_vm2, %v8611_v10  ;;  %176 = vst.msk [vmem:[#allocation3 + $0x8] sm:$0xff] %vm174_vm3, %v8914_v58 }
  0x85   :  { %7876 = vmatprep.subr.bf16.mxu1 %v8607_v3  ;;  %7853 = vmatpush3.bf16.msra.mxu0 %v8606_v2  ;;  %v8610_v8 = vld [vmem:[%s10031_s0] sm:$0xff]   ;;  %v608_v9 = vand.u32 %v8609_v6, %v335_v4  ;;  %v8612_v11 = vld [vmem:[%s10031_s0 + $0x8] sm:$0xff]   ;;  %v8615_v14 = vld [vmem:[%s10031_s0 + $0x10] sm:$0xff]   ;;  %177 = vst.msk [vmem:[#allocation3 + $0x10] sm:$0xff] %vm174_vm3, %v8914_v58 }
  0x86   :  { %7877 = vmatpush3.bf16.msra.mxu1 %v8607_v3  ;;  %7854 = vmatprep.subr.bf16.mxu0 %v337_v7  ;;  %v8614_v13 = vld [vmem:[#allocation8] sm:$0xff]   ;;  %v8617_v16 = vld [vmem:[%s10031_s0 + $0x18] sm:$0xff]   ;;  %v8618_v17 = vld [vmem:[%s10031_s0 + $0x68] sm:$0xff]   ;;  %178 = vst.msk [vmem:[#allocation3 + $0x18] sm:$0xff] %vm174_vm3, %v8914_v58 }
  0x87   :  { %7856 = vmatprep.mubr.msk.bf16.mxu0 %vm301_vm2, %v8610_v8  ;;  %7878 = vmatprep.subr.bf16.mxu1 %v608_v9  ;;  %v8616_v15 = vld [vmem:[%s10031_s0 + $0x60] sm:$0xff]   ;;  %v8620_v20 = vld [vmem:[%s10031_s0 + $0x70] sm:$0xff]   ;;  %v8624_v21 = vld [vmem:[#allocation8 + $0x8] sm:$0x3f]   ;;  %179 = vst.msk [vmem:[#allocation3 + $0x20] sm:$0xff] %vm174_vm3, %v8914_v58 }
  0x88   :  { %v8619_v18 = vld [vmem:[%s10031_s0 + $0x20] sm:$0xff]   ;;  %v879_v22 = vand.u32 %v8624_v21, %v335_v4  ;;  %v8622_v23 = vld [vmem:[%s10031_s0 + $0x28] sm:$0xff]   ;;  %v8623_v24 = vld [vmem:[%s10031_s0 + $0x78] sm:$0xff]   ;;  %180 = vst.msk [vmem:[#allocation3 + $0x28] sm:$0xff] %vm174_vm3, %v8914_v58 }
  0x89   :  { %7855 = vmatpush3.bf16.msra.mxu0 %v337_v7  ;;  %v8621_v19 = vld [vmem:[#allocation8] sm:$0xff]   ;;  %v8625_v25 = vld [vmem:[%s10031_s0 + $0x30] sm:$0xff]   ;;  %v8633_v27 = vld [vmem:[#allocation8 + $0x8] sm:$0x3f]   ;;  %181 = vst.msk [vmem:[#allocation3 + $0x30] sm:$0xff] %vm174_vm3, %v8914_v58 }
  0x8a   :  { %7879 = vmatpush3.bf16.msra.mxu1 %v608_v9  ;;  %7900 = vmatprep.subr.bf16.mxu0 %v8614_v13  ;;  %v8626_v26 = vld [vmem:[%s10031_s0 + $0x80] sm:$0xff]   ;;  %v8627_v28 = vld [vmem:[%s10031_s0 + $0x38] sm:$0xff]   ;;  %v1150_v29 = vand.u32 %v8633_v27, %v335_v4  ;;  %v8628_v30 = vld [vmem:[%s10031_s0 + $0x88] sm:$0xff]   ;;  %182 = vst.msk [vmem:[#allocation3 + $0x38] sm:$0xff] %vm174_vm3, %v8914_v58 }
  0x8b   :  { %7924 = vmatprep.subr.bf16.mxu1 %v8621_v19  ;;  %v8629_v31 = vld [vmem:[%s10031_s0 + $0x40] sm:$0xff]   ;;  %v8630_v32 = vld [vmem:[%s10031_s0 + $0x90] sm:$0xff]   ;;  %v8631_v33 = vld [vmem:[%s10031_s0 + $0x48] sm:$0xff]   ;;  %183 = vst.msk [vmem:[#allocation3 + $0x40] sm:$0xff] %vm174_vm3, %v8914_v58 }
  0x8c   :  { %7857 = vmatmul.mubr.msk.bf16.vlgmr.msra.gmra.mrb[0].mxu0 %vm301_vm2, %v8612_v11  ;;  %v8632_v34 = vld [vmem:[%s10031_s0 + $0x98] sm:$0xff]   ;;  %v8634_v35 = vld [vmem:[%s10031_s0 + $0xa0] sm:$0xff]   ;;  %v8635_v36 = vld [vmem:[%s10031_s0 + $0xf0] sm:$0xff]   ;;  %184 = vst.msk [vmem:[#allocation3 + $0x48] sm:$0xff] %vm174_vm3, %v8914_v58 }
  0x8d   :  { %7881 = vmatmul.mubr.msk.bf16.vlgmr.msra.gmra.mrb[0].mxu1 %vm301_vm2, %v8613_v12  ;;  %7901 = vmatpush3.bf16.msra.mxu0 %v8614_v13  ;;  %v8636_v37 = vld [vmem:[%s10031_s0 + $0xa8] sm:$0xff]   ;;  %v8637_v38 = vld [vmem:[%s10031_s0 + $0xf8] sm:$0xff]   ;;  %v8638_v39 = vld [vmem:[%s10031_s0 + $0xb0] sm:$0xff]   ;;  %185 = vst.msk [vmem:[#allocation3 + $0x50] sm:$0xff] %vm174_vm3, %v8914_v58 }
  0x8e   :  { %7860 = vmatprep.mubr.msk.bf16.mxu0 %vm301_vm2, %v8615_v14  ;;  %7884 = vmatprep.mubr.msk.bf16.mxu1 %vm301_vm2, %v8616_v15  ;;  %v8639_v40 = vld [vmem:[%s10031_s0 + $0x100] sm:$0xff]   ;;  %v8640_v41 = vld [vmem:[%s10031_s0 + $0xb8] sm:$0xff]   ;;  %v8641_v42 = vld [vmem:[%s10031_s0 + $0x108] sm:$0xff]   ;;  %186 = vst.msk [vmem:[#allocation3 + $0x58] sm:$0xff] %vm174_vm3, %v8914_v58 }
  0x8f   :  { %7925 = vmatpush3.bf16.msra.mxu1 %v8621_v19  ;;  %7902 = vmatprep.subr.bf16.mxu0 %v879_v22  ;;  %v8642_v43 = vld [vmem:[%s10031_s0 + $0xc0] sm:$0xff]   ;;  %v8643_v44 = vld [vmem:[%s10031_s0 + $0x110] sm:$0xff]   ;;  %v8644_v45 = vld [vmem:[%s10031_s0 + $0xc8] sm:$0xff]   ;;  %187 = vst.msk [vmem:[#allocation3 + $0x60] sm:$0xff] %vm174_vm3, %v8914_v58 }
  0x90   :  { %7926 = vmatprep.subr.bf16.mxu1 %v1150_v29  ;;  %v8645_v46 = vld [vmem:[%s10031_s0 + $0x118] sm:$0xff]   ;;  %v8646_v47 = vld [vmem:[%s10031_s0 + $0xd0] sm:$0xff]   ;;  %v8647_v48 = vld [vmem:[%s10031_s0 + $0x120] sm:$0xff]   ;;  %188 = vst.msk [vmem:[#allocation3 + $0x68] sm:$0xff] %vm174_vm3, %v8914_v58 }
  0x91   :  { %7903 = vmatpush3.bf16.msra.mxu0 %v879_v22  ;;  %v8648_v49 = vld [vmem:[%s10031_s0 + $0xd8] sm:$0xff]   ;;  %v8649_v50 = vld [vmem:[%s10031_s0 + $0x128] sm:$0xff]   ;;  %v8650_v51 = vld [vmem:[%s10031_s0 + $0xe0] sm:$0xff]   ;;  %189 = vst.msk [vmem:[#allocation3 + $0x70] sm:$0xff] %vm174_vm3, %v8914_v58 }
  0x92   :  { %v8651_v52 = vld [vmem:[%s10031_s0 + $0x130] sm:$0xff]   ;;  %v8652_v53 = vld [vmem:[%s10031_s0 + $0xe8] sm:$0xff]   ;;  %v8653_v54 = vld [vmem:[%s10031_s0 + $0x138] sm:$0xff]   ;;  %190 = vst.msk [vmem:[#allocation3 + $0x78] sm:$0xff] %vm174_vm3, %v8914_v58 }
  0x93   :  { %7927 = vmatpush3.bf16.msra.mxu1 %v1150_v29  ;;  %v8654_v55 = vld [vmem:[#allocation13 + $0x20] sm:$0xff]   ;;  %v8655_v56 = vld [vmem:[#allocation13 + $0x28] sm:$0xff]   ;;  %v8656_v57 = vld [vmem:[#allocation13 + $0x30] sm:$0xff]   ;;  %191 = vst.msk [vmem:[#allocation3 + $0x80] sm:$0xff] %vm174_vm3, %v8914_v58 }
  0x94   :  { %7861 = vmatmul.mubr.msk.bf16.gmra.mrb[4].mxu0 %vm301_vm2, %v8617_v16  ;;  %7948 = vmatprep.subr.bf16.mxu0 %v8654_v55  ;;  %192 = vst.msk [vmem:[#allocation3 + $0x88] sm:$0xff] %vm174_vm3, %v8914_v58  ;;  %193 = vst.msk [vmem:[#allocation3 + $0x90] sm:$0xff] %vm174_vm3, %v8914_v58  ;;  %v8657_v59 = vld [vmem:[#allocation13 + $0x38] sm:$0xff]   ;;  %v8658_v63 = vld [vmem:[#allocation13 + $0x20] sm:$0xff]  }
  0x95   :  { %7885 = vmatmul.mubr.msk.bf16.gmra.mrb[4].mxu1 %vm301_vm2, %v8618_v17  ;;  %7864 = vmatprep.mubr.msk.bf16.mxu0 %vm301_vm2, %v8619_v18  ;;  %194 = vst.msk [vmem:[#allocation3 + $0x98] sm:$0xff] %vm174_vm3, %v8914_v58  ;;  %195 = vst.msk [vmem:[#allocation3 + $0xa0] sm:$0xff] %vm174_vm3, %v8914_v58  ;;  %v1721_v60 = vld [vmem:[#allocation3 + $0x4] sm:$0xff]  ;;  %v1722_v61 = vld [vmem:[#allocation3 + $0xc] sm:$0xff] }
  0x96   :  { %7888 = vmatprep.mubr.msk.bf16.mxu1 %vm301_vm2, %v8620_v20  ;;  %196 = vst.msk [vmem:[#allocation3 + $0xa8] sm:$0xff] %vm174_vm3, %v8914_v58  ;;  %197 = vst.msk [vmem:[#allocation3 + $0xb0] sm:$0xff] %vm174_vm3, %v8914_v58  ;;  %v1736_v62 = vpack.c.bf16 %v1722_v61, %v1721_v60  ;;  %8164 = vmatprep.subr.bf16.mxu1 %v8658_v63  ;;  %v8659_v0 = vld [vmem:[#allocation13 + $0x28] sm:$0xff]   ;;  %v8660_v1 = vld [vmem:[#allocation13 + $0x30] sm:$0xff]  }
  0x97   :  { %198 = vst.msk [vmem:[#allocation3 + $0xb8] sm:$0xff] %vm174_vm3, %v8914_v58  ;;  %199 = vst.msk [vmem:[#allocation3 + $0xc0] sm:$0xff] %vm174_vm3, %v8914_v58  ;;  %v9254_v2 = vld [vmem:[#allocation13] sm:$0xff]   ;;  %v8662_v3 = vld [vmem:[#allocation13 + $0x38] sm:$0xff]  }
  0x98   :  { %200 = vst.msk [vmem:[#allocation3 + $0xc8] sm:$0xff] %vm174_vm3, %v8914_v58  ;;  %201 = vst.msk [vmem:[#allocation3 + $0xd0] sm:$0xff] %vm174_vm3, %v8914_v58  ;;  %v9258_v7 = vld [vmem:[#allocation13] sm:$0xff]   ;;  %v9261_v8 = vld [vmem:[#allocation11] ss:$0 sm:$0xff] }
  0x99   :  { %202 = vst.msk [vmem:[#allocation3 + $0xd8] sm:$0xff] %vm174_vm3, %v8914_v58  ;;  %203 = vst.msk [vmem:[#allocation3 + $0xe0] sm:$0xff] %vm174_vm3, %v8914_v58 }
  0x9a   :  { %204 = vst.msk [vmem:[#allocation3 + $0xe8] sm:$0xff] %vm174_vm3, %v8914_v58  ;;  %205 = vst.msk [vmem:[#allocation3 + $0xf0] sm:$0xff] %vm174_vm3, %v8914_v58  ;;  %v3460_v4 = vld [vmem:[#allocation3 + $0x7c] sm:$0xff] }
  0x9b   :  { %206 = vst.msk [vmem:[#allocation3 + $0xf8] sm:$0xff] %vm174_vm3, %v8914_v58  ;;  %207 = vst.msk [vmem:[#allocation3 + $0x100] sm:$0xff] %vm174_vm3, %v8914_v58  ;;  %v3461_v5 = vld [vmem:[#allocation3 + $0x84] sm:$0xff] }
  0x9c   :  { %7865 = vmatmul.mubr.msk.bf16.gmra.mrb[8].mxu0 %vm301_vm2, %v8622_v23  ;;  %208 = vst.msk [vmem:[#allocation3 + $0x108] sm:$0xff] %vm174_vm3, %v8914_v58  ;;  %v3475_v6 = vpack.c.bf16 %v3461_v5, %v3460_v4 }
  0x9d   :  { %7889 = vmatmul.mubr.msk.bf16.gmra.mrb[8].mxu1 %vm301_vm2, %v8623_v24  ;;  %7868 = vmatprep.mubr.msk.bf16.mxu0 %vm301_vm2, %v8625_v25 }
  0x9e   :  { %7892 = vmatprep.mubr.msk.bf16.mxu1 %vm301_vm2, %v8626_v26 }
  0xa4   :  { %7869 = vmatmul.mubr.msk.bf16.gmra.mrb[12].mxu0 %vm301_vm2, %v8627_v28 }
  0xa5   :  { %7893 = vmatmul.mubr.msk.bf16.gmra.mrb[12].mxu1 %vm301_vm2, %v8628_v30  ;;  %7872 = vmatprep.mubr.msk.bf16.mxu0 %vm301_vm2, %v8629_v31 }
  0xa6   :  { %7896 = vmatprep.mubr.msk.bf16.mxu1 %vm301_vm2, %v8630_v32 }
  0xac   :  { %7873 = vmatmul.mubr.msk.bf16.gmra.mrb[16].mxu0 %vm301_vm2, %v8631_v33 }
  0xad   :  { %7897 = vmatmul.mubr.msk.bf16.gmra.mrb[16].mxu1 %vm301_vm2, %v8632_v34  ;;  %7904 = vmatprep.mubr.msk.bf16.mxu0 %vm301_vm2, %v8634_v35 }
  0xae   :  { %7928 = vmatprep.mubr.msk.bf16.mxu1 %vm301_vm2, %v8635_v36 }
  0xb4   :  { %7905 = vmatmul.mubr.msk.bf16.vlgmr.msra.gmra.mrb[20].mxu0 %vm301_vm2, %v8636_v37 }
  0xb5   :  { %7929 = vmatmul.mubr.msk.bf16.vlgmr.msra.gmra.mrb[20].mxu1 %vm301_vm2, %v8637_v38  ;;  %7908 = vmatprep.mubr.msk.bf16.mxu0 %vm301_vm2, %v8638_v39 }
  0xb6   :  { %7932 = vmatprep.mubr.msk.bf16.mxu1 %vm301_vm2, %v8639_v40  ;;  %7949 = vmatpush3.bf16.msra.mxu0 %v8654_v55 }
  0xb7   :  { %7950 = vmatprep.subr.bf16.mxu0 %v8655_v56  ;;  %8165 = vmatpush3.bf16.msra.mxu1 %v8658_v63 }
  0xb8   :  { %8166 = vmatprep.subr.bf16.mxu1 %v8659_v0 }
  0xba   :  { %7951 = vmatpush3.bf16.msra.mxu0 %v8655_v56 }
  0xbb   :  { %7952 = vmatprep.subr.bf16.mxu0 %v8656_v57  ;;  %8167 = vmatpush3.bf16.msra.mxu1 %v8659_v0 }
  0xbc   :  { %7909 = vmatmul.mubr.msk.bf16.gmra.mrb[24].mxu0 %vm301_vm2, %v8640_v41  ;;  %8168 = vmatprep.subr.bf16.mxu1 %v8660_v1 }
  0xbd   :  { %7933 = vmatmul.mubr.msk.bf16.gmra.mrb[24].mxu1 %vm301_vm2, %v8641_v42  ;;  %7912 = vmatprep.mubr.msk.bf16.mxu0 %vm301_vm2, %v8642_v43 }
  0xbe   :  { %7936 = vmatprep.mubr.msk.bf16.mxu1 %vm301_vm2, %v8643_v44  ;;  %7953 = vmatpush3.bf16.msra.mxu0 %v8656_v57 }
  0xbf   :  { %7954 = vmatprep.subr.bf16.mxu0 %v8657_v59  ;;  %8169 = vmatpush3.bf16.msra.mxu1 %v8660_v1 }
  0xc0   :  { %8170 = vmatprep.subr.bf16.mxu1 %v8662_v3 }
  0xc2   :  { %7955 = vmatpush3.bf16.msra.mxu0 %v8657_v59 }
  0xc3   :  { %7972 = vmatprep.subr.bf16.mxu0 %v9254_v2  ;;  %8171 = vmatpush3.bf16.msra.mxu1 %v8662_v3 }
  0xc4   :  { %7913 = vmatmul.mubr.msk.bf16.gmra.mrb[28].mxu0 %vm301_vm2, %v8644_v45  ;;  %8188 = vmatprep.subr.bf16.mxu1 %v9258_v7 }
  0xc5   :  { %7937 = vmatmul.mubr.msk.bf16.gmra.mrb[28].mxu1 %vm301_vm2, %v8645_v46  ;;  %7916 = vmatprep.mubr.msk.bf16.mxu0 %vm301_vm2, %v8646_v47 }
  0xc6   :  { %7940 = vmatprep.mubr.msk.bf16.mxu1 %vm301_vm2, %v8647_v48 }
  0xcc   :  { %7917 = vmatmul.mubr.msk.bf16.gmra.mrb[32].mxu0 %vm301_vm2, %v8648_v49 }
  0xcd   :  { %7941 = vmatmul.mubr.msk.bf16.gmra.mrb[32].mxu1 %vm301_vm2, %v8649_v50  ;;  %7920 = vmatprep.mubr.msk.bf16.mxu0 %vm301_vm2, %v8650_v51 }
  0xce   :  { %7944 = vmatprep.mubr.msk.bf16.mxu1 %vm301_vm2, %v8651_v52 }
  0xd4   :  { %7921 = vmatmul.mubr.msk.bf16.gmra.mrb[36].mxu0 %vm301_vm2, %v8652_v53 }
  0xd5   :  { %7945 = vmatmul.mubr.msk.bf16.gmra.mrb[36].mxu1 %vm301_vm2, %v8653_v54  ;;  %7956 = vmatprep.mubr.msk.bf16.mxu0 %vm174_vm3, %v1736_v62 }
  0xd6   :  { %8172 = vmatprep.mubr.msk.bf16.mxu1 %vm174_vm3, %v3475_v6 }
 0x15f   :  { %v7858_v9 = vpop.f32.mrb[0].mxu0 }
 0x160   :  { %v382_v10 = vadd.f32 %v7858_v9, %v9261_v8  ;;  %v373_v11 = vpop.f32.mrb[1].mxu0  ;;  %v7882_v12 = vpop.f32.mrb[0].mxu1 }
 0x161   :  { %v374_v13 = vadd.f32 %v9261_v8, %v373_v11  ;;  %v7859_v14 = vpop.f32.mrb[2].mxu0  ;;  %v653_v15 = vadd.f32 %v7882_v12, %v9261_v8  ;;  %v644_v16 = vpop.f32.mrb[1].mxu1 }
 0x162   :  { %v454_v17 = vmax.f32 %v382_v10, 0.0  ;;  %v385_v18 = vadd.f32 %v7859_v14, %v9261_v8  ;;  %v376_v19 = vpop.f32.mrb[3].mxu0  ;;  %v645_v20 = vadd.f32 %v9261_v8, %v644_v16  ;;  %v7883_v21 = vpop.f32.mrb[2].mxu1 }
 0x163   :  { %v452_v22 = vmax.f32 %v374_v13, 0.0  ;;  %v377_v23 = vadd.f32 %v9261_v8, %v376_v19  ;;  %v725_v24 = vmax.f32 %v653_v15, 0.0  ;;  %v656_v25 = vadd.f32 %v7883_v21, %v9261_v8  ;;  %v647_v26 = vpop.f32.mrb[3].mxu1 }
 0x164   :  { %474 = vst.msk [vmem:[#allocation2 + $0x10] sm:$0xff] %vm174_vm3, %v454_v17  ;;  %v455_v27 = vmax.f32 %v385_v18, 0.0  ;;  %v723_v28 = vmax.f32 %v645_v20, 0.0  ;;  %v648_v29 = vadd.f32 %v9261_v8, %v647_v26 }
 0x165   :  { %472 = vst.msk [vmem:[#allocation2] sm:$0xff] %vm174_vm3, %v452_v22  ;;  %v453_v30 = vmax.f32 %v377_v23, 0.0  ;;  %745 = vst.msk [vmem:[#allocation2 + $0xb0] sm:$0xff] %vm174_vm3, %v725_v24  ;;  %v726_v31 = vmax.f32 %v656_v25, 0.0 }
 0x166   :  { %475 = vst.msk [vmem:[#allocation2 + $0x18] sm:$0xff] %vm174_vm3, %v455_v27  ;;  %743 = vst.msk [vmem:[#allocation2 + $0xa0] sm:$0xff] %vm174_vm3, %v723_v28  ;;  %v724_v32 = vmax.f32 %v648_v29, 0.0 }
 0x167   :  { %473 = vst.msk [vmem:[#allocation2 + $0x8] sm:$0xff] %vm174_vm3, %v453_v30  ;;  %v7862_v33 = vpop.f32.mrb[4].mxu0  ;;  %746 = vst.msk [vmem:[#allocation2 + $0xb8] sm:$0xff] %vm174_vm3, %v726_v31 }
 0x168   :  { %v398_v34 = vadd.f32 %v7862_v33, %v9261_v8  ;;  %v389_v35 = vpop.f32.mrb[5].mxu0  ;;  %744 = vst.msk [vmem:[#allocation2 + $0xa8] sm:$0xff] %vm174_vm3, %v724_v32  ;;  %v7886_v36 = vpop.f32.mrb[4].mxu1 }
 0x169   :  { %v390_v37 = vadd.f32 %v9261_v8, %v389_v35  ;;  %v7863_v38 = vpop.f32.mrb[6].mxu0  ;;  %v660_v39 = vpop.f32.mrb[5].mxu1  ;;  %v669_v43 = vadd.f32 %v7886_v36, %v9261_v8 }
 0x16a   :  { %v458_v40 = vmax.f32 %v398_v34, 0.0  ;;  %v401_v41 = vadd.f32 %v7863_v38, %v9261_v8  ;;  %v392_v42 = vpop.f32.mrb[7].mxu0  ;;  %v661_v44 = vadd.f32 %v9261_v8, %v660_v39  ;;  %v7887_v45 = vpop.f32.mrb[6].mxu1 }
 0x16b   :  { %v393_v46 = vadd.f32 %v9261_v8, %v392_v42  ;;  %v672_v47 = vadd.f32 %v7887_v45, %v9261_v8  ;;  %v456_v48 = vmax.f32 %v390_v37, 0.0  ;;  %v663_v51 = vpop.f32.mrb[7].mxu1  ;;  %v729_v52 = vmax.f32 %v669_v43, 0.0  ;;  %v1307_v1 = vld [vmem:[#allocation2 + $0x10] ss:$2 sm:$0x3] }
 0x16c   :  { %478 = vst.msk [vmem:[#allocation2 + $0x30] sm:$0xff] %vm174_vm3, %v458_v40  ;;  %v459_v49 = vmax.f32 %v401_v41, 0.0  ;;  %v727_v53 = vmax.f32 %v661_v44, 0.0  ;;  %v664_v54 = vadd.f32 %v9261_v8, %v663_v51  ;;  %v1311_v10 = vld [vmem:[#allocation2 + $0x11] ss:$2 sm:$0x3] }
 0x16d   :  { %v457_v50 = vmax.f32 %v393_v46, 0.0  ;;  %476 = vst.msk [vmem:[#allocation2 + $0x20] sm:$0xff] %vm174_vm3, %v456_v48  ;;  %v730_v55 = vmax.f32 %v672_v47, 0.0  ;;  %749 = vst.msk [vmem:[#allocation2 + $0xd0] sm:$0xff] %vm174_vm3, %v729_v52  ;;  %v1321_v30 = vmax.f32 %v1307_v1, %v1311_v10 }
 0x16e   :  { %479 = vst.msk [vmem:[#allocation2 + $0x38] sm:$0xff] %vm174_vm3, %v459_v49  ;;  %747 = vst.msk [vmem:[#allocation2 + $0xc0] sm:$0xff] %vm174_vm3, %v727_v53  ;;  %v728_v57 = vmax.f32 %v664_v54, 0.0  ;;  %v1305_v16 = vld [vmem:[#allocation2] ss:$2 sm:$0xff] }
 0x16f   :  { %477 = vst.msk [vmem:[#allocation2 + $0x28] sm:$0xff] %vm174_vm3, %v457_v50  ;;  %v7866_v56 = vpop.f32.mrb[8].mxu0  ;;  %750 = vst.msk [vmem:[#allocation2 + $0xd8] sm:$0xff] %vm174_vm3, %v730_v55  ;;  %v1309_v17 = vld [vmem:[#allocation2 + $0x1] ss:$2 sm:$0xff] }
 0x170   :  { %v414_v58 = vadd.f32 %v7866_v56, %v9261_v8  ;;  %v7890_v59 = vpop.f32.mrb[8].mxu1  ;;  %v405_v60 = vpop.f32.mrb[9].mxu0  ;;  %748 = vst.msk [vmem:[#allocation2 + $0xc8] sm:$0xff] %vm174_vm3, %v728_v57  ;;  %v1404_v21 = vld [vmem:[#allocation2 + $0xb0] ss:$2 sm:$0x3]  ;;  %v1320_v34 = vmax.f32 %v1305_v16, %v1309_v17 }
 0x171   :  { %v685_v61 = vadd.f32 %v7890_v59, %v9261_v8  ;;  %v406_v62 = vadd.f32 %v9261_v8, %v405_v60  ;;  %v676_v63 = vpop.f32.mrb[9].mxu1  ;;  %v7867_v0 = vpop.f32.mrb[10].mxu0  ;;  %v1408_v22 = vld [vmem:[#allocation2 + $0xb1] ss:$2 sm:$0x3] }
 0x172   :  { %v462_v3 = vmax.f32 %v414_v58, 0.0  ;;  %v677_v4 = vadd.f32 %v9261_v8, %v676_v63  ;;  %v417_v5 = vadd.f32 %v7867_v0, %v9261_v8  ;;  %v7891_v6 = vpop.f32.mrb[10].mxu1  ;;  %v408_v9 = vpop.f32.mrb[11].mxu0  ;;  %v1402_v23 = vld [vmem:[#allocation2 + $0xa0] ss:$2 sm:$0xff]  ;;  %v1418_v40 = vmax.f32 %v1404_v21, %v1408_v22 }
 0x173   :  { %v733_v11 = vmax.f32 %v685_v61, 0.0  ;;  %v460_v12 = vmax.f32 %v406_v62, 0.0  ;;  %v688_v13 = vadd.f32 %v7891_v6, %v9261_v8  ;;  %v409_v14 = vadd.f32 %v9261_v8, %v408_v9  ;;  %v679_v15 = vpop.f32.mrb[11].mxu1  ;;  %v1406_v24 = vld [vmem:[#allocation2 + $0xa1] ss:$2 sm:$0xff] }
 0x174   :  { %482 = vst.msk [vmem:[#allocation2 + $0x50] sm:$0xff] %vm174_vm3, %v462_v3  ;;  %v731_v18 = vmax.f32 %v677_v4, 0.0  ;;  %v463_v19 = vmax.f32 %v417_v5, 0.0  ;;  %v680_v20 = vadd.f32 %v9261_v8, %v679_v15  ;;  %v1313_v27 = vld [vmem:[#allocation2 + $0x14] ss:$2 sm:$0xff]  ;;  %v1417_v38 = vmax.f32 %v1402_v23, %v1406_v24 }
 0x175   :  { %753 = vst.msk [vmem:[#allocation2 + $0xf0] sm:$0xff] %vm174_vm3, %v733_v11  ;;  %480 = vst.msk [vmem:[#allocation2 + $0x40] sm:$0xff] %vm174_vm3, %v460_v12  ;;  %v734_v25 = vmax.f32 %v688_v13, 0.0  ;;  %v461_v26 = vmax.f32 %v409_v14, 0.0  ;;  %v1317_v31 = vld [vmem:[#allocation2 + $0x15] ss:$2 sm:$0xff] }
 0x176   :  { %v1315_v28 = vld [vmem:[#allocation2 + $0x24] ss:$2 sm:$0x3]  ;;  %751 = vst.msk [vmem:[#allocation2 + $0xe0] sm:$0xff] %vm174_vm3, %v731_v18  ;;  %483 = vst.msk [vmem:[#allocation2 + $0x58] sm:$0xff] %vm174_vm3, %v463_v19  ;;  %v732_v29 = vmax.f32 %v680_v20, 0.0  ;;  %v1322_v35 = vmax.f32 %v1313_v27, %v1317_v31 }
 0x177   :  { %v1319_v32 = vld [vmem:[#allocation2 + $0x25] ss:$2 sm:$0x3]  ;;  %754 = vst.msk [vmem:[#allocation2 + $0xf8] sm:$0xff] %vm174_vm3, %v734_v25  ;;  %481 = vst.msk [vmem:[#allocation2 + $0x48] sm:$0xff] %vm174_vm3, %v461_v26  ;;  %v7870_v33 = vpop.f32.mrb[12].mxu0 }
 0x178   :  { %v1323_v36 = vmax.f32 %v1315_v28, %v1319_v32  ;;  %752 = vst.msk [vmem:[#allocation2 + $0xe8] sm:$0xff] %vm174_vm3, %v732_v29  ;;  %v430_v37 = vadd.f32 %v7870_v33, %v9261_v8  ;;  %v1410_v39 = vld [vmem:[#allocation2 + $0xb4] ss:$2 sm:$0xff]  ;;  %v1324_v41 = vmax.f32 %v1320_v34, %v1322_v35  ;;  %v1412_v43 = vld [vmem:[#allocation2 + $0xc4] ss:$2 sm:$0x3] }
 0x179   :  { %v1414_v44 = vld [vmem:[#allocation2 + $0xb5] ss:$2 sm:$0xff]  ;;  %v1416_v46 = vld [vmem:[#allocation2 + $0xc5] ss:$2 sm:$0x3]  ;;  %v7894_v53 = vpop.f32.mrb[12].mxu1 }
 0x17a   :  { %v1325_v42 = vmax.f32 %v1321_v30, %v1323_v36  ;;  %v466_v45 = vmax.f32 %v430_v37, 0.0  ;;  %v1419_v47 = vmax.f32 %v1410_v39, %v1414_v44  ;;  %v1332_v48 = vld [vmem:[#allocation2 + $0x38] ss:$2 sm:$0x3]  ;;  %v1330_v50 = vld [vmem:[#allocation2 + $0x28] ss:$2 sm:$0xff]  ;;  %v1420_v51 = vmax.f32 %v1412_v43, %v1416_v46 }
 0x17b   :  { %v1336_v49 = vld [vmem:[#allocation2 + $0x39] ss:$2 sm:$0x3]  ;;  %v1428_v52 = vld [vmem:[#allocation2 + $0xd8] ss:$2 sm:$0x3]  ;;  %v701_v58 = vadd.f32 %v7894_v53, %v9261_v8 }
 0x17c   :  { %486 = vst.msk [vmem:[#allocation2 + $0x70] sm:$0xff] %vm174_vm3, %v466_v45  ;;  %1326 = vst.msk [vmem:[#allocation3 + $0x1d] sm:$0xff] %vm174_vm3, %v1324_v41  ;;  %v1334_v54 = vld [vmem:[#allocation2 + $0x29] ss:$2 sm:$0xff]  ;;  %v1421_v55 = vmax.f32 %v1417_v38, %v1419_v47  ;;  %v1426_v56 = vld [vmem:[#allocation2 + $0xc8] ss:$2 sm:$0xff]  ;;  %v1422_v59 = vmax.f32 %v1418_v40, %v1420_v51  ;;  %v1346_v10 = vmax.f32 %v1332_v48, %v1336_v49 }
 0x17d   :  { %1328 = vst.msk [vmem:[#allocation3 + $0x25] sm:$0x3] %vm1327_vm4, %v1325_v42  ;;  %v1430_v57 = vld [vmem:[#allocation2 + $0xc9] ss:$2 sm:$0xff]  ;;  %v737_v0 = vmax.f32 %v701_v58, 0.0  ;;  %v1345_v1 = vmax.f32 %v1330_v50, %v1334_v54  ;;  %v421_v9 = vpop.f32.mrb[13].mxu0 }
 0x17e   :  { %v1432_v60 = vld [vmem:[#allocation2 + $0xd9] ss:$2 sm:$0x3]  ;;  %v1338_v61 = vld [vmem:[#allocation2 + $0x3c] ss:$2 sm:$0xff]  ;;  %1423 = vst.msk [vmem:[#allocation3 + $0x4d] sm:$0xff] %vm174_vm3, %v1421_v55  ;;  %v1441_v3 = vmax.f32 %v1426_v56, %v1430_v57  ;;  %v422_v15 = vadd.f32 %v9261_v8, %v421_v9 }
 0x17f   :  { %v1340_v62 = vld [vmem:[#allocation2 + $0x4c] ss:$2 sm:$0x3]  ;;  %v1342_v63 = vld [vmem:[#allocation2 + $0x3d] ss:$2 sm:$0xff]  ;;  %v1442_v11 = vmax.f32 %v1428_v52, %v1432_v60  ;;  %757 = vst.msk [vmem:[#allocation2 + $0x110] sm:$0xff] %vm174_vm3, %v737_v0 }
 0x180   :  { %v1344_v4 = vld [vmem:[#allocation2 + $0x4d] ss:$2 sm:$0x3]  ;;  %v1347_v5 = vmax.f32 %v1338_v61, %v1342_v63  ;;  %v1434_v6 = vld [vmem:[#allocation2 + $0xdc] ss:$2 sm:$0xff]  ;;  %v692_v16 = vpop.f32.mrb[13].mxu1 }
 0x181   :  { %1424 = vst.msk [vmem:[#allocation3 + $0x55] sm:$0x3] %vm1327_vm4, %v1422_v59  ;;  %v1348_v12 = vmax.f32 %v1340_v62, %v1344_v4  ;;  %v1436_v13 = vld [vmem:[#allocation2 + $0xec] ss:$2 sm:$0x3]  ;;  %v693_v20 = vadd.f32 %v9261_v8, %v692_v16  ;;  %v7871_v21 = vpop.f32.mrb[14].mxu0 }
 0x182   :  { %v1438_v14 = vld [vmem:[#allocation2 + $0xdd] ss:$2 sm:$0xff]  ;;  %v1349_v17 = vmax.f32 %v1345_v1, %v1347_v5  ;;  %v1440_v18 = vld [vmem:[#allocation2 + $0xed] ss:$2 sm:$0x3]  ;;  %v7895_v22 = vpop.f32.mrb[14].mxu1  ;;  %v433_v25 = vadd.f32 %v7871_v21, %v9261_v8 }
 0x183   :  { %v1443_v19 = vmax.f32 %v1434_v6, %v1438_v14  ;;  %v1350_v23 = vmax.f32 %v1346_v10, %v1348_v12  ;;  %v1444_v24 = vmax.f32 %v1436_v13, %v1440_v18  ;;  %v704_v26 = vadd.f32 %v7895_v22, %v9261_v8  ;;  %v1723_v27 = vld [vmem:[#allocation3 + $0x14] sm:$0xff]  ;;  %v424_v31 = vpop.f32.mrb[15].mxu0  ;;  %v695_v32 = vpop.f32.mrb[15].mxu1  ;;  %v1724_v33 = vld [vmem:[#allocation3 + $0x1c] sm:$0xff] }
 0x184   :  { %v464_v29 = vmax.f32 %v422_v15, 0.0  ;;  %v735_v30 = vmax.f32 %v693_v20, 0.0  ;;  %1351 = vst.msk [vmem:[#allocation3 + $0x29] sm:$0xff] %vm174_vm3, %v1349_v17  ;;  %v467_v35 = vmax.f32 %v433_v25, 0.0  ;;  %v425_v37 = vadd.f32 %v9261_v8, %v424_v31  ;;  %v7874_v38 = vpop.f32.mrb[16].mxu0  ;;  %v7898_v39 = vpop.f32.mrb[16].mxu1 }
 0x185   :  { %v1445_v28 = vmax.f32 %v1441_v3, %v1443_v19  ;;  %v1446_v34 = vmax.f32 %v1442_v11, %v1444_v24  ;;  %v738_v36 = vmax.f32 %v704_v26, 0.0  ;;  %1352 = vst.msk [vmem:[#allocation3 + $0x31] sm:$0x3] %vm1327_vm4, %v1350_v23  ;;  %v696_v40 = vadd.f32 %v9261_v8, %v695_v32  ;;  %v437_v43 = vpop.f32.mrb[17].mxu0  ;;  %v708_v44 = vpop.f32.mrb[17].mxu1  ;;  %v9332_v46 = vld [vmem:[#allocation13 + $0x8] sm:$0xff]  }
 0x186   :  { %484 = vst.msk [vmem:[#allocation2 + $0x60] sm:$0xff] %vm174_vm3, %v464_v29  ;;  %755 = vst.msk [vmem:[#allocation2 + $0x100] sm:$0xff] %vm174_vm3, %v735_v30  ;;  %v446_v41 = vadd.f32 %v7874_v38, %v9261_v8  ;;  %v717_v42 = vadd.f32 %v7898_v39, %v9261_v8  ;;  %v1737_v45 = vpack.c.bf16 %v1724_v33, %v1723_v27  ;;  %v9334_v47 = vld [vmem:[#allocation2 + $0x74] ss:$2 sm:$0x3]  ;;  %v465_v49 = vmax.f32 %v425_v37, 0.0 }
 0x187   :  { %1447 = vst.msk [vmem:[#allocation3 + $0x59] sm:$0xff] %vm174_vm3, %v1445_v28  ;;  %v9336_v48 = vld [vmem:[#allocation2 + $0x75] ss:$2 sm:$0x3]  ;;  %487 = vst.msk [vmem:[#allocation2 + $0x78] sm:$0xff] %vm174_vm3, %v467_v35  ;;  %v438_v50 = vadd.f32 %v9261_v8, %v437_v43  ;;  %v709_v51 = vadd.f32 %v9261_v8, %v708_v44  ;;  %v7875_v52 = vpop.f32.mrb[18].mxu0 }
 0x188   :  { %758 = vst.msk [vmem:[#allocation2 + $0x118] sm:$0xff] %vm174_vm3, %v738_v36  ;;  %v7899_v53 = vpop.f32.mrb[18].mxu1  ;;  %v9343_v54 = vld [vmem:[#allocation2 + $0x114] ss:$2 sm:$0x3]  ;;  %v449_v56 = vadd.f32 %v7875_v52, %v9261_v8  ;;  %7957 = vmatmul.mubr.msk.bf16.vlgmr.msra.gmra.mrb[40].mxu0 %vm174_vm3, %v1737_v45  ;;  %485 = vst.msk [vmem:[#allocation2 + $0x68] sm:$0xff] %vm174_vm3, %v465_v49  ;;  %v1372_v20 = vmax.f32 %v9334_v47, %v9336_v48 }
 0x189   :  { %1448 = vst.msk [vmem:[#allocation3 + $0x61] sm:$0x3] %vm1327_vm4, %v1446_v34  ;;  %v9345_v55 = vld [vmem:[#allocation2 + $0x115] ss:$2 sm:$0x3]  ;;  %v720_v57 = vadd.f32 %v7899_v53, %v9261_v8  ;;  %v736_v62 = vmax.f32 %v696_v40, 0.0  ;;  %7973 = vmatpush3.bf16.msra.mxu0 %v9254_v2 }
 0x18a   :  { %v9350_v58 = vld [vmem:[#allocation2 + $0x50] ss:$2 sm:$0xff]  ;;  %v9352_v59 = vld [vmem:[#allocation2 + $0x51] ss:$2 sm:$0xff]  ;;  %v470_v63 = vmax.f32 %v446_v41, 0.0  ;;  %v741_v0 = vmax.f32 %v717_v42, 0.0  ;;  %7974 = vmatprep.subr.bf16.mxu0 %v9332_v46  ;;  %v1468_v21 = vmax.f32 %v9343_v54, %v9345_v55 }
 0x18b   :  { %v9354_v60 = vld [vmem:[#allocation2 + $0xf0] ss:$2 sm:$0xff]  ;;  %v9356_v61 = vld [vmem:[#allocation2 + $0xf1] ss:$2 sm:$0xff]  ;;  %v440_v1 = vpop.f32.mrb[19].mxu0  ;;  %v711_v3 = vpop.f32.mrb[19].mxu1  ;;  %v1369_v34 = vmax.f32 %v9350_v58, %v9352_v59 }
 0x18c   :  { %v9360_v4 = vld [vmem:[#allocation13 + $0x10] sm:$0xff]   ;;  %v468_v5 = vmax.f32 %v438_v50, 0.0  ;;  %v739_v6 = vmax.f32 %v709_v51, 0.0  ;;  %v471_v9 = vmax.f32 %v449_v56, 0.0  ;;  %v742_v10 = vmax.f32 %v720_v57, 0.0  ;;  %v7906_v11 = vpop.f32.mrb[20].mxu0 }
 0x18d   :  { %v7930_v12 = vpop.f32.mrb[20].mxu1  ;;  %756 = vst.msk [vmem:[#allocation2 + $0x108] sm:$0xff] %vm174_vm3, %v736_v62  ;;  %490 = vst.msk [vmem:[#allocation2 + $0x90] sm:$0xff] %vm174_vm3, %v470_v63  ;;  %v441_v13 = vadd.f32 %v9261_v8, %v440_v1  ;;  %v712_v2 = vadd.f32 %v9261_v8, %v711_v3  ;;  %v924_v14 = vadd.f32 %v7906_v11, %v9261_v8  ;;  %v915_v15 = vpop.f32.mrb[21].mxu0  ;;  %v1725_v16 = vld [vmem:[#allocation3 + $0x24] sm:$0xff]  ;;  %v9369_v18 = vld [vmem:[#allocation3 + $0x1b] sm:$0xff]  ;;  %7975 = vmatpush3.bf16.msra.mxu0 %v9332_v46 }
 0x18e   :  { %761 = vst.msk [vmem:[#allocation2 + $0x130] sm:$0xff] %vm174_vm3, %v741_v0  ;;  %v1186_v17 = vpop.f32.mrb[21].mxu1  ;;  %v9371_v19 = vld [vmem:[#allocation3 + $0x23] sm:$0xff]  ;;  %488 = vst.msk [vmem:[#allocation2 + $0x80] sm:$0xff] %vm174_vm3, %v468_v5  ;;  %v916_v22 = vadd.f32 %v9261_v8, %v915_v15  ;;  %v7907_v23 = vpop.f32.mrb[22].mxu0  ;;  %v1726_v24 = vld [vmem:[#allocation3 + $0x2c] sm:$0xff]  ;;  %v1195_v32 = vadd.f32 %v7930_v12, %v9261_v8  ;;  %v1465_v35 = vmax.f32 %v9354_v60, %v9356_v61  ;;  %7976 = vmatprep.subr.bf16.mxu0 %v9360_v4 }
 0x18f   :  { %759 = vst.msk [vmem:[#allocation2 + $0x120] sm:$0xff] %vm174_vm3, %v739_v6  ;;  %491 = vst.msk [vmem:[#allocation2 + $0x98] sm:$0xff] %vm174_vm3, %v471_v9  ;;  %v7931_v25 = vpop.f32.mrb[22].mxu1  ;;  %v9382_v26 = vld [vmem:[#allocation13 + $0x18] sm:$0xff]   ;;  %v2820_v27 = vpack.c.bf16 %v9371_v19, %v9369_v18  ;;  %v927_v30 = vadd.f32 %v7907_v23, %v9261_v8  ;;  %v1738_v31 = vpack.c.bf16 %v1726_v24, %v1725_v16  ;;  %v469_v40 = vmax.f32 %v441_v13, 0.0  ;;  %v918_v43 = vpop.f32.mrb[23].mxu0 }
 0x190   :  { %762 = vst.msk [vmem:[#allocation2 + $0x138] sm:$0xff] %vm174_vm3, %v742_v10  ;;  %v1356_v28 = vld [vmem:[#allocation2 + $0x60] ss:$2 sm:$0x3]  ;;  %v1187_v33 = vadd.f32 %v9261_v8, %v1186_v17  ;;  %v740_v41 = vmax.f32 %v712_v2, 0.0  ;;  %v996_v42 = vmax.f32 %v924_v14, 0.0  ;;  %v919_v50 = vadd.f32 %v9261_v8, %v918_v43 }
 0x191   :  { %v1360_v29 = vld [vmem:[#allocation2 + $0x61] ss:$2 sm:$0x3]  ;;  %v1452_v37 = vld [vmem:[#allocation2 + $0x100] ss:$2 sm:$0x3]  ;;  %7960 = vmatprep.mubr.msk.bf16.mxu0 %vm174_vm3, %v1738_v31  ;;  %7977 = vmatpush3.bf16.msra.mxu0 %v9360_v4  ;;  %v1198_v0 = vadd.f32 %v7931_v25, %v9261_v8 }
 0x192   :  { %v1370_v36 = vmax.f32 %v1356_v28, %v1360_v29  ;;  %v1456_v38 = vld [vmem:[#allocation2 + $0x101] ss:$2 sm:$0x3]  ;;  %v1189_v44 = vpop.f32.mrb[23].mxu1  ;;  %v1362_v46 = vld [vmem:[#allocation2 + $0x64] ss:$2 sm:$0xff]  ;;  %7978 = vmatprep.subr.bf16.mxu0 %v9382_v26 }
 0x193   :  { %v1466_v39 = vmax.f32 %v1452_v37, %v1456_v38  ;;  %v1366_v47 = vld [vmem:[#allocation2 + $0x65] ss:$2 sm:$0xff]  ;;  %v994_v48 = vmax.f32 %v916_v22, 0.0  ;;  %v997_v49 = vmax.f32 %v927_v30, 0.0  ;;  %489 = vst.msk [vmem:[#allocation2 + $0x88] sm:$0xff] %vm174_vm3, %v469_v40  ;;  %760 = vst.msk [vmem:[#allocation2 + $0x128] sm:$0xff] %vm174_vm3, %v740_v41  ;;  %v1190_v1 = vadd.f32 %v9261_v8, %v1189_v44 }
 0x194   :  { %v1374_v45 = vmax.f32 %v1370_v36, %v1372_v20  ;;  %v1371_v52 = vmax.f32 %v1362_v46, %v1366_v47  ;;  %1016 = vst.msk [vmem:[#allocation2 + $0x150] sm:$0xff] %vm174_vm3, %v996_v42  ;;  %v7910_v53 = vpop.f32.mrb[24].mxu0  ;;  %v1267_v54 = vmax.f32 %v1195_v32, 0.0  ;;  %v1265_v55 = vmax.f32 %v1187_v33, 0.0  ;;  %v7934_v56 = vpop.f32.mrb[24].mxu1  ;;  %v9401_v57 = vld [vmem:[#allocation3 + $0x53] sm:$0xff] }
 0x195   :  { %v1470_v51 = vmax.f32 %v1466_v39, %v1468_v21  ;;  %v9403_v58 = vld [vmem:[#allocation13 + $0x40] sm:$0xff]   ;;  %1014 = vst.msk [vmem:[#allocation2 + $0x140] sm:$0xff] %vm174_vm3, %v994_v48  ;;  %1017 = vst.msk [vmem:[#allocation2 + $0x158] sm:$0xff] %vm174_vm3, %v997_v49  ;;  %v995_v61 = vmax.f32 %v919_v50, 0.0  ;;  %v940_v62 = vadd.f32 %v7910_v53, %v9261_v8  ;;  %v931_v63 = vpop.f32.mrb[25].mxu0  ;;  %v1211_v6 = vadd.f32 %v7934_v56, %v9261_v8  ;;  %v1202_v32 = vpop.f32.mrb[25].mxu1 }
 0x196   :  { %v1458_v59 = vld [vmem:[#allocation2 + $0x104] ss:$2 sm:$0xff]  ;;  %v1462_v60 = vld [vmem:[#allocation2 + $0x105] ss:$2 sm:$0xff]  ;;  %1376 = vst.msk [vmem:[#allocation3 + $0x3d] sm:$0x3] %vm1327_vm4, %v1374_v45  ;;  %v1373_v3 = vmax.f32 %v1369_v34, %v1371_v52  ;;  %v932_v5 = vadd.f32 %v9261_v8, %v931_v63  ;;  %7979 = vmatpush3.bf16.msra.mxu0 %v9382_v26  ;;  %v1203_v40 = vadd.f32 %v9261_v8, %v1202_v32 }
 0x197   :  { %v1467_v4 = vmax.f32 %v1458_v59, %v1462_v60  ;;  %1472 = vst.msk [vmem:[#allocation3 + $0x6d] sm:$0x3] %vm1327_vm4, %v1470_v51  ;;  %v9417_v9 = vld [vmem:[#allocation3 + $0x4b] sm:$0xff]  ;;  %v1388_v10 = vld [vmem:[#allocation2 + $0x9c] ss:$2 sm:$0x3]  ;;  %7996 = vmatprep.subr.bf16.mxu0 %v9403_v58 }
 0x198   :  { %1287 = vst.msk [vmem:[#allocation2 + $0x1f0] sm:$0xff] %vm174_vm3, %v1267_v54  ;;  %1285 = vst.msk [vmem:[#allocation2 + $0x1e0] sm:$0xff] %vm174_vm3, %v1265_v55  ;;  %v1000_v11 = vmax.f32 %v940_v62, 0.0  ;;  %v2823_v12 = vpack.c.bf16 %v9401_v57, %v9417_v9  ;;  %v1378_v2 = vld [vmem:[#allocation2 + $0x78] ss:$2 sm:$0xff]  ;;  %v998_v21 = vmax.f32 %v932_v5, 0.0 }
 0x199   :  { %1015 = vst.msk [vmem:[#allocation2 + $0x148] sm:$0xff] %vm174_vm3, %v995_v61  ;;  %v1469_v13 = vmax.f32 %v1465_v35, %v1467_v4  ;;  %v1382_v14 = vld [vmem:[#allocation2 + $0x79] ss:$2 sm:$0xff]  ;;  %v1474_v15 = vld [vmem:[#allocation2 + $0x118] ss:$2 sm:$0xff]  ;;  %1375 = vst.msk [vmem:[#allocation3 + $0x35] sm:$0xff] %vm174_vm3, %v1373_v3 }
 0x19a   :  { %v1392_v16 = vld [vmem:[#allocation2 + $0x9d] ss:$2 sm:$0x3]  ;;  %v1484_v17 = vld [vmem:[#allocation2 + $0x13c] ss:$2 sm:$0x3]  ;;  %v1393_v41 = vmax.f32 %v1378_v2, %v1382_v14 }
 0x19b   :  { %v1488_v20 = vld [vmem:[#allocation2 + $0x13d] ss:$2 sm:$0x3]  ;;  %1020 = vst.msk [vmem:[#allocation2 + $0x170] sm:$0xff] %vm174_vm3, %v1000_v11  ;;  %v7911_v22 = vpop.f32.mrb[26].mxu0  ;;  %v1268_v23 = vmax.f32 %v1198_v0, 0.0  ;;  %v1396_v25 = vmax.f32 %v1388_v10, %v1392_v16 }
 0x19c   :  { %v1478_v24 = vld [vmem:[#allocation2 + $0x119] ss:$2 sm:$0xff]  ;;  %1471 = vst.msk [vmem:[#allocation3 + $0x65] sm:$0xff] %vm174_vm3, %v1469_v13  ;;  %v943_v28 = vadd.f32 %v7911_v22, %v9261_v8  ;;  %v934_v29 = vpop.f32.mrb[27].mxu0  ;;  %v1266_v30 = vmax.f32 %v1190_v1, 0.0  ;;  %v1271_v31 = vmax.f32 %v1211_v6, 0.0  ;;  %v1492_v35 = vmax.f32 %v1484_v17, %v1488_v20 }
 0x19d   :  { %v1380_v33 = vld [vmem:[#allocation2 + $0x88] ss:$2 sm:$0x3]  ;;  %v1384_v26 = vld [vmem:[#allocation2 + $0x89] ss:$2 sm:$0x3]  ;;  %v935_v34 = vadd.f32 %v9261_v8, %v934_v29  ;;  %v1489_v42 = vmax.f32 %v1474_v15, %v1478_v24 }
 0x19e   :  { %1018 = vst.msk [vmem:[#allocation2 + $0x160] sm:$0xff] %vm174_vm3, %v998_v21  ;;  %1288 = vst.msk [vmem:[#allocation2 + $0x1f8] sm:$0xff] %vm174_vm3, %v1268_v23  ;;  %v1386_v36 = vld [vmem:[#allocation2 + $0x8c] ss:$2 sm:$0xff]  ;;  %v1390_v37 = vld [vmem:[#allocation2 + $0x8d] ss:$2 sm:$0xff]  ;;  %v1394_v38 = vmax.f32 %v1380_v33, %v1384_v26 }
 0x19f   :  { %v1482_v39 = vld [vmem:[#allocation2 + $0x12c] ss:$2 sm:$0xff]  ;;  %1286 = vst.msk [vmem:[#allocation2 + $0x1e8] sm:$0xff] %vm174_vm3, %v1266_v30  ;;  %1291 = vst.msk [vmem:[#allocation2 + $0x210] sm:$0xff] %vm174_vm3, %v1271_v31  ;;  %v1395_v43 = vmax.f32 %v1386_v36, %v1390_v37  ;;  %v1486_v47 = vld [vmem:[#allocation2 + $0x12d] ss:$2 sm:$0xff] }
 0x1a0   :  { %v1476_v44 = vld [vmem:[#allocation2 + $0x128] ss:$2 sm:$0x3]  ;;  %v1480_v45 = vld [vmem:[#allocation2 + $0x129] ss:$2 sm:$0x3]  ;;  %v1398_v46 = vmax.f32 %v1394_v38, %v1396_v25  ;;  %v1491_v52 = vmax.f32 %v1482_v39, %v1486_v47 }
 0x1a1   :  { %v1490_v48 = vmax.f32 %v1476_v44, %v1480_v45  ;;  %v1500_v49 = vld [vmem:[#allocation2 + $0x150] ss:$2 sm:$0x3]  ;;  %v1001_v50 = vmax.f32 %v943_v28, 0.0  ;;  %v1397_v51 = vmax.f32 %v1393_v41, %v1395_v43  ;;  %v999_v54 = vmax.f32 %v935_v34, 0.0  ;;  %v7935_v62 = vpop.f32.mrb[26].mxu1 }
 0x1a2   :  { %v1504_v53 = vld [vmem:[#allocation2 + $0x151] ss:$2 sm:$0x3]  ;;  %v1498_v56 = vld [vmem:[#allocation2 + $0x140] ss:$2 sm:$0xff]  ;;  %v1269_v60 = vmax.f32 %v1203_v40, 0.0  ;;  %v1493_v61 = vmax.f32 %v1489_v42, %v1491_v52  ;;  %v1214_v3 = vadd.f32 %v7935_v62, %v9261_v8 }
 0x1a3   :  { %v1494_v55 = vmax.f32 %v1490_v48, %v1492_v35  ;;  %v1502_v59 = vld [vmem:[#allocation2 + $0x141] ss:$2 sm:$0xff]  ;;  %1400 = vst.msk [vmem:[#allocation3 + $0x49] sm:$0x3] %vm1327_vm4, %v1398_v46  ;;  %v7914_v63 = vpop.f32.mrb[28].mxu0  ;;  %v1205_v4 = vpop.f32.mrb[27].mxu1  ;;  %v1514_v6 = vmax.f32 %v1500_v49, %v1504_v53 }
 0x1a4   :  { %1021 = vst.msk [vmem:[#allocation2 + $0x178] sm:$0xff] %vm174_vm3, %v1001_v50  ;;  %1399 = vst.msk [vmem:[#allocation3 + $0x41] sm:$0xff] %vm174_vm3, %v1397_v51  ;;  %v956_v5 = vadd.f32 %v7914_v63, %v9261_v8  ;;  %v1513_v10 = vmax.f32 %v1498_v56, %v1502_v59  ;;  %v1206_v2 = vadd.f32 %v9261_v8, %v1205_v4  ;;  %v7938_v14 = vpop.f32.mrb[28].mxu1  ;;  %v1596_v15 = vld [vmem:[#allocation2 + $0x1f0] ss:$2 sm:$0x3] }
 0x1a5   :  { %1019 = vst.msk [vmem:[#allocation2 + $0x168] sm:$0xff] %vm174_vm3, %v999_v54  ;;  %v1506_v0 = vld [vmem:[#allocation2 + $0x154] ss:$2 sm:$0xff]  ;;  %v1508_v1 = vld [vmem:[#allocation2 + $0x164] ss:$2 sm:$0x3]  ;;  %v1227_v24 = vadd.f32 %v7938_v14, %v9261_v8 }
 0x1a6   :  { %1496 = vst.msk [vmem:[#allocation3 + $0x79] sm:$0x3] %vm1327_vm4, %v1494_v55  ;;  %v1510_v11 = vld [vmem:[#allocation2 + $0x155] ss:$2 sm:$0xff]  ;;  %v1272_v21 = vmax.f32 %v1214_v3, 0.0  ;;  %v1004_v22 = vmax.f32 %v956_v5, 0.0 }
 0x1a7   :  { %1289 = vst.msk [vmem:[#allocation2 + $0x200] sm:$0xff] %vm174_vm3, %v1269_v60  ;;  %1495 = vst.msk [vmem:[#allocation3 + $0x71] sm:$0xff] %vm174_vm3, %v1493_v61  ;;  %v1512_v13 = vld [vmem:[#allocation2 + $0x165] ss:$2 sm:$0x3]  ;;  %v1515_v17 = vmax.f32 %v1506_v0, %v1510_v11  ;;  %v1270_v23 = vmax.f32 %v1206_v2, 0.0 }
 0x1a8   :  { %v1600_v16 = vld [vmem:[#allocation2 + $0x1f1] ss:$2 sm:$0x3]  ;;  %v1516_v20 = vmax.f32 %v1508_v1, %v1512_v13  ;;  %v947_v25 = vpop.f32.mrb[29].mxu0  ;;  %v1218_v28 = vpop.f32.mrb[29].mxu1  ;;  %v9449_v31 = vld [vmem:[#allocation3 + $0x63] sm:$0xff] }
 0x1a9   :  { %v9445_v29 = vld [vmem:[#allocation3 + $0x2b] sm:$0xff]  ;;  %v9447_v30 = vld [vmem:[#allocation3 + $0x33] sm:$0xff]  ;;  %v1517_v32 = vmax.f32 %v1513_v10, %v1515_v17  ;;  %1292 = vst.msk [vmem:[#allocation2 + $0x218] sm:$0xff] %vm174_vm3, %v1272_v21  ;;  %1024 = vst.msk [vmem:[#allocation2 + $0x190] sm:$0xff] %vm174_vm3, %v1004_v22  ;;  %v948_v35 = vadd.f32 %v9261_v8, %v947_v25  ;;  %v1219_v36 = vadd.f32 %v9261_v8, %v1218_v28  ;;  %v7915_v37 = vpop.f32.mrb[30].mxu0  ;;  %v7939_v38 = vpop.f32.mrb[30].mxu1 }
 0x1aa   :  { %v1518_v33 = vmax.f32 %v1514_v6, %v1516_v20  ;;  %v1594_v26 = vld [vmem:[#allocation2 + $0x1e0] ss:$2 sm:$0xff]  ;;  %v1598_v34 = vld [vmem:[#allocation2 + $0x1e1] ss:$2 sm:$0xff]  ;;  %1290 = vst.msk [vmem:[#allocation2 + $0x208] sm:$0xff] %vm174_vm3, %v1270_v23  ;;  %v959_v39 = vadd.f32 %v7915_v37, %v9261_v8  ;;  %v1230_v40 = vadd.f32 %v7939_v38, %v9261_v8  ;;  %v2821_v42 = vpack.c.bf16 %v9447_v30, %v9445_v29  ;;  %v950_v60 = vpop.f32.mrb[31].mxu0 }
 0x1ab   :  { %v9458_v41 = vld [vmem:[#allocation3 + $0x5b] sm:$0xff]  ;;  %1519 = vst.msk [vmem:[#allocation3 + $0x95] sm:$0xff] %vm174_vm3, %v1517_v32  ;;  %v1275_v43 = vmax.f32 %v1227_v24, 0.0  ;;  %v1002_v44 = vmax.f32 %v948_v35, 0.0  ;;  %v1610_v46 = vmax.f32 %v1596_v15, %v1600_v16  ;;  %v1609_v47 = vmax.f32 %v1594_v26, %v1598_v34  ;;  %v1730_v51 = vld [vmem:[#allocation3 + $0x4c] sm:$0xff]  ;;  %v1221_v61 = vpop.f32.mrb[31].mxu1 }
 0x1ac   :  { %1520 = vst.msk [vmem:[#allocation3 + $0x9d] sm:$0x3] %vm1327_vm4, %v1518_v33  ;;  %v2824_v45 = vpack.c.bf16 %v9449_v31, %v9458_v41  ;;  %v1273_v50 = vmax.f32 %v1219_v36, 0.0  ;;  %v1005_v54 = vmax.f32 %v959_v39, 0.0  ;;  %v1276_v59 = vmax.f32 %v1230_v40, 0.0  ;;  %v1727_v62 = vld [vmem:[#allocation3 + $0x34] sm:$0xff] }
 0x1ad   :  { %1295 = vst.msk [vmem:[#allocation2 + $0x230] sm:$0xff] %vm174_vm3, %v1275_v43  ;;  %1022 = vst.msk [vmem:[#allocation2 + $0x180] sm:$0xff] %vm174_vm3, %v1002_v44  ;;  %v1728_v63 = vld [vmem:[#allocation3 + $0x3c] sm:$0xff]  ;;  %v1729_v0 = vld [vmem:[#allocation3 + $0x44] sm:$0xff]  ;;  %v951_v1 = vadd.f32 %v9261_v8, %v950_v60  ;;  %v1222_v3 = vadd.f32 %v9261_v8, %v1221_v61  ;;  %v7918_v6 = vpop.f32.mrb[32].mxu0  ;;  %v7942_v10 = vpop.f32.mrb[32].mxu1 }
 0x1ae   :  { %v1602_v48 = vld [vmem:[#allocation2 + $0x1f4] ss:$2 sm:$0xff]  ;;  %v1604_v49 = vld [vmem:[#allocation2 + $0x204] ss:$2 sm:$0x3]  ;;  %1293 = vst.msk [vmem:[#allocation2 + $0x220] sm:$0xff] %vm174_vm3, %v1273_v50  ;;  %v1739_v4 = vpack.c.bf16 %v1728_v63, %v1727_v62  ;;  %v1740_v5 = vpack.c.bf16 %v1730_v51, %v1729_v0  ;;  %v972_v2 = vadd.f32 %v7918_v6, %v9261_v8  ;;  %v1243_v14 = vadd.f32 %v7942_v10, %v9261_v8 }
 0x1af   :  { %v1606_v52 = vld [vmem:[#allocation2 + $0x1f5] ss:$2 sm:$0xff]  ;;  %v1608_v53 = vld [vmem:[#allocation2 + $0x205] ss:$2 sm:$0x3]  ;;  %1025 = vst.msk [vmem:[#allocation2 + $0x198] sm:$0xff] %vm174_vm3, %v1005_v54 }
 0x1b0   :  { %v1611_v55 = vmax.f32 %v1602_v48, %v1606_v52  ;;  %v1612_v56 = vmax.f32 %v1604_v49, %v1608_v53  ;;  %1296 = vst.msk [vmem:[#allocation2 + $0x238] sm:$0xff] %vm174_vm3, %v1276_v59  ;;  %v3462_v15 = vld [vmem:[#allocation3 + $0x8c] sm:$0xff]  ;;  %v1003_v16 = vmax.f32 %v951_v1, 0.0  ;;  %v1274_v17 = vmax.f32 %v1222_v3, 0.0  ;;  %7961 = vmatmul.mubr.msk.bf16.gmra.mrb[44].mxu0 %vm174_vm3, %v1739_v4  ;;  %v963_v22 = vpop.f32.mrb[33].mxu0  ;;  %v1234_v23 = vpop.f32.mrb[33].mxu1 }
 0x1b1   :  { %7964 = vmatprep.mubr.msk.bf16.mxu0 %vm174_vm3, %v1740_v5  ;;  %v1008_v20 = vmax.f32 %v972_v2, 0.0  ;;  %v1279_v21 = vmax.f32 %v1243_v14, 0.0  ;;  %v964_v25 = vadd.f32 %v9261_v8, %v963_v22  ;;  %v1235_v28 = vadd.f32 %v9261_v8, %v1234_v23  ;;  %v7919_v32 = vpop.f32.mrb[34].mxu0  ;;  %v7943_v33 = vpop.f32.mrb[34].mxu1  ;;  %v9483_v34 = vld [vmem:[#allocation13 + $0x8] sm:$0xff]   ;;  %v1734_v48 = vld [vmem:[#allocation3 + $0x6c] sm:$0xff] }
 0x1b2   :  { %v1613_v11 = vmax.f32 %v1609_v47, %v1611_v55  ;;  %v1614_v13 = vmax.f32 %v1610_v46, %v1612_v56  ;;  %v3463_v24 = vld [vmem:[#allocation3 + $0x94] sm:$0xff]  ;;  %1023 = vst.msk [vmem:[#allocation2 + $0x188] sm:$0xff] %vm174_vm3, %v1003_v16  ;;  %1294 = vst.msk [vmem:[#allocation2 + $0x228] sm:$0xff] %vm174_vm3, %v1274_v17  ;;  %v975_v35 = vadd.f32 %v7919_v32, %v9261_v8  ;;  %v966_v37 = vpop.f32.mrb[35].mxu0  ;;  %v1237_v38 = vpop.f32.mrb[35].mxu1  ;;  %v1732_v40 = vld [vmem:[#allocation3 + $0x5c] sm:$0xff] }
 0x1b3   :  { %v3476_v26 = vpack.c.bf16 %v3463_v24, %v3462_v15  ;;  %1028 = vst.msk [vmem:[#allocation2 + $0x1b0] sm:$0xff] %vm174_vm3, %v1008_v20  ;;  %1299 = vst.msk [vmem:[#allocation2 + $0x250] sm:$0xff] %vm174_vm3, %v1279_v21  ;;  %v1246_v36 = vadd.f32 %v7943_v33, %v9261_v8  ;;  %v1731_v39 = vld [vmem:[#allocation3 + $0x54] sm:$0xff]  ;;  %v1006_v43 = vmax.f32 %v964_v25, 0.0  ;;  %v1277_v44 = vmax.f32 %v1235_v28, 0.0  ;;  %v7922_v49 = vpop.f32.mrb[36].mxu0 }
 0x1b4   :  { %1615 = vst.msk [vmem:[#allocation3 + $0xc5] sm:$0xff] %vm174_vm3, %v1613_v11  ;;  %v967_v46 = vadd.f32 %v9261_v8, %v966_v37  ;;  %v1238_v47 = vadd.f32 %v9261_v8, %v1237_v38  ;;  %v7946_v50 = vpop.f32.mrb[36].mxu1  ;;  %v9492_v51 = vld [vmem:[#allocation2 + $0x178] ss:$2 sm:$0x3]  ;;  %v1009_v56 = vmax.f32 %v975_v35, 0.0  ;;  %v988_v60 = vadd.f32 %v7922_v49, %v9261_v8 }
 0x1b5   :  { %1616 = vst.msk [vmem:[#allocation3 + $0xcd] sm:$0x3] %vm1327_vm4, %v1614_v13  ;;  %8173 = vmatmul.mubr.msk.bf16.vlgmr.msra.gmra.mrb[40].mxu1 %vm174_vm3, %v3476_v26  ;;  %v9494_v52 = vld [vmem:[#allocation2 + $0x179] ss:$2 sm:$0x3]  ;;  %v1280_v59 = vmax.f32 %v1246_v36, 0.0  ;;  %v1259_v61 = vadd.f32 %v7946_v50, %v9261_v8  ;;  %v1741_v3 = vpack.c.bf16 %v1732_v40, %v1731_v39 }
 0x1b6   :  { %v9496_v53 = vld [vmem:[#allocation2 + $0x168] ss:$2 sm:$0xff]  ;;  %v9498_v54 = vld [vmem:[#allocation2 + $0x169] ss:$2 sm:$0xff]  ;;  %8189 = vmatpush3.bf16.msra.mxu1 %v9258_v7  ;;  %1026 = vst.msk [vmem:[#allocation2 + $0x1a0] sm:$0xff] %vm174_vm3, %v1006_v43  ;;  %1297 = vst.msk [vmem:[#allocation2 + $0x240] sm:$0xff] %vm174_vm3, %v1277_v44  ;;  %v1538_v37 = vmax.f32 %v9492_v51, %v9494_v52 }
 0x1b7   :  { %v9500_v55 = vld [vmem:[#allocation2 + $0x218] ss:$2 sm:$0x3]  ;;  %v9505_v62 = vld [vmem:[#allocation13 + $0x10] sm:$0xff]   ;;  %v1007_v0 = vmax.f32 %v967_v46, 0.0  ;;  %v1278_v1 = vmax.f32 %v1238_v47, 0.0  ;;  %8190 = vmatprep.subr.bf16.mxu1 %v9483_v34  ;;  %v1537_v38 = vmax.f32 %v9496_v53, %v9498_v54 }
 0x1b8   :  { %v9507_v63 = vld [vmem:[#allocation2 + $0x219] ss:$2 sm:$0x3]  ;;  %v1733_v4 = vld [vmem:[#allocation3 + $0x64] sm:$0xff]  ;;  %1029 = vst.msk [vmem:[#allocation2 + $0x1b8] sm:$0xff] %vm174_vm3, %v1009_v56  ;;  %1300 = vst.msk [vmem:[#allocation2 + $0x258] sm:$0xff] %vm174_vm3, %v1280_v59  ;;  %7965 = vmatmul.mubr.msk.bf16.gmra.mrb[48].mxu0 %vm174_vm3, %v1741_v3 }
 0x1b9   :  { %v9512_v5 = vld [vmem:[#allocation2 + $0x208] ss:$2 sm:$0xff]  ;;  %v1742_v7 = vpack.c.bf16 %v1734_v48, %v1733_v4  ;;  %v1012_v8 = vmax.f32 %v988_v60, 0.0  ;;  %v1283_v6 = vmax.f32 %v1259_v61, 0.0  ;;  %v979_v10 = vpop.f32.mrb[37].mxu0  ;;  %v1250_v11 = vpop.f32.mrb[37].mxu1  ;;  %v1634_v39 = vmax.f32 %v9500_v55, %v9507_v63 }
 0x1ba   :  { %v9516_v13 = vld [vmem:[#allocation3 + $0x3] sm:$0xff]  ;;  %v9518_v2 = vld [vmem:[#allocation3 + $0xb] sm:$0xff]  ;;  %v9520_v14 = vld [vmem:[#allocation3 + $0x3b] sm:$0xff]  ;;  %1027 = vst.msk [vmem:[#allocation2 + $0x1a8] sm:$0xff] %vm174_vm3, %v1007_v0  ;;  %v7923_v22 = vpop.f32.mrb[38].mxu0  ;;  %v7947_v23 = vpop.f32.mrb[38].mxu1  ;;  %8191 = vmatpush3.bf16.msra.mxu1 %v9483_v34 }
 0x1bb   :  { %v9522_v15 = vld [vmem:[#allocation3 + $0x43] sm:$0xff]  ;;  %1298 = vst.msk [vmem:[#allocation2 + $0x248] sm:$0xff] %vm174_vm3, %v1278_v1  ;;  %v9529_v17 = vld [vmem:[#allocation11] ss:$0 sm:$0xff]  ;;  %v9535_v25 = vld [vmem:[#allocation3 + $0x73] sm:$0xff]  ;;  %7968 = vmatprep.mubr.msk.bf16.mxu0 %vm174_vm3, %v1742_v7  ;;  %v982_v35 = vpop.f32.mrb[39].mxu0  ;;  %8192 = vmatprep.subr.bf16.mxu1 %v9505_v62  ;;  %v1705_v60 = vpack.c.bf16 %v9518_v2, %v9516_v13 }
 0x1bc   :  { %v9524_v16 = vld [vmem:[#allocation2 + $0x209] ss:$2 sm:$0xff]  ;;  %v980_v20 = vadd.f32 %v9529_v17, %v979_v10  ;;  %v1251_v21 = vadd.f32 %v9529_v17, %v1250_v11  ;;  %v1530_v32 = vld [vmem:[#allocation2 + $0x17c] ss:$2 sm:$0xff]  ;;  %1032 = vst.msk [vmem:[#allocation2 + $0x1d0] sm:$0xff] %vm174_vm3, %v1012_v8  ;;  %1303 = vst.msk [vmem:[#allocation2 + $0x270] sm:$0xff] %vm174_vm3, %v1283_v6  ;;  %v991_v26 = vadd.f32 %v9529_v17, %v7923_v22 }
 0x1bd   :  { %v9533_v24 = vld [vmem:[#allocation3 + $0x6b] sm:$0xff]  ;;  %v1735_v36 = vld [vmem:[#allocation3 + $0x74] sm:$0xff]  ;;  %v1633_v46 = vmax.f32 %v9512_v5, %v9524_v16  ;;  %v1626_v34 = vld [vmem:[#allocation2 + $0x21c] ss:$2 sm:$0xff]  ;;  %v2822_v63 = vpack.c.bf16 %v9522_v15, %v9520_v14  ;;  %v1262_v13 = vadd.f32 %v9529_v17, %v7947_v23  ;;  %v983_v2 = vadd.f32 %v9529_v17, %v982_v35 }
 0x1be   :  { %v9537_v28 = vld [vmem:[#allocation13 + $0x18] sm:$0xff]   ;;  %v1010_v44 = vmax.f32 %v980_v20, 0.0  ;;  %v1281_v50 = vmax.f32 %v1251_v21, 0.0  ;;  %v1013_v59 = vmax.f32 %v991_v26, 0.0  ;;  %v9560_v61 = vld [vmem:[#allocation13 + $0x40] sm:$0xff]   ;;  %v2825_v0 = vpack.c.bf16 %v9535_v25, %v9533_v24  ;;  %8193 = vmatpush3.bf16.msra.mxu1 %v9505_v62 }
 0x1bf   :  { %v1532_v33 = vld [vmem:[#allocation2 + $0x18c] ss:$2 sm:$0x3]  ;;  %v1534_v40 = vld [vmem:[#allocation2 + $0x17d] ss:$2 sm:$0xff]  ;;  %v1743_v16 = vpack.c.bf16 %v1735_v36, %v1735_v36  ;;  %8194 = vmatprep.subr.bf16.mxu1 %v9537_v28 }
 0x1c0   :  { %v1536_v43 = vld [vmem:[#allocation2 + $0x18d] ss:$2 sm:$0x3]  ;;  %v1539_v47 = vmax.f32 %v1530_v32, %v1534_v40  ;;  %v1628_v49 = vld [vmem:[#allocation2 + $0x22c] ss:$2 sm:$0x3] }
 0x1c1   :  { %v1540_v48 = vmax.f32 %v1532_v33, %v1536_v43  ;;  %v1546_v51 = vld [vmem:[#allocation2 + $0x190] ss:$2 sm:$0xff]  ;;  %v1550_v52 = vld [vmem:[#allocation2 + $0x191] ss:$2 sm:$0xff]  ;;  %1030 = vst.msk [vmem:[#allocation2 + $0x1c0] sm:$0xff] %vm174_vm3, %v1010_v44  ;;  %1301 = vst.msk [vmem:[#allocation2 + $0x260] sm:$0xff] %vm174_vm3, %v1281_v50  ;;  %7969 = vmatmul.mubr.msk.bf16.gmra.mrb[52].mxu0 %vm174_vm3, %v1743_v16 }
 0x1c2   :  { %v9553_v56 = vld [vmem:[#allocation2 + $0x230] ss:$2 sm:$0xff]  ;;  %v9555_v53 = vld [vmem:[#allocation2 + $0x231] ss:$2 sm:$0xff]  ;;  %v1541_v1 = vmax.f32 %v1537_v38, %v1539_v47  ;;  %1033 = vst.msk [vmem:[#allocation2 + $0x1d8] sm:$0xff] %vm174_vm3, %v1013_v59  ;;  %v1561_v23 = vmax.f32 %v1546_v51, %v1550_v52  ;;  %7980 = vmatprep.mubr.msk.bf16.mxu0 %vm174_vm3, %v1705_v60  ;;  %8195 = vmatpush3.bf16.msra.mxu1 %v9537_v28  ;;  %v1284_v47 = vmax.f32 %v1262_v13, 0.0 }
 0x1c3   :  { %v1630_v54 = vld [vmem:[#allocation2 + $0x21d] ss:$2 sm:$0xff]  ;;  %v1632_v55 = vld [vmem:[#allocation2 + $0x22d] ss:$2 sm:$0x3]  ;;  %v1542_v3 = vmax.f32 %v1538_v37, %v1540_v48  ;;  %v1657_v35 = vmax.f32 %v9553_v56, %v9555_v53  ;;  %v1011_v48 = vmax.f32 %v983_v2, 0.0  ;;  %8212 = vmatprep.subr.bf16.mxu1 %v9560_v61 }
 0x1c4   :  { %v1635_v4 = vmax.f32 %v1626_v34, %v1630_v54  ;;  %v1636_v5 = vmax.f32 %v1628_v49, %v1632_v55  ;;  %v1556_v7 = vld [vmem:[#allocation2 + $0x1b4] ss:$2 sm:$0x3]  ;;  %v1560_v8 = vld [vmem:[#allocation2 + $0x1b5] ss:$2 sm:$0x3] }
 0x1c5   :  { %v1564_v6 = vmax.f32 %v1556_v7, %v1560_v8  ;;  %v1652_v10 = vld [vmem:[#allocation2 + $0x254] ss:$2 sm:$0x3]  ;;  %v1656_v11 = vld [vmem:[#allocation2 + $0x255] ss:$2 sm:$0x3] }
 0x1c6   :  { %1543 = vst.msk [vmem:[#allocation3 + $0xa1] sm:$0xff] %vm174_vm3, %v1541_v1  ;;  %v1637_v20 = vmax.f32 %v1633_v46, %v1635_v4  ;;  %v1638_v21 = vmax.f32 %v1634_v39, %v1636_v5  ;;  %v1660_v22 = vmax.f32 %v1652_v10, %v1656_v11  ;;  %v1548_v62 = vld [vmem:[#allocation2 + $0x1a0] ss:$2 sm:$0x3]  ;;  %v1554_v38 = vld [vmem:[#allocation2 + $0x1a4] ss:$2 sm:$0xff]  ;;  %v1707_v4 = vpack.c.bf16 %v9445_v29, %v9371_v19 }
 0x1c7   :  { %1544 = vst.msk [vmem:[#allocation3 + $0xa9] sm:$0x3] %vm1327_vm4, %v1542_v3  ;;  %v1552_v32 = vld [vmem:[#allocation2 + $0x1a1] ss:$2 sm:$0x3]  ;;  %v1253_v34 = vpop.f32.mrb[39].mxu1 }
 0x1c8   :  { %v1562_v33 = vmax.f32 %v1548_v62, %v1552_v32  ;;  %v1644_v26 = vld [vmem:[#allocation2 + $0x240] ss:$2 sm:$0x3]  ;;  %v1648_v37 = vld [vmem:[#allocation2 + $0x241] ss:$2 sm:$0x3]  ;;  %v1254_v51 = vadd.f32 %v9529_v17, %v1253_v34 }
 0x1c9   :  { %1639 = vst.msk [vmem:[#allocation3 + $0xd1] sm:$0xff] %vm174_vm3, %v1637_v20  ;;  %v1658_v36 = vmax.f32 %v1644_v26, %v1648_v37  ;;  %v1558_v40 = vld [vmem:[#allocation2 + $0x1a5] ss:$2 sm:$0xff]  ;;  %v1650_v39 = vld [vmem:[#allocation2 + $0x244] ss:$2 sm:$0xff]  ;;  %1304 = vst.msk [vmem:[#allocation2 + $0x278] sm:$0xff] %vm174_vm3, %v1284_v47 }
 0x1ca   :  { %1640 = vst.msk [vmem:[#allocation3 + $0xd9] sm:$0x3] %vm1327_vm4, %v1638_v21  ;;  %v1566_v43 = vmax.f32 %v1562_v33, %v1564_v6  ;;  %v1563_v44 = vmax.f32 %v1554_v38, %v1558_v40  ;;  %v1654_v46 = vld [vmem:[#allocation2 + $0x245] ss:$2 sm:$0xff]  ;;  %v1282_v54 = vmax.f32 %v1254_v51, 0.0  ;;  %v8669_v5 = vld [vmem:[#allocation13 + $0x48] sm:$0xff]  }
 0x1cb   :  { %v1662_v49 = vmax.f32 %v1658_v36, %v1660_v22  ;;  %v1659_v50 = vmax.f32 %v1650_v39, %v1654_v46  ;;  %v1692_v52 = vld [vmem:[#allocation3 + $0x13] sm:$0xff]  ;;  %1031 = vst.msk [vmem:[#allocation2 + $0x1c8] sm:$0xff] %vm174_vm3, %v1011_v48  ;;  %v1580_v1 = vld [vmem:[#allocation2 + $0x1dc] ss:$2 sm:$0x3]  ;;  %v9600_v6 = vld [vmem:[#allocation3 + $0xc3] sm:$0xff]  ;;  %v1708_v36 = vpack.c.bf16 %v9520_v14, %v9447_v30 }
 0x1cc   :  { %1568 = vst.msk [vmem:[#allocation3 + $0xb5] sm:$0x3] %vm1327_vm4, %v1566_v43  ;;  %v1565_v56 = vmax.f32 %v1561_v23, %v1563_v44  ;;  %v9587_v53 = vld [vmem:[#allocation3 + $0x93] sm:$0xff]  ;;  %v1706_v55 = vpack.c.bf16 %v9369_v18, %v1692_v52  ;;  %v1584_v8 = vld [vmem:[#allocation2 + $0x1dd] ss:$2 sm:$0x3] }
 0x1cd   :  { %1664 = vst.msk [vmem:[#allocation3 + $0xe5] sm:$0x3] %vm1327_vm4, %v1662_v49  ;;  %v1661_v28 = vmax.f32 %v1657_v35, %v1659_v50  ;;  %v3464_v59 = vld [vmem:[#allocation3 + $0x9c] sm:$0xff]  ;;  %v1588_v22 = vmax.f32 %v1580_v1, %v1584_v8  ;;  %v8672_v38 = vld [vmem:[#allocation13 + $0x58] sm:$0xff]   ;;  %v1711_v8 = vpack.c.bf16 %v9533_v24, %v9449_v31 }
 0x1ce   :  { %1567 = vst.msk [vmem:[#allocation3 + $0xad] sm:$0xff] %vm174_vm3, %v1565_v56  ;;  %v3465_v17 = vld [vmem:[#allocation3 + $0xa4] sm:$0xff]  ;;  %v9591_v60 = vld [vmem:[#allocation3 + $0x9b] sm:$0xff]  ;;  %1302 = vst.msk [vmem:[#allocation2 + $0x268] sm:$0xff] %vm174_vm3, %v1282_v54  ;;  %7981 = vmatmul.mubr.msk.bf16.vlgmr.msra.gmra.mrb[40].mxu0 %vm174_vm3, %v1706_v55 }
 0x1cf   :  { %1663 = vst.msk [vmem:[#allocation3 + $0xdd] sm:$0xff] %vm174_vm3, %v1661_v28  ;;  %v3477_v3 = vpack.c.bf16 %v3465_v17, %v3464_v59  ;;  %v4554_v7 = vpack.c.bf16 %v9591_v60, %v9587_v53  ;;  %v1570_v11 = vld [vmem:[#allocation2 + $0x1b8] ss:$2 sm:$0xff]  ;;  %7984 = vmatprep.mubr.msk.bf16.mxu0 %vm174_vm3, %v1707_v4  ;;  %v1574_v16 = vld [vmem:[#allocation2 + $0x1b9] ss:$2 sm:$0xff]  ;;  %7997 = vmatpush3.bf16.msra.mxu0 %v9403_v58  ;;  %v8712_v29 = vld [vmem:[#allocation13 + $0xf8] sm:$0xff]  }
 0x1d0   :  { %v9602_v10 = vld [vmem:[#allocation3 + $0xcb] sm:$0xff]  ;;  %v8670_v13 = vld [vmem:[#allocation13 + $0x50] sm:$0xff]   ;;  %v1676_v62 = vld [vmem:[#allocation2 + $0x27c] ss:$2 sm:$0x3]  ;;  %7998 = vmatprep.subr.bf16.mxu0 %v8669_v5  ;;  %v1585_v39 = vmax.f32 %v1570_v11, %v1574_v16  ;;  %v1709_v58 = vpack.c.bf16 %v9417_v9, %v9522_v15 }
 0x1d1   :  { %8176 = vmatprep.mubr.msk.bf16.mxu1 %vm174_vm3, %v3477_v3  ;;  %v4557_v2 = vpack.c.bf16 %v9602_v10, %v9600_v6  ;;  %v1666_v20 = vld [vmem:[#allocation2 + $0x258] ss:$2 sm:$0xff]  ;;  %v1670_v21 = vld [vmem:[#allocation2 + $0x259] ss:$2 sm:$0xff] }
 0x1d2   :  { %v1680_v32 = vld [vmem:[#allocation2 + $0x27d] ss:$2 sm:$0x3]  ;;  %v1572_v33 = vld [vmem:[#allocation2 + $0x1c8] ss:$2 sm:$0x3]  ;;  %v1681_v34 = vmax.f32 %v1666_v20, %v1670_v21 }
 0x1d3   :  { %v1576_v26 = vld [vmem:[#allocation2 + $0x1c9] ss:$2 sm:$0x3]  ;;  %v1578_v37 = vld [vmem:[#allocation2 + $0x1cc] ss:$2 sm:$0xff]  ;;  %v1684_v43 = vmax.f32 %v1676_v62, %v1680_v32  ;;  %7999 = vmatpush3.bf16.msra.mxu0 %v8669_v5  ;;  %v1710_v5 = vpack.c.bf16 %v9458_v41, %v9401_v57  ;;  %v4352_v30 = vld [vmem:[#allocation3 + $0xa1] sm:$0xff] }
 0x1d4   :  { %v1582_v23 = vld [vmem:[#allocation2 + $0x1cd] ss:$2 sm:$0xff]  ;;  %v1586_v35 = vmax.f32 %v1572_v33, %v1576_v26  ;;  %v9611_v40 = vld [vmem:[#allocation3 + $0xa3] sm:$0xff]  ;;  %8000 = vmatprep.subr.bf16.mxu0 %v8670_v13 }
 0x1d5   :  { %v1587_v44 = vmax.f32 %v1578_v37, %v1582_v23  ;;  %v9615_v46 = vld [vmem:[#allocation3 + $0xab] sm:$0xff]  ;;  %v9617_v47 = vld [vmem:[#allocation3 + $0xd3] sm:$0xff]  ;;  %v1668_v50 = vld [vmem:[#allocation2 + $0x268] ss:$2 sm:$0x3] }
 0x1d6   :  { %v9619_v48 = vld [vmem:[#allocation3 + $0xdb] sm:$0xff]  ;;  %v1590_v49 = vmax.f32 %v1586_v35, %v1588_v22  ;;  %v1672_v51 = vld [vmem:[#allocation2 + $0x269] ss:$2 sm:$0x3]  ;;  %v4555_v52 = vpack.c.bf16 %v9615_v46, %v9611_v40  ;;  %v1674_v54 = vld [vmem:[#allocation2 + $0x26c] ss:$2 sm:$0xff]  ;;  %7985 = vmatmul.mubr.msk.bf16.gmra.mrb[44].mxu0 %vm174_vm3, %v1708_v36 }
 0x1d7   :  { %v4558_v56 = vpack.c.bf16 %v9619_v48, %v9617_v47  ;;  %v1589_v28 = vmax.f32 %v1585_v39, %v1587_v44  ;;  %v1678_v55 = vld [vmem:[#allocation2 + $0x26d] ss:$2 sm:$0xff]  ;;  %v1682_v59 = vmax.f32 %v1668_v50, %v1672_v51  ;;  %7988 = vmatprep.mubr.msk.bf16.mxu0 %vm174_vm3, %v1709_v58  ;;  %8001 = vmatpush3.bf16.msra.mxu0 %v8670_v13  ;;  %v3469_v16 = vld [vmem:[#allocation3 + $0xc4] sm:$0xff]  ;;  %v2996_v24 = vld [vmem:[#allocation3 + $0x1c] sm:$0xff] }
 0x1d8   :  { %1592 = vst.msk [vmem:[#allocation3 + $0xc1] sm:$0x3] %vm1327_vm4, %v1590_v49  ;;  %v1683_v17 = vmax.f32 %v1674_v54, %v1678_v55  ;;  %8002 = vmatprep.subr.bf16.mxu0 %v8672_v38  ;;  %v8675_v4 = vld [vmem:[#allocation13 + $0x60] sm:$0xff]   ;;  %v2041_v32 = vld [vmem:[#allocation3 + $0x5] sm:$0xff]  ;;  %v3472_v49 = vld [vmem:[#allocation3 + $0xdc] sm:$0xff] }
 0x1d9   :  { %1591 = vst.msk [vmem:[#allocation3 + $0xb9] sm:$0xff] %vm174_vm3, %v1589_v28  ;;  %v1686_v1 = vmax.f32 %v1682_v59, %v1684_v43  ;;  %v3466_v11 = vld [vmem:[#allocation3 + $0xac] sm:$0xff]  ;;  %v3471_v44 = vld [vmem:[#allocation3 + $0xd4] sm:$0xff]  ;;  %v2044_v28 = vld [vmem:[#allocation3 + $0x1d] sm:$0xff] }
 0x1da   :  { %v1685_v3 = vmax.f32 %v1681_v34, %v1683_v17  ;;  %v2042_v33 = vld [vmem:[#allocation3 + $0xd] sm:$0xff]  ;;  %v2043_v51 = vld [vmem:[#allocation3 + $0x15] sm:$0xff]  ;;  %v2045_v54 = vld [vmem:[#allocation3 + $0x25] sm:$0xff] }
 0x1db   :  { %1688 = vst.msk [vmem:[#allocation3 + $0xf1] sm:$0x3] %vm1327_vm4, %v1686_v1  ;;  %8003 = vmatpush3.bf16.msra.mxu0 %v8672_v38  ;;  %v2056_v35 = vpack.c.bf16 %v2042_v33, %v2041_v32  ;;  %v1712_v38 = vpack.c.bf16 %v9535_v25, %v9535_v25  ;;  %v3470_v43 = vld [vmem:[#allocation3 + $0xcc] sm:$0xff]  ;;  %v2057_v59 = vpack.c.bf16 %v2044_v28, %v2043_v51  ;;  %v3429_v17 = vld [vmem:[#allocation3 + $0x7b] sm:$0xff]  ;;  %v3430_v1 = vld [vmem:[#allocation3 + $0x83] sm:$0xff] }
 0x1dc   :  { %1687 = vst.msk [vmem:[#allocation3 + $0xe9] sm:$0xff] %vm174_vm3, %v1685_v3  ;;  %8020 = vmatprep.subr.bf16.mxu0 %v8675_v4  ;;  %v3480_v34 = vpack.c.bf16 %v3471_v44, %v3470_v43  ;;  %v2046_v55 = vld [vmem:[#allocation3 + $0x2d] sm:$0xff]  ;;  %v8677_v3 = vld [vmem:[#allocation13 + $0x68] sm:$0xff]   ;;  %v8710_v19 = vld [vmem:[#allocation13 + $0xf0] sm:$0xff]  }
 0x1dd   :  { %v2050_v33 = vld [vmem:[#allocation3 + $0x4d] sm:$0xff]  ;;  %v8676_v44 = vld [vmem:[#allocation13 + $0x48] sm:$0xff]   ;;  %v8711_v57 = vld [vmem:[#allocation13 + $0xd0] sm:$0xff]  }
 0x1de   :  { %7989 = vmatmul.mubr.msk.bf16.gmra.mrb[48].mxu0 %vm174_vm3, %v1710_v5  ;;  %v2054_v51 = vld [vmem:[#allocation3 + $0x6d] sm:$0xff]  ;;  %v4351_v15 = vld [vmem:[#allocation3 + $0x99] sm:$0xff] }
 0x1df   :  { %7992 = vmatprep.mubr.msk.bf16.mxu0 %vm174_vm3, %v1711_v8  ;;  %v2058_v8 = vpack.c.bf16 %v2046_v55, %v2045_v54  ;;  %v2053_v54 = vld [vmem:[#allocation3 + $0x65] sm:$0xff]  ;;  %v4350_v18 = vld [vmem:[#allocation3 + $0x91] sm:$0xff] }
 0x1e0   :  { %v3467_v13 = vld [vmem:[#allocation3 + $0xb4] sm:$0xff]  ;;  %v3468_v20 = vld [vmem:[#allocation3 + $0xbc] sm:$0xff] }
 0x1e1   :  { %v9637_v21 = vld [vmem:[#allocation3 + $0xb3] sm:$0xff]  ;;  %v3478_v22 = vpack.c.bf16 %v3467_v13, %v3466_v11  ;;  %v3479_v62 = vpack.c.bf16 %v3469_v16, %v3468_v20  ;;  %v9639_v26 = vld [vmem:[#allocation3 + $0xbb] sm:$0xff]  ;;  %v9659_v11 = vpack.c.bf16 %v3430_v1, %v3429_v17  ;;  %v8681_v1 = vld [vmem:[#allocation13 + $0x58] sm:$0xff]  }
 0x1e2   :  { %v4556_v37 = vpack.c.bf16 %v9639_v26, %v9637_v21  ;;  %v8678_v13 = vld [vmem:[#allocation13 + $0x70] sm:$0xff]   ;;  %v3447_v17 = vpack.c.bf16 %v9637_v21, %v9615_v46  ;;  %v4354_v14 = vld [vmem:[#allocation3 + $0xb1] sm:$0xff]  ;;  %v4355_v9 = vld [vmem:[#allocation3 + $0xb9] sm:$0xff] }
 0x1e3   :  { %8177 = vmatmul.mubr.msk.bf16.gmra.mrb[44].mxu1 %vm174_vm3, %v3478_v22  ;;  %v9644_v23 = vld [vmem:[#allocation3 + $0xe3] sm:$0xff]  ;;  %v9647_v36 = vld [vmem:[#allocation3 + $0xeb] sm:$0xff] }
 0x1e4   :  { %8180 = vmatprep.mubr.msk.bf16.mxu1 %vm174_vm3, %v3479_v62  ;;  %v4559_v39 = vpack.c.bf16 %v9647_v36, %v9644_v23  ;;  %v3473_v58 = vld [vmem:[#allocation3 + $0xe4] sm:$0xff]  ;;  %v3474_v5 = vld [vmem:[#allocation3 + $0xec] sm:$0xff]  ;;  %v2047_v62 = vld [vmem:[#allocation3 + $0x35] sm:$0xff] }
 0x1e5   :  { %v3481_v50 = vpack.c.bf16 %v3473_v58, %v3472_v49  ;;  %v3482_v16 = vpack.c.bf16 %v3474_v5, %v3474_v5  ;;  %v2048_v20 = vld [vmem:[#allocation3 + $0x3d] sm:$0xff]  ;;  %v2049_v22 = vld [vmem:[#allocation3 + $0x45] sm:$0xff]  ;;  %v3446_v58 = vpack.c.bf16 %v9611_v40, %v9591_v60  ;;  %v2232_v5 = vld [vmem:[#allocation3 + $0xf] sm:$0xff] }
 0x1e6   :  { %7993 = vmatmul.mubr.msk.bf16.gmra.mrb[56].mxu0 %vm174_vm3, %v1712_v38  ;;  %v2059_v32 = vpack.c.bf16 %v2048_v20, %v2047_v62  ;;  %v9664_v38 = vld [vmem:[#allocation3 + $0x8b] sm:$0xff]  ;;  %v2060_v43 = vpack.c.bf16 %v2050_v33, %v2049_v22  ;;  %v2052_v49 = vld [vmem:[#allocation3 + $0x5d] sm:$0xff]  ;;  %v3449_v22 = vpack.c.bf16 %v9617_v47, %v9602_v10  ;;  %v3450_v62 = vpack.c.bf16 %v9644_v23, %v9619_v48  ;;  %v3007_v60 = vld [vmem:[#allocation3 + $0x74] sm:$0xff] }
 0x1e7   :  { %8004 = vmatprep.mubr.msk.bf16.mxu0 %vm174_vm3, %v2056_v35  ;;  %v8680_v35 = vld [vmem:[#allocation13 + $0x78] sm:$0xff]   ;;  %v8679_v55 = vld [vmem:[#allocation13 + $0x50] sm:$0xff]   ;;  %v8714_v25 = vld [vmem:[#allocation13 + $0xe0] sm:$0xff]  }
 0x1e8   :  { %v2236_v33 = vld [vmem:[#allocation3 + $0x2f] sm:$0xff]  ;;  %v3188_v21 = vld [vmem:[#allocation3 + $0x25] sm:$0xff] }
 0x1e9   :  { %v4358_v31 = vld [vmem:[#allocation3 + $0xd1] sm:$0xff]  ;;  %v3192_v47 = vld [vmem:[#allocation3 + $0x45] sm:$0xff] }
 0x1ea   :  { %v3010_v40 = vld [vmem:[#allocation3 + $0x8c] sm:$0xff]  ;;  %v3190_v10 = vld [vmem:[#allocation3 + $0x35] sm:$0xff] }
 0x1eb   :  { %8181 = vmatmul.mubr.msk.bf16.gmra.mrb[48].mxu1 %vm174_vm3, %v3480_v34  ;;  %v2051_v34 = vld [vmem:[#allocation3 + $0x55] sm:$0xff]  ;;  %v8721_v46 = vld [vmem:[#allocation13 + $0xf8] sm:$0xff]  }
 0x1ec   :  { %8184 = vmatprep.mubr.msk.bf16.mxu1 %vm174_vm3, %v3481_v50  ;;  %v8683_v50 = vld [vmem:[#allocation13 + $0x80] sm:$0xff]   ;;  %v2061_v28 = vpack.c.bf16 %v2052_v49, %v2051_v34  ;;  %v8685_v34 = vld [vmem:[#allocation13 + $0x88] sm:$0xff]   ;;  %v3196_v23 = vld [vmem:[#allocation3 + $0x65] sm:$0xff] }
 0x1ed   :  { %v3189_v48 = vld [vmem:[#allocation3 + $0x2d] sm:$0xff] }
 0x1ee   :  { %8005 = vmatmul.mubr.msk.bf16.vlgmr.msra.gmra.mrb[40].mxu0 %vm174_vm3, %v2057_v59  ;;  %v2062_v59 = vpack.c.bf16 %v2054_v51, %v2053_v54  ;;  %v8686_v54 = vld [vmem:[#allocation13 + $0x90] sm:$0xff]  }
 0x1ef   :  { %8008 = vmatprep.mubr.msk.bf16.mxu0 %vm174_vm3, %v2058_v8  ;;  %8021 = vmatpush3.bf16.msra.mxu0 %v8675_v4  ;;  %v3445_v4 = vpack.c.bf16 %v9587_v53, %v9664_v38  ;;  %v2233_v8 = vld [vmem:[#allocation3 + $0x17] sm:$0xff]  ;;  %v3006_v53 = vld [vmem:[#allocation3 + $0x6c] sm:$0xff] }
 0x1f0   :  { %8022 = vmatprep.subr.bf16.mxu0 %v8677_v3  ;;  %v2247_v20 = vpack.c.bf16 %v2233_v8, %v2232_v5  ;;  %v3781_v5 = vld [vmem:[#allocation3 + $0x8d] sm:$0xff]  ;;  %v3782_v8 = vld [vmem:[#allocation3 + $0x95] sm:$0xff] }
 0x1f3   :  { %8185 = vmatmul.mubr.msk.bf16.gmra.mrb[52].mxu1 %vm174_vm3, %v3482_v16  ;;  %8023 = vmatpush3.bf16.msra.mxu0 %v8677_v3  ;;  %v2055_v3 = vld [vmem:[#allocation3 + $0x75] sm:$0xff] }
 0x1f4   :  { %8196 = vmatprep.mubr.msk.bf16.mxu1 %vm174_vm3, %v9659_v11  ;;  %8024 = vmatprep.subr.bf16.mxu0 %v8678_v13  ;;  %v2063_v16 = vpack.c.bf16 %v2055_v3, %v2055_v3  ;;  %v8688_v3 = vld [vmem:[#allocation13 + $0x98] sm:$0xff]  }
 0x1f6   :  { %8009 = vmatmul.mubr.msk.bf16.gmra.mrb[44].mxu0 %vm174_vm3, %v2059_v32  ;;  %v2235_v32 = vld [vmem:[#allocation3 + $0x27] sm:$0xff] }
 0x1f7   :  { %8012 = vmatprep.mubr.msk.bf16.mxu0 %vm174_vm3, %v2060_v43  ;;  %8025 = vmatpush3.bf16.msra.mxu0 %v8678_v13  ;;  %v8682_v13 = vld [vmem:[#allocation13 + $0x60] sm:$0xff]   ;;  %v2234_v43 = vld [vmem:[#allocation3 + $0x1f] sm:$0xff] }
 0x1f8   :  { %8026 = vmatprep.subr.bf16.mxu0 %v8680_v35 }
 0x1fb   :  { %8197 = vmatmul.mubr.msk.bf16.vlgmr.msra.gmra.mrb[40].mxu1 %vm174_vm3, %v3445_v4  ;;  %8027 = vmatpush3.bf16.msra.mxu0 %v8680_v35  ;;  %v2237_v35 = vld [vmem:[#allocation3 + $0x37] sm:$0xff]  ;;  %v2248_v4 = vpack.c.bf16 %v2235_v32, %v2234_v43 }
 0x1fc   :  { %8200 = vmatprep.mubr.msk.bf16.mxu1 %vm174_vm3, %v3446_v58  ;;  %8213 = vmatpush3.bf16.msra.mxu1 %v9560_v61  ;;  %v3448_v61 = vpack.c.bf16 %v9600_v6, %v9639_v26  ;;  %v3780_v58 = vld [vmem:[#allocation3 + $0x85] sm:$0xff]  ;;  %v2249_v49 = vpack.c.bf16 %v2237_v35, %v2236_v33  ;;  %v8691_v43 = vld [vmem:[#allocation13 + $0xa0] sm:$0xff]   ;;  %v3187_v26 = vld [vmem:[#allocation3 + $0x1d] sm:$0xff] }
 0x1fd   :  { %8214 = vmatprep.subr.bf16.mxu1 %v8676_v44  ;;  %8044 = vmatprep.subr.bf16.mxu0 %v8683_v50  ;;  %v2242_v33 = vld [vmem:[#allocation3 + $0x5f] sm:$0xff]  ;;  %v2243_v35 = vld [vmem:[#allocation3 + $0x67] sm:$0xff] }
 0x1fe   :  { %8013 = vmatmul.mubr.msk.bf16.gmra.mrb[48].mxu0 %vm174_vm3, %v2061_v28  ;;  %v3451_v28 = vpack.c.bf16 %v9647_v36, %v9647_v36  ;;  %v3193_v36 = vld [vmem:[#allocation3 + $0x4d] sm:$0xff] }
 0x1ff   :  { %8016 = vmatprep.mubr.msk.bf16.mxu0 %vm174_vm3, %v2062_v59  ;;  %v2239_v59 = vld [vmem:[#allocation3 + $0x47] sm:$0xff] }
 0x200   :  { %8215 = vmatpush3.bf16.msra.mxu1 %v8676_v44  ;;  %v3779_v44 = vld [vmem:[#allocation3 + $0x7d] sm:$0xff] }
 0x201   :  { %8216 = vmatprep.subr.bf16.mxu1 %v8679_v55  ;;  %v3794_v51 = vpack.c.bf16 %v3780_v58, %v3779_v44  ;;  %v2245_v44 = vld [vmem:[#allocation3 + $0x77] sm:$0xff]  ;;  %v2252_v58 = vpack.c.bf16 %v2243_v35, %v2242_v33  ;;  %v2426_v35 = vld [vmem:[#allocation3 + $0x28] sm:$0xff] }
 0x203   :  { %8201 = vmatmul.mubr.msk.bf16.gmra.mrb[44].mxu1 %vm174_vm3, %v3447_v17  ;;  %v2241_v17 = vld [vmem:[#allocation3 + $0x57] sm:$0xff] }
 0x204   :  { %8204 = vmatprep.mubr.msk.bf16.mxu1 %vm174_vm3, %v3448_v61  ;;  %8217 = vmatpush3.bf16.msra.mxu1 %v8679_v55  ;;  %v2238_v55 = vld [vmem:[#allocation3 + $0x3f] sm:$0xff]  ;;  %v2240_v61 = vld [vmem:[#allocation3 + $0x4f] sm:$0xff] }
 0x205   :  { %8218 = vmatprep.subr.bf16.mxu1 %v8681_v1 }
 0x206   :  { %8017 = vmatmul.mubr.msk.bf16.gmra.mrb[60].mxu0 %vm174_vm3, %v2063_v16  ;;  %v3783_v16 = vld [vmem:[#allocation3 + $0x9d] sm:$0xff] }
 0x207   :  { %8028 = vmatprep.mubr.msk.bf16.mxu0 %vm174_vm3, %v2247_v20  ;;  %v3784_v20 = vld [vmem:[#allocation3 + $0xa5] sm:$0xff] }
 0x208   :  { %8219 = vmatpush3.bf16.msra.mxu1 %v8681_v1  ;;  %v2250_v1 = vpack.c.bf16 %v2239_v59, %v2238_v55  ;;  %v3796_v32 = vpack.c.bf16 %v3784_v20, %v3783_v16  ;;  %v2246_v55 = vld [vmem:[#allocation3 + $0x7f] sm:$0xff]  ;;  %v3790_v16 = vld [vmem:[#allocation3 + $0xd5] sm:$0xff] }
 0x209   :  { %8236 = vmatprep.subr.bf16.mxu1 %v8682_v13 }
 0x20b   :  { %8205 = vmatmul.mubr.msk.bf16.gmra.mrb[48].mxu1 %vm174_vm3, %v3449_v22  ;;  %v3795_v22 = vpack.c.bf16 %v3782_v8, %v3781_v5  ;;  %v2424_v5 = vld [vmem:[#allocation3 + $0x18] sm:$0xff] }
 0x20c   :  { %8208 = vmatprep.mubr.msk.bf16.mxu1 %vm174_vm3, %v3450_v62  ;;  %v8684_v62 = vld [vmem:[#allocation13 + $0x68] sm:$0xff]   ;;  %v8690_v8 = vld [vmem:[#allocation13 + $0x80] sm:$0xff]  }
 0x20e   :  { %8029 = vmatmul.mubr.msk.bf16.vlgmr.msra.gmra.mrb[40].mxu0 %vm174_vm3, %v2248_v4  ;;  %v2244_v4 = vld [vmem:[#allocation3 + $0x6f] sm:$0xff] }
 0x20f   :  { %8032 = vmatprep.mubr.msk.bf16.mxu0 %vm174_vm3, %v2249_v49  ;;  %8045 = vmatpush3.bf16.msra.mxu0 %v8683_v50  ;;  %v2251_v50 = vpack.c.bf16 %v2241_v17, %v2240_v61  ;;  %v3786_v49 = vld [vmem:[#allocation3 + $0xb5] sm:$0xff]  ;;  %v3788_v17 = vld [vmem:[#allocation3 + $0xc5] sm:$0xff]  ;;  %v2254_v61 = vpack.c.bf16 %v2246_v55, %v2246_v55 }
 0x210   :  { %8046 = vmatprep.subr.bf16.mxu0 %v8685_v34  ;;  %v3970_v55 = vld [vmem:[#allocation3 + $0x8f] sm:$0xff] }
 0x213   :  { %8209 = vmatmul.mubr.msk.bf16.gmra.mrb[56].mxu1 %vm174_vm3, %v3451_v28  ;;  %8047 = vmatpush3.bf16.msra.mxu0 %v8685_v34  ;;  %v8687_v34 = vld [vmem:[#allocation13 + $0x70] sm:$0xff]  }
 0x214   :  { %8220 = vmatprep.mubr.msk.bf16.mxu1 %vm174_vm3, %v3794_v51  ;;  %8048 = vmatprep.subr.bf16.mxu0 %v8686_v54  ;;  %v2253_v51 = vpack.c.bf16 %v2245_v44, %v2244_v4  ;;  %v3787_v28 = vld [vmem:[#allocation3 + $0xbd] sm:$0xff]  ;;  %v2427_v4 = vld [vmem:[#allocation3 + $0x30] sm:$0xff] }
 0x215   :  { %v2428_v44 = vld [vmem:[#allocation3 + $0x38] sm:$0xff] }
 0x216   :  { %8033 = vmatmul.mubr.msk.bf16.gmra.mrb[44].mxu0 %vm174_vm3, %v2250_v1  ;;  %v8689_v1 = vld [vmem:[#allocation13 + $0x78] sm:$0xff]  }
 0x217   :  { %8036 = vmatprep.mubr.msk.bf16.mxu0 %vm174_vm3, %v2251_v50  ;;  %8049 = vmatpush3.bf16.msra.mxu0 %v8686_v54  ;;  %v3785_v54 = vld [vmem:[#allocation3 + $0xad] sm:$0xff] }
 0x218   :  { %8050 = vmatprep.subr.bf16.mxu0 %v8688_v3  ;;  %v3797_v59 = vpack.c.bf16 %v3786_v49, %v3785_v54  ;;  %v3789_v50 = vld [vmem:[#allocation3 + $0xcd] sm:$0xff]  ;;  %v8693_v49 = vld [vmem:[#allocation13 + $0xa8] sm:$0xff]  }
 0x219   :  { %v3969_v54 = vld [vmem:[#allocation3 + $0x87] sm:$0xff] }
 0x21b   :  { %8221 = vmatmul.mubr.msk.bf16.vlgmr.msra.gmra.mrb[40].mxu1 %vm174_vm3, %v3795_v22  ;;  %8051 = vmatpush3.bf16.msra.mxu0 %v8688_v3  ;;  %v2423_v3 = vld [vmem:[#allocation3 + $0x10] sm:$0xff]  ;;  %v3792_v22 = vld [vmem:[#allocation3 + $0xe5] sm:$0xff] }
 0x21c   :  { %8224 = vmatprep.mubr.msk.bf16.mxu1 %vm174_vm3, %v3796_v32  ;;  %8237 = vmatpush3.bf16.msra.mxu1 %v8682_v13  ;;  %v3798_v13 = vpack.c.bf16 %v3788_v17, %v3787_v28  ;;  %v2438_v20 = vpack.c.bf16 %v2424_v5, %v2423_v3  ;;  %v3791_v32 = vld [vmem:[#allocation3 + $0xdd] sm:$0xff]  ;;  %v2440_v28 = vpack.c.bf16 %v2428_v44, %v2427_v4 }
 0x21d   :  { %8238 = vmatprep.subr.bf16.mxu1 %v8684_v62  ;;  %8068 = vmatprep.subr.bf16.mxu0 %v8691_v43  ;;  %v3800_v33 = vpack.c.bf16 %v3792_v22, %v3791_v32  ;;  %v8694_v17 = vld [vmem:[#allocation13 + $0xb0] sm:$0xff]   ;;  %v2432_v3 = vld [vmem:[#allocation3 + $0x58] sm:$0xff] }
 0x21e   :  { %8037 = vmatmul.mubr.msk.bf16.gmra.mrb[48].mxu0 %vm174_vm3, %v2252_v58  ;;  %v2425_v58 = vld [vmem:[#allocation3 + $0x20] sm:$0xff]  ;;  %v3971_v32 = vld [vmem:[#allocation3 + $0x97] sm:$0xff] }
 0x21f   :  { %8040 = vmatprep.mubr.msk.bf16.mxu0 %vm174_vm3, %v2253_v51  ;;  %v3793_v51 = vld [vmem:[#allocation3 + $0xed] sm:$0xff]  ;;  %v2433_v44 = vld [vmem:[#allocation3 + $0x60] sm:$0xff] }
 0x220   :  { %8239 = vmatpush3.bf16.msra.mxu1 %v8684_v62  ;;  %v3799_v62 = vpack.c.bf16 %v3790_v16, %v3789_v50  ;;  %v2431_v50 = vld [vmem:[#allocation3 + $0x50] sm:$0xff] }
 0x221   :  { %8240 = vmatprep.subr.bf16.mxu1 %v8687_v34  ;;  %v8696_v16 = vld [vmem:[#allocation13 + $0xb8] sm:$0xff]   ;;  %v2442_v22 = vpack.c.bf16 %v2432_v3, %v2431_v50 }
 0x222   :  { %v3977_v3 = vld [vmem:[#allocation3 + $0xc7] sm:$0xff] }
 0x223   :  { %8225 = vmatmul.mubr.msk.bf16.gmra.mrb[44].mxu1 %vm174_vm3, %v3797_v59  ;;  %v3801_v59 = vpack.c.bf16 %v3793_v51, %v3793_v51  ;;  %v2436_v51 = vld [vmem:[#allocation3 + $0x78] sm:$0xff] }
 0x224   :  { %8228 = vmatprep.mubr.msk.bf16.mxu1 %vm174_vm3, %v3798_v13  ;;  %8241 = vmatpush3.bf16.msra.mxu1 %v8687_v34  ;;  %v2439_v34 = vpack.c.bf16 %v2426_v35, %v2425_v58  ;;  %v2429_v13 = vld [vmem:[#allocation3 + $0x40] sm:$0xff]  ;;  %v2434_v58 = vld [vmem:[#allocation3 + $0x68] sm:$0xff] }
 0x225   :  { %8242 = vmatprep.subr.bf16.mxu1 %v8689_v1  ;;  %v8692_v35 = vld [vmem:[#allocation13 + $0x88] sm:$0xff]  }
 0x226   :  { %8041 = vmatmul.mubr.msk.bf16.gmra.mrb[64].mxu0 %vm174_vm3, %v2254_v61  ;;  %v2430_v61 = vld [vmem:[#allocation3 + $0x48] sm:$0xff] }
 0x227   :  { %8052 = vmatprep.mubr.msk.bf16.mxu0 %vm174_vm3, %v2438_v20  ;;  %v2441_v5 = vpack.c.bf16 %v2430_v61, %v2429_v13  ;;  %v3972_v20 = vld [vmem:[#allocation3 + $0x9f] sm:$0xff] }
 0x228   :  { %8243 = vmatpush3.bf16.msra.mxu1 %v8689_v1  ;;  %v3984_v1 = vpack.c.bf16 %v3970_v55, %v3969_v54  ;;  %v8695_v54 = vld [vmem:[#allocation13 + $0x90] sm:$0xff]   ;;  %v3975_v55 = vld [vmem:[#allocation3 + $0xb7] sm:$0xff] }
 0x229   :  { %8260 = vmatprep.subr.bf16.mxu1 %v8690_v8  ;;  %v2437_v13 = vld [vmem:[#allocation3 + $0x80] sm:$0xff] }
 0x22a   :  { %v2445_v50 = vpack.c.bf16 %v2437_v13, %v2437_v13  ;;  %v4159_v13 = vld [vmem:[#allocation3 + $0x88] sm:$0xff] }
 0x22b   :  { %8229 = vmatmul.mubr.msk.bf16.gmra.mrb[48].mxu1 %vm174_vm3, %v3799_v62  ;;  %v3974_v62 = vld [vmem:[#allocation3 + $0xaf] sm:$0xff] }
 0x22c   :  { %8232 = vmatprep.mubr.msk.bf16.mxu1 %vm174_vm3, %v3800_v33  ;;  %v3985_v33 = vpack.c.bf16 %v3972_v20, %v3971_v32  ;;  %v2615_v20 = vld [vmem:[#allocation3 + $0x19] sm:$0xff] }
 0x22e   :  { %8053 = vmatmul.mubr.msk.bf16.vlgmr.msra.gmra.mrb[40].mxu0 %vm174_vm3, %v2439_v34  ;;  %v8699_v34 = vld [vmem:[#allocation13 + $0xc0] sm:$0xff]  }
 0x22f   :  { %8056 = vmatprep.mubr.msk.bf16.mxu0 %vm174_vm3, %v2440_v28  ;;  %8069 = vmatpush3.bf16.msra.mxu0 %v8691_v43  ;;  %v3973_v43 = vld [vmem:[#allocation3 + $0xa7] sm:$0xff]  ;;  %v2443_v28 = vpack.c.bf16 %v2434_v58, %v2433_v44 }
 0x230   :  { %8070 = vmatprep.subr.bf16.mxu0 %v8693_v49  ;;  %v3986_v4 = vpack.c.bf16 %v3974_v62, %v3973_v43  ;;  %v3979_v43 = vld [vmem:[#allocation3 + $0xd7] sm:$0xff]  ;;  %v3980_v62 = vld [vmem:[#allocation3 + $0xdf] sm:$0xff]  ;;  %v2617_v58 = vld [vmem:[#allocation3 + $0x29] sm:$0xff] }
 0x233   :  { %8233 = vmatmul.mubr.msk.bf16.gmra.mrb[60].mxu1 %vm174_vm3, %v3801_v59  ;;  %8071 = vmatpush3.bf16.msra.mxu0 %v8693_v49  ;;  %v2435_v49 = vld [vmem:[#allocation3 + $0x70] sm:$0xff]  ;;  %v3976_v59 = vld [vmem:[#allocation3 + $0xbf] sm:$0xff] }
 0x234   :  { %8244 = vmatprep.mubr.msk.bf16.mxu1 %vm174_vm3, %v3984_v1  ;;  %8072 = vmatprep.subr.bf16.mxu0 %v8694_v17  ;;  %v3978_v1 = vld [vmem:[#allocation3 + $0xcf] sm:$0xff]  ;;  %v3987_v61 = vpack.c.bf16 %v3976_v59, %v3975_v55  ;;  %v8701_v59 = vld [vmem:[#allocation13 + $0xc8] sm:$0xff]  }
 0x236   :  { %8057 = vmatmul.mubr.msk.bf16.gmra.mrb[44].mxu0 %vm174_vm3, %v2441_v5  ;;  %v8697_v5 = vld [vmem:[#allocation13 + $0x98] sm:$0xff]  }
 0x237   :  { %8060 = vmatprep.mubr.msk.bf16.mxu0 %vm174_vm3, %v2442_v22  ;;  %8073 = vmatpush3.bf16.msra.mxu0 %v8694_v17  ;;  %v2444_v17 = vpack.c.bf16 %v2436_v51, %v2435_v49  ;;  %v8698_v22 = vld [vmem:[#allocation13 + $0xa0] sm:$0xff]  }
 0x238   :  { %8074 = vmatprep.subr.bf16.mxu0 %v8696_v16  ;;  %v2618_v49 = vld [vmem:[#allocation3 + $0x31] sm:$0xff]  ;;  %v2619_v51 = vld [vmem:[#allocation3 + $0x39] sm:$0xff] }
 0x23b   :  { %8245 = vmatmul.mubr.msk.bf16.vlgmr.msra.gmra.mrb[40].mxu1 %vm174_vm3, %v3985_v33  ;;  %8075 = vmatpush3.bf16.msra.mxu0 %v8696_v16  ;;  %v2614_v16 = vld [vmem:[#allocation3 + $0x11] sm:$0xff]  ;;  %v3981_v33 = vld [vmem:[#allocation3 + $0xe7] sm:$0xff] }
 0x23c   :  { %8248 = vmatprep.mubr.msk.bf16.mxu1 %vm174_vm3, %v3986_v4  ;;  %8261 = vmatpush3.bf16.msra.mxu1 %v8690_v8  ;;  %v3988_v8 = vpack.c.bf16 %v3978_v1, %v3977_v3  ;;  %v2629_v32 = vpack.c.bf16 %v2615_v20, %v2614_v16  ;;  %v3989_v4 = vpack.c.bf16 %v3980_v62, %v3979_v43  ;;  %v8702_v3 = vld [vmem:[#allocation13 + $0xd0] sm:$0xff]   ;;  %v2623_v16 = vld [vmem:[#allocation3 + $0x59] sm:$0xff]  ;;  %v2622_v43 = vld [vmem:[#allocation3 + $0x51] sm:$0xff] }
 0x23d   :  { %8262 = vmatprep.subr.bf16.mxu1 %v8692_v35  ;;  %8092 = vmatprep.subr.bf16.mxu0 %v8699_v34  ;;  %v8704_v62 = vld [vmem:[#allocation13 + $0xd8] sm:$0xff]  }
 0x23e   :  { %8061 = vmatmul.mubr.msk.bf16.gmra.mrb[48].mxu0 %vm174_vm3, %v2443_v28  ;;  %v2616_v28 = vld [vmem:[#allocation3 + $0x21] sm:$0xff] }
 0x23f   :  { %8064 = vmatprep.mubr.msk.bf16.mxu0 %vm174_vm3, %v2444_v17  ;;  %v2630_v55 = vpack.c.bf16 %v2617_v58, %v2616_v28  ;;  %v2631_v17 = vpack.c.bf16 %v2619_v51, %v2618_v49  ;;  %v8700_v58 = vld [vmem:[#allocation13 + $0xa8] sm:$0xff]   ;;  %v2625_v28 = vld [vmem:[#allocation3 + $0x69] sm:$0xff] }
 0x240   :  { %8263 = vmatpush3.bf16.msra.mxu1 %v8692_v35  ;;  %v3982_v35 = vld [vmem:[#allocation3 + $0xef] sm:$0xff]  ;;  %v2624_v51 = vld [vmem:[#allocation3 + $0x61] sm:$0xff] }
 0x241   :  { %8264 = vmatprep.subr.bf16.mxu1 %v8695_v54  ;;  %v3990_v44 = vpack.c.bf16 %v3982_v35, %v3981_v33  ;;  %v2633_v33 = vpack.c.bf16 %v2623_v16, %v2622_v43  ;;  %v4164_v35 = vld [vmem:[#allocation3 + $0xb0] sm:$0xff]  ;;  %v4167_v16 = vld [vmem:[#allocation3 + $0xc8] sm:$0xff] }
 0x243   :  { %8249 = vmatmul.mubr.msk.bf16.gmra.mrb[44].mxu1 %vm174_vm3, %v3987_v61  ;;  %v4160_v61 = vld [vmem:[#allocation3 + $0x90] sm:$0xff] }
 0x244   :  { %8252 = vmatprep.mubr.msk.bf16.mxu1 %vm174_vm3, %v3988_v8  ;;  %8265 = vmatpush3.bf16.msra.mxu1 %v8695_v54  ;;  %v3983_v54 = vld [vmem:[#allocation3 + $0xf7] sm:$0xff]  ;;  %v2620_v8 = vld [vmem:[#allocation3 + $0x41] sm:$0xff] }
 0x245   :  { %8266 = vmatprep.subr.bf16.mxu1 %v8697_v5  ;;  %v3991_v1 = vpack.c.bf16 %v3983_v54, %v3983_v54  ;;  %v8707_v54 = vld [vmem:[#allocation13 + $0xe0] sm:$0xff]  }
 0x246   :  { %8065 = vmatmul.mubr.msk.bf16.gmra.mrb[68].mxu0 %vm174_vm3, %v2445_v50  ;;  %v2621_v50 = vld [vmem:[#allocation3 + $0x49] sm:$0xff] }
 0x247   :  { %8076 = vmatprep.mubr.msk.bf16.mxu0 %vm174_vm3, %v2629_v32  ;;  %v2632_v20 = vpack.c.bf16 %v2621_v50, %v2620_v8  ;;  %v4162_v32 = vld [vmem:[#allocation3 + $0xa0] sm:$0xff] }
 0x248   :  { %8267 = vmatpush3.bf16.msra.mxu1 %v8697_v5  ;;  %v4174_v5 = vpack.c.bf16 %v4160_v61, %v4159_v13  ;;  %v4165_v13 = vld [vmem:[#allocation3 + $0xb8] sm:$0xff]  ;;  %v4166_v61 = vld [vmem:[#allocation3 + $0xc0] sm:$0xff] }
 0x249   :  { %8284 = vmatprep.subr.bf16.mxu1 %v8698_v22  ;;  %v2628_v8 = vld [vmem:[#allocation3 + $0x81] sm:$0xff]  ;;  %v4177_v50 = vpack.c.bf16 %v4166_v61, %v4165_v13  ;;  %v2827_v13 = vpack.c.bf16 %v9664_v38, %v9664_v38 }
 0x24a   :  { %v2636_v43 = vpack.c.bf16 %v2628_v8, %v2628_v8  ;;  %v2997_v61 = vld [vmem:[#allocation3 + $0x24] sm:$0xff]  ;;  %v4362_v8 = vld [vmem:[#allocation3 + $0xf1] sm:$0xff] }
 0x24b   :  { %8253 = vmatmul.mubr.msk.bf16.gmra.mrb[48].mxu1 %vm174_vm3, %v3989_v4  ;;  %v4161_v4 = vld [vmem:[#allocation3 + $0x98] sm:$0xff] }
 0x24c   :  { %8256 = vmatprep.mubr.msk.bf16.mxu1 %vm174_vm3, %v3990_v44  ;;  %v4175_v44 = vpack.c.bf16 %v4162_v32, %v4161_v4  ;;  %v4169_v32 = vld [vmem:[#allocation3 + $0xd8] sm:$0xff] }
 0x24e   :  { %8077 = vmatmul.mubr.msk.bf16.vlgmr.msra.gmra.mrb[40].mxu0 %vm174_vm3, %v2630_v55  ;;  %v2626_v55 = vld [vmem:[#allocation3 + $0x71] sm:$0xff] }
 0x24f   :  { %8080 = vmatprep.mubr.msk.bf16.mxu0 %vm174_vm3, %v2631_v17  ;;  %8093 = vmatpush3.bf16.msra.mxu0 %v8699_v34  ;;  %v4163_v34 = vld [vmem:[#allocation3 + $0xa8] sm:$0xff]  ;;  %v2634_v17 = vpack.c.bf16 %v2625_v28, %v2624_v51 }
 0x250   :  { %8094 = vmatprep.subr.bf16.mxu0 %v8701_v59  ;;  %v4176_v49 = vpack.c.bf16 %v4164_v35, %v4163_v34  ;;  %v4171_v34 = vld [vmem:[#allocation3 + $0xe8] sm:$0xff]  ;;  %v4172_v35 = vld [vmem:[#allocation3 + $0xf0] sm:$0xff] }
 0x251   :  { %v4349_v28 = vld [vmem:[#allocation3 + $0x89] sm:$0xff] }
 0x253   :  { %8257 = vmatmul.mubr.msk.bf16.gmra.mrb[64].mxu1 %vm174_vm3, %v3991_v1  ;;  %8095 = vmatpush3.bf16.msra.mxu0 %v8701_v59  ;;  %v2627_v59 = vld [vmem:[#allocation3 + $0x79] sm:$0xff]  ;;  %v8703_v1 = vld [vmem:[#allocation13 + $0xb0] sm:$0xff]  }
 0x254   :  { %8268 = vmatprep.mubr.msk.bf16.mxu1 %vm174_vm3, %v4174_v5  ;;  %8096 = vmatprep.subr.bf16.mxu0 %v8702_v3  ;;  %v4168_v5 = vld [vmem:[#allocation3 + $0xd0] sm:$0xff] }
 0x256   :  { %8081 = vmatmul.mubr.msk.bf16.gmra.mrb[44].mxu0 %vm174_vm3, %v2632_v20  ;;  %v8705_v20 = vld [vmem:[#allocation13 + $0xb8] sm:$0xff]  }
 0x257   :  { %8084 = vmatprep.mubr.msk.bf16.mxu0 %vm174_vm3, %v2633_v33  ;;  %8097 = vmatpush3.bf16.msra.mxu0 %v8702_v3  ;;  %v2635_v3 = vpack.c.bf16 %v2627_v59, %v2626_v55  ;;  %v4170_v33 = vld [vmem:[#allocation3 + $0xe0] sm:$0xff]  ;;  %v8715_v59 = vld [vmem:[#allocation13 + $0x100] sm:$0xff]  }
 0x258   :  { %8098 = vmatprep.subr.bf16.mxu0 %v8704_v62  ;;  %v4179_v4 = vpack.c.bf16 %v4170_v33, %v4169_v32  ;;  %v8717_v33 = vld [vmem:[#allocation13 + $0x108] sm:$0xff]  }
 0x25b   :  { %8269 = vmatmul.mubr.msk.bf16.vlgmr.msra.gmra.mrb[40].mxu1 %vm174_vm3, %v4175_v44  ;;  %8099 = vmatpush3.bf16.msra.mxu0 %v8704_v62  ;;  %v8706_v62 = vld [vmem:[#allocation13 + $0xc0] sm:$0xff]   ;;  %v4180_v44 = vpack.c.bf16 %v4172_v35, %v4171_v34 }
 0x25c   :  { %8272 = vmatprep.mubr.msk.bf16.mxu1 %vm174_vm3, %v4176_v49  ;;  %8285 = vmatpush3.bf16.msra.mxu1 %v8698_v22  ;;  %v4178_v22 = vpack.c.bf16 %v4168_v5, %v4167_v16  ;;  %v8709_v49 = vld [vmem:[#allocation13 + $0xe8] sm:$0xff]   ;;  %v4361_v5 = vld [vmem:[#allocation3 + $0xe9] sm:$0xff] }
 0x25d   :  { %8286 = vmatprep.subr.bf16.mxu1 %v8700_v58  ;;  %8116 = vmatprep.subr.bf16.mxu0 %v8707_v54  ;;  %v4370_v38 = vpack.c.bf16 %v4362_v8, %v4361_v5  ;;  %v2999_v16 = vld [vmem:[#allocation3 + $0x34] sm:$0xff] }
 0x25e   :  { %8085 = vmatmul.mubr.msk.bf16.gmra.mrb[48].mxu0 %vm174_vm3, %v2634_v17  ;;  %v8713_v17 = vld [vmem:[#allocation13 + $0xd8] sm:$0xff]   ;;  %v8723_v8 = vld [vmem:[#allocation13 + $0x108] sm:$0xff]  }
 0x25f   :  { %8088 = vmatprep.mubr.msk.bf16.mxu0 %vm174_vm3, %v2635_v3  ;;  %v4360_v3 = vld [vmem:[#allocation3 + $0xe1] sm:$0xff] }
 0x260   :  { %8287 = vmatpush3.bf16.msra.mxu1 %v8700_v58  ;;  %v4173_v58 = vld [vmem:[#allocation3 + $0xf8] sm:$0xff] }
 0x261   :  { %8288 = vmatprep.subr.bf16.mxu1 %v8703_v1  ;;  %v4181_v51 = vpack.c.bf16 %v4173_v58, %v4173_v58  ;;  %v3005_v58 = vld [vmem:[#allocation3 + $0x64] sm:$0xff] }
 0x263   :  { %8273 = vmatmul.mubr.msk.bf16.gmra.mrb[44].mxu1 %vm174_vm3, %v4177_v50 }
 0x264   :  { %8276 = vmatprep.mubr.msk.bf16.mxu1 %vm174_vm3, %v4178_v22  ;;  %8289 = vmatpush3.bf16.msra.mxu1 %v8703_v1  ;;  %v3001_v22 = vld [vmem:[#allocation3 + $0x44] sm:$0xff] }
 0x265   :  { %8290 = vmatprep.subr.bf16.mxu1 %v8705_v20 }
 0x266   :  { %8089 = vmatmul.mubr.msk.bf16.gmra.mrb[72].mxu0 %vm174_vm3, %v2636_v43  ;;  %v2998_v43 = vld [vmem:[#allocation3 + $0x2c] sm:$0xff] }
 0x267   :  { %8100 = vmatprep.mubr.msk.bf16.mxu0 %vm174_vm3, %v2820_v27  ;;  %v4364_v27 = vpack.c.bf16 %v4350_v18, %v4349_v28  ;;  %v3012_v32 = vpack.c.bf16 %v2999_v16, %v2998_v43  ;;  %v3004_v28 = vld [vmem:[#allocation3 + $0x5c] sm:$0xff]  ;;  %v8720_v18 = vld [vmem:[#allocation13 + $0x118] sm:$0xff]  }
 0x268   :  { %8291 = vmatpush3.bf16.msra.mxu1 %v8705_v20  ;;  %v3000_v20 = vld [vmem:[#allocation3 + $0x3c] sm:$0xff] }
 0x269   :  { %8308 = vmatprep.subr.bf16.mxu1 %v8706_v62  ;;  %v3013_v34 = vpack.c.bf16 %v3001_v22, %v3000_v20  ;;  %v3197_v22 = vld [vmem:[#allocation3 + $0x6d] sm:$0xff]  ;;  %v3198_v43 = vld [vmem:[#allocation3 + $0x75] sm:$0xff] }
 0x26b   :  { %8277 = vmatmul.mubr.msk.bf16.gmra.mrb[48].mxu1 %vm174_vm3, %v4179_v4  ;;  %v8718_v4 = vld [vmem:[#allocation13 + $0x110] sm:$0xff]  }
 0x26c   :  { %8280 = vmatprep.mubr.msk.bf16.mxu1 %vm174_vm3, %v4180_v44  ;;  %v3003_v44 = vld [vmem:[#allocation3 + $0x54] sm:$0xff] }
 0x26e   :  { %8101 = vmatmul.mubr.msk.bf16.vlgmr.msra.gmra.mrb[40].mxu0 %vm174_vm3, %v2821_v42  ;;  %v4353_v42 = vld [vmem:[#allocation3 + $0xa9] sm:$0xff] }
 0x26f   :  { %8104 = vmatprep.mubr.msk.bf16.mxu0 %vm174_vm3, %v2822_v63  ;;  %8117 = vmatpush3.bf16.msra.mxu0 %v8707_v54  ;;  %v4365_v63 = vpack.c.bf16 %v4352_v30, %v4351_v15  ;;  %v8708_v54 = vld [vmem:[#allocation13 + $0xc8] sm:$0xff]   ;;  %v4366_v55 = vpack.c.bf16 %v4354_v14, %v4353_v42  ;;  %v3009_v30 = vld [vmem:[#allocation3 + $0x84] sm:$0xff] }
 0x270   :  { %8118 = vmatprep.subr.bf16.mxu0 %v8709_v49 }
 0x273   :  { %8281 = vmatmul.mubr.msk.bf16.gmra.mrb[68].mxu1 %vm174_vm3, %v4181_v51  ;;  %8119 = vmatpush3.bf16.msra.mxu0 %v8709_v49  ;;  %v3002_v49 = vld [vmem:[#allocation3 + $0x4c] sm:$0xff] }
 0x274   :  { %8292 = vmatprep.mubr.msk.bf16.mxu1 %vm174_vm3, %v4364_v27  ;;  %8120 = vmatprep.subr.bf16.mxu0 %v8710_v19  ;;  %v3014_v51 = vpack.c.bf16 %v3003_v44, %v3002_v49  ;;  %v8716_v27 = vld [vmem:[#allocation13 + $0xe8] sm:$0xff]   ;;  %v8724_v44 = vld [vmem:[#allocation13 + $0x110] sm:$0xff]   ;;  %v4736_v49 = vld [vmem:[#allocation3 + $0xcc] sm:$0xff] }
 0x276   :  { %8105 = vmatmul.mubr.msk.bf16.gmra.mrb[44].mxu0 %vm174_vm3, %v2823_v12  ;;  %v4356_v12 = vld [vmem:[#allocation3 + $0xc1] sm:$0xff] }
 0x277   :  { %8108 = vmatprep.mubr.msk.bf16.mxu0 %vm174_vm3, %v2824_v45  ;;  %8121 = vmatpush3.bf16.msra.mxu0 %v8710_v19  ;;  %v4367_v41 = vpack.c.bf16 %v4356_v12, %v4355_v9  ;;  %v4357_v45 = vld [vmem:[#allocation3 + $0xc9] sm:$0xff]  ;;  %v3015_v19 = vpack.c.bf16 %v3005_v58, %v3004_v28  ;;  %v3202_v9 = vpack.c.bf16 %v3188_v21, %v3187_v26  ;;  %v4920_v26 = vld [vmem:[#allocation3 + $0x9d] sm:$0xff] }
 0x278   :  { %8122 = vmatprep.subr.bf16.mxu0 %v8712_v29  ;;  %v4368_v1 = vpack.c.bf16 %v4358_v31, %v4357_v45  ;;  %v3203_v12 = vpack.c.bf16 %v3190_v10, %v3189_v48  ;;  %v4730_v45 = vld [vmem:[#allocation3 + $0x9c] sm:$0xff]  ;;  %v4735_v28 = vld [vmem:[#allocation3 + $0xc4] sm:$0xff] }
 0x279   :  { %v4921_v10 = vld [vmem:[#allocation3 + $0xa5] sm:$0xff] }
 0x27b   :  { %8293 = vmatmul.mubr.msk.bf16.vlgmr.msra.gmra.mrb[40].mxu1 %vm174_vm3, %v4365_v63  ;;  %8123 = vmatpush3.bf16.msra.mxu0 %v8712_v29  ;;  %v3008_v29 = vld [vmem:[#allocation3 + $0x7c] sm:$0xff] }
 0x27c   :  { %8296 = vmatprep.mubr.msk.bf16.mxu1 %vm174_vm3, %v4366_v55  ;;  %8309 = vmatpush3.bf16.msra.mxu1 %v8706_v62  ;;  %v4363_v62 = vld [vmem:[#allocation3 + $0xf9] sm:$0xff]  ;;  %v3017_v15 = vpack.c.bf16 %v3009_v30, %v3008_v29  ;;  %v8719_v55 = vld [vmem:[#allocation13 + $0xf0] sm:$0xff]   ;;  %v8725_v29 = vld [vmem:[#allocation13 + $0x118] sm:$0xff]  }
 0x27d   :  { %8310 = vmatprep.subr.bf16.mxu1 %v8708_v54  ;;  %8140 = vmatprep.subr.bf16.mxu0 %v8715_v59  ;;  %v4371_v35 = vpack.c.bf16 %v4363_v62, %v4363_v62 }
 0x27e   :  { %8109 = vmatmul.mubr.msk.bf16.gmra.mrb[48].mxu0 %vm174_vm3, %v2825_v0  ;;  %v4359_v0 = vld [vmem:[#allocation3 + $0xd9] sm:$0xff] }
 0x27f   :  { %8112 = vmatprep.mubr.msk.bf16.mxu0 %vm174_vm3, %v9659_v11  ;;  %v3011_v11 = vpack.c.bf16 %v2997_v61, %v2996_v24  ;;  %v4369_v50 = vpack.c.bf16 %v4360_v3, %v4359_v0  ;;  %v3195_v61 = vld [vmem:[#allocation3 + $0x5d] sm:$0xff]  ;;  %v4732_v24 = vld [vmem:[#allocation3 + $0xac] sm:$0xff]  ;;  %v4733_v0 = vld [vmem:[#allocation3 + $0xb4] sm:$0xff] }
 0x280   :  { %8311 = vmatpush3.bf16.msra.mxu1 %v8708_v54  ;;  %v3016_v54 = vpack.c.bf16 %v3007_v60, %v3006_v53  ;;  %v4734_v3 = vld [vmem:[#allocation3 + $0xbc] sm:$0xff]  ;;  %v4741_v53 = vld [vmem:[#allocation3 + $0xf4] sm:$0xff] }
 0x281   :  { %8312 = vmatprep.subr.bf16.mxu1 %v8711_v57  ;;  %v4746_v16 = vpack.c.bf16 %v4734_v3, %v4733_v0  ;;  %v4742_v60 = vld [vmem:[#allocation3 + $0xfc] sm:$0xff]  ;;  %v4929_v0 = vld [vmem:[#allocation3 + $0xe5] sm:$0xff]  ;;  %v4930_v3 = vld [vmem:[#allocation3 + $0xed] sm:$0xff] }
 0x283   :  { %8297 = vmatmul.mubr.msk.bf16.gmra.mrb[44].mxu1 %vm174_vm3, %v4367_v41 }
 0x284   :  { %8300 = vmatprep.mubr.msk.bf16.mxu1 %vm174_vm3, %v4368_v1  ;;  %8313 = vmatpush3.bf16.msra.mxu1 %v8711_v57  ;;  %v8722_v57 = vld [vmem:[#allocation13 + $0x100] sm:$0xff]  }
 0x285   :  { %8314 = vmatprep.subr.bf16.mxu1 %v8713_v17 }
 0x286   :  { %8113 = vmatmul.mubr.msk.bf16.gmra.mrb[76].mxu0 %vm174_vm3, %v2827_v13  ;;  %v3194_v13 = vld [vmem:[#allocation3 + $0x55] sm:$0xff] }
 0x287   :  { %8124 = vmatprep.mubr.msk.bf16.mxu0 %vm174_vm3, %v3011_v11  ;;  %v4731_v11 = vld [vmem:[#allocation3 + $0xa4] sm:$0xff] }
 0x288   :  { %8315 = vmatpush3.bf16.msra.mxu1 %v8713_v17  ;;  %v4729_v17 = vld [vmem:[#allocation3 + $0x94] sm:$0xff]  ;;  %v4745_v5 = vpack.c.bf16 %v4732_v24, %v4731_v11  ;;  %v4932_v24 = vld [vmem:[#allocation3 + $0xfd] sm:$0xff] }
 0x289   :  { %8332 = vmatprep.subr.bf16.mxu1 %v8714_v25  ;;  %v4744_v1 = vpack.c.bf16 %v4730_v45, %v4729_v17  ;;  %v4926_v17 = vld [vmem:[#allocation3 + $0xcd] sm:$0xff] }
 0x28b   :  { %8301 = vmatmul.mubr.msk.bf16.gmra.mrb[48].mxu1 %vm174_vm3, %v4369_v50  ;;  %v3199_v50 = vld [vmem:[#allocation3 + $0x7d] sm:$0xff] }
 0x28c   :  { %8304 = vmatprep.mubr.msk.bf16.mxu1 %vm174_vm3, %v4370_v38  ;;  %v3200_v38 = vld [vmem:[#allocation3 + $0x85] sm:$0xff] }
 0x28e   :  { %8125 = vmatmul.mubr.msk.bf16.vlgmr.msra.gmra.mrb[40].mxu0 %vm174_vm3, %v3012_v32 }
 0x28f   :  { %8128 = vmatprep.mubr.msk.bf16.mxu0 %vm174_vm3, %v3013_v34  ;;  %8141 = vmatpush3.bf16.msra.mxu0 %v8715_v59  ;;  %v4552_v59 = vld [vmem:[#allocation3 + $0xfb] sm:$0xff]  ;;  %v3208_v34 = vpack.c.bf16 %v3200_v38, %v3199_v50 }
 0x290   :  { %8142 = vmatprep.subr.bf16.mxu0 %v8717_v33 }
 0x293   :  { %8305 = vmatmul.mubr.msk.bf16.gmra.mrb[72].mxu1 %vm174_vm3, %v4371_v35  ;;  %8143 = vmatpush3.bf16.msra.mxu0 %v8717_v33 }
 0x294   :  { %8316 = vmatprep.mubr.msk.bf16.mxu1 %vm174_vm3, %v4554_v7  ;;  %8144 = vmatprep.subr.bf16.mxu0 %v8718_v4  ;;  %v7970_v42 = vpop.f32.mrb[52].mxu0 }
 0x295   :  { %v9791_v7 = vpop.f32.mrb[53].mxu0 }
 0x296   :  { %8129 = vmatmul.mubr.msk.bf16.gmra.mrb[44].mxu0 %vm174_vm3, %v3014_v51  ;;  %v7971_v14 = vpop.f32.mrb[54].mxu0  ;;  %v4738_v51 = vld [vmem:[#allocation3 + $0xdc] sm:$0xff] }
 0x297   :  { %8132 = vmatprep.mubr.msk.bf16.mxu0 %vm174_vm3, %v3015_v19  ;;  %8145 = vmatpush3.bf16.msra.mxu0 %v8718_v4  ;;  %v9797_v63 = vpop.f32.mrb[55].mxu0  ;;  %v3207_v4 = vpack.c.bf16 %v3198_v43, %v3197_v22  ;;  %v4747_v19 = vpack.c.bf16 %v4736_v49, %v4735_v28  ;;  %v4739_v14 = vld [vmem:[#allocation3 + $0xe4] sm:$0xff] }
 0x298   :  { %8146 = vmatprep.subr.bf16.mxu0 %v8720_v18  ;;  %v4933_v22 = vld [vmem:[#allocation3 + $0x105] sm:$0xff] }
 0x299   :  { %v4941_v43 = vpack.c.bf16 %v4933_v22, %v4933_v22 }
 0x29b   :  { %8317 = vmatmul.mubr.msk.bf16.vlgmr.msra.gmra.mrb[40].mxu1 %vm174_vm3, %v4555_v52  ;;  %8147 = vmatpush3.bf16.msra.mxu0 %v8720_v18  ;;  %v3018_v52 = vpack.c.bf16 %v3010_v40, %v3010_v40  ;;  %v3201_v18 = vld [vmem:[#allocation3 + $0x8d] sm:$0xff] }
 0x29c   :  { %8320 = vmatprep.mubr.msk.bf16.mxu1 %vm174_vm3, %v4556_v37  ;;  %8333 = vmatpush3.bf16.msra.mxu1 %v8714_v25  ;;  %v4551_v37 = vld [vmem:[#allocation3 + $0xf3] sm:$0xff]  ;;  %v3206_v25 = vpack.c.bf16 %v3196_v23, %v3195_v61  ;;  %v3209_v42 = vpack.c.bf16 %v3201_v18, %v3201_v18 }
 0x29d   :  { %8334 = vmatprep.subr.bf16.mxu1 %v8716_v27  ;;  %v4560_v6 = vpack.c.bf16 %v4552_v59, %v4551_v37  ;;  %v4919_v37 = vld [vmem:[#allocation3 + $0x95] sm:$0xff] }
 0x29e   :  { %8133 = vmatmul.mubr.msk.bf16.gmra.mrb[48].mxu0 %vm174_vm3, %v3016_v54  ;;  %v4934_v59 = vpack.c.bf16 %v4920_v26, %v4919_v37  ;;  %v4931_v61 = vld [vmem:[#allocation3 + $0xf5] sm:$0xff] }
 0x29f   :  { %8136 = vmatprep.mubr.msk.bf16.mxu0 %vm174_vm3, %v3017_v15  ;;  %v4740_v15 = vld [vmem:[#allocation3 + $0xec] sm:$0xff]  ;;  %v4940_v50 = vpack.c.bf16 %v4932_v24, %v4931_v61 }
 0x2a0   :  { %8335 = vmatpush3.bf16.msra.mxu1 %v8716_v27  ;;  %v4737_v27 = vld [vmem:[#allocation3 + $0xd4] sm:$0xff] }
 0x2a1   :  { %8336 = vmatprep.subr.bf16.mxu1 %v8719_v55  ;;  %v4748_v30 = vpack.c.bf16 %v4738_v51, %v4737_v27 }
 0x2a3   :  { %8321 = vmatmul.mubr.msk.bf16.gmra.mrb[44].mxu1 %vm174_vm3, %v4557_v2  ;;  %v3191_v2 = vld [vmem:[#allocation3 + $0x3d] sm:$0xff] }
 0x2a4   :  { %8324 = vmatprep.mubr.msk.bf16.mxu1 %vm174_vm3, %v4558_v56  ;;  %8337 = vmatpush3.bf16.msra.mxu1 %v8719_v55  ;;  %v4553_v56 = vld [vmem:[#allocation3 + $0x103] sm:$0xff]  ;;  %v3204_v31 = vpack.c.bf16 %v3192_v47, %v3191_v2  ;;  %v4750_v55 = vpack.c.bf16 %v4742_v60, %v4741_v53 }
 0x2a5   :  { %8338 = vmatprep.subr.bf16.mxu1 %v8721_v46  ;;  %v4561_v41 = vpack.c.bf16 %v4553_v56, %v4553_v56 }
 0x2a6   :  { %8137 = vmatmul.mubr.msk.bf16.gmra.mrb[80].mxu0 %vm174_vm3, %v3018_v52  ;;  %v4743_v52 = vld [vmem:[#allocation3 + $0x104] sm:$0xff] }
 0x2a7   :  { %8148 = vmatprep.mubr.msk.bf16.mxu0 %vm174_vm3, %v3202_v9  ;;  %v4751_v21 = vpack.c.bf16 %v4743_v52, %v4743_v52  ;;  %v4923_v9 = vld [vmem:[#allocation3 + $0xb5] sm:$0xff] }
 0x2a8   :  { %8339 = vmatpush3.bf16.msra.mxu1 %v8721_v46  ;;  %v4749_v46 = vpack.c.bf16 %v4740_v15, %v4739_v14 }
 0x2a9   :  { %8356 = vmatprep.subr.bf16.mxu1 %v8722_v57 }
 0x2ab   :  { %8325 = vmatmul.mubr.msk.bf16.gmra.mrb[48].mxu1 %vm174_vm3, %v4559_v39  ;;  %v3205_v39 = vpack.c.bf16 %v3194_v13, %v3193_v36  ;;  %v4925_v13 = vld [vmem:[#allocation3 + $0xc5] sm:$0xff]  ;;  %v4927_v36 = vld [vmem:[#allocation3 + $0xd5] sm:$0xff] }
 0x2ac   :  { %8328 = vmatprep.mubr.msk.bf16.mxu1 %vm174_vm3, %v4560_v6  ;;  %v4924_v6 = vld [vmem:[#allocation3 + $0xbd] sm:$0xff]  ;;  %v4937_v23 = vpack.c.bf16 %v4926_v17, %v4925_v13 }
 0x2ad   :  { %v4936_v47 = vpack.c.bf16 %v4924_v6, %v4923_v9 }
 0x2ae   :  { %8149 = vmatmul.mubr.msk.bf16.vlgmr.msra.gmra.mrb[40].mxu0 %vm174_vm3, %v3203_v12 }
 0x2af   :  { %8152 = vmatprep.mubr.msk.bf16.mxu0 %vm174_vm3, %v3204_v31 }
 0x2b3   :  { %8329 = vmatmul.mubr.msk.bf16.gmra.mrb[76].mxu1 %vm174_vm3, %v4561_v41 }
 0x2b4   :  { %8340 = vmatprep.mubr.msk.bf16.mxu1 %vm174_vm3, %v4744_v1  ;;  %v4928_v1 = vld [vmem:[#allocation3 + $0xdd] sm:$0xff] }
 0x2b6   :  { %8153 = vmatmul.mubr.msk.bf16.gmra.mrb[44].mxu0 %vm174_vm3, %v3205_v39  ;;  %v4938_v39 = vpack.c.bf16 %v4928_v1, %v4927_v36 }
 0x2b7   :  { %8156 = vmatprep.mubr.msk.bf16.mxu0 %vm174_vm3, %v3206_v25 }
 0x2b9   :  { %v7994_v20 = vpop.f32.mrb[56].mxu0 }
 0x2ba   :  { %v2027_v62 = vpop.f32.mrb[57].mxu0 }
 0x2bb   :  { %8341 = vmatmul.mubr.msk.bf16.vlgmr.msra.gmra.mrb[40].mxu1 %vm174_vm3, %v4745_v5  ;;  %v2028_v32 = vadd.f32 %v2027_v62, %v9791_v7  ;;  %v7995_v33 = vpop.f32.mrb[58].mxu0 }
 0x2bc   :  { %8344 = vmatprep.mubr.msk.bf16.mxu1 %vm174_vm3, %v4746_v16  ;;  %8357 = vmatpush3.bf16.msra.mxu1 %v8722_v57  ;;  %v2030_v35 = vpop.f32.mrb[59].mxu0  ;;  %v4922_v57 = vld [vmem:[#allocation3 + $0xad] sm:$0xff]  ;;  %v4939_v16 = vpack.c.bf16 %v4930_v3, %v4929_v0 }
 0x2bd   :  { %8358 = vmatprep.subr.bf16.mxu1 %v8723_v8  ;;  %v2031_v58 = vadd.f32 %v2030_v35, %v9797_v63  ;;  %v4935_v2 = vpack.c.bf16 %v4922_v57, %v4921_v10  ;;  %v9842_v3 = vld [vmem:[#allocation14] ss:$0 sm:$0xff] }
 0x2be   :  { %8157 = vmatmul.mubr.msk.bf16.gmra.mrb[48].mxu0 %vm174_vm3, %v3207_v4 }
 0x2bf   :  { %8160 = vmatprep.mubr.msk.bf16.mxu0 %vm174_vm3, %v3208_v34 }
 0x2c0   :  { %8359 = vmatpush3.bf16.msra.mxu1 %v8723_v8 }
 0x2c1   :  { %8360 = vmatprep.subr.bf16.mxu1 %v8724_v44 }
 0x2c3   :  { %8345 = vmatmul.mubr.msk.bf16.gmra.mrb[44].mxu1 %vm174_vm3, %v4747_v19 }
 0x2c4   :  { %8348 = vmatprep.mubr.msk.bf16.mxu1 %vm174_vm3, %v4748_v30  ;;  %8361 = vmatpush3.bf16.msra.mxu1 %v8724_v44 }
 0x2c5   :  { %8362 = vmatprep.subr.bf16.mxu1 %v8725_v29 }
 0x2c6   :  { %v8186_v7 = vpop.f32.mrb[52].mxu1  ;;  %8161 = vmatmul.mubr.msk.bf16.gmra.mrb[84].mxu0 %vm174_vm3, %v3209_v42 }
 0x2c7   :  { %v3621_v63 = vpop.f32.mrb[53].mxu1 }
 0x2c8   :  { %v8187_v54 = vpop.f32.mrb[54].mxu1  ;;  %8363 = vmatpush3.bf16.msra.mxu1 %v8725_v29 }
 0x2c9   :  { %v3624_v40 = vpop.f32.mrb[55].mxu1 }
 0x2cb   :  { %8349 = vmatmul.mubr.msk.bf16.gmra.mrb[48].mxu1 %vm174_vm3, %v4749_v46 }
 0x2cc   :  { %8352 = vmatprep.mubr.msk.bf16.mxu1 %vm174_vm3, %v4750_v55 }
 0x2d3   :  { %8353 = vmatmul.mubr.msk.bf16.gmra.mrb[80].mxu1 %vm174_vm3, %v4751_v21 }
 0x2d4   :  { %8364 = vmatprep.mubr.msk.bf16.mxu1 %vm174_vm3, %v4934_v59 }
 0x2d9   :  { %v8018_v48 = vpop.f32.mrb[60].mxu0 }
 0x2da   :  { %v2203_v56 = vpop.f32.mrb[61].mxu0 }
 0x2db   :  { %8365 = vmatmul.mubr.msk.bf16.vlgmr.msra.gmra.mrb[40].mxu1 %vm174_vm3, %v4935_v2  ;;  %v2229_v12 = vadd.f32 %v2203_v56, %v2028_v32  ;;  %v8019_v31 = vpop.f32.mrb[62].mxu0 }
 0x2dc   :  { %8368 = vmatprep.mubr.msk.bf16.mxu1 %vm174_vm3, %v4936_v47  ;;  %v2206_v41 = vpop.f32.mrb[63].mxu0 }
 0x2dd   :  { %v2230_v45 = vadd.f32 %v2206_v41, %v2031_v58 }
 0x2e3   :  { %8369 = vmatmul.mubr.msk.bf16.gmra.mrb[44].mxu1 %vm174_vm3, %v4937_v23 }
 0x2e4   :  { %8372 = vmatprep.mubr.msk.bf16.mxu1 %vm174_vm3, %v4938_v39 }
 0x2e6   :  { %v8210_v25 = vpop.f32.mrb[56].mxu1 }
 0x2e7   :  { %v3765_v11 = vpop.f32.mrb[57].mxu1 }
 0x2e8   :  { %v3766_v5 = vadd.f32 %v3765_v11, %v3621_v63  ;;  %v8211_v8 = vpop.f32.mrb[58].mxu1 }
 0x2e9   :  { %v3768_v38 = vpop.f32.mrb[59].mxu1 }
 0x2ea   :  { %v3769_v20 = vadd.f32 %v3768_v38, %v3624_v40 }
 0x2eb   :  { %8373 = vmatmul.mubr.msk.bf16.gmra.mrb[48].mxu1 %vm174_vm3, %v4939_v16 }
 0x2ec   :  { %8376 = vmatprep.mubr.msk.bf16.mxu1 %vm174_vm3, %v4940_v50 }
 0x2f3   :  { %8377 = vmatmul.mubr.msk.bf16.gmra.mrb[84].mxu1 %vm174_vm3, %v4941_v43 }
 0x2f9   :  { %v8042_v62 = vpop.f32.mrb[64].mxu0 }
 0x2fa   :  { %v2394_v32 = vpop.f32.mrb[65].mxu0 }
 0x2fb   :  { %v2420_v33 = vadd.f32 %v2394_v32, %v2229_v12  ;;  %v8043_v34 = vpop.f32.mrb[66].mxu0 }
 0x2fc   :  { %v2397_v35 = vpop.f32.mrb[67].mxu0 }
 0x2fd   :  { %v2421_v4 = vadd.f32 %v2397_v35, %v2230_v45 }
 0x306   :  { %v8234_v44 = vpop.f32.mrb[60].mxu1 }
 0x307   :  { %v3940_v58 = vpop.f32.mrb[61].mxu1 }
 0x308   :  { %v3966_v49 = vadd.f32 %v3940_v58, %v3766_v5  ;;  %v8235_v51 = vpop.f32.mrb[62].mxu1 }
 0x309   :  { %v3943_v28 = vpop.f32.mrb[63].mxu1 }
 0x30a   :  { %v3967_v18 = vadd.f32 %v3943_v28, %v3769_v20 }
 0x319   :  { %v8066_v19 = vpop.f32.mrb[68].mxu0 }
 0x31a   :  { %v2585_v27 = vpop.f32.mrb[69].mxu0 }
 0x31b   :  { %v2611_v29 = vadd.f32 %v2585_v27, %v2420_v33  ;;  %v8067_v30 = vpop.f32.mrb[70].mxu0 }
 0x31c   :  { %v2588_v42 = vpop.f32.mrb[71].mxu0 }
 0x31d   :  { %v2612_v53 = vadd.f32 %v2588_v42, %v2421_v4 }
 0x326   :  { %v8258_v60 = vpop.f32.mrb[64].mxu1 }
 0x327   :  { %v4130_v7 = vpop.f32.mrb[65].mxu1 }
 0x328   :  { %v4156_v14 = vadd.f32 %v4130_v7, %v3966_v49  ;;  %v8259_v15 = vpop.f32.mrb[66].mxu1 }
 0x329   :  { %v4133_v63 = vpop.f32.mrb[67].mxu1 }
 0x32a   :  { %v4157_v54 = vadd.f32 %v4133_v63, %v3967_v18 }
 0x339   :  { %v8090_v55 = vpop.f32.mrb[72].mxu0 }
 0x33a   :  { %v2776_v40 = vpop.f32.mrb[73].mxu0 }
 0x33b   :  { %v2802_v46 = vadd.f32 %v2776_v40, %v2611_v29  ;;  %v8091_v52 = vpop.f32.mrb[74].mxu0 }
 0x33c   :  { %v2779_v21 = vpop.f32.mrb[75].mxu0 }
 0x33d   :  { %v2803_v26 = vadd.f32 %v2779_v21, %v2612_v53 }
 0x346   :  { %v8282_v37 = vpop.f32.mrb[68].mxu1 }
 0x347   :  { %v4320_v59 = vpop.f32.mrb[69].mxu1 }
 0x348   :  { %v4346_v57 = vadd.f32 %v4320_v59, %v4156_v14  ;;  %v8283_v9 = vpop.f32.mrb[70].mxu1 }
 0x349   :  { %v4323_v6 = vpop.f32.mrb[71].mxu1 }
 0x34a   :  { %v4347_v10 = vadd.f32 %v4323_v6, %v4157_v54 }
 0x359   :  { %v8114_v2 = vpop.f32.mrb[76].mxu0 }
 0x35a   :  { %v2967_v47 = vpop.f32.mrb[77].mxu0 }
 0x35b   :  { %v2993_v48 = vadd.f32 %v2967_v47, %v2802_v46  ;;  %v8115_v56 = vpop.f32.mrb[78].mxu0 }
 0x35c   :  { %v2970_v12 = vpop.f32.mrb[79].mxu0 }
 0x35d   :  { %v2994_v31 = vadd.f32 %v2970_v12, %v2803_v26 }
 0x366   :  { %v8306_v41 = vpop.f32.mrb[72].mxu1 }
 0x367   :  { %v4510_v45 = vpop.f32.mrb[73].mxu1 }
 0x368   :  { %v4536_v17 = vadd.f32 %v4510_v45, %v4346_v57  ;;  %v8307_v1 = vpop.f32.mrb[74].mxu1 }
 0x369   :  { %v4513_v13 = vpop.f32.mrb[75].mxu1 }
 0x36a   :  { %v4537_v23 = vadd.f32 %v4513_v13, %v4347_v10 }
 0x379   :  { %v8138_v36 = vpop.f32.mrb[80].mxu0 }
 0x37a   :  { %v3158_v39 = vpop.f32.mrb[81].mxu0 }
 0x37b   :  { %v3184_v61 = vadd.f32 %v3158_v39, %v2993_v48  ;;  %v8139_v24 = vpop.f32.mrb[82].mxu0 }
 0x37c   :  { %v3161_v25 = vpop.f32.mrb[83].mxu0 }
 0x37d   :  { %v3185_v0 = vadd.f32 %v3161_v25, %v2994_v31 }
 0x381   :  { %v8150_v11 = vpop.f32.mrb[40].mxu0 }
 0x382   :  { %v3386_v5 = vadd.f32 %v8150_v11, %v9842_v3  ;;  %v3301_v8 = vpop.f32.mrb[41].mxu0 }
 0x383   :  { %v8151_v50 = vpop.f32.mrb[42].mxu0 }
 0x384   :  { %v3401_v38 = vmax.f32 %v3386_v5, 0.0  ;;  %v3387_v16 = vadd.f32 %v8151_v50, %v9842_v3  ;;  %v3304_v20 = vpop.f32.mrb[43].mxu0 }
 0x385   :  { %v3385_v43 = vadd.f32 %v9842_v3, %v3304_v20 }
 0x386   :  { %v8330_v22 = vpop.f32.mrb[76].mxu1  ;;  %3416 = vst [vmem:[#allocation4 + $0x10] sm:$0xff] %v3401_v38  ;;  %v3402_v32 = vmax.f32 %v3387_v16, 0.0 }
 0x387   :  { %v4700_v62 = vpop.f32.mrb[77].mxu1  ;;  %v3400_v35 = vmax.f32 %v3385_v43, 0.0 }
 0x388   :  { %v4726_v33 = vadd.f32 %v4700_v62, %v4536_v17  ;;  %v8331_v34 = vpop.f32.mrb[78].mxu1  ;;  %3417 = vst [vmem:[#allocation4 + $0x18] sm:$0xff] %v3402_v32 }
 0x389   :  { %v4703_v4 = vpop.f32.mrb[79].mxu1  ;;  %3415 = vst [vmem:[#allocation4 + $0x8] sm:$0xff] %v3400_v35  ;;  %v8154_v58 = vpop.f32.mrb[44].mxu0 }
 0x38a   :  { %v4727_v44 = vadd.f32 %v4703_v4, %v4537_v23  ;;  %v3390_v49 = vadd.f32 %v8154_v58, %v9842_v3  ;;  %v3317_v51 = vpop.f32.mrb[45].mxu0 }
 0x38b   :  { %v3388_v28 = vadd.f32 %v9842_v3, %v3317_v51  ;;  %v8155_v18 = vpop.f32.mrb[46].mxu0 }
 0x38c   :  { %v3405_v19 = vmax.f32 %v3390_v49, 0.0  ;;  %v3391_v27 = vadd.f32 %v8155_v18, %v9842_v3  ;;  %v3320_v29 = vpop.f32.mrb[47].mxu0 }
 0x38d   :  { %v3403_v30 = vmax.f32 %v3388_v28, 0.0  ;;  %v3389_v42 = vadd.f32 %v9842_v3, %v3320_v29 }
 0x38e   :  { %3420 = vst [vmem:[#allocation4 + $0x30] sm:$0xff] %v3405_v19  ;;  %v3406_v53 = vmax.f32 %v3391_v27, 0.0 }
 0x38f   :  { %3418 = vst [vmem:[#allocation4 + $0x20] sm:$0xff] %v3403_v30  ;;  %v3404_v60 = vmax.f32 %v3389_v42, 0.0 }
 0x390   :  { %3421 = vst [vmem:[#allocation4 + $0x38] sm:$0xff] %v3406_v53 }
 0x391   :  { %3419 = vst [vmem:[#allocation4 + $0x28] sm:$0xff] %v3404_v60  ;;  %v8158_v7 = vpop.f32.mrb[48].mxu0 }
 0x392   :  { %v3394_v14 = vadd.f32 %v8158_v7, %v9842_v3  ;;  %v3333_v15 = vpop.f32.mrb[49].mxu0 }
 0x393   :  { %v3392_v63 = vadd.f32 %v9842_v3, %v3333_v15  ;;  %v8159_v54 = vpop.f32.mrb[50].mxu0 }
 0x394   :  { %v3409_v55 = vmax.f32 %v3394_v14, 0.0  ;;  %v3395_v40 = vadd.f32 %v8159_v54, %v9842_v3  ;;  %v3336_v46 = vpop.f32.mrb[51].mxu0 }
 0x395   :  { %v3407_v52 = vmax.f32 %v3392_v63, 0.0  ;;  %v3393_v21 = vadd.f32 %v9842_v3, %v3336_v46 }
 0x396   :  { %3424 = vst [vmem:[#allocation4 + $0x50] sm:$0xff] %v3409_v55  ;;  %v3410_v26 = vmax.f32 %v3395_v40, 0.0 }
 0x397   :  { %3422 = vst [vmem:[#allocation4 + $0x40] sm:$0xff] %v3407_v52  ;;  %v3408_v37 = vmax.f32 %v3393_v21, 0.0 }
 0x398   :  { %3425 = vst [vmem:[#allocation4 + $0x58] sm:$0xff] %v3410_v26 }
 0x399   :  { %3423 = vst [vmem:[#allocation4 + $0x48] sm:$0xff] %v3408_v37  ;;  %v8162_v59 = vpop.f32.mrb[84].mxu0 }
 0x39a   :  { %v3349_v57 = vpop.f32.mrb[85].mxu0 }
 0x39b   :  { %v3375_v9 = vadd.f32 %v3349_v57, %v3184_v61  ;;  %v8163_v6 = vpop.f32.mrb[86].mxu0 }
 0x39c   :  { %v3352_v10 = vpop.f32.mrb[87].mxu0 }
 0x39d   :  { %v3396_v2 = vadd.f32 %v9842_v3, %v3375_v9  ;;  %v3376_v47 = vadd.f32 %v3352_v10, %v3185_v0 }
 0x39f   :  { %v3411_v48 = vmax.f32 %v3396_v2, 0.0  ;;  %v3397_v56 = vadd.f32 %v9842_v3, %v3376_v47 }
 0x3a1   :  { %3426 = vst [vmem:[#allocation4 + $0x60] sm:$0xff] %v3411_v48  ;;  %v3412_v12 = vmax.f32 %v3397_v56, 0.0 }
 0x3a3   :  { %3427 = vst [vmem:[#allocation4 + $0x68] sm:$0xff] %v3412_v12 }
 0x3a6   :  { %v8354_v31 = vpop.f32.mrb[80].mxu1 }
 0x3a7   :  { %v4890_v41 = vpop.f32.mrb[81].mxu1 }
 0x3a8   :  { %v4916_v45 = vadd.f32 %v4890_v41, %v4726_v33  ;;  %v8355_v17 = vpop.f32.mrb[82].mxu1 }
 0x3a9   :  { %v4893_v1 = vpop.f32.mrb[83].mxu1 }
 0x3aa   :  { %v4917_v13 = vadd.f32 %v4893_v1, %v4727_v44 }
 0x3ae   :  { %v8366_v23 = vpop.f32.mrb[40].mxu1 }
 0x3af   :  { %v5111_v36 = vadd.f32 %v8366_v23, %v9842_v3  ;;  %v5032_v39 = vpop.f32.mrb[41].mxu1 }
 0x3b0   :  { %v8367_v61 = vpop.f32.mrb[42].mxu1 }
 0x3b1   :  { %v5126_v24 = vmax.f32 %v5111_v36, 0.0  ;;  %v5112_v25 = vadd.f32 %v8367_v61, %v9842_v3  ;;  %v5035_v0 = vpop.f32.mrb[43].mxu1 }
 0x3b2   :  { %v5110_v11 = vadd.f32 %v9842_v3, %v5035_v0 }
 0x3b3   :  { %5141 = vst [vmem:[#allocation4 + $0x88] sm:$0xff] %v5126_v24  ;;  %v5127_v5 = vmax.f32 %v5112_v25, 0.0 }
 0x3b4   :  { %v5125_v8 = vmax.f32 %v5110_v11, 0.0 }
 0x3b5   :  { %5142 = vst [vmem:[#allocation4 + $0x90] sm:$0xff] %v5127_v5 }
 0x3b6   :  { %5140 = vst [vmem:[#allocation4 + $0x80] sm:$0xff] %v5125_v8  ;;  %v8370_v50 = vpop.f32.mrb[44].mxu1 }
 0x3b7   :  { %v5115_v38 = vadd.f32 %v8370_v50, %v9842_v3  ;;  %v5048_v16 = vpop.f32.mrb[45].mxu1 }
 0x3b8   :  { %v5113_v20 = vadd.f32 %v9842_v3, %v5048_v16  ;;  %v8371_v22 = vpop.f32.mrb[46].mxu1 }
 0x3b9   :  { %v5130_v43 = vmax.f32 %v5115_v38, 0.0  ;;  %v5116_v62 = vadd.f32 %v8371_v22, %v9842_v3  ;;  %v5051_v32 = vpop.f32.mrb[47].mxu1 }
 0x3ba   :  { %v5128_v33 = vmax.f32 %v5113_v20, 0.0  ;;  %v5114_v34 = vadd.f32 %v9842_v3, %v5051_v32 }
 0x3bb   :  { %5145 = vst [vmem:[#allocation4 + $0xa8] sm:$0xff] %v5130_v43  ;;  %v5131_v35 = vmax.f32 %v5116_v62, 0.0 }
 0x3bc   :  { %5143 = vst [vmem:[#allocation4 + $0x98] sm:$0xff] %v5128_v33  ;;  %v5129_v4 = vmax.f32 %v5114_v34, 0.0 }
 0x3bd   :  { %5146 = vst [vmem:[#allocation4 + $0xb0] sm:$0xff] %v5131_v35 }
 0x3be   :  { %5144 = vst [vmem:[#allocation4 + $0xa0] sm:$0xff] %v5129_v4  ;;  %v8374_v44 = vpop.f32.mrb[48].mxu1 }
 0x3bf   :  { %v5119_v58 = vadd.f32 %v8374_v44, %v9842_v3  ;;  %v5064_v49 = vpop.f32.mrb[49].mxu1 }
 0x3c0   :  { %v5117_v51 = vadd.f32 %v9842_v3, %v5064_v49  ;;  %v8375_v28 = vpop.f32.mrb[50].mxu1 }
 0x3c1   :  { %v5134_v18 = vmax.f32 %v5119_v58, 0.0  ;;  %v5120_v19 = vadd.f32 %v8375_v28, %v9842_v3  ;;  %v5067_v27 = vpop.f32.mrb[51].mxu1 }
 0x3c2   :  { %v5132_v29 = vmax.f32 %v5117_v51, 0.0  ;;  %v5118_v30 = vadd.f32 %v9842_v3, %v5067_v27 }
 0x3c3   :  { %5149 = vst [vmem:[#allocation4 + $0xc8] sm:$0xff] %v5134_v18  ;;  %v5135_v42 = vmax.f32 %v5120_v19, 0.0 }
 0x3c4   :  { %5147 = vst [vmem:[#allocation4 + $0xb8] sm:$0xff] %v5132_v29  ;;  %v5133_v53 = vmax.f32 %v5118_v30, 0.0 }
 0x3c5   :  { %5150 = vst [vmem:[#allocation4 + $0xd0] sm:$0xff] %v5135_v42 }
 0x3c6   :  { %5148 = vst [vmem:[#allocation4 + $0xc0] sm:$0xff] %v5133_v53  ;;  %v8378_v60 = vpop.f32.mrb[84].mxu1 }
 0x3c7   :  { %v5080_v7 = vpop.f32.mrb[85].mxu1 }
 0x3c8   :  { %v5106_v14 = vadd.f32 %v5080_v7, %v4916_v45  ;;  %v8379_v15 = vpop.f32.mrb[86].mxu1 }
 0x3c9   :  { %v5083_v63 = vpop.f32.mrb[87].mxu1 }
 0x3ca   :  { %v5121_v54 = vadd.f32 %v9842_v3, %v5106_v14  ;;  %v5107_v55 = vadd.f32 %v5083_v63, %v4917_v13 }
 0x3cc   :  { %v5136_v40 = vmax.f32 %v5121_v54, 0.0  ;;  %v5122_v46 = vadd.f32 %v9842_v3, %v5107_v55 }
 0x3ce   :  { %5151 = vst [vmem:[#allocation4 + $0xd8] sm:$0xff] %v5136_v40  ;;  %v5137_v52 = vmax.f32 %v5122_v46, 0.0 }
 0x3d0   :  { %5152 = vst [vmem:[#allocation4 + $0xe0] sm:$0xff] %v5137_v52 }
 0x3d1   :  { %8889 = dma.done.wait [#allocation7], 81920 }
 0x3d2   :  { %8890 = vsyncadd [#allocation7], 4294885376 }
 0x3d3   :  { %8891 = dma.done.wait [#allocation7 + $0x1], 16384 }
 0x3d4   :  { %8892 = vsyncadd [#allocation7 + $0x1], 4294950912  ;;  %v5531_v21 = vld [vmem:[#allocation5 + $0x408] sm:$0xff]  ;;  %v5530_v37 = vld [vmem:[#allocation5 + $0x400] sm:$0xff]  ;;  %s8916_s0 = smov [#allocation19]  }
 0x3d5   :  { %v5595_v26 = vld [vmem:[#allocation5 + $0x608] sm:$0xff]  ;;  %5658 = vmatprep.subr.bf16.mxu0 %v5531_v21  ;;  %v5594_v59 = vld [vmem:[#allocation5 + $0x600] sm:$0xff]  ;;  %v5240_v43 = vld [vmem:[#allocation4 + $0x29] ss:$120 sm:$0x3]  ;;  %s7251_s26 = sshll.u32 %s8916_s0, 4  ;;  %s7252_s26 = int_to_ptr.vmem [resolvable:$true] %s7251_s26 }
 0x3d6   :  { %5699 = vmatprep.subr.bf16.mxu1 %v5595_v26  ;;  %v5535_v57 = vld [vmem:[#allocation5 + $0x428] sm:$0xff]  ;;  %5659 = vmatpush1.bf16.msra.mxu0 %v5530_v37  ;;  %v5534_v3 = vld [vmem:[#allocation5 + $0x420] sm:$0xff]  ;;  %v5242_v32 = vld [vmem:[#allocation4 + $0x2a] ss:$120 sm:$0x3]  ;;  %s8859_s27 = scalar_lea.vmem %s7252_s26, 128  ;;  %p8864_p7 = scmp.lt.s32.totalorder %s7252_s26, %s7252_s26 }
 0x3d7   :  { %v5599_v9 = vld [vmem:[#allocation5 + $0x628] sm:$0xff]  ;;  %5700 = vmatpush1.bf16.msra.mxu1 %v5594_v59  ;;  %5660 = vmatprep.subr.bf16.mxu0 %v5535_v57  ;;  %v5598_v6 = vld [vmem:[#allocation5 + $0x620] sm:$0xff]  ;;  %v5247_v35 = vmax.f32 %v5240_v43, %v5242_v32  ;;  %v5596_v43 = vld [vmem:[#allocation5 + $0x610] sm:$0xff]  ;;  %p8860_p6 = scmp.ne.s32.totalorder %s7252_s26, %s8859_s27  ;;  %p8865_p8 = scmp.lt.s32.totalorder %s8859_s27, %s8859_s27 }
 0x3d8   :  { %5701 = vmatprep.subr.bf16.mxu1 %v5599_v9  ;;  %v5539_v10 = vld [vmem:[#allocation5 + $0x448] sm:$0xff]  ;;  %v5538_v47 = vld [vmem:[#allocation5 + $0x440] sm:$0xff]  ;;  %v5601_v32 = vld [vmem:[#allocation5 + $0x638] sm:$0xff] }
 0x3d9   :  { %v5603_v2 = vld [vmem:[#allocation5 + $0x648] sm:$0xff]  ;;  %v5602_v48 = vld [vmem:[#allocation5 + $0x640] sm:$0xff]  ;;  %p8866_p9 = por %p8865_p8, %p8864_p7 }
 0x3da   :  { %5661 = vmatpush1.bf16.msra.mxu0 %v5534_v3  ;;  %v5543_v56 = vld [vmem:[#allocation5 + $0x468] sm:$0xff]  ;;  %v5542_v31 = vld [vmem:[#allocation5 + $0x460] sm:$0xff] }
 0x3db   :  { %5702 = vmatpush1.bf16.msra.mxu1 %v5598_v6  ;;  %5662 = vmatprep.subr.bf16.mxu0 %v5539_v10  ;;  %v5607_v12 = vld [vmem:[#allocation5 + $0x668] sm:$0xff]  ;;  %v5606_v41 = vld [vmem:[#allocation5 + $0x660] sm:$0xff]  ;;  %p8867_p10 = pnand %p8866_p9, %p8860_p6 }
 0x3dc   :  { %5703 = vmatprep.subr.bf16.mxu1 %v5603_v2  ;;  %v5547_v45 = vld [vmem:[#allocation5 + $0x488] sm:$0xff]  ;;  %v5546_v1 = vld [vmem:[#allocation5 + $0x480] sm:$0xff] }
 0x3dd   :  { %v5611_v17 = vld [vmem:[#allocation5 + $0x688] sm:$0xff]  ;;  %v5610_v13 = vld [vmem:[#allocation5 + $0x680] sm:$0xff] }
 0x3de   :  { %5663 = vmatpush1.bf16.msra.mxu0 %v5538_v47  ;;  %v5551_v23 = vld [vmem:[#allocation5 + $0x4a8] sm:$0xff]  ;;  %v5550_v39 = vld [vmem:[#allocation5 + $0x4a0] sm:$0xff] }
 0x3df   :  { %5704 = vmatpush1.bf16.msra.mxu1 %v5602_v48  ;;  %5664 = vmatprep.subr.bf16.mxu0 %v5543_v56  ;;  %v5615_v36 = vld [vmem:[#allocation5 + $0x6a8] sm:$0xff]  ;;  %v5614_v61 = vld [vmem:[#allocation5 + $0x6a0] sm:$0xff]  ;;  %v5231_v48 = vld [vmem:[#allocation4 + $0x28] ss:$120 sm:$0x3] }
 0x3e0   :  { %5705 = vmatprep.subr.bf16.mxu1 %v5607_v12  ;;  %v5555_v24 = vld [vmem:[#allocation5 + $0x4c8] sm:$0xff]  ;;  %v5554_v0 = vld [vmem:[#allocation5 + $0x4c0] sm:$0xff] }
 0x3e1   :  { %v5619_v25 = vld [vmem:[#allocation5 + $0x6c8] sm:$0xff]  ;;  %v5618_v11 = vld [vmem:[#allocation5 + $0x6c0] sm:$0xff] }
 0x3e2   :  { %5665 = vmatpush1.bf16.msra.mxu0 %v5542_v31  ;;  %v5218_v5 = vld [vmem:[#allocation4 + $0x25] ss:$120 sm:$0x3]  ;;  %v5220_v38 = vld [vmem:[#allocation4 + $0x26] ss:$120 sm:$0x3] }
 0x3e3   :  { %5706 = vmatpush1.bf16.msra.mxu1 %v5606_v41  ;;  %5666 = vmatprep.subr.bf16.mxu0 %v5547_v45  ;;  %v5559_v8 = vld [vmem:[#allocation5 + $0x4e8] sm:$0xff]  ;;  %v5222_v16 = vld [vmem:[#allocation4 + $0x31] ss:$120 sm:$0x3]  ;;  %v5225_v22 = vmax.f32 %v5218_v5, %v5220_v38 }
 0x3e4   :  { %5707 = vmatprep.subr.bf16.mxu1 %v5611_v17  ;;  %v5623_v50 = vld [vmem:[#allocation5 + $0x6e8] sm:$0xff]  ;;  %v5224_v20 = vld [vmem:[#allocation4 + $0x32] ss:$120 sm:$0x3] }
 0x3e5   :  { %v5226_v62 = vmax.f32 %v5222_v16, %v5224_v20  ;;  %v5244_v33 = vld [vmem:[#allocation4 + $0x35] ss:$120 sm:$0x3]  ;;  %v5246_v34 = vld [vmem:[#allocation4 + $0x36] ss:$120 sm:$0x3] }
 0x3e6   :  { %5667 = vmatpush1.bf16.msra.mxu0 %v5546_v1  ;;  %v5248_v44 = vmax.f32 %v5244_v33, %v5246_v34  ;;  %v5558_v58 = vld [vmem:[#allocation5 + $0x4e0] sm:$0xff]  ;;  %v5563_v51 = vld [vmem:[#allocation5 + $0x508] sm:$0xff]  ;;  %v5597_v38 = vld [vmem:[#allocation5 + $0x618] sm:$0xff] }
 0x3e7   :  { %5708 = vmatpush1.bf16.msra.mxu1 %v5610_v13  ;;  %5668 = vmatprep.subr.bf16.mxu0 %v5551_v23  ;;  %v5227_v4 = vmax.f32 %v5225_v22, %v5226_v62  ;;  %v5622_v49 = vld [vmem:[#allocation5 + $0x6e0] sm:$0xff]  ;;  %v5627_v28 = vld [vmem:[#allocation5 + $0x708] sm:$0xff]  ;;  %v5532_v22 = vld [vmem:[#allocation5 + $0x410] sm:$0xff] }
 0x3e8   :  { %5709 = vmatprep.subr.bf16.mxu1 %v5615_v36  ;;  %v5249_v19 = vmax.f32 %v5247_v35, %v5248_v44  ;;  %v5562_v29 = vld [vmem:[#allocation5 + $0x500] sm:$0xff]  ;;  %v5567_v42 = vld [vmem:[#allocation5 + $0x528] sm:$0xff]  ;;  %v5537_v62 = vld [vmem:[#allocation5 + $0x438] sm:$0xff] }
 0x3e9   :  { %v9870_v18 = vpack.c.bf16 %v5227_v4, %v5227_v4  ;;  %v5626_v30 = vld [vmem:[#allocation5 + $0x700] sm:$0xff]  ;;  %v5631_v53 = vld [vmem:[#allocation5 + $0x728] sm:$0xff]  ;;  %v5536_v33 = vld [vmem:[#allocation5 + $0x430] sm:$0xff] }
 0x3ea   :  { %5669 = vmatpush1.bf16.msra.mxu0 %v5550_v39  ;;  %v9872_v27 = vpack.c.bf16 %v5249_v19, %v5249_v19  ;;  %v5566_v60 = vld [vmem:[#allocation5 + $0x520] sm:$0xff]  ;;  %v5571_v14 = vld [vmem:[#allocation5 + $0x548] sm:$0xff]  ;;  %v5600_v34 = vld [vmem:[#allocation5 + $0x630] sm:$0xff] }
 0x3eb   :  { %5710 = vmatpush1.bf16.msra.mxu1 %v5614_v61  ;;  %5670 = vmatprep.subr.bf16.mxu0 %v5555_v24  ;;  %v5630_v7 = vld [vmem:[#allocation5 + $0x720] sm:$0xff]  ;;  %v5635_v15 = vld [vmem:[#allocation5 + $0x748] sm:$0xff]  ;;  %v5541_v35 = vld [vmem:[#allocation5 + $0x458] sm:$0xff] }
 0x3ec   :  { %5711 = vmatprep.subr.bf16.mxu1 %v5619_v25  ;;  %5690 = vmatprep.mubr.bf16.mxu0 %v9870_v18  ;;  %v5570_v63 = vld [vmem:[#allocation5 + $0x540] sm:$0xff]  ;;  %v5575_v55 = vld [vmem:[#allocation5 + $0x568] sm:$0xff]  ;;  %v5605_v4 = vld [vmem:[#allocation5 + $0x658] sm:$0xff] }
 0x3ed   :  { %5731 = vmatprep.mubr.bf16.mxu1 %v9872_v27  ;;  %v5634_v54 = vld [vmem:[#allocation5 + $0x740] sm:$0xff]  ;;  %v5639_v40 = vld [vmem:[#allocation5 + $0x768] sm:$0xff]  ;;  %v5540_v44 = vld [vmem:[#allocation5 + $0x450] sm:$0xff] }
 0x3ee   :  { %5671 = vmatpush1.bf16.msra.mxu0 %v5554_v0  ;;  %v5574_v46 = vld [vmem:[#allocation5 + $0x560] sm:$0xff]  ;;  %v5579_v21 = vld [vmem:[#allocation5 + $0x588] sm:$0xff]  ;;  %v5608_v19 = vld [vmem:[#allocation5 + $0x670] sm:$0xff] }
 0x3ef   :  { %5712 = vmatpush1.bf16.msra.mxu1 %v5618_v11  ;;  %5672 = vmatprep.subr.bf16.mxu0 %v5559_v8  ;;  %v5638_v52 = vld [vmem:[#allocation5 + $0x760] sm:$0xff]  ;;  %v5643_v26 = vld [vmem:[#allocation5 + $0x788] sm:$0xff] }
 0x3f0   :  { %5713 = vmatprep.subr.bf16.mxu1 %v5623_v50  ;;  %v5578_v37 = vld [vmem:[#allocation5 + $0x580] sm:$0xff]  ;;  %v5583_v57 = vld [vmem:[#allocation5 + $0x5a8] sm:$0xff]  ;;  %v5533_v50 = vld [vmem:[#allocation5 + $0x418] sm:$0xff] }
 0x3f1   :  { %v5642_v59 = vld [vmem:[#allocation5 + $0x780] sm:$0xff]  ;;  %v5647_v9 = vld [vmem:[#allocation5 + $0x7a8] sm:$0xff] }
 0x3f2   :  { %5673 = vmatpush1.bf16.msra.mxu0 %v5558_v58  ;;  %v5207_v3 = vld [vmem:[#allocation4 + $0x15] ss:$120 sm:$0x3]  ;;  %v5209_v6 = vld [vmem:[#allocation4 + $0x16] ss:$120 sm:$0x3] }
 0x3f3   :  { %5714 = vmatpush1.bf16.msra.mxu1 %v5622_v49  ;;  %5674 = vmatprep.subr.bf16.mxu0 %v5563_v51  ;;  %v5211_v10 = vld [vmem:[#allocation4 + $0x21] ss:$120 sm:$0x3]  ;;  %v5213_v2 = vld [vmem:[#allocation4 + $0x22] ss:$120 sm:$0x3]  ;;  %v5214_v1 = vmax.f32 %v5207_v3, %v5209_v6 }
 0x3f4   :  { %5715 = vmatprep.subr.bf16.mxu1 %v5627_v28  ;;  %v5229_v47 = vld [vmem:[#allocation4 + $0x27] ss:$120 sm:$0x3]  ;;  %v5233_v56 = vld [vmem:[#allocation4 + $0x33] ss:$120 sm:$0x3]  ;;  %v5215_v13 = vmax.f32 %v5211_v10, %v5213_v2 }
 0x3f5   :  { %v5235_v12 = vld [vmem:[#allocation4 + $0x34] ss:$120 sm:$0x3]  ;;  %v5587_v45 = vld [vmem:[#allocation5 + $0x5c8] sm:$0xff]  ;;  %v5236_v23 = vmax.f32 %v5229_v47, %v5231_v48  ;;  %v5604_v58 = vld [vmem:[#allocation5 + $0x650] sm:$0xff] }
 0x3f6   :  { %5675 = vmatpush1.bf16.msra.mxu0 %v5562_v29  ;;  %v5582_v31 = vld [vmem:[#allocation5 + $0x5a0] sm:$0xff]  ;;  %v5651_v17 = vld [vmem:[#allocation5 + $0x7c8] sm:$0xff]  ;;  %v5237_v36 = vmax.f32 %v5233_v56, %v5235_v12  ;;  %v5216_v0 = vmax.f32 %v5214_v1, %v5215_v13  ;;  %v5545_v49 = vld [vmem:[#allocation5 + $0x478] sm:$0xff] }
 0x3f7   :  { %5716 = vmatpush1.bf16.msra.mxu1 %v5626_v30  ;;  %5676 = vmatprep.subr.bf16.mxu0 %v5567_v42  ;;  %v5646_v41 = vld [vmem:[#allocation5 + $0x7a0] sm:$0xff]  ;;  %v5591_v24 = vld [vmem:[#allocation5 + $0x5e8] sm:$0xff]  ;;  %v5609_v51 = vld [vmem:[#allocation5 + $0x678] sm:$0xff] }
 0x3f8   :  { %5717 = vmatprep.subr.bf16.mxu1 %v5631_v53  ;;  %v5586_v39 = vld [vmem:[#allocation5 + $0x5c0] sm:$0xff]  ;;  %v5655_v25 = vld [vmem:[#allocation5 + $0x7e8] sm:$0xff]  ;;  %v5238_v11 = vmax.f32 %v5236_v23, %v5237_v36  ;;  %v9876_v16 = vpack.c.bf16 %v5216_v0, %v5216_v0  ;;  %v5544_v28 = vld [vmem:[#allocation5 + $0x470] sm:$0xff] }
 0x3f9   :  { %v5650_v61 = vld [vmem:[#allocation5 + $0x7c0] sm:$0xff]  ;;  %v5549_v29 = vld [vmem:[#allocation5 + $0x498] sm:$0xff]  ;;  %v5568_v3 = vld [vmem:[#allocation5 + $0x530] sm:$0xff] }
 0x3fa   :  { %5677 = vmatpush1.bf16.msra.mxu0 %v5566_v60  ;;  %v5590_v5 = vld [vmem:[#allocation5 + $0x5e0] sm:$0xff]  ;;  %v9878_v20 = vpack.c.bf16 %v5238_v11, %v5238_v11  ;;  %v5613_v30 = vld [vmem:[#allocation5 + $0x698] sm:$0xff]  ;;  %v5552_v60 = vld [vmem:[#allocation5 + $0x4b0] sm:$0xff] }
 0x3fb   :  { %5718 = vmatpush1.bf16.msra.mxu1 %v5630_v7  ;;  %5678 = vmatprep.subr.bf16.mxu0 %v5571_v14  ;;  %v5654_v8 = vld [vmem:[#allocation5 + $0x7e0] sm:$0xff]  ;;  %v5553_v42 = vld [vmem:[#allocation5 + $0x4b8] sm:$0xff]  ;;  %v5616_v7 = vld [vmem:[#allocation5 + $0x6b0] sm:$0xff] }
 0x3fc   :  { %5719 = vmatprep.subr.bf16.mxu1 %v5635_v15  ;;  %v5617_v53 = vld [vmem:[#allocation5 + $0x6b8] sm:$0xff]  ;;  %v5632_v6 = vld [vmem:[#allocation5 + $0x730] sm:$0xff] }
 0x3fd   :  { %v5557_v14 = vld [vmem:[#allocation5 + $0x4d8] sm:$0xff]  ;;  %v5572_v47 = vld [vmem:[#allocation5 + $0x550] sm:$0xff] }
 0x3fe   :  { %5679 = vmatpush1.bf16.msra.mxu0 %v5570_v63  ;;  %v5621_v15 = vld [vmem:[#allocation5 + $0x6d8] sm:$0xff]  ;;  %v5556_v63 = vld [vmem:[#allocation5 + $0x4d0] sm:$0xff] }
 0x3ff   :  { %5720 = vmatpush1.bf16.msra.mxu1 %v5634_v54  ;;  %5680 = vmatprep.subr.bf16.mxu0 %v5575_v55  ;;  %v5620_v54 = vld [vmem:[#allocation5 + $0x6d0] sm:$0xff]  ;;  %v5561_v55 = vld [vmem:[#allocation5 + $0x4f8] sm:$0xff] }
 0x400   :  { %5721 = vmatprep.subr.bf16.mxu1 %v5639_v40  ;;  %v5625_v40 = vld [vmem:[#allocation5 + $0x6f8] sm:$0xff]  ;;  %v5636_v48 = vld [vmem:[#allocation5 + $0x750] sm:$0xff] }
 0x401   :  { %v5573_v10 = vld [vmem:[#allocation5 + $0x558] sm:$0xff]  ;;  %v5580_v1 = vld [vmem:[#allocation5 + $0x590] sm:$0xff] }
 0x402   :  { %5681 = vmatpush1.bf16.msra.mxu0 %v5574_v46  ;;  %v5560_v46 = vld [vmem:[#allocation5 + $0x4f0] sm:$0xff]  ;;  %v5637_v2 = vld [vmem:[#allocation5 + $0x758] sm:$0xff] }
 0x403   :  { %5722 = vmatpush1.bf16.msra.mxu1 %v5638_v52  ;;  %5682 = vmatprep.subr.bf16.mxu0 %v5579_v21  ;;  %v5624_v52 = vld [vmem:[#allocation5 + $0x6f0] sm:$0xff]  ;;  %v5565_v21 = vld [vmem:[#allocation5 + $0x518] sm:$0xff] }
 0x404   :  { %5723 = vmatprep.subr.bf16.mxu1 %v5643_v26  ;;  %v5629_v26 = vld [vmem:[#allocation5 + $0x718] sm:$0xff]  ;;  %v5644_v13 = vld [vmem:[#allocation5 + $0x790] sm:$0xff] }
 0x405   :  { %v5577_v56 = vld [vmem:[#allocation5 + $0x578] sm:$0xff] }
 0x406   :  { %5683 = vmatpush1.bf16.msra.mxu0 %v5578_v37  ;;  %v5564_v37 = vld [vmem:[#allocation5 + $0x510] sm:$0xff]  ;;  %v5641_v12 = vld [vmem:[#allocation5 + $0x778] sm:$0xff] }
 0x407   :  { %5724 = vmatpush1.bf16.msra.mxu1 %v5642_v59  ;;  %5684 = vmatprep.subr.bf16.mxu0 %v5583_v57  ;;  %v5628_v59 = vld [vmem:[#allocation5 + $0x710] sm:$0xff]  ;;  %v5569_v57 = vld [vmem:[#allocation5 + $0x538] sm:$0xff] }
 0x408   :  { %5725 = vmatprep.subr.bf16.mxu1 %v5647_v9  ;;  %v5633_v9 = vld [vmem:[#allocation5 + $0x738] sm:$0xff] }
 0x409   :  { %v5585_v23 = vld [vmem:[#allocation5 + $0x5b8] sm:$0xff] }
 0x40a   :  { %5685 = vmatpush1.bf16.msra.mxu0 %v5582_v31  ;;  %v5576_v31 = vld [vmem:[#allocation5 + $0x570] sm:$0xff]  ;;  %v5649_v36 = vld [vmem:[#allocation5 + $0x7b8] sm:$0xff] }
 0x40b   :  { %5726 = vmatpush1.bf16.msra.mxu1 %v5646_v41  ;;  %5686 = vmatprep.subr.bf16.mxu0 %v5587_v45  ;;  %v5640_v41 = vld [vmem:[#allocation5 + $0x770] sm:$0xff]  ;;  %v5581_v45 = vld [vmem:[#allocation5 + $0x598] sm:$0xff] }
 0x40c   :  { %5727 = vmatprep.subr.bf16.mxu1 %v5651_v17  ;;  %v5645_v17 = vld [vmem:[#allocation5 + $0x798] sm:$0xff] }
 0x40d   :  { %v5174_v0 = vld [vmem:[#allocation4 + $0xf] ss:$120 sm:$0x3]  ;;  %v5176_v11 = vld [vmem:[#allocation4 + $0x10] ss:$120 sm:$0x3] }
 0x40e   :  { %5687 = vmatpush1.bf16.msra.mxu0 %v5586_v39  ;;  %v5584_v39 = vld [vmem:[#allocation5 + $0x5b0] sm:$0xff] }
 0x40f   :  { %5728 = vmatpush1.bf16.msra.mxu1 %v5650_v61  ;;  %5688 = vmatprep.subr.bf16.mxu0 %v5591_v24  ;;  %v5648_v61 = vld [vmem:[#allocation5 + $0x7b0] sm:$0xff]  ;;  %v5589_v24 = vld [vmem:[#allocation5 + $0x5d8] sm:$0xff] }
 0x410   :  { %5729 = vmatprep.subr.bf16.mxu1 %v5655_v25  ;;  %v5653_v25 = vld [vmem:[#allocation5 + $0x7d8] sm:$0xff] }
 0x412   :  { %5689 = vmatpush1.bf16.msra.mxu0 %v5590_v5  ;;  %v5178_v5 = vld [vmem:[#allocation4 + $0x1b] ss:$120 sm:$0x3] }
 0x413   :  { %5730 = vmatpush1.bf16.msra.mxu1 %v5654_v8  ;;  %5740 = vmatprep.subr.bf16.mxu0 %v5533_v50  ;;  %v5180_v8 = vld [vmem:[#allocation4 + $0x1c] ss:$120 sm:$0x3]  ;;  %v5196_v50 = vld [vmem:[#allocation4 + $0x13] ss:$120 sm:$0x3] }
 0x414   :  { %5781 = vmatprep.subr.bf16.mxu1 %v5597_v38  ;;  %v5198_v38 = vld [vmem:[#allocation4 + $0x14] ss:$120 sm:$0x3] }
 0x415   :  { %5691 = vmatmul.mubr.bf16.vlgmr.msra.gmra.mrb[88].mxu0 %v9876_v16 }
 0x416   :  { %5732 = vmatmul.mubr.bf16.vlgmr.msra.gmra.mrb[88].mxu1 %v9878_v20  ;;  %5741 = vmatpush1.bf16.msra.mxu0 %v5532_v22  ;;  %v5200_v22 = vld [vmem:[#allocation4 + $0x1f] ss:$120 sm:$0x3] }
 0x417   :  { %5782 = vmatpush1.bf16.msra.mxu1 %v5596_v43  ;;  %5742 = vmatprep.subr.bf16.mxu0 %v5537_v62  ;;  %v5202_v43 = vld [vmem:[#allocation4 + $0x20] ss:$120 sm:$0x3] }
 0x418   :  { %5783 = vmatprep.subr.bf16.mxu1 %v5601_v32  ;;  %5772 = vmatprep.mubr.bf16.mxu0 %v9870_v18  ;;  %v5548_v18 = vld [vmem:[#allocation5 + $0x490] sm:$0xff] }
 0x419   :  { %5813 = vmatprep.mubr.bf16.mxu1 %v9872_v27  ;;  %v5612_v27 = vld [vmem:[#allocation5 + $0x690] sm:$0xff] }
 0x41a   :  { %5743 = vmatpush1.bf16.msra.mxu0 %v5536_v33  ;;  %v5588_v62 = vld [vmem:[#allocation5 + $0x5d0] sm:$0xff]  ;;  %v5593_v33 = vld [vmem:[#allocation5 + $0x5f8] sm:$0xff] }
 0x41b   :  { %5784 = vmatpush1.bf16.msra.mxu1 %v5600_v34  ;;  %5744 = vmatprep.subr.bf16.mxu0 %v5541_v35  ;;  %v5652_v32 = vld [vmem:[#allocation5 + $0x7d0] sm:$0xff]  ;;  %v5657_v34 = vld [vmem:[#allocation5 + $0x7f8] sm:$0xff]  ;;  %v5181_v35 = vmax.f32 %v5174_v0, %v5176_v11  ;;  %v5442_v0 = vld [vmem:[#allocation5 + $0x140] sm:$0xff] }
 0x41c   :  { %5785 = vmatprep.subr.bf16.mxu1 %v5605_v4  ;;  %v5182_v4 = vmax.f32 %v5178_v5, %v5180_v8  ;;  %v5506_v11 = vld [vmem:[#allocation5 + $0x340] sm:$0xff]  ;;  %v5447_v5 = vld [vmem:[#allocation5 + $0x168] sm:$0xff] }
 0x41d   :  { %v5511_v8 = vld [vmem:[#allocation5 + $0x368] sm:$0xff] }
 0x41e   :  { %5745 = vmatpush1.bf16.msra.mxu0 %v5540_v44  ;;  %v5203_v44 = vmax.f32 %v5196_v50, %v5198_v38  ;;  %v5446_v50 = vld [vmem:[#allocation5 + $0x160] sm:$0xff] }
 0x41f   :  { %5786 = vmatpush1.bf16.msra.mxu1 %v5604_v58  ;;  %5746 = vmatprep.subr.bf16.mxu0 %v5545_v49  ;;  %v5204_v58 = vmax.f32 %v5200_v22, %v5202_v43  ;;  %v5592_v49 = vld [vmem:[#allocation5 + $0x5f0] sm:$0xff]  ;;  %v5510_v38 = vld [vmem:[#allocation5 + $0x360] sm:$0xff]  ;;  %v5451_v22 = vld [vmem:[#allocation5 + $0x188] sm:$0xff] }
 0x420   :  { %5787 = vmatprep.subr.bf16.mxu1 %v5609_v51  ;;  %v5656_v51 = vld [vmem:[#allocation5 + $0x7f0] sm:$0xff]  ;;  %v5515_v43 = vld [vmem:[#allocation5 + $0x388] sm:$0xff] }
 0x422   :  { %5747 = vmatpush1.bf16.msra.mxu0 %v5544_v28  ;;  %v5403_v28 = vld [vmem:[#allocation5 + $0x8] sm:$0xff] }
 0x423   :  { %5788 = vmatpush1.bf16.msra.mxu1 %v5608_v19  ;;  %5748 = vmatprep.subr.bf16.mxu0 %v5549_v29  ;;  %v5467_v19 = vld [vmem:[#allocation5 + $0x208] sm:$0xff]  ;;  %v5183_v29 = vmax.f32 %v5181_v35, %v5182_v4  ;;  %v5163_v35 = vld [vmem:[#allocation4 + $0xd] ss:$120 sm:$0x3] }
 0x424   :  { %5789 = vmatprep.subr.bf16.mxu1 %v5613_v30  ;;  %v5205_v30 = vmax.f32 %v5203_v44, %v5204_v58  ;;  %v5165_v4 = vld [vmem:[#allocation4 + $0xe] ss:$120 sm:$0x3]  ;;  %v5167_v44 = vld [vmem:[#allocation4 + $0x19] ss:$120 sm:$0x3] }
 0x425   :  { %v5169_v58 = vld [vmem:[#allocation4 + $0x1a] ss:$120 sm:$0x3] }
 0x426   :  { %5749 = vmatpush1.bf16.msra.mxu0 %v5548_v18  ;;  %v5402_v18 = vld [vmem:[#allocation5] sm:$0xff] }
 0x427   :  { %5790 = vmatpush1.bf16.msra.mxu1 %v5612_v27  ;;  %5750 = vmatprep.subr.bf16.mxu0 %v5553_v42  ;;  %v5466_v27 = vld [vmem:[#allocation5 + $0x200] sm:$0xff]  ;;  %v5407_v42 = vld [vmem:[#allocation5 + $0x28] sm:$0xff] }
 0x428   :  { %5791 = vmatprep.subr.bf16.mxu1 %v5617_v53  ;;  %v5471_v53 = vld [vmem:[#allocation5 + $0x228] sm:$0xff] }
 0x42a   :  { %5751 = vmatpush1.bf16.msra.mxu0 %v5552_v60  ;;  %v9884_v60 = vpack.c.bf16 %v5183_v29, %v5183_v29  ;;  %v5454_v29 = vld [vmem:[#allocation5 + $0x1a0] sm:$0xff] }
 0x42b   :  { %5792 = vmatpush1.bf16.msra.mxu1 %v5616_v7  ;;  %5752 = vmatprep.subr.bf16.mxu0 %v5557_v14  ;;  %v9886_v7 = vpack.c.bf16 %v5205_v30, %v5205_v30  ;;  %v5406_v14 = vld [vmem:[#allocation5 + $0x20] sm:$0xff] }
 0x42c   :  { %5793 = vmatprep.subr.bf16.mxu1 %v5621_v15  ;;  %v5470_v15 = vld [vmem:[#allocation5 + $0x220] sm:$0xff] }
 0x42d   :  { %v5518_v30 = vld [vmem:[#allocation5 + $0x3a0] sm:$0xff] }
 0x42e   :  { %5753 = vmatpush1.bf16.msra.mxu0 %v5556_v63  ;;  %v5411_v63 = vld [vmem:[#allocation5 + $0x48] sm:$0xff] }
 0x42f   :  { %5794 = vmatpush1.bf16.msra.mxu1 %v5620_v54  ;;  %5754 = vmatprep.subr.bf16.mxu0 %v5561_v55  ;;  %v5475_v54 = vld [vmem:[#allocation5 + $0x248] sm:$0xff]  ;;  %v5410_v55 = vld [vmem:[#allocation5 + $0x40] sm:$0xff] }
 0x430   :  { %5795 = vmatprep.subr.bf16.mxu1 %v5625_v40  ;;  %v5415_v40 = vld [vmem:[#allocation5 + $0x68] sm:$0xff] }
 0x432   :  { %5755 = vmatpush1.bf16.msra.mxu0 %v5560_v46  ;;  %v5414_v46 = vld [vmem:[#allocation5 + $0x60] sm:$0xff] }
 0x433   :  { %5796 = vmatpush1.bf16.msra.mxu1 %v5624_v52  ;;  %5756 = vmatprep.subr.bf16.mxu0 %v5565_v21  ;;  %v5478_v52 = vld [vmem:[#allocation5 + $0x260] sm:$0xff]  ;;  %v5419_v21 = vld [vmem:[#allocation5 + $0x88] sm:$0xff] }
 0x434   :  { %5797 = vmatprep.subr.bf16.mxu1 %v5629_v26  ;;  %v5483_v26 = vld [vmem:[#allocation5 + $0x288] sm:$0xff] }
 0x436   :  { %5757 = vmatpush1.bf16.msra.mxu0 %v5564_v37  ;;  %v5418_v37 = vld [vmem:[#allocation5 + $0x80] sm:$0xff] }
 0x437   :  { %5798 = vmatpush1.bf16.msra.mxu1 %v5628_v59  ;;  %5758 = vmatprep.subr.bf16.mxu0 %v5569_v57  ;;  %v5482_v59 = vld [vmem:[#allocation5 + $0x280] sm:$0xff]  ;;  %v5423_v57 = vld [vmem:[#allocation5 + $0xa8] sm:$0xff] }
 0x438   :  { %5799 = vmatprep.subr.bf16.mxu1 %v5633_v9  ;;  %v5487_v9 = vld [vmem:[#allocation5 + $0x2a8] sm:$0xff] }
 0x43a   :  { %5759 = vmatpush1.bf16.msra.mxu0 %v5568_v3  ;;  %v5422_v3 = vld [vmem:[#allocation5 + $0xa0] sm:$0xff] }
 0x43b   :  { %5800 = vmatpush1.bf16.msra.mxu1 %v5632_v6  ;;  %5760 = vmatprep.subr.bf16.mxu0 %v5573_v10  ;;  %v5486_v6 = vld [vmem:[#allocation5 + $0x2a0] sm:$0xff]  ;;  %v5427_v10 = vld [vmem:[#allocation5 + $0xc8] sm:$0xff] }
 0x43c   :  { %5801 = vmatprep.subr.bf16.mxu1 %v5637_v2  ;;  %v5491_v2 = vld [vmem:[#allocation5 + $0x2c8] sm:$0xff] }
 0x43e   :  { %5761 = vmatpush1.bf16.msra.mxu0 %v5572_v47  ;;  %v5426_v47 = vld [vmem:[#allocation5 + $0xc0] sm:$0xff] }
 0x43f   :  { %5802 = vmatpush1.bf16.msra.mxu1 %v5636_v48  ;;  %5762 = vmatprep.subr.bf16.mxu0 %v5577_v56  ;;  %v5490_v48 = vld [vmem:[#allocation5 + $0x2c0] sm:$0xff]  ;;  %v5431_v56 = vld [vmem:[#allocation5 + $0xe8] sm:$0xff] }
 0x440   :  { %5803 = vmatprep.subr.bf16.mxu1 %v5641_v12  ;;  %v5495_v12 = vld [vmem:[#allocation5 + $0x2e8] sm:$0xff] }
 0x442   :  { %5763 = vmatpush1.bf16.msra.mxu0 %v5576_v31  ;;  %v5430_v31 = vld [vmem:[#allocation5 + $0xe0] sm:$0xff] }
 0x443   :  { %5804 = vmatpush1.bf16.msra.mxu1 %v5640_v41  ;;  %5764 = vmatprep.subr.bf16.mxu0 %v5581_v45  ;;  %v5494_v41 = vld [vmem:[#allocation5 + $0x2e0] sm:$0xff]  ;;  %v5435_v45 = vld [vmem:[#allocation5 + $0x108] sm:$0xff] }
 0x444   :  { %5805 = vmatprep.subr.bf16.mxu1 %v5645_v17  ;;  %v5499_v17 = vld [vmem:[#allocation5 + $0x308] sm:$0xff] }
 0x446   :  { %5765 = vmatpush1.bf16.msra.mxu0 %v5580_v1  ;;  %v5434_v1 = vld [vmem:[#allocation5 + $0x100] sm:$0xff] }
 0x447   :  { %5806 = vmatpush1.bf16.msra.mxu1 %v5644_v13  ;;  %5766 = vmatprep.subr.bf16.mxu0 %v5585_v23  ;;  %v5498_v13 = vld [vmem:[#allocation5 + $0x300] sm:$0xff]  ;;  %v5439_v23 = vld [vmem:[#allocation5 + $0x128] sm:$0xff] }
 0x448   :  { %5807 = vmatprep.subr.bf16.mxu1 %v5649_v36  ;;  %v5503_v36 = vld [vmem:[#allocation5 + $0x328] sm:$0xff] }
 0x44a   :  { %5767 = vmatpush1.bf16.msra.mxu0 %v5584_v39  ;;  %v5438_v39 = vld [vmem:[#allocation5 + $0x120] sm:$0xff] }
 0x44b   :  { %5808 = vmatpush1.bf16.msra.mxu1 %v5648_v61  ;;  %5768 = vmatprep.subr.bf16.mxu0 %v5589_v24  ;;  %v5502_v61 = vld [vmem:[#allocation5 + $0x320] sm:$0xff]  ;;  %v5443_v24 = vld [vmem:[#allocation5 + $0x148] sm:$0xff] }
 0x44c   :  { %5809 = vmatprep.subr.bf16.mxu1 %v5653_v25  ;;  %v5507_v25 = vld [vmem:[#allocation5 + $0x348] sm:$0xff] }
 0x44e   :  { %5769 = vmatpush1.bf16.msra.mxu0 %v5588_v62  ;;  %v5450_v62 = vld [vmem:[#allocation5 + $0x180] sm:$0xff] }
 0x44f   :  { %5810 = vmatpush1.bf16.msra.mxu1 %v5652_v32  ;;  %5770 = vmatprep.subr.bf16.mxu0 %v5593_v33  ;;  %v5514_v32 = vld [vmem:[#allocation5 + $0x380] sm:$0xff]  ;;  %v5455_v33 = vld [vmem:[#allocation5 + $0x1a8] sm:$0xff] }
 0x450   :  { %5811 = vmatprep.subr.bf16.mxu1 %v5657_v34  ;;  %v5519_v34 = vld [vmem:[#allocation5 + $0x3a8] sm:$0xff] }
 0x452   :  { %5771 = vmatpush1.bf16.msra.mxu0 %v5592_v49  ;;  %v5185_v49 = vld [vmem:[#allocation4 + $0x11] ss:$120 sm:$0x3] }
 0x453   :  { %5812 = vmatpush1.bf16.msra.mxu1 %v5656_v51  ;;  %5822 = vmatprep.subr.bf16.mxu0 %v5403_v28  ;;  %v5187_v51 = vld [vmem:[#allocation4 + $0x12] ss:$120 sm:$0x3]  ;;  %v5189_v28 = vld [vmem:[#allocation4 + $0x1d] ss:$120 sm:$0x3] }
 0x454   :  { %5863 = vmatprep.subr.bf16.mxu1 %v5467_v19  ;;  %v5191_v19 = vld [vmem:[#allocation4 + $0x1e] ss:$120 sm:$0x3] }
 0x455   :  { %5773 = vmatmul.mubr.bf16.vlgmr.msra.gmra.mrb[92].mxu0 %v9876_v16  ;;  %v5474_v16 = vld [vmem:[#allocation5 + $0x240] sm:$0xff] }
 0x456   :  { %5814 = vmatmul.mubr.bf16.vlgmr.msra.gmra.mrb[92].mxu1 %v9878_v20  ;;  %5823 = vmatpush1.bf16.msra.mxu0 %v5402_v18  ;;  %v5479_v20 = vld [vmem:[#allocation5 + $0x268] sm:$0xff] }
 0x457   :  { %5864 = vmatpush1.bf16.msra.mxu1 %v5466_v27  ;;  %5824 = vmatprep.subr.bf16.mxu0 %v5407_v42  ;;  %v5459_v18 = vld [vmem:[#allocation5 + $0x1c8] sm:$0xff]  ;;  %v5170_v42 = vmax.f32 %v5163_v35, %v5165_v4  ;;  %v5440_v35 = vld [vmem:[#allocation5 + $0x130] sm:$0xff] }
 0x458   :  { %5865 = vmatprep.subr.bf16.mxu1 %v5471_v53  ;;  %5854 = vmatprep.mubr.bf16.mxu0 %v9884_v60  ;;  %v5523_v27 = vld [vmem:[#allocation5 + $0x3c8] sm:$0xff]  ;;  %v5171_v53 = vmax.f32 %v5167_v44, %v5169_v58  ;;  %v5504_v4 = vld [vmem:[#allocation5 + $0x330] sm:$0xff]  ;;  %v5445_v44 = vld [vmem:[#allocation5 + $0x158] sm:$0xff] }
 0x459   :  { %5895 = vmatprep.mubr.bf16.mxu1 %v9886_v7  ;;  %v5509_v58 = vld [vmem:[#allocation5 + $0x358] sm:$0xff] }
 0x45a   :  { %5825 = vmatpush1.bf16.msra.mxu0 %v5406_v14  ;;  %v5192_v14 = vmax.f32 %v5185_v49, %v5187_v51  ;;  %v5444_v49 = vld [vmem:[#allocation5 + $0x150] sm:$0xff] }
 0x45b   :  { %5866 = vmatpush1.bf16.msra.mxu1 %v5470_v15  ;;  %5826 = vmatprep.subr.bf16.mxu0 %v5411_v63  ;;  %v5193_v15 = vmax.f32 %v5189_v28, %v5191_v19  ;;  %v5458_v63 = vld [vmem:[#allocation5 + $0x1c0] sm:$0xff]  ;;  %v5508_v51 = vld [vmem:[#allocation5 + $0x350] sm:$0xff]  ;;  %v5449_v28 = vld [vmem:[#allocation5 + $0x178] sm:$0xff] }
 0x45c   :  { %5867 = vmatprep.subr.bf16.mxu1 %v5475_v54  ;;  %v5522_v54 = vld [vmem:[#allocation5 + $0x3c0] sm:$0xff]  ;;  %v5513_v19 = vld [vmem:[#allocation5 + $0x378] sm:$0xff] }
 0x45e   :  { %5827 = vmatpush1.bf16.msra.mxu0 %v5410_v55  ;;  %v5463_v55 = vld [vmem:[#allocation5 + $0x1e8] sm:$0xff] }
 0x45f   :  { %5868 = vmatpush1.bf16.msra.mxu1 %v5474_v16  ;;  %5828 = vmatprep.subr.bf16.mxu0 %v5415_v40  ;;  %v5527_v16 = vld [vmem:[#allocation5 + $0x3e8] sm:$0xff]  ;;  %v5172_v40 = vmax.f32 %v5170_v42, %v5171_v53  ;;  %v5452_v42 = vld [vmem:[#allocation5 + $0x190] sm:$0xff] }
 0x460   :  { %5869 = vmatprep.subr.bf16.mxu1 %v5479_v20  ;;  %v5194_v20 = vmax.f32 %v5192_v14, %v5193_v15  ;;  %v5516_v53 = vld [vmem:[#allocation5 + $0x390] sm:$0xff]  ;;  %v5457_v14 = vld [vmem:[#allocation5 + $0x1b8] sm:$0xff] }
 0x461   :  { %v5521_v15 = vld [vmem:[#allocation5 + $0x3b8] sm:$0xff] }
 0x462   :  { %5829 = vmatpush1.bf16.msra.mxu0 %v5414_v46  ;;  %v5462_v46 = vld [vmem:[#allocation5 + $0x1e0] sm:$0xff] }
 0x463   :  { %5870 = vmatpush1.bf16.msra.mxu1 %v5478_v52  ;;  %5830 = vmatprep.subr.bf16.mxu0 %v5419_v21  ;;  %v5526_v52 = vld [vmem:[#allocation5 + $0x3e0] sm:$0xff]  ;;  %v5405_v21 = vld [vmem:[#allocation5 + $0x18] sm:$0xff] }
 0x464   :  { %5871 = vmatprep.subr.bf16.mxu1 %v5483_v26  ;;  %v5469_v26 = vld [vmem:[#allocation5 + $0x218] sm:$0xff] }
 0x466   :  { %5831 = vmatpush1.bf16.msra.mxu0 %v5418_v37  ;;  %v9892_v37 = vpack.c.bf16 %v5172_v40, %v5172_v40  ;;  %v5262_v40 = vld [vmem:[#allocation4 + $0x2d] ss:$120 sm:$0x3] }
 0x467   :  { %5872 = vmatpush1.bf16.msra.mxu1 %v5482_v59  ;;  %5832 = vmatprep.subr.bf16.mxu0 %v5423_v57  ;;  %v9894_v59 = vpack.c.bf16 %v5194_v20, %v5194_v20  ;;  %v5404_v57 = vld [vmem:[#allocation5 + $0x10] sm:$0xff] }
 0x468   :  { %5873 = vmatprep.subr.bf16.mxu1 %v5487_v9  ;;  %v5468_v9 = vld [vmem:[#allocation5 + $0x210] sm:$0xff] }
 0x469   :  { %v5264_v20 = vld [vmem:[#allocation4 + $0x2e] ss:$120 sm:$0x3] }
 0x46a   :  { %5833 = vmatpush1.bf16.msra.mxu0 %v5422_v3  ;;  %v5409_v3 = vld [vmem:[#allocation5 + $0x38] sm:$0xff] }
 0x46b   :  { %5874 = vmatpush1.bf16.msra.mxu1 %v5486_v6  ;;  %5834 = vmatprep.subr.bf16.mxu0 %v5427_v10  ;;  %v5473_v6 = vld [vmem:[#allocation5 + $0x238] sm:$0xff]  ;;  %v5408_v10 = vld [vmem:[#allocation5 + $0x30] sm:$0xff] }
 0x46c   :  { %5875 = vmatprep.subr.bf16.mxu1 %v5491_v2  ;;  %v5472_v2 = vld [vmem:[#allocation5 + $0x230] sm:$0xff] }
 0x46e   :  { %5835 = vmatpush1.bf16.msra.mxu0 %v5426_v47  ;;  %v5413_v47 = vld [vmem:[#allocation5 + $0x58] sm:$0xff] }
 0x46f   :  { %5876 = vmatpush1.bf16.msra.mxu1 %v5490_v48  ;;  %5836 = vmatprep.subr.bf16.mxu0 %v5431_v56  ;;  %v5477_v48 = vld [vmem:[#allocation5 + $0x258] sm:$0xff]  ;;  %v5412_v56 = vld [vmem:[#allocation5 + $0x50] sm:$0xff] }
 0x470   :  { %5877 = vmatprep.subr.bf16.mxu1 %v5495_v12  ;;  %v5476_v12 = vld [vmem:[#allocation5 + $0x250] sm:$0xff] }
 0x472   :  { %5837 = vmatpush1.bf16.msra.mxu0 %v5430_v31  ;;  %v5417_v31 = vld [vmem:[#allocation5 + $0x78] sm:$0xff] }
 0x473   :  { %5878 = vmatpush1.bf16.msra.mxu1 %v5494_v41  ;;  %5838 = vmatprep.subr.bf16.mxu0 %v5435_v45  ;;  %v5481_v41 = vld [vmem:[#allocation5 + $0x278] sm:$0xff]  ;;  %v5416_v45 = vld [vmem:[#allocation5 + $0x70] sm:$0xff] }
 0x474   :  { %5879 = vmatprep.subr.bf16.mxu1 %v5499_v17  ;;  %v5480_v17 = vld [vmem:[#allocation5 + $0x270] sm:$0xff] }
 0x476   :  { %5839 = vmatpush1.bf16.msra.mxu0 %v5434_v1  ;;  %v5421_v1 = vld [vmem:[#allocation5 + $0x98] sm:$0xff] }
 0x477   :  { %5880 = vmatpush1.bf16.msra.mxu1 %v5498_v13  ;;  %5840 = vmatprep.subr.bf16.mxu0 %v5439_v23  ;;  %v5485_v13 = vld [vmem:[#allocation5 + $0x298] sm:$0xff] }
 0x478   :  { %5881 = vmatprep.subr.bf16.mxu1 %v5503_v36  ;;  %v5425_v23 = vld [vmem:[#allocation5 + $0xb8] sm:$0xff] }
 0x479   :  { %v5489_v36 = vld [vmem:[#allocation5 + $0x2b8] sm:$0xff] }
 0x47a   :  { %5841 = vmatpush1.bf16.msra.mxu0 %v5438_v39  ;;  %v5424_v39 = vld [vmem:[#allocation5 + $0xb0] sm:$0xff] }
 0x47b   :  { %5882 = vmatpush1.bf16.msra.mxu1 %v5502_v61  ;;  %5842 = vmatprep.subr.bf16.mxu0 %v5443_v24  ;;  %v5488_v61 = vld [vmem:[#allocation5 + $0x2b0] sm:$0xff]  ;;  %v5429_v24 = vld [vmem:[#allocation5 + $0xd8] sm:$0xff] }
 0x47c   :  { %5883 = vmatprep.subr.bf16.mxu1 %v5507_v25  ;;  %v5493_v25 = vld [vmem:[#allocation5 + $0x2d8] sm:$0xff] }
 0x47e   :  { %5843 = vmatpush1.bf16.msra.mxu0 %v5442_v0  ;;  %v5428_v0 = vld [vmem:[#allocation5 + $0xd0] sm:$0xff] }
 0x47f   :  { %5884 = vmatpush1.bf16.msra.mxu1 %v5506_v11  ;;  %5844 = vmatprep.subr.bf16.mxu0 %v5447_v5  ;;  %v5492_v11 = vld [vmem:[#allocation5 + $0x2d0] sm:$0xff]  ;;  %v5433_v5 = vld [vmem:[#allocation5 + $0xf8] sm:$0xff] }
 0x480   :  { %5885 = vmatprep.subr.bf16.mxu1 %v5511_v8  ;;  %v5497_v8 = vld [vmem:[#allocation5 + $0x2f8] sm:$0xff] }
 0x482   :  { %5845 = vmatpush1.bf16.msra.mxu0 %v5446_v50  ;;  %v5432_v50 = vld [vmem:[#allocation5 + $0xf0] sm:$0xff] }
 0x483   :  { %5886 = vmatpush1.bf16.msra.mxu1 %v5510_v38  ;;  %5846 = vmatprep.subr.bf16.mxu0 %v5451_v22  ;;  %v5496_v38 = vld [vmem:[#allocation5 + $0x2f0] sm:$0xff]  ;;  %v5437_v22 = vld [vmem:[#allocation5 + $0x118] sm:$0xff] }
 0x484   :  { %5887 = vmatprep.subr.bf16.mxu1 %v5515_v43  ;;  %v5501_v43 = vld [vmem:[#allocation5 + $0x318] sm:$0xff] }
 0x486   :  { %5847 = vmatpush1.bf16.msra.mxu0 %v5450_v62  ;;  %v5436_v62 = vld [vmem:[#allocation5 + $0x110] sm:$0xff] }
 0x487   :  { %5888 = vmatpush1.bf16.msra.mxu1 %v5514_v32  ;;  %5848 = vmatprep.subr.bf16.mxu0 %v5455_v33  ;;  %v5500_v32 = vld [vmem:[#allocation5 + $0x310] sm:$0xff]  ;;  %v5441_v33 = vld [vmem:[#allocation5 + $0x138] sm:$0xff] }
 0x488   :  { %5889 = vmatprep.subr.bf16.mxu1 %v5519_v34  ;;  %v5505_v34 = vld [vmem:[#allocation5 + $0x338] sm:$0xff] }
 0x48a   :  { %5849 = vmatpush1.bf16.msra.mxu0 %v5454_v29  ;;  %v5448_v29 = vld [vmem:[#allocation5 + $0x170] sm:$0xff] }
 0x48b   :  { %5890 = vmatpush1.bf16.msra.mxu1 %v5518_v30  ;;  %5850 = vmatprep.subr.bf16.mxu0 %v5459_v18  ;;  %v5512_v30 = vld [vmem:[#allocation5 + $0x370] sm:$0xff]  ;;  %v5453_v18 = vld [vmem:[#allocation5 + $0x198] sm:$0xff] }
 0x48c   :  { %5891 = vmatprep.subr.bf16.mxu1 %v5523_v27  ;;  %v5517_v27 = vld [vmem:[#allocation5 + $0x398] sm:$0xff] }
 0x48e   :  { %5851 = vmatpush1.bf16.msra.mxu0 %v5458_v63  ;;  %v5456_v63 = vld [vmem:[#allocation5 + $0x1b0] sm:$0xff] }
 0x48f   :  { %5892 = vmatpush1.bf16.msra.mxu1 %v5522_v54  ;;  %5852 = vmatprep.subr.bf16.mxu0 %v5463_v55  ;;  %v5520_v54 = vld [vmem:[#allocation5 + $0x3b0] sm:$0xff]  ;;  %v5461_v55 = vld [vmem:[#allocation5 + $0x1d8] sm:$0xff] }
 0x490   :  { %5893 = vmatprep.subr.bf16.mxu1 %v5527_v16  ;;  %v5525_v16 = vld [vmem:[#allocation5 + $0x3d8] sm:$0xff] }
 0x492   :  { %5853 = vmatpush1.bf16.msra.mxu0 %v5462_v46  ;;  %v5266_v46 = vld [vmem:[#allocation4 + $0x39] ss:$120 sm:$0x3] }
 0x493   :  { %5894 = vmatpush1.bf16.msra.mxu1 %v5526_v52  ;;  %5904 = vmatprep.subr.bf16.mxu0 %v5405_v21  ;;  %v5268_v52 = vld [vmem:[#allocation4 + $0x3a] ss:$120 sm:$0x3]  ;;  %v5284_v21 = vld [vmem:[#allocation4 + $0x3f] ss:$120 sm:$0x3] }
 0x494   :  { %5945 = vmatprep.subr.bf16.mxu1 %v5469_v26  ;;  %v5286_v26 = vld [vmem:[#allocation4 + $0x40] ss:$120 sm:$0x3] }
 0x495   :  { %5855 = vmatmul.mubr.bf16.vlgmr.msra.gmra.mrb[96].mxu0 %v9892_v37 }
 0x496   :  { %5896 = vmatmul.mubr.bf16.vlgmr.msra.gmra.mrb[96].mxu1 %v9894_v59  ;;  %5905 = vmatpush1.bf16.msra.mxu0 %v5404_v57  ;;  %v5288_v57 = vld [vmem:[#allocation4 + $0x4b] ss:$120 sm:$0x3] }
 0x497   :  { %5946 = vmatpush1.bf16.msra.mxu1 %v5468_v9  ;;  %5906 = vmatprep.subr.bf16.mxu0 %v5409_v3  ;;  %v5290_v9 = vld [vmem:[#allocation4 + $0x4c] ss:$120 sm:$0x3] }
 0x498   :  { %5947 = vmatprep.subr.bf16.mxu1 %v5473_v6  ;;  %5936 = vmatprep.mubr.bf16.mxu0 %v9884_v60  ;;  %v5420_v60 = vld [vmem:[#allocation5 + $0x90] sm:$0xff] }
 0x499   :  { %5977 = vmatprep.mubr.bf16.mxu1 %v9886_v7  ;;  %v5484_v7 = vld [vmem:[#allocation5 + $0x290] sm:$0xff] }
 0x49a   :  { %5907 = vmatpush1.bf16.msra.mxu0 %v5408_v10  ;;  %v5460_v3 = vld [vmem:[#allocation5 + $0x1d0] sm:$0xff]  ;;  %v5465_v10 = vld [vmem:[#allocation5 + $0x1f8] sm:$0xff] }
 0x49b   :  { %5948 = vmatpush1.bf16.msra.mxu1 %v5472_v2  ;;  %5908 = vmatprep.subr.bf16.mxu0 %v5413_v47  ;;  %v5524_v6 = vld [vmem:[#allocation5 + $0x3d0] sm:$0xff]  ;;  %v5529_v2 = vld [vmem:[#allocation5 + $0x3f8] sm:$0xff]  ;;  %v5269_v47 = vmax.f32 %v5262_v40, %v5264_v20  ;;  %v6019_v40 = vld [vmem:[#allocation5 + $0x908] sm:$0xff] }
 0x49c   :  { %5949 = vmatprep.subr.bf16.mxu1 %v5477_v48  ;;  %v5270_v48 = vmax.f32 %v5266_v46, %v5268_v52  ;;  %v6083_v20 = vld [vmem:[#allocation5 + $0xb08] sm:$0xff]  ;;  %v6018_v46 = vld [vmem:[#allocation5 + $0x900] sm:$0xff] }
 0x49d   :  { %v6082_v52 = vld [vmem:[#allocation5 + $0xb00] sm:$0xff] }
 0x49e   :  { %5909 = vmatpush1.bf16.msra.mxu0 %v5412_v56  ;;  %v5291_v56 = vmax.f32 %v5284_v21, %v5286_v26  ;;  %v6023_v21 = vld [vmem:[#allocation5 + $0x928] sm:$0xff] }
 0x49f   :  { %5950 = vmatpush1.bf16.msra.mxu1 %v5476_v12  ;;  %5910 = vmatprep.subr.bf16.mxu0 %v5417_v31  ;;  %v5292_v12 = vmax.f32 %v5288_v57, %v5290_v9  ;;  %v5464_v31 = vld [vmem:[#allocation5 + $0x1f0] sm:$0xff]  ;;  %v6087_v26 = vld [vmem:[#allocation5 + $0xb28] sm:$0xff]  ;;  %v6022_v57 = vld [vmem:[#allocation5 + $0x920] sm:$0xff] }
 0x4a0   :  { %5951 = vmatprep.subr.bf16.mxu1 %v5481_v41  ;;  %v5528_v41 = vld [vmem:[#allocation5 + $0x3f0] sm:$0xff]  ;;  %v6086_v9 = vld [vmem:[#allocation5 + $0xb20] sm:$0xff] }
 0x4a2   :  { %5911 = vmatpush1.bf16.msra.mxu0 %v5416_v45  ;;  %v5987_v45 = vld [vmem:[#allocation5 + $0x808] sm:$0xff] }
 0x4a3   :  { %5952 = vmatpush1.bf16.msra.mxu1 %v5480_v17  ;;  %5912 = vmatprep.subr.bf16.mxu0 %v5421_v1  ;;  %v6051_v17 = vld [vmem:[#allocation5 + $0xa08] sm:$0xff]  ;;  %v5271_v1 = vmax.f32 %v5269_v47, %v5270_v48 }
 0x4a4   :  { %5953 = vmatprep.subr.bf16.mxu1 %v5485_v13  ;;  %v5293_v13 = vmax.f32 %v5291_v56, %v5292_v12  ;;  %v6031_v47 = vld [vmem:[#allocation5 + $0x968] sm:$0xff]  ;;  %v6030_v56 = vld [vmem:[#allocation5 + $0x960] sm:$0xff] }
 0x4a5   :  { %v6095_v48 = vld [vmem:[#allocation5 + $0xb68] sm:$0xff]  ;;  %v6094_v12 = vld [vmem:[#allocation5 + $0xb60] sm:$0xff] }
 0x4a6   :  { %5913 = vmatpush1.bf16.msra.mxu0 %v5420_v60  ;;  %v5986_v60 = vld [vmem:[#allocation5 + $0x800] sm:$0xff] }
 0x4a7   :  { %5954 = vmatpush1.bf16.msra.mxu1 %v5484_v7  ;;  %5914 = vmatprep.subr.bf16.mxu0 %v5425_v23  ;;  %v6050_v7 = vld [vmem:[#allocation5 + $0xa00] sm:$0xff]  ;;  %v5991_v23 = vld [vmem:[#allocation5 + $0x828] sm:$0xff] }
 0x4a8   :  { %5955 = vmatprep.subr.bf16.mxu1 %v5489_v36  ;;  %v6055_v36 = vld [vmem:[#allocation5 + $0xa28] sm:$0xff] }
 0x4aa   :  { %5915 = vmatpush1.bf16.msra.mxu0 %v5424_v39  ;;  %v9900_v39 = vpack.c.bf16 %v5271_v1, %v5271_v1  ;;  %v6039_v1 = vld [vmem:[#allocation5 + $0x9a8] sm:$0xff] }
 0x4ab   :  { %5956 = vmatpush1.bf16.msra.mxu1 %v5488_v61  ;;  %5916 = vmatprep.subr.bf16.mxu0 %v5429_v24  ;;  %v9902_v61 = vpack.c.bf16 %v5293_v13, %v5293_v13  ;;  %v5990_v24 = vld [vmem:[#allocation5 + $0x820] sm:$0xff]  ;;  %v6103_v13 = vld [vmem:[#allocation5 + $0xba8] sm:$0xff] }
 0x4ac   :  { %5957 = vmatprep.subr.bf16.mxu1 %v5493_v25  ;;  %v6054_v25 = vld [vmem:[#allocation5 + $0xa20] sm:$0xff] }
 0x4ae   :  { %5917 = vmatpush1.bf16.msra.mxu0 %v5428_v0  ;;  %v5995_v0 = vld [vmem:[#allocation5 + $0x848] sm:$0xff] }
 0x4af   :  { %5958 = vmatpush1.bf16.msra.mxu1 %v5492_v11  ;;  %5918 = vmatprep.subr.bf16.mxu0 %v5433_v5  ;;  %v6059_v11 = vld [vmem:[#allocation5 + $0xa48] sm:$0xff]  ;;  %v5994_v5 = vld [vmem:[#allocation5 + $0x840] sm:$0xff] }
 0x4b0   :  { %5959 = vmatprep.subr.bf16.mxu1 %v5497_v8  ;;  %v5999_v8 = vld [vmem:[#allocation5 + $0x868] sm:$0xff] }
 0x4b2   :  { %5919 = vmatpush1.bf16.msra.mxu0 %v5432_v50  ;;  %v5998_v50 = vld [vmem:[#allocation5 + $0x860] sm:$0xff] }
 0x4b3   :  { %5960 = vmatpush1.bf16.msra.mxu1 %v5496_v38  ;;  %5920 = vmatprep.subr.bf16.mxu0 %v5437_v22  ;;  %v6062_v38 = vld [vmem:[#allocation5 + $0xa60] sm:$0xff]  ;;  %v6003_v22 = vld [vmem:[#allocation5 + $0x888] sm:$0xff] }
 0x4b4   :  { %5961 = vmatprep.subr.bf16.mxu1 %v5501_v43  ;;  %v6067_v43 = vld [vmem:[#allocation5 + $0xa88] sm:$0xff] }
 0x4b6   :  { %5921 = vmatpush1.bf16.msra.mxu0 %v5436_v62  ;;  %v6002_v62 = vld [vmem:[#allocation5 + $0x880] sm:$0xff] }
 0x4b7   :  { %5962 = vmatpush1.bf16.msra.mxu1 %v5500_v32  ;;  %5922 = vmatprep.subr.bf16.mxu0 %v5441_v33  ;;  %v6066_v32 = vld [vmem:[#allocation5 + $0xa80] sm:$0xff]  ;;  %v6007_v33 = vld [vmem:[#allocation5 + $0x8a8] sm:$0xff] }
 0x4b8   :  { %5963 = vmatprep.subr.bf16.mxu1 %v5505_v34  ;;  %v6071_v34 = vld [vmem:[#allocation5 + $0xaa8] sm:$0xff] }
 0x4ba   :  { %5923 = vmatpush1.bf16.msra.mxu0 %v5440_v35  ;;  %v6006_v35 = vld [vmem:[#allocation5 + $0x8a0] sm:$0xff] }
 0x4bb   :  { %5964 = vmatpush1.bf16.msra.mxu1 %v5504_v4  ;;  %5924 = vmatprep.subr.bf16.mxu0 %v5445_v44  ;;  %v6070_v4 = vld [vmem:[#allocation5 + $0xaa0] sm:$0xff] }
 0x4bc   :  { %5965 = vmatprep.subr.bf16.mxu1 %v5509_v58 }
 0x4be   :  { %5925 = vmatpush1.bf16.msra.mxu0 %v5444_v49  ;;  %v6011_v49 = vld [vmem:[#allocation5 + $0x8c8] sm:$0xff] }
 0x4bf   :  { %5966 = vmatpush1.bf16.msra.mxu1 %v5508_v51  ;;  %5926 = vmatprep.subr.bf16.mxu0 %v5449_v28  ;;  %v6075_v51 = vld [vmem:[#allocation5 + $0xac8] sm:$0xff] }
 0x4c0   :  { %5967 = vmatprep.subr.bf16.mxu1 %v5513_v19 }
 0x4c2   :  { %5927 = vmatpush1.bf16.msra.mxu0 %v5448_v29 }
 0x4c3   :  { %5968 = vmatpush1.bf16.msra.mxu1 %v5512_v30  ;;  %5928 = vmatprep.subr.bf16.mxu0 %v5453_v18 }
 0x4c4   :  { %5969 = vmatprep.subr.bf16.mxu1 %v5517_v27 }
 0x4c6   :  { %5929 = vmatpush1.bf16.msra.mxu0 %v5452_v42 }
 0x4c7   :  { %5970 = vmatpush1.bf16.msra.mxu1 %v5516_v53  ;;  %5930 = vmatprep.subr.bf16.mxu0 %v5457_v14  ;;  %v6010_v14 = vld [vmem:[#allocation5 + $0x8c0] sm:$0xff] }
 0x4c8   :  { %5971 = vmatprep.subr.bf16.mxu1 %v5521_v15  ;;  %v6074_v15 = vld [vmem:[#allocation5 + $0xac0] sm:$0xff] }
 0x4ca   :  { %5931 = vmatpush1.bf16.msra.mxu0 %v5456_v63  ;;  %v6015_v63 = vld [vmem:[#allocation5 + $0x8e8] sm:$0xff] }
 0x4cb   :  { %5972 = vmatpush1.bf16.msra.mxu1 %v5520_v54  ;;  %5932 = vmatprep.subr.bf16.mxu0 %v5461_v55  ;;  %v6079_v54 = vld [vmem:[#allocation5 + $0xae8] sm:$0xff]  ;;  %v6014_v55 = vld [vmem:[#allocation5 + $0x8e0] sm:$0xff] }
 0x4cc   :  { %5973 = vmatprep.subr.bf16.mxu1 %v5525_v16  ;;  %v6078_v16 = vld [vmem:[#allocation5 + $0xae0] sm:$0xff] }
 0x4ce   :  { %5933 = vmatpush1.bf16.msra.mxu0 %v5460_v3  ;;  %v6027_v3 = vld [vmem:[#allocation5 + $0x948] sm:$0xff] }
 0x4cf   :  { %5974 = vmatpush1.bf16.msra.mxu1 %v5524_v6  ;;  %5934 = vmatprep.subr.bf16.mxu0 %v5465_v10  ;;  %v6091_v6 = vld [vmem:[#allocation5 + $0xb48] sm:$0xff]  ;;  %v6026_v10 = vld [vmem:[#allocation5 + $0x940] sm:$0xff] }
 0x4d0   :  { %5975 = vmatprep.subr.bf16.mxu1 %v5529_v2  ;;  %v6090_v2 = vld [vmem:[#allocation5 + $0xb40] sm:$0xff] }
 0x4d2   :  { %5935 = vmatpush1.bf16.msra.mxu0 %v5464_v31  ;;  %v6035_v31 = vld [vmem:[#allocation5 + $0x988] sm:$0xff] }
 0x4d3   :  { %5976 = vmatpush1.bf16.msra.mxu1 %v5528_v41  ;;  %6114 = vmatprep.subr.bf16.mxu0 %v5987_v45  ;;  %v6099_v41 = vld [vmem:[#allocation5 + $0xb88] sm:$0xff]  ;;  %v6034_v45 = vld [vmem:[#allocation5 + $0x980] sm:$0xff] }
 0x4d4   :  { %6155 = vmatprep.subr.bf16.mxu1 %v6051_v17  ;;  %v6098_v17 = vld [vmem:[#allocation5 + $0xb80] sm:$0xff] }
 0x4d5   :  { %5937 = vmatmul.mubr.bf16.vlgmr.msra.gmra.mrb[100].mxu0 %v9892_v37  ;;  %v6058_v37 = vld [vmem:[#allocation5 + $0xa40] sm:$0xff] }
 0x4d6   :  { %5978 = vmatmul.mubr.bf16.vlgmr.msra.gmra.mrb[100].mxu1 %v9894_v59  ;;  %6115 = vmatpush1.bf16.msra.mxu0 %v5986_v60  ;;  %v6063_v59 = vld [vmem:[#allocation5 + $0xa68] sm:$0xff]  ;;  %v5251_v60 = vld [vmem:[#allocation4 + $0x2b] ss:$120 sm:$0x3] }
 0x4d7   :  { %6156 = vmatpush1.bf16.msra.mxu1 %v6050_v7  ;;  %6116 = vmatprep.subr.bf16.mxu0 %v5991_v23  ;;  %v5253_v7 = vld [vmem:[#allocation4 + $0x2c] ss:$120 sm:$0x3]  ;;  %v5255_v23 = vld [vmem:[#allocation4 + $0x37] ss:$120 sm:$0x3] }
 0x4d8   :  { %6157 = vmatprep.subr.bf16.mxu1 %v6055_v36  ;;  %6146 = vmatprep.mubr.bf16.mxu0 %v9900_v39  ;;  %v5257_v36 = vld [vmem:[#allocation4 + $0x38] ss:$120 sm:$0x3] }
 0x4d9   :  { %6187 = vmatprep.mubr.bf16.mxu1 %v9902_v61 }
 0x4da   :  { %6117 = vmatpush1.bf16.msra.mxu0 %v5990_v24  ;;  %v5273_v24 = vld [vmem:[#allocation4 + $0x3d] ss:$120 sm:$0x3] }
 0x4db   :  { %6158 = vmatpush1.bf16.msra.mxu1 %v6054_v25  ;;  %6118 = vmatprep.subr.bf16.mxu0 %v5995_v0  ;;  %v5275_v25 = vld [vmem:[#allocation4 + $0x3e] ss:$120 sm:$0x3]  ;;  %v5277_v0 = vld [vmem:[#allocation4 + $0x49] ss:$120 sm:$0x3] }
 0x4dc   :  { %6159 = vmatprep.subr.bf16.mxu1 %v6059_v11  ;;  %v5279_v11 = vld [vmem:[#allocation4 + $0x4a] ss:$120 sm:$0x3] }
 0x4de   :  { %6119 = vmatpush1.bf16.msra.mxu0 %v5994_v5  ;;  %v6038_v5 = vld [vmem:[#allocation5 + $0x9a0] sm:$0xff] }
 0x4df   :  { %6160 = vmatpush1.bf16.msra.mxu1 %v6058_v37  ;;  %6120 = vmatprep.subr.bf16.mxu0 %v5999_v8  ;;  %v6102_v37 = vld [vmem:[#allocation5 + $0xba0] sm:$0xff]  ;;  %v6043_v8 = vld [vmem:[#allocation5 + $0x9c8] sm:$0xff] }
 0x4e0   :  { %6161 = vmatprep.subr.bf16.mxu1 %v6063_v59  ;;  %v6107_v59 = vld [vmem:[#allocation5 + $0xbc8] sm:$0xff] }
 0x4e2   :  { %6121 = vmatpush1.bf16.msra.mxu0 %v5998_v50  ;;  %v5258_v50 = vmax.f32 %v5251_v60, %v5253_v7  ;;  %v6012_v60 = vld [vmem:[#allocation5 + $0x8d0] sm:$0xff] }
 0x4e3   :  { %6162 = vmatpush1.bf16.msra.mxu1 %v6062_v38  ;;  %6122 = vmatprep.subr.bf16.mxu0 %v6003_v22  ;;  %v5259_v38 = vmax.f32 %v5255_v23, %v5257_v36  ;;  %v5280_v22 = vmax.f32 %v5273_v24, %v5275_v25  ;;  %v6076_v7 = vld [vmem:[#allocation5 + $0xad0] sm:$0xff]  ;;  %v6017_v23 = vld [vmem:[#allocation5 + $0x8f8] sm:$0xff] }
 0x4e4   :  { %6163 = vmatprep.subr.bf16.mxu1 %v6067_v43  ;;  %v5281_v43 = vmax.f32 %v5277_v0, %v5279_v11  ;;  %v6081_v36 = vld [vmem:[#allocation5 + $0xaf8] sm:$0xff]  ;;  %v6016_v24 = vld [vmem:[#allocation5 + $0x8f0] sm:$0xff] }
 0x4e5   :  { %v6080_v25 = vld [vmem:[#allocation5 + $0xaf0] sm:$0xff]  ;;  %v6021_v0 = vld [vmem:[#allocation5 + $0x918] sm:$0xff] }
 0x4e6   :  { %6123 = vmatpush1.bf16.msra.mxu0 %v6002_v62  ;;  %v6042_v62 = vld [vmem:[#allocation5 + $0x9c0] sm:$0xff]  ;;  %v6085_v11 = vld [vmem:[#allocation5 + $0xb18] sm:$0xff] }
 0x4e7   :  { %6164 = vmatpush1.bf16.msra.mxu1 %v6066_v32  ;;  %6124 = vmatprep.subr.bf16.mxu0 %v6007_v33  ;;  %v6106_v32 = vld [vmem:[#allocation5 + $0xbc0] sm:$0xff]  ;;  %v6047_v33 = vld [vmem:[#allocation5 + $0x9e8] sm:$0xff] }
 0x4e8   :  { %6165 = vmatprep.subr.bf16.mxu1 %v6071_v34  ;;  %v5692_v44 = vpop.f32.mrb[88].mxu0  ;;  %v6111_v34 = vld [vmem:[#allocation5 + $0xbe8] sm:$0xff] }
 0x4e9   :  { %v5733_v58 = vpop.f32.mrb[88].mxu1  ;;  %v5694_v19 = vpop.f32.mrb[89].mxu0 }
 0x4ea   :  { %v9908_v28 = vadd.f32 %v5733_v58, %v5692_v44  ;;  %v5735_v29 = vpop.f32.mrb[89].mxu1  ;;  %v5696_v18 = vpop.f32.mrb[90].mxu0  ;;  %6125 = vmatpush1.bf16.msra.mxu0 %v6006_v35  ;;  %v5260_v35 = vmax.f32 %v5258_v50, %v5259_v38  ;;  %v6046_v44 = vld [vmem:[#allocation5 + $0x9e0] sm:$0xff]  ;;  %v6024_v50 = vld [vmem:[#allocation5 + $0x930] sm:$0xff] }
 0x4eb   :  { %v9910_v30 = vadd.f32 %v5735_v29, %v5694_v19  ;;  %v5737_v27 = vpop.f32.mrb[90].mxu1  ;;  %6166 = vmatpush1.bf16.msra.mxu1 %v6070_v4  ;;  %v5697_v42 = vpop.f32.mrb[91].mxu0  ;;  %6126 = vmatprep.subr.bf16.mxu0 %v6011_v49  ;;  %v5282_v4 = vmax.f32 %v5280_v22, %v5281_v43  ;;  %v6110_v58 = vld [vmem:[#allocation5 + $0xbe0] sm:$0xff]  ;;  %v5989_v49 = vld [vmem:[#allocation5 + $0x818] sm:$0xff]  ;;  %v5988_v18 = vld [vmem:[#allocation5 + $0x810] sm:$0xff] }
 0x4ec   :  { %v5738_v53 = vpop.f32.mrb[91].mxu1  ;;  %6167 = vmatprep.subr.bf16.mxu1 %v6075_v51  ;;  %v6053_v51 = vld [vmem:[#allocation5 + $0xa18] sm:$0xff]  ;;  %v9912_v19 = vpack.c.bf16 %v5260_v35, %v5260_v35  ;;  %v6052_v27 = vld [vmem:[#allocation5 + $0xa10] sm:$0xff] }
 0x4ed   :  { %v9914_v29 = vpack.c.bf16 %v5282_v4, %v5282_v4  ;;  %v5993_v42 = vld [vmem:[#allocation5 + $0x838] sm:$0xff]  ;;  %v6088_v38 = vld [vmem:[#allocation5 + $0xb30] sm:$0xff] }
 0x4ee   :  { %6127 = vmatpush1.bf16.msra.mxu0 %v6010_v14  ;;  %v6057_v53 = vld [vmem:[#allocation5 + $0xa38] sm:$0xff]  ;;  %v5992_v14 = vld [vmem:[#allocation5 + $0x830] sm:$0xff] }
 0x4ef   :  { %6168 = vmatpush1.bf16.msra.mxu1 %v6074_v15  ;;  %6128 = vmatprep.subr.bf16.mxu0 %v6015_v63  ;;  %v6056_v15 = vld [vmem:[#allocation5 + $0xa30] sm:$0xff]  ;;  %v5997_v63 = vld [vmem:[#allocation5 + $0x858] sm:$0xff] }
 0x4f0   :  { %6169 = vmatprep.subr.bf16.mxu1 %v6079_v54  ;;  %v6061_v54 = vld [vmem:[#allocation5 + $0xa58] sm:$0xff]  ;;  %v6032_v35 = vld [vmem:[#allocation5 + $0x970] sm:$0xff] }
 0x4f1   :  { %v6029_v22 = vld [vmem:[#allocation5 + $0x958] sm:$0xff]  ;;  %v6096_v4 = vld [vmem:[#allocation5 + $0xb70] sm:$0xff] }
 0x4f2   :  { %6129 = vmatpush1.bf16.msra.mxu0 %v6014_v55  ;;  %v5996_v55 = vld [vmem:[#allocation5 + $0x850] sm:$0xff]  ;;  %v6093_v43 = vld [vmem:[#allocation5 + $0xb58] sm:$0xff] }
 0x4f3   :  { %6170 = vmatpush1.bf16.msra.mxu1 %v6078_v16  ;;  %6130 = vmatprep.subr.bf16.mxu0 %v6019_v40  ;;  %v6060_v16 = vld [vmem:[#allocation5 + $0xa50] sm:$0xff]  ;;  %v6001_v40 = vld [vmem:[#allocation5 + $0x878] sm:$0xff] }
 0x4f4   :  { %6171 = vmatprep.subr.bf16.mxu1 %v6083_v20  ;;  %v6065_v20 = vld [vmem:[#allocation5 + $0xa78] sm:$0xff] }
 0x4f6   :  { %6131 = vmatpush1.bf16.msra.mxu0 %v6018_v46  ;;  %v6000_v46 = vld [vmem:[#allocation5 + $0x870] sm:$0xff] }
 0x4f7   :  { %6172 = vmatpush1.bf16.msra.mxu1 %v6082_v52  ;;  %6132 = vmatprep.subr.bf16.mxu0 %v6023_v21  ;;  %v6064_v52 = vld [vmem:[#allocation5 + $0xa70] sm:$0xff]  ;;  %v6005_v21 = vld [vmem:[#allocation5 + $0x898] sm:$0xff] }
 0x4f8   :  { %6173 = vmatprep.subr.bf16.mxu1 %v6087_v26  ;;  %v6069_v26 = vld [vmem:[#allocation5 + $0xa98] sm:$0xff] }
 0x4fa   :  { %6133 = vmatpush1.bf16.msra.mxu0 %v6022_v57  ;;  %v6009_v57 = vld [vmem:[#allocation5 + $0x8b8] sm:$0xff] }
 0x4fb   :  { %6174 = vmatpush1.bf16.msra.mxu1 %v6086_v9  ;;  %6134 = vmatprep.subr.bf16.mxu0 %v6027_v3  ;;  %v6073_v9 = vld [vmem:[#allocation5 + $0xab8] sm:$0xff]  ;;  %v6008_v3 = vld [vmem:[#allocation5 + $0x8b0] sm:$0xff] }
 0x4fc   :  { %6175 = vmatprep.subr.bf16.mxu1 %v6091_v6  ;;  %v6072_v6 = vld [vmem:[#allocation5 + $0xab0] sm:$0xff] }
 0x4fe   :  { %6135 = vmatpush1.bf16.msra.mxu0 %v6026_v10 }
 0x4ff   :  { %6176 = vmatpush1.bf16.msra.mxu1 %v6090_v2  ;;  %6136 = vmatprep.subr.bf16.mxu0 %v6031_v47  ;;  %v6013_v47 = vld [vmem:[#allocation5 + $0x8d8] sm:$0xff] }
 0x500   :  { %6177 = vmatprep.subr.bf16.mxu1 %v6095_v48  ;;  %v6077_v48 = vld [vmem:[#allocation5 + $0xad8] sm:$0xff] }
 0x502   :  { %6137 = vmatpush1.bf16.msra.mxu0 %v6030_v56 }
 0x503   :  { %6178 = vmatpush1.bf16.msra.mxu1 %v6094_v12  ;;  %6138 = vmatprep.subr.bf16.mxu0 %v6035_v31 }
 0x504   :  { %6179 = vmatprep.subr.bf16.mxu1 %v6099_v41 }
 0x506   :  { %6139 = vmatpush1.bf16.msra.mxu0 %v6034_v45 }
 0x507   :  { %6180 = vmatpush1.bf16.msra.mxu1 %v6098_v17  ;;  %6140 = vmatprep.subr.bf16.mxu0 %v6039_v1 }
 0x508   :  { %6181 = vmatprep.subr.bf16.mxu1 %v6103_v13 }
 0x50a   :  { %6141 = vmatpush1.bf16.msra.mxu0 %v6038_v5  ;;  %v6020_v5 = vld [vmem:[#allocation5 + $0x910] sm:$0xff] }
 0x50b   :  { %6182 = vmatpush1.bf16.msra.mxu1 %v6102_v37  ;;  %6142 = vmatprep.subr.bf16.mxu0 %v6043_v8  ;;  %v6084_v37 = vld [vmem:[#allocation5 + $0xb10] sm:$0xff]  ;;  %v6025_v8 = vld [vmem:[#allocation5 + $0x938] sm:$0xff] }
 0x50c   :  { %6183 = vmatprep.subr.bf16.mxu1 %v6107_v59  ;;  %v6089_v59 = vld [vmem:[#allocation5 + $0xb38] sm:$0xff] }
 0x50e   :  { %6143 = vmatpush1.bf16.msra.mxu0 %v6042_v62  ;;  %v6028_v62 = vld [vmem:[#allocation5 + $0x950] sm:$0xff] }
 0x50f   :  { %6184 = vmatpush1.bf16.msra.mxu1 %v6106_v32  ;;  %6144 = vmatprep.subr.bf16.mxu0 %v6047_v33  ;;  %v6092_v32 = vld [vmem:[#allocation5 + $0xb50] sm:$0xff]  ;;  %v6033_v33 = vld [vmem:[#allocation5 + $0x978] sm:$0xff] }
 0x510   :  { %6185 = vmatprep.subr.bf16.mxu1 %v6111_v34  ;;  %v6097_v34 = vld [vmem:[#allocation5 + $0xb78] sm:$0xff] }
 0x512   :  { %6145 = vmatpush1.bf16.msra.mxu0 %v6046_v44  ;;  %v6037_v44 = vld [vmem:[#allocation5 + $0x998] sm:$0xff] }
 0x513   :  { %6186 = vmatpush1.bf16.msra.mxu1 %v6110_v58  ;;  %6196 = vmatprep.subr.bf16.mxu0 %v5989_v49  ;;  %v6101_v58 = vld [vmem:[#allocation5 + $0xb98] sm:$0xff]  ;;  %v6036_v49 = vld [vmem:[#allocation5 + $0x990] sm:$0xff] }
 0x514   :  { %6237 = vmatprep.subr.bf16.mxu1 %v6053_v51  ;;  %v6100_v51 = vld [vmem:[#allocation5 + $0xb90] sm:$0xff] }
 0x515   :  { %6147 = vmatmul.mubr.bf16.vlgmr.msra.gmra.mrb[104].mxu0 %v9912_v19 }
 0x516   :  { %6188 = vmatmul.mubr.bf16.vlgmr.msra.gmra.mrb[104].mxu1 %v9914_v29  ;;  %6197 = vmatpush1.bf16.msra.mxu0 %v5988_v18  ;;  %v6041_v18 = vld [vmem:[#allocation5 + $0x9b8] sm:$0xff] }
 0x517   :  { %6238 = vmatpush1.bf16.msra.mxu1 %v6052_v27  ;;  %6198 = vmatprep.subr.bf16.mxu0 %v5993_v42  ;;  %v6105_v27 = vld [vmem:[#allocation5 + $0xbb8] sm:$0xff]  ;;  %v6040_v42 = vld [vmem:[#allocation5 + $0x9b0] sm:$0xff] }
 0x518   :  { %6239 = vmatprep.subr.bf16.mxu1 %v6057_v53  ;;  %6228 = vmatprep.mubr.bf16.mxu0 %v9900_v39  ;;  %v6004_v39 = vld [vmem:[#allocation5 + $0x890] sm:$0xff] }
 0x519   :  { %6269 = vmatprep.mubr.bf16.mxu1 %v9902_v61  ;;  %v6068_v61 = vld [vmem:[#allocation5 + $0xa90] sm:$0xff] }
 0x51a   :  { %6199 = vmatpush1.bf16.msra.mxu0 %v5992_v14  ;;  %v6104_v53 = vld [vmem:[#allocation5 + $0xbb0] sm:$0xff]  ;;  %v6045_v14 = vld [vmem:[#allocation5 + $0x9d8] sm:$0xff] }
 0x51b   :  { %6240 = vmatpush1.bf16.msra.mxu1 %v6056_v15  ;;  %6200 = vmatprep.subr.bf16.mxu0 %v5997_v63  ;;  %v6109_v15 = vld [vmem:[#allocation5 + $0xbd8] sm:$0xff]  ;;  %v5306_v63 = vld [vmem:[#allocation4 + $0x43] ss:$120 sm:$0x3] }
 0x51c   :  { %6241 = vmatprep.subr.bf16.mxu1 %v6061_v54  ;;  %v5308_v54 = vld [vmem:[#allocation4 + $0x44] ss:$120 sm:$0x3] }
 0x51e   :  { %6201 = vmatpush1.bf16.msra.mxu0 %v5996_v55  ;;  %v5310_v55 = vld [vmem:[#allocation4 + $0x4f] ss:$120 sm:$0x3] }
 0x51f   :  { %6242 = vmatpush1.bf16.msra.mxu1 %v6060_v16  ;;  %6202 = vmatprep.subr.bf16.mxu0 %v6001_v40  ;;  %v5312_v16 = vld [vmem:[#allocation4 + $0x50] ss:$120 sm:$0x3]  ;;  %v5328_v40 = vld [vmem:[#allocation4 + $0x55] ss:$120 sm:$0x3] }
 0x520   :  { %6243 = vmatprep.subr.bf16.mxu1 %v6065_v20  ;;  %v5330_v20 = vld [vmem:[#allocation4 + $0x56] ss:$120 sm:$0x3] }
 0x522   :  { %6203 = vmatpush1.bf16.msra.mxu0 %v6000_v46  ;;  %v5332_v46 = vld [vmem:[#allocation4 + $0x61] ss:$120 sm:$0x3] }
 0x523   :  { %6244 = vmatpush1.bf16.msra.mxu1 %v6064_v52  ;;  %6204 = vmatprep.subr.bf16.mxu0 %v6005_v21  ;;  %v5334_v52 = vld [vmem:[#allocation4 + $0x62] ss:$120 sm:$0x3] }
 0x524   :  { %6245 = vmatprep.subr.bf16.mxu1 %v6069_v26  ;;  %v6044_v21 = vld [vmem:[#allocation5 + $0x9d0] sm:$0xff] }
 0x525   :  { %v6108_v26 = vld [vmem:[#allocation5 + $0xbd0] sm:$0xff] }
 0x526   :  { %6205 = vmatpush1.bf16.msra.mxu0 %v6004_v39  ;;  %v6049_v39 = vld [vmem:[#allocation5 + $0x9f8] sm:$0xff] }
 0x527   :  { %6246 = vmatpush1.bf16.msra.mxu1 %v6068_v61  ;;  %6206 = vmatprep.subr.bf16.mxu0 %v6009_v57  ;;  %v6113_v61 = vld [vmem:[#allocation5 + $0xbf8] sm:$0xff]  ;;  %v5313_v57 = vmax.f32 %v5306_v63, %v5308_v54  ;;  %v6370_v63 = vld [vmem:[#allocation5 + $0xec0] sm:$0xff] }
 0x528   :  { %6247 = vmatprep.subr.bf16.mxu1 %v6073_v9  ;;  %v5774_v10 = vpop.f32.mrb[92].mxu0  ;;  %v5314_v9 = vmax.f32 %v5310_v55, %v5312_v16  ;;  %v6311_v55 = vld [vmem:[#allocation5 + $0xce8] sm:$0xff]  ;;  %v6374_v16 = vld [vmem:[#allocation5 + $0xee0] sm:$0xff] }
 0x529   :  { %v5815_v2 = vpop.f32.mrb[92].mxu1  ;;  %v5776_v12 = vpop.f32.mrb[93].mxu0 }
 0x52a   :  { %v9920_v56 = vadd.f32 %v5815_v2, %v5774_v10  ;;  %v5817_v31 = vpop.f32.mrb[93].mxu1  ;;  %v5778_v45 = vpop.f32.mrb[94].mxu0  ;;  %6207 = vmatpush1.bf16.msra.mxu0 %v6008_v3  ;;  %v5335_v3 = vmax.f32 %v5328_v40, %v5330_v20  ;;  %v6048_v10 = vld [vmem:[#allocation5 + $0x9f0] sm:$0xff]  ;;  %v6315_v40 = vld [vmem:[#allocation5 + $0xd08] sm:$0xff] }
 0x52b   :  { %v9922_v41 = vadd.f32 %v5817_v31, %v5776_v12  ;;  %v5819_v17 = vpop.f32.mrb[94].mxu1  ;;  %6248 = vmatpush1.bf16.msra.mxu1 %v6072_v6  ;;  %v5779_v1 = vpop.f32.mrb[95].mxu0  ;;  %6208 = vmatprep.subr.bf16.mxu0 %v6013_v47  ;;  %v5336_v6 = vmax.f32 %v5332_v46, %v5334_v52  ;;  %v6112_v2 = vld [vmem:[#allocation5 + $0xbf0] sm:$0xff]  ;;  %v6283_v47 = vld [vmem:[#allocation5 + $0xc08] sm:$0xff]  ;;  %v5315_v12 = vmax.f32 %v5313_v57, %v5314_v9  ;;  %v6282_v45 = vld [vmem:[#allocation5 + $0xc00] sm:$0xff] }
 0x52c   :  { %v5820_v13 = vpop.f32.mrb[95].mxu1  ;;  %6249 = vmatprep.subr.bf16.mxu1 %v6077_v48  ;;  %v6347_v48 = vld [vmem:[#allocation5 + $0xe08] sm:$0xff]  ;;  %v6346_v17 = vld [vmem:[#allocation5 + $0xe00] sm:$0xff] }
 0x52d   :  { %v5337_v31 = vmax.f32 %v5335_v3, %v5336_v6  ;;  %v6287_v1 = vld [vmem:[#allocation5 + $0xc28] sm:$0xff]  ;;  %v6314_v46 = vld [vmem:[#allocation5 + $0xd00] sm:$0xff] }
 0x52e   :  { %6209 = vmatpush1.bf16.msra.mxu0 %v6012_v60  ;;  %v6351_v13 = vld [vmem:[#allocation5 + $0xe28] sm:$0xff]  ;;  %v9924_v60 = vpack.c.bf16 %v5315_v12, %v5315_v12  ;;  %v6378_v52 = vld [vmem:[#allocation5 + $0xf00] sm:$0xff] }
 0x52f   :  { %6250 = vmatpush1.bf16.msra.mxu1 %v6076_v7  ;;  %6210 = vmatprep.subr.bf16.mxu0 %v6017_v23  ;;  %v9926_v7 = vpack.c.bf16 %v5337_v31, %v5337_v31  ;;  %v6286_v23 = vld [vmem:[#allocation5 + $0xc20] sm:$0xff]  ;;  %v6379_v20 = vld [vmem:[#allocation5 + $0xf08] sm:$0xff] }
 0x530   :  { %6251 = vmatprep.subr.bf16.mxu1 %v6081_v36  ;;  %v6350_v36 = vld [vmem:[#allocation5 + $0xe20] sm:$0xff]  ;;  %v6323_v57 = vld [vmem:[#allocation5 + $0xd48] sm:$0xff] }
 0x531   :  { %v6387_v9 = vld [vmem:[#allocation5 + $0xf48] sm:$0xff]  ;;  %v6322_v3 = vld [vmem:[#allocation5 + $0xd40] sm:$0xff] }
 0x532   :  { %6211 = vmatpush1.bf16.msra.mxu0 %v6016_v24  ;;  %v6291_v24 = vld [vmem:[#allocation5 + $0xc48] sm:$0xff]  ;;  %v6386_v6 = vld [vmem:[#allocation5 + $0xf40] sm:$0xff] }
 0x533   :  { %6252 = vmatpush1.bf16.msra.mxu1 %v6080_v25  ;;  %6212 = vmatprep.subr.bf16.mxu0 %v6021_v0  ;;  %v6355_v25 = vld [vmem:[#allocation5 + $0xe48] sm:$0xff]  ;;  %v6290_v0 = vld [vmem:[#allocation5 + $0xc40] sm:$0xff] }
 0x534   :  { %6253 = vmatprep.subr.bf16.mxu1 %v6085_v11  ;;  %v6295_v11 = vld [vmem:[#allocation5 + $0xc68] sm:$0xff] }
 0x535   :  { %v6331_v12 = vld [vmem:[#allocation5 + $0xd88] sm:$0xff] }
 0x536   :  { %6213 = vmatpush1.bf16.msra.mxu0 %v6020_v5  ;;  %v6294_v5 = vld [vmem:[#allocation5 + $0xc60] sm:$0xff]  ;;  %v6395_v31 = vld [vmem:[#allocation5 + $0xf88] sm:$0xff] }
 0x537   :  { %6254 = vmatpush1.bf16.msra.mxu1 %v6084_v37  ;;  %6214 = vmatprep.subr.bf16.mxu0 %v6025_v8  ;;  %v6358_v37 = vld [vmem:[#allocation5 + $0xe60] sm:$0xff]  ;;  %v6299_v8 = vld [vmem:[#allocation5 + $0xc88] sm:$0xff] }
 0x538   :  { %6255 = vmatprep.subr.bf16.mxu1 %v6089_v59  ;;  %v6363_v59 = vld [vmem:[#allocation5 + $0xe88] sm:$0xff] }
 0x53a   :  { %6215 = vmatpush1.bf16.msra.mxu0 %v6024_v50  ;;  %v6298_v50 = vld [vmem:[#allocation5 + $0xc80] sm:$0xff] }
 0x53b   :  { %6256 = vmatpush1.bf16.msra.mxu1 %v6088_v38  ;;  %6216 = vmatprep.subr.bf16.mxu0 %v6029_v22  ;;  %v6362_v38 = vld [vmem:[#allocation5 + $0xe80] sm:$0xff]  ;;  %v6303_v22 = vld [vmem:[#allocation5 + $0xca8] sm:$0xff] }
 0x53c   :  { %6257 = vmatprep.subr.bf16.mxu1 %v6093_v43  ;;  %v6367_v43 = vld [vmem:[#allocation5 + $0xea8] sm:$0xff] }
 0x53e   :  { %6217 = vmatpush1.bf16.msra.mxu0 %v6028_v62  ;;  %v6302_v62 = vld [vmem:[#allocation5 + $0xca0] sm:$0xff] }
 0x53f   :  { %6258 = vmatpush1.bf16.msra.mxu1 %v6092_v32  ;;  %6218 = vmatprep.subr.bf16.mxu0 %v6033_v33  ;;  %v6366_v32 = vld [vmem:[#allocation5 + $0xea0] sm:$0xff] }
 0x540   :  { %6259 = vmatprep.subr.bf16.mxu1 %v6097_v34 }
 0x542   :  { %6219 = vmatpush1.bf16.msra.mxu0 %v6032_v35  ;;  %v6307_v35 = vld [vmem:[#allocation5 + $0xcc8] sm:$0xff] }
 0x543   :  { %6260 = vmatpush1.bf16.msra.mxu1 %v6096_v4  ;;  %6220 = vmatprep.subr.bf16.mxu0 %v6037_v44  ;;  %v6371_v4 = vld [vmem:[#allocation5 + $0xec8] sm:$0xff] }
 0x544   :  { %6261 = vmatprep.subr.bf16.mxu1 %v6101_v58 }
 0x546   :  { %6221 = vmatpush1.bf16.msra.mxu0 %v6036_v49 }
 0x547   :  { %6262 = vmatpush1.bf16.msra.mxu1 %v6100_v51  ;;  %6222 = vmatprep.subr.bf16.mxu0 %v6041_v18 }
 0x548   :  { %6263 = vmatprep.subr.bf16.mxu1 %v6105_v27 }
 0x54a   :  { %6223 = vmatpush1.bf16.msra.mxu0 %v6040_v42 }
 0x54b   :  { %6264 = vmatpush1.bf16.msra.mxu1 %v6104_v53  ;;  %6224 = vmatprep.subr.bf16.mxu0 %v6045_v14 }
 0x54c   :  { %6265 = vmatprep.subr.bf16.mxu1 %v6109_v15  ;;  %v6306_v15 = vld [vmem:[#allocation5 + $0xcc0] sm:$0xff] }
 0x54e   :  { %6225 = vmatpush1.bf16.msra.mxu0 %v6044_v21  ;;  %v6319_v21 = vld [vmem:[#allocation5 + $0xd28] sm:$0xff] }
 0x54f   :  { %6266 = vmatpush1.bf16.msra.mxu1 %v6108_v26  ;;  %6226 = vmatprep.subr.bf16.mxu0 %v6049_v39  ;;  %v6383_v26 = vld [vmem:[#allocation5 + $0xf28] sm:$0xff]  ;;  %v6318_v39 = vld [vmem:[#allocation5 + $0xd20] sm:$0xff] }
 0x550   :  { %6267 = vmatprep.subr.bf16.mxu1 %v6113_v61  ;;  %v6382_v61 = vld [vmem:[#allocation5 + $0xf20] sm:$0xff] }
 0x552   :  { %6227 = vmatpush1.bf16.msra.mxu0 %v6048_v10  ;;  %v6327_v10 = vld [vmem:[#allocation5 + $0xd68] sm:$0xff] }
 0x553   :  { %6268 = vmatpush1.bf16.msra.mxu1 %v6112_v2  ;;  %6410 = vmatprep.subr.bf16.mxu0 %v6283_v47  ;;  %v6391_v2 = vld [vmem:[#allocation5 + $0xf68] sm:$0xff]  ;;  %v6326_v47 = vld [vmem:[#allocation5 + $0xd60] sm:$0xff] }
 0x554   :  { %6451 = vmatprep.subr.bf16.mxu1 %v6347_v48  ;;  %v6390_v48 = vld [vmem:[#allocation5 + $0xf60] sm:$0xff] }
 0x555   :  { %6229 = vmatmul.mubr.bf16.vlgmr.msra.gmra.mrb[108].mxu0 %v9912_v19  ;;  %v6354_v19 = vld [vmem:[#allocation5 + $0xe40] sm:$0xff] }
 0x556   :  { %6270 = vmatmul.mubr.bf16.vlgmr.msra.gmra.mrb[108].mxu1 %v9914_v29  ;;  %6411 = vmatpush1.bf16.msra.mxu0 %v6282_v45  ;;  %v6359_v29 = vld [vmem:[#allocation5 + $0xe68] sm:$0xff]  ;;  %v6330_v45 = vld [vmem:[#allocation5 + $0xd80] sm:$0xff] }
 0x557   :  { %6452 = vmatpush1.bf16.msra.mxu1 %v6346_v17  ;;  %6412 = vmatprep.subr.bf16.mxu0 %v6287_v1  ;;  %v6394_v17 = vld [vmem:[#allocation5 + $0xf80] sm:$0xff]  ;;  %v6335_v1 = vld [vmem:[#allocation5 + $0xda8] sm:$0xff] }
 0x558   :  { %6453 = vmatprep.subr.bf16.mxu1 %v6351_v13  ;;  %6442 = vmatprep.mubr.bf16.mxu0 %v9924_v60  ;;  %v6399_v13 = vld [vmem:[#allocation5 + $0xfa8] sm:$0xff] }
 0x559   :  { %6483 = vmatprep.mubr.bf16.mxu1 %v9926_v7 }
 0x55a   :  { %6413 = vmatpush1.bf16.msra.mxu0 %v6286_v23  ;;  %v5295_v23 = vld [vmem:[#allocation4 + $0x41] ss:$120 sm:$0x3] }
 0x55b   :  { %6454 = vmatpush1.bf16.msra.mxu1 %v6350_v36  ;;  %6414 = vmatprep.subr.bf16.mxu0 %v6291_v24  ;;  %v5297_v36 = vld [vmem:[#allocation4 + $0x42] ss:$120 sm:$0x3]  ;;  %v5299_v24 = vld [vmem:[#allocation4 + $0x4d] ss:$120 sm:$0x3] }
 0x55c   :  { %6455 = vmatprep.subr.bf16.mxu1 %v6355_v25  ;;  %v5301_v25 = vld [vmem:[#allocation4 + $0x4e] ss:$120 sm:$0x3] }
 0x55e   :  { %6415 = vmatpush1.bf16.msra.mxu0 %v6290_v0  ;;  %v5317_v0 = vld [vmem:[#allocation4 + $0x45] ss:$120 sm:$0x3] }
 0x55f   :  { %6456 = vmatpush1.bf16.msra.mxu1 %v6354_v19  ;;  %6416 = vmatprep.subr.bf16.mxu0 %v6295_v11  ;;  %v5319_v19 = vld [vmem:[#allocation4 + $0x46] ss:$120 sm:$0x3]  ;;  %v5321_v11 = vld [vmem:[#allocation4 + $0x51] ss:$120 sm:$0x3] }
 0x560   :  { %6457 = vmatprep.subr.bf16.mxu1 %v6359_v29  ;;  %v5323_v29 = vld [vmem:[#allocation4 + $0x52] ss:$120 sm:$0x3] }
 0x562   :  { %6417 = vmatpush1.bf16.msra.mxu0 %v6294_v5  ;;  %v6334_v5 = vld [vmem:[#allocation5 + $0xda0] sm:$0xff] }
 0x563   :  { %6458 = vmatpush1.bf16.msra.mxu1 %v6358_v37  ;;  %6418 = vmatprep.subr.bf16.mxu0 %v6299_v8  ;;  %v6398_v37 = vld [vmem:[#allocation5 + $0xfa0] sm:$0xff]  ;;  %v6339_v8 = vld [vmem:[#allocation5 + $0xdc8] sm:$0xff] }
 0x564   :  { %6459 = vmatprep.subr.bf16.mxu1 %v6363_v59  ;;  %v6403_v59 = vld [vmem:[#allocation5 + $0xfc8] sm:$0xff] }
 0x566   :  { %6419 = vmatpush1.bf16.msra.mxu0 %v6298_v50  ;;  %v5302_v50 = vmax.f32 %v5295_v23, %v5297_v36 }
 0x567   :  { %6460 = vmatpush1.bf16.msra.mxu1 %v6362_v38  ;;  %6420 = vmatprep.subr.bf16.mxu0 %v6303_v22  ;;  %v5303_v38 = vmax.f32 %v5299_v24, %v5301_v25  ;;  %v5324_v22 = vmax.f32 %v5317_v0, %v5319_v19  ;;  %v6308_v25 = vld [vmem:[#allocation5 + $0xcd0] sm:$0xff] }
 0x568   :  { %6461 = vmatprep.subr.bf16.mxu1 %v6367_v43  ;;  %v5856_v33 = vpop.f32.mrb[96].mxu0  ;;  %v5325_v43 = vmax.f32 %v5321_v11, %v5323_v29  ;;  %v6372_v0 = vld [vmem:[#allocation5 + $0xed0] sm:$0xff]  ;;  %v6313_v11 = vld [vmem:[#allocation5 + $0xcf8] sm:$0xff] }
 0x569   :  { %v5897_v34 = vpop.f32.mrb[96].mxu1  ;;  %v5857_v44 = vadd.f32 %v5856_v33, %v9908_v28  ;;  %v5858_v58 = vpop.f32.mrb[97].mxu0  ;;  %v6375_v28 = vld [vmem:[#allocation5 + $0xee8] sm:$0xff]  ;;  %v6376_v29 = vld [vmem:[#allocation5 + $0xef0] sm:$0xff] }
 0x56a   :  { %v5899_v49 = vpop.f32.mrb[97].mxu1  ;;  %v5859_v51 = vadd.f32 %v5858_v58, %v9910_v30  ;;  %v5860_v18 = vpop.f32.mrb[98].mxu0  ;;  %6421 = vmatpush1.bf16.msra.mxu0 %v6302_v62  ;;  %v6310_v30 = vld [vmem:[#allocation5 + $0xce0] sm:$0xff]  ;;  %v6343_v33 = vld [vmem:[#allocation5 + $0xde8] sm:$0xff] }
 0x56b   :  { %v5901_v27 = vpop.f32.mrb[98].mxu1  ;;  %6462 = vmatpush1.bf16.msra.mxu1 %v6366_v32  ;;  %v9934_v42 = vadd.f32 %v5897_v34, %v5857_v44  ;;  %v5861_v53 = vpop.f32.mrb[99].mxu0  ;;  %6422 = vmatprep.subr.bf16.mxu0 %v6307_v35  ;;  %v6338_v62 = vld [vmem:[#allocation5 + $0xdc0] sm:$0xff]  ;;  %v6407_v34 = vld [vmem:[#allocation5 + $0xfe8] sm:$0xff]  ;;  %v5304_v35 = vmax.f32 %v5302_v50, %v5303_v38  ;;  %v6321_v50 = vld [vmem:[#allocation5 + $0xd38] sm:$0xff] }
 0x56c   :  { %v5902_v14 = vpop.f32.mrb[99].mxu1  ;;  %6463 = vmatprep.subr.bf16.mxu1 %v6371_v4  ;;  %v9936_v54 = vadd.f32 %v5899_v49, %v5859_v51  ;;  %v6402_v32 = vld [vmem:[#allocation5 + $0xfc0] sm:$0xff]  ;;  %v5326_v4 = vmax.f32 %v5324_v22, %v5325_v43  ;;  %v6285_v49 = vld [vmem:[#allocation5 + $0xc18] sm:$0xff]  ;;  %v6284_v53 = vld [vmem:[#allocation5 + $0xc10] sm:$0xff] }
 0x56d   :  { %v6342_v44 = vld [vmem:[#allocation5 + $0xde0] sm:$0xff]  ;;  %v6349_v51 = vld [vmem:[#allocation5 + $0xe18] sm:$0xff]  ;;  %v9938_v18 = vpack.c.bf16 %v5304_v35, %v5304_v35  ;;  %v6348_v14 = vld [vmem:[#allocation5 + $0xe10] sm:$0xff] }
 0x56e   :  { %6423 = vmatpush1.bf16.msra.mxu0 %v6306_v15  ;;  %v6406_v58 = vld [vmem:[#allocation5 + $0xfe0] sm:$0xff]  ;;  %v9940_v27 = vpack.c.bf16 %v5326_v4, %v5326_v4  ;;  %v6289_v15 = vld [vmem:[#allocation5 + $0xc38] sm:$0xff]  ;;  %v6320_v22 = vld [vmem:[#allocation5 + $0xd30] sm:$0xff] }
 0x56f   :  { %6464 = vmatpush1.bf16.msra.mxu1 %v6370_v63  ;;  %6424 = vmatprep.subr.bf16.mxu0 %v6311_v55  ;;  %v6353_v63 = vld [vmem:[#allocation5 + $0xe38] sm:$0xff]  ;;  %v6288_v55 = vld [vmem:[#allocation5 + $0xc30] sm:$0xff] }
 0x570   :  { %6465 = vmatprep.subr.bf16.mxu1 %v6375_v28  ;;  %v6352_v28 = vld [vmem:[#allocation5 + $0xe30] sm:$0xff]  ;;  %v6385_v38 = vld [vmem:[#allocation5 + $0xf38] sm:$0xff] }
 0x571   :  { %v6384_v43 = vld [vmem:[#allocation5 + $0xf30] sm:$0xff]  ;;  %v6329_v35 = vld [vmem:[#allocation5 + $0xd78] sm:$0xff] }
 0x572   :  { %6425 = vmatpush1.bf16.msra.mxu0 %v6310_v30  ;;  %v6293_v30 = vld [vmem:[#allocation5 + $0xc58] sm:$0xff] }
 0x573   :  { %6466 = vmatpush1.bf16.msra.mxu1 %v6374_v16  ;;  %6426 = vmatprep.subr.bf16.mxu0 %v6315_v40  ;;  %v6357_v16 = vld [vmem:[#allocation5 + $0xe58] sm:$0xff]  ;;  %v6292_v40 = vld [vmem:[#allocation5 + $0xc50] sm:$0xff] }
 0x574   :  { %6467 = vmatprep.subr.bf16.mxu1 %v6379_v20  ;;  %v6356_v20 = vld [vmem:[#allocation5 + $0xe50] sm:$0xff]  ;;  %v6393_v4 = vld [vmem:[#allocation5 + $0xf78] sm:$0xff] }
 0x576   :  { %6427 = vmatpush1.bf16.msra.mxu0 %v6314_v46  ;;  %v6297_v46 = vld [vmem:[#allocation5 + $0xc78] sm:$0xff] }
 0x577   :  { %6468 = vmatpush1.bf16.msra.mxu1 %v6378_v52  ;;  %6428 = vmatprep.subr.bf16.mxu0 %v6319_v21  ;;  %v6361_v52 = vld [vmem:[#allocation5 + $0xe78] sm:$0xff]  ;;  %v6296_v21 = vld [vmem:[#allocation5 + $0xc70] sm:$0xff] }
 0x578   :  { %6469 = vmatprep.subr.bf16.mxu1 %v6383_v26  ;;  %v6360_v26 = vld [vmem:[#allocation5 + $0xe70] sm:$0xff] }
 0x57a   :  { %6429 = vmatpush1.bf16.msra.mxu0 %v6318_v39  ;;  %v6301_v39 = vld [vmem:[#allocation5 + $0xc98] sm:$0xff] }
 0x57b   :  { %6470 = vmatpush1.bf16.msra.mxu1 %v6382_v61  ;;  %6430 = vmatprep.subr.bf16.mxu0 %v6323_v57  ;;  %v6365_v61 = vld [vmem:[#allocation5 + $0xe98] sm:$0xff] }
 0x57c   :  { %6471 = vmatprep.subr.bf16.mxu1 %v6387_v9  ;;  %v6305_v57 = vld [vmem:[#allocation5 + $0xcb8] sm:$0xff] }
 0x57d   :  { %v6369_v9 = vld [vmem:[#allocation5 + $0xeb8] sm:$0xff] }
 0x57e   :  { %6431 = vmatpush1.bf16.msra.mxu0 %v6322_v3  ;;  %v6304_v3 = vld [vmem:[#allocation5 + $0xcb0] sm:$0xff] }
 0x57f   :  { %6472 = vmatpush1.bf16.msra.mxu1 %v6386_v6  ;;  %6432 = vmatprep.subr.bf16.mxu0 %v6327_v10  ;;  %v6368_v6 = vld [vmem:[#allocation5 + $0xeb0] sm:$0xff] }
 0x580   :  { %6473 = vmatprep.subr.bf16.mxu1 %v6391_v2 }
 0x582   :  { %6433 = vmatpush1.bf16.msra.mxu0 %v6326_v47  ;;  %v6309_v47 = vld [vmem:[#allocation5 + $0xcd8] sm:$0xff] }
 0x583   :  { %6474 = vmatpush1.bf16.msra.mxu1 %v6390_v48  ;;  %6434 = vmatprep.subr.bf16.mxu0 %v6331_v12  ;;  %v6373_v48 = vld [vmem:[#allocation5 + $0xed8] sm:$0xff] }
 0x584   :  { %6475 = vmatprep.subr.bf16.mxu1 %v6395_v31 }
 0x586   :  { %6435 = vmatpush1.bf16.msra.mxu0 %v6330_v45 }
 0x587   :  { %6476 = vmatpush1.bf16.msra.mxu1 %v6394_v17  ;;  %6436 = vmatprep.subr.bf16.mxu0 %v6335_v1 }
 0x588   :  { %6477 = vmatprep.subr.bf16.mxu1 %v6399_v13 }
 0x58a   :  { %6437 = vmatpush1.bf16.msra.mxu0 %v6334_v5  ;;  %v6317_v5 = vld [vmem:[#allocation5 + $0xd18] sm:$0xff] }
 0x58b   :  { %6478 = vmatpush1.bf16.msra.mxu1 %v6398_v37  ;;  %6438 = vmatprep.subr.bf16.mxu0 %v6339_v8  ;;  %v6381_v37 = vld [vmem:[#allocation5 + $0xf18] sm:$0xff]  ;;  %v6316_v8 = vld [vmem:[#allocation5 + $0xd10] sm:$0xff] }
 0x58c   :  { %6479 = vmatprep.subr.bf16.mxu1 %v6403_v59  ;;  %v6380_v59 = vld [vmem:[#allocation5 + $0xf10] sm:$0xff] }
 0x58e   :  { %6439 = vmatpush1.bf16.msra.mxu0 %v6338_v62  ;;  %v6325_v62 = vld [vmem:[#allocation5 + $0xd58] sm:$0xff] }
 0x58f   :  { %6480 = vmatpush1.bf16.msra.mxu1 %v6402_v32  ;;  %6440 = vmatprep.subr.bf16.mxu0 %v6343_v33  ;;  %v6389_v32 = vld [vmem:[#allocation5 + $0xf58] sm:$0xff]  ;;  %v6324_v33 = vld [vmem:[#allocation5 + $0xd50] sm:$0xff] }
 0x590   :  { %6481 = vmatprep.subr.bf16.mxu1 %v6407_v34  ;;  %v6388_v34 = vld [vmem:[#allocation5 + $0xf50] sm:$0xff] }
 0x592   :  { %6441 = vmatpush1.bf16.msra.mxu0 %v6342_v44  ;;  %v6328_v44 = vld [vmem:[#allocation5 + $0xd70] sm:$0xff] }
 0x593   :  { %6482 = vmatpush1.bf16.msra.mxu1 %v6406_v58  ;;  %6492 = vmatprep.subr.bf16.mxu0 %v6285_v49  ;;  %v6392_v58 = vld [vmem:[#allocation5 + $0xf70] sm:$0xff]  ;;  %v6333_v49 = vld [vmem:[#allocation5 + $0xd98] sm:$0xff] }
 0x594   :  { %6533 = vmatprep.subr.bf16.mxu1 %v6349_v51  ;;  %v6397_v51 = vld [vmem:[#allocation5 + $0xf98] sm:$0xff] }
 0x595   :  { %6443 = vmatmul.mubr.bf16.vlgmr.msra.gmra.mrb[112].mxu0 %v9938_v18 }
 0x596   :  { %6484 = vmatmul.mubr.bf16.vlgmr.msra.gmra.mrb[112].mxu1 %v9940_v27  ;;  %6493 = vmatpush1.bf16.msra.mxu0 %v6284_v53  ;;  %v6332_v53 = vld [vmem:[#allocation5 + $0xd90] sm:$0xff] }
 0x597   :  { %6534 = vmatpush1.bf16.msra.mxu1 %v6348_v14  ;;  %6494 = vmatprep.subr.bf16.mxu0 %v6289_v15  ;;  %v6396_v14 = vld [vmem:[#allocation5 + $0xf90] sm:$0xff]  ;;  %v6337_v15 = vld [vmem:[#allocation5 + $0xdb8] sm:$0xff] }
 0x598   :  { %6535 = vmatprep.subr.bf16.mxu1 %v6353_v63  ;;  %6524 = vmatprep.mubr.bf16.mxu0 %v9924_v60  ;;  %v6300_v60 = vld [vmem:[#allocation5 + $0xc90] sm:$0xff]  ;;  %v6401_v63 = vld [vmem:[#allocation5 + $0xfb8] sm:$0xff] }
 0x599   :  { %6565 = vmatprep.mubr.bf16.mxu1 %v9926_v7  ;;  %v6364_v7 = vld [vmem:[#allocation5 + $0xe90] sm:$0xff] }
 0x59a   :  { %6495 = vmatpush1.bf16.msra.mxu0 %v6288_v55  ;;  %v6336_v55 = vld [vmem:[#allocation5 + $0xdb0] sm:$0xff] }
 0x59b   :  { %6536 = vmatpush1.bf16.msra.mxu1 %v6352_v28  ;;  %6496 = vmatprep.subr.bf16.mxu0 %v6293_v30  ;;  %v6400_v28 = vld [vmem:[#allocation5 + $0xfb0] sm:$0xff]  ;;  %v6341_v30 = vld [vmem:[#allocation5 + $0xdd8] sm:$0xff] }
 0x59c   :  { %6537 = vmatprep.subr.bf16.mxu1 %v6357_v16  ;;  %v6405_v16 = vld [vmem:[#allocation5 + $0xfd8] sm:$0xff] }
 0x59e   :  { %6497 = vmatpush1.bf16.msra.mxu0 %v6292_v40  ;;  %v5350_v40 = vld [vmem:[#allocation4 + $0x59] ss:$120 sm:$0x3] }
 0x59f   :  { %6538 = vmatpush1.bf16.msra.mxu1 %v6356_v20  ;;  %6498 = vmatprep.subr.bf16.mxu0 %v6297_v46  ;;  %v5352_v20 = vld [vmem:[#allocation4 + $0x5a] ss:$120 sm:$0x3]  ;;  %v5354_v46 = vld [vmem:[#allocation4 + $0x65] ss:$120 sm:$0x3] }
 0x5a0   :  { %6539 = vmatprep.subr.bf16.mxu1 %v6361_v52  ;;  %v5356_v52 = vld [vmem:[#allocation4 + $0x66] ss:$120 sm:$0x3] }
 0x5a2   :  { %6499 = vmatpush1.bf16.msra.mxu0 %v6296_v21  ;;  %v5372_v21 = vld [vmem:[#allocation4 + $0x5d] ss:$120 sm:$0x3] }
 0x5a3   :  { %6540 = vmatpush1.bf16.msra.mxu1 %v6360_v26  ;;  %6500 = vmatprep.subr.bf16.mxu0 %v6301_v39  ;;  %v5374_v26 = vld [vmem:[#allocation4 + $0x5e] ss:$120 sm:$0x3]  ;;  %v5376_v39 = vld [vmem:[#allocation4 + $0x69] ss:$120 sm:$0x3] }
 0x5a4   :  { %6541 = vmatprep.subr.bf16.mxu1 %v6365_v61  ;;  %v5378_v61 = vld [vmem:[#allocation4 + $0x6a] ss:$120 sm:$0x3] }
 0x5a6   :  { %6501 = vmatpush1.bf16.msra.mxu0 %v6300_v60  ;;  %v6340_v60 = vld [vmem:[#allocation5 + $0xdd0] sm:$0xff] }
 0x5a7   :  { %6542 = vmatpush1.bf16.msra.mxu1 %v6364_v7  ;;  %6502 = vmatprep.subr.bf16.mxu0 %v6305_v57  ;;  %v6404_v7 = vld [vmem:[#allocation5 + $0xfd0] sm:$0xff]  ;;  %v6345_v57 = vld [vmem:[#allocation5 + $0xdf8] sm:$0xff] }
 0x5a8   :  { %6543 = vmatprep.subr.bf16.mxu1 %v6369_v9  ;;  %v5938_v10 = vpop.f32.mrb[100].mxu0  ;;  %v6409_v9 = vld [vmem:[#allocation5 + $0xff8] sm:$0xff] }
 0x5a9   :  { %v5979_v2 = vpop.f32.mrb[100].mxu1  ;;  %v5939_v12 = vadd.f32 %v5938_v10, %v9920_v56  ;;  %v5940_v31 = vpop.f32.mrb[101].mxu0  ;;  %v6377_v56 = vld [vmem:[#allocation5 + $0xef8] sm:$0xff]  ;;  %v5379_v10 = vmax.f32 %v5372_v21, %v5374_v26  ;;  %v6606_v21 = vld [vmem:[#allocation5 + $0x10e0] sm:$0xff] }
 0x5aa   :  { %v5981_v45 = vpop.f32.mrb[101].mxu1  ;;  %v5941_v17 = vadd.f32 %v5940_v31, %v9922_v41  ;;  %v5942_v1 = vpop.f32.mrb[102].mxu0  ;;  %6503 = vmatpush1.bf16.msra.mxu0 %v6304_v3  ;;  %v6312_v41 = vld [vmem:[#allocation5 + $0xcf0] sm:$0xff]  ;;  %v5357_v3 = vmax.f32 %v5350_v40, %v5352_v20  ;;  %v6643_v31 = vld [vmem:[#allocation5 + $0x1208] sm:$0xff]  ;;  %v6666_v40 = vld [vmem:[#allocation5 + $0x12c0] sm:$0xff] }
 0x5ab   :  { %v5983_v13 = vpop.f32.mrb[102].mxu1  ;;  %6544 = vmatpush1.bf16.msra.mxu1 %v6368_v6  ;;  %v9948_v23 = vadd.f32 %v5979_v2, %v5939_v12  ;;  %v5943_v36 = vpop.f32.mrb[103].mxu0  ;;  %6504 = vmatprep.subr.bf16.mxu0 %v6309_v47  ;;  %v5358_v6 = vmax.f32 %v5354_v46, %v5356_v52  ;;  %v5380_v2 = vmax.f32 %v5376_v39, %v5378_v61  ;;  %v6344_v47 = vld [vmem:[#allocation5 + $0xdf0] sm:$0xff]  ;;  %v6579_v12 = vld [vmem:[#allocation5 + $0x1008] sm:$0xff]  ;;  %v6578_v1 = vld [vmem:[#allocation5 + $0x1000] sm:$0xff] }
 0x5ac   :  { %v5984_v24 = vpop.f32.mrb[103].mxu1  ;;  %6545 = vmatprep.subr.bf16.mxu1 %v6373_v48  ;;  %v9950_v19 = vadd.f32 %v5981_v45, %v5941_v17  ;;  %v6408_v48 = vld [vmem:[#allocation5 + $0xff0] sm:$0xff]  ;;  %v6642_v13 = vld [vmem:[#allocation5 + $0x1200] sm:$0xff]  ;;  %v6583_v36 = vld [vmem:[#allocation5 + $0x1028] sm:$0xff] }
 0x5ad   :  { %v5359_v45 = vmax.f32 %v5357_v3, %v5358_v6  ;;  %v5381_v17 = vmax.f32 %v5379_v10, %v5380_v2  ;;  %v6647_v24 = vld [vmem:[#allocation5 + $0x1228] sm:$0xff]  ;;  %v6670_v26 = vld [vmem:[#allocation5 + $0x12e0] sm:$0xff] }
 0x5ae   :  { %6505 = vmatpush1.bf16.msra.mxu0 %v6308_v25  ;;  %v6607_v46 = vld [vmem:[#allocation5 + $0x10e8] sm:$0xff]  ;;  %v6610_v61 = vld [vmem:[#allocation5 + $0x1100] sm:$0xff] }
 0x5af   :  { %6546 = vmatpush1.bf16.msra.mxu1 %v6372_v0  ;;  %6506 = vmatprep.subr.bf16.mxu0 %v6313_v11  ;;  %v9952_v25 = vpack.c.bf16 %v5359_v45, %v5359_v45  ;;  %v9954_v0 = vpack.c.bf16 %v5381_v17, %v5381_v17  ;;  %v6582_v11 = vld [vmem:[#allocation5 + $0x1020] sm:$0xff]  ;;  %v6671_v52 = vld [vmem:[#allocation5 + $0x12e8] sm:$0xff] }
 0x5b0   :  { %6547 = vmatprep.subr.bf16.mxu1 %v6377_v56  ;;  %v6646_v56 = vld [vmem:[#allocation5 + $0x1220] sm:$0xff]  ;;  %v6611_v39 = vld [vmem:[#allocation5 + $0x1108] sm:$0xff] }
 0x5b1   :  { %v6619_v3 = vld [vmem:[#allocation5 + $0x1148] sm:$0xff]  ;;  %v6618_v10 = vld [vmem:[#allocation5 + $0x1140] sm:$0xff] }
 0x5b2   :  { %6507 = vmatpush1.bf16.msra.mxu0 %v6312_v41  ;;  %v6587_v41 = vld [vmem:[#allocation5 + $0x1048] sm:$0xff]  ;;  %v6682_v2 = vld [vmem:[#allocation5 + $0x1340] sm:$0xff] }
 0x5b3   :  { %6548 = vmatpush1.bf16.msra.mxu1 %v6376_v29  ;;  %6508 = vmatprep.subr.bf16.mxu0 %v6317_v5  ;;  %v6651_v29 = vld [vmem:[#allocation5 + $0x1248] sm:$0xff]  ;;  %v6586_v5 = vld [vmem:[#allocation5 + $0x1040] sm:$0xff] }
 0x5b4   :  { %6549 = vmatprep.subr.bf16.mxu1 %v6381_v37  ;;  %v6591_v37 = vld [vmem:[#allocation5 + $0x1068] sm:$0xff] }
 0x5b5   :  { %v6683_v6 = vld [vmem:[#allocation5 + $0x1348] sm:$0xff] }
 0x5b6   :  { %6509 = vmatpush1.bf16.msra.mxu0 %v6316_v8  ;;  %v6590_v8 = vld [vmem:[#allocation5 + $0x1060] sm:$0xff]  ;;  %v6627_v45 = vld [vmem:[#allocation5 + $0x1188] sm:$0xff] }
 0x5b7   :  { %6550 = vmatpush1.bf16.msra.mxu1 %v6380_v59  ;;  %6510 = vmatprep.subr.bf16.mxu0 %v6321_v50  ;;  %v6654_v59 = vld [vmem:[#allocation5 + $0x1260] sm:$0xff]  ;;  %v6595_v50 = vld [vmem:[#allocation5 + $0x1088] sm:$0xff] }
 0x5b8   :  { %6551 = vmatprep.subr.bf16.mxu1 %v6385_v38  ;;  %v6659_v38 = vld [vmem:[#allocation5 + $0x1288] sm:$0xff] }
 0x5b9   :  { %v6691_v17 = vld [vmem:[#allocation5 + $0x1388] sm:$0xff] }
 0x5ba   :  { %6511 = vmatpush1.bf16.msra.mxu0 %v6320_v22  ;;  %v6594_v22 = vld [vmem:[#allocation5 + $0x1080] sm:$0xff] }
 0x5bb   :  { %6552 = vmatpush1.bf16.msra.mxu1 %v6384_v43  ;;  %6512 = vmatprep.subr.bf16.mxu0 %v6325_v62  ;;  %v6658_v43 = vld [vmem:[#allocation5 + $0x1280] sm:$0xff]  ;;  %v6599_v62 = vld [vmem:[#allocation5 + $0x10a8] sm:$0xff] }
 0x5bc   :  { %6553 = vmatprep.subr.bf16.mxu1 %v6389_v32  ;;  %v6663_v32 = vld [vmem:[#allocation5 + $0x12a8] sm:$0xff] }
 0x5be   :  { %6513 = vmatpush1.bf16.msra.mxu0 %v6324_v33  ;;  %v6598_v33 = vld [vmem:[#allocation5 + $0x10a0] sm:$0xff] }
 0x5bf   :  { %6554 = vmatpush1.bf16.msra.mxu1 %v6388_v34  ;;  %6514 = vmatprep.subr.bf16.mxu0 %v6329_v35  ;;  %v6662_v34 = vld [vmem:[#allocation5 + $0x12a0] sm:$0xff] }
 0x5c0   :  { %6555 = vmatprep.subr.bf16.mxu1 %v6393_v4 }
 0x5c2   :  { %6515 = vmatpush1.bf16.msra.mxu0 %v6328_v44  ;;  %v6603_v44 = vld [vmem:[#allocation5 + $0x10c8] sm:$0xff] }
 0x5c3   :  { %6556 = vmatpush1.bf16.msra.mxu1 %v6392_v58  ;;  %6516 = vmatprep.subr.bf16.mxu0 %v6333_v49  ;;  %v6667_v58 = vld [vmem:[#allocation5 + $0x12c8] sm:$0xff] }
 0x5c4   :  { %6557 = vmatprep.subr.bf16.mxu1 %v6397_v51 }
 0x5c6   :  { %6517 = vmatpush1.bf16.msra.mxu0 %v6332_v53 }
 0x5c7   :  { %6558 = vmatpush1.bf16.msra.mxu1 %v6396_v14  ;;  %6518 = vmatprep.subr.bf16.mxu0 %v6337_v15 }
 0x5c8   :  { %6559 = vmatprep.subr.bf16.mxu1 %v6401_v63 }
 0x5ca   :  { %6519 = vmatpush1.bf16.msra.mxu0 %v6336_v55 }
 0x5cb   :  { %6560 = vmatpush1.bf16.msra.mxu1 %v6400_v28  ;;  %6520 = vmatprep.subr.bf16.mxu0 %v6341_v30 }
 0x5cc   :  { %6561 = vmatprep.subr.bf16.mxu1 %v6405_v16  ;;  %v6602_v16 = vld [vmem:[#allocation5 + $0x10c0] sm:$0xff] }
 0x5ce   :  { %6521 = vmatpush1.bf16.msra.mxu0 %v6340_v60  ;;  %v6674_v60 = vld [vmem:[#allocation5 + $0x1300] sm:$0xff] }
 0x5cf   :  { %6562 = vmatpush1.bf16.msra.mxu1 %v6404_v7  ;;  %6522 = vmatprep.subr.bf16.mxu0 %v6345_v57  ;;  %v6615_v7 = vld [vmem:[#allocation5 + $0x1128] sm:$0xff] }
 0x5d0   :  { %6563 = vmatprep.subr.bf16.mxu1 %v6409_v9  ;;  %v6679_v57 = vld [vmem:[#allocation5 + $0x1328] sm:$0xff]  ;;  %v6678_v9 = vld [vmem:[#allocation5 + $0x1320] sm:$0xff] }
 0x5d2   :  { %6523 = vmatpush1.bf16.msra.mxu0 %v6344_v47  ;;  %v6623_v47 = vld [vmem:[#allocation5 + $0x1168] sm:$0xff] }
 0x5d3   :  { %6564 = vmatpush1.bf16.msra.mxu1 %v6408_v48  ;;  %6706 = vmatprep.subr.bf16.mxu0 %v6579_v12  ;;  %v6687_v48 = vld [vmem:[#allocation5 + $0x1368] sm:$0xff]  ;;  %v6622_v12 = vld [vmem:[#allocation5 + $0x1160] sm:$0xff] }
 0x5d4   :  { %6747 = vmatprep.subr.bf16.mxu1 %v6643_v31  ;;  %v6686_v31 = vld [vmem:[#allocation5 + $0x1360] sm:$0xff] }
 0x5d5   :  { %6525 = vmatmul.mubr.bf16.vlgmr.msra.gmra.mrb[116].mxu0 %v9938_v18  ;;  %v6650_v18 = vld [vmem:[#allocation5 + $0x1240] sm:$0xff] }
 0x5d6   :  { %6566 = vmatmul.mubr.bf16.vlgmr.msra.gmra.mrb[116].mxu1 %v9940_v27  ;;  %6707 = vmatpush1.bf16.msra.mxu0 %v6578_v1  ;;  %v6655_v27 = vld [vmem:[#allocation5 + $0x1268] sm:$0xff]  ;;  %v6626_v1 = vld [vmem:[#allocation5 + $0x1180] sm:$0xff] }
 0x5d7   :  { %6748 = vmatpush1.bf16.msra.mxu1 %v6642_v13  ;;  %6708 = vmatprep.subr.bf16.mxu0 %v6583_v36  ;;  %v6690_v13 = vld [vmem:[#allocation5 + $0x1380] sm:$0xff]  ;;  %v6631_v36 = vld [vmem:[#allocation5 + $0x11a8] sm:$0xff] }
 0x5d8   :  { %6749 = vmatprep.subr.bf16.mxu1 %v6647_v24  ;;  %6738 = vmatprep.mubr.bf16.mxu0 %v9952_v25  ;;  %v6695_v24 = vld [vmem:[#allocation5 + $0x13a8] sm:$0xff] }
 0x5d9   :  { %6779 = vmatprep.mubr.bf16.mxu1 %v9954_v0 }
 0x5da   :  { %6709 = vmatpush1.bf16.msra.mxu0 %v6582_v11  ;;  %v5339_v11 = vld [vmem:[#allocation4 + $0x57] ss:$120 sm:$0x3] }
 0x5db   :  { %6750 = vmatpush1.bf16.msra.mxu1 %v6646_v56  ;;  %6710 = vmatprep.subr.bf16.mxu0 %v6587_v41  ;;  %v5341_v56 = vld [vmem:[#allocation4 + $0x58] ss:$120 sm:$0x3]  ;;  %v5343_v41 = vld [vmem:[#allocation4 + $0x63] ss:$120 sm:$0x3] }
 0x5dc   :  { %6751 = vmatprep.subr.bf16.mxu1 %v6651_v29  ;;  %v5345_v29 = vld [vmem:[#allocation4 + $0x64] ss:$120 sm:$0x3] }
 0x5de   :  { %6711 = vmatpush1.bf16.msra.mxu0 %v6586_v5  ;;  %v5361_v5 = vld [vmem:[#allocation4 + $0x5b] ss:$120 sm:$0x3] }
 0x5df   :  { %6752 = vmatpush1.bf16.msra.mxu1 %v6650_v18  ;;  %6712 = vmatprep.subr.bf16.mxu0 %v6591_v37  ;;  %v5363_v18 = vld [vmem:[#allocation4 + $0x5c] ss:$120 sm:$0x3]  ;;  %v5365_v37 = vld [vmem:[#allocation4 + $0x67] ss:$120 sm:$0x3] }
 0x5e0   :  { %6753 = vmatprep.subr.bf16.mxu1 %v6655_v27  ;;  %v5367_v27 = vld [vmem:[#allocation4 + $0x68] ss:$120 sm:$0x3] }
 0x5e2   :  { %6713 = vmatpush1.bf16.msra.mxu0 %v6590_v8  ;;  %v6630_v8 = vld [vmem:[#allocation5 + $0x11a0] sm:$0xff] }
 0x5e3   :  { %6754 = vmatpush1.bf16.msra.mxu1 %v6654_v59  ;;  %6714 = vmatprep.subr.bf16.mxu0 %v6595_v50  ;;  %v6694_v59 = vld [vmem:[#allocation5 + $0x13a0] sm:$0xff]  ;;  %v6635_v50 = vld [vmem:[#allocation5 + $0x11c8] sm:$0xff] }
 0x5e4   :  { %6755 = vmatprep.subr.bf16.mxu1 %v6659_v38  ;;  %v6699_v38 = vld [vmem:[#allocation5 + $0x13c8] sm:$0xff] }
 0x5e6   :  { %6715 = vmatpush1.bf16.msra.mxu0 %v6594_v22  ;;  %v5346_v22 = vmax.f32 %v5339_v11, %v5341_v56 }
 0x5e7   :  { %6756 = vmatpush1.bf16.msra.mxu1 %v6658_v43  ;;  %6716 = vmatprep.subr.bf16.mxu0 %v6599_v62  ;;  %v5347_v43 = vmax.f32 %v5343_v41, %v5345_v29  ;;  %v5368_v62 = vmax.f32 %v5361_v5, %v5363_v18  ;;  %v6604_v29 = vld [vmem:[#allocation5 + $0x10d0] sm:$0xff] }
 0x5e8   :  { %6757 = vmatprep.subr.bf16.mxu1 %v6663_v32  ;;  %v6148_v35 = vpop.f32.mrb[104].mxu0  ;;  %v5369_v32 = vmax.f32 %v5365_v37, %v5367_v27  ;;  %v6668_v5 = vld [vmem:[#allocation5 + $0x12d0] sm:$0xff]  ;;  %v6609_v37 = vld [vmem:[#allocation5 + $0x10f8] sm:$0xff] }
 0x5e9   :  { %v6189_v4 = vpop.f32.mrb[104].mxu1  ;;  %v6150_v51 = vpop.f32.mrb[105].mxu0  ;;  %v6673_v27 = vld [vmem:[#allocation5 + $0x12f8] sm:$0xff] }
 0x5ea   :  { %v6190_v49 = vadd.f32 %v6189_v4, %v6148_v35  ;;  %v6191_v53 = vpop.f32.mrb[105].mxu1  ;;  %v6152_v15 = vpop.f32.mrb[106].mxu0  ;;  %6717 = vmatpush1.bf16.msra.mxu0 %v6598_v33  ;;  %v6634_v33 = vld [vmem:[#allocation5 + $0x11c0] sm:$0xff]  ;;  %v6639_v35 = vld [vmem:[#allocation5 + $0x11e8] sm:$0xff] }
 0x5eb   :  { %v6192_v14 = vadd.f32 %v6191_v53, %v6150_v51  ;;  %v6193_v63 = vpop.f32.mrb[106].mxu1  ;;  %6758 = vmatpush1.bf16.msra.mxu1 %v6662_v34  ;;  %v6153_v28 = vpop.f32.mrb[107].mxu0  ;;  %6718 = vmatprep.subr.bf16.mxu0 %v6603_v44  ;;  %v6698_v34 = vld [vmem:[#allocation5 + $0x13c0] sm:$0xff]  ;;  %v6703_v4 = vld [vmem:[#allocation5 + $0x13e8] sm:$0xff]  ;;  %v5348_v44 = vmax.f32 %v5346_v22, %v5347_v43  ;;  %v6581_v53 = vld [vmem:[#allocation5 + $0x1018] sm:$0xff] }
 0x5ec   :  { %v9961_v55 = vadd.f32 %v6190_v49, %v9934_v42  ;;  %v6194_v30 = vpop.f32.mrb[107].mxu1  ;;  %6759 = vmatprep.subr.bf16.mxu1 %v6667_v58  ;;  %v6675_v42 = vld [vmem:[#allocation5 + $0x1308] sm:$0xff]  ;;  %v5370_v58 = vmax.f32 %v5368_v62, %v5369_v32  ;;  %v6638_v49 = vld [vmem:[#allocation5 + $0x11e0] sm:$0xff]  ;;  %v6580_v28 = vld [vmem:[#allocation5 + $0x1010] sm:$0xff] }
 0x5ed   :  { %v9964_v20 = vadd.f32 %v6192_v14, %v9936_v54  ;;  %v6614_v54 = vld [vmem:[#allocation5 + $0x1120] sm:$0xff]  ;;  %v6645_v14 = vld [vmem:[#allocation5 + $0x1218] sm:$0xff]  ;;  %v9966_v15 = vpack.c.bf16 %v5348_v44, %v5348_v44  ;;  %v6644_v30 = vld [vmem:[#allocation5 + $0x1210] sm:$0xff] }
 0x5ee   :  { %6719 = vmatpush1.bf16.msra.mxu0 %v6602_v16  ;;  %v6702_v51 = vld [vmem:[#allocation5 + $0x13e0] sm:$0xff]  ;;  %v9968_v63 = vpack.c.bf16 %v5370_v58, %v5370_v58  ;;  %v6585_v16 = vld [vmem:[#allocation5 + $0x1038] sm:$0xff]  ;;  %v6676_v22 = vld [vmem:[#allocation5 + $0x1310] sm:$0xff] }
 0x5ef   :  { %6760 = vmatpush1.bf16.msra.mxu1 %v6666_v40  ;;  %6720 = vmatprep.subr.bf16.mxu0 %v6607_v46  ;;  %v6649_v40 = vld [vmem:[#allocation5 + $0x1238] sm:$0xff]  ;;  %v6584_v46 = vld [vmem:[#allocation5 + $0x1030] sm:$0xff] }
 0x5f0   :  { %6761 = vmatprep.subr.bf16.mxu1 %v6671_v52  ;;  %v6648_v52 = vld [vmem:[#allocation5 + $0x1230] sm:$0xff]  ;;  %v6617_v43 = vld [vmem:[#allocation5 + $0x1138] sm:$0xff] }
 0x5f1   :  { %v6681_v62 = vld [vmem:[#allocation5 + $0x1338] sm:$0xff]  ;;  %v6680_v32 = vld [vmem:[#allocation5 + $0x1330] sm:$0xff] }
 0x5f2   :  { %6721 = vmatpush1.bf16.msra.mxu0 %v6606_v21  ;;  %v6589_v21 = vld [vmem:[#allocation5 + $0x1058] sm:$0xff] }
 0x5f3   :  { %6762 = vmatpush1.bf16.msra.mxu1 %v6670_v26  ;;  %6722 = vmatprep.subr.bf16.mxu0 %v6611_v39  ;;  %v6653_v26 = vld [vmem:[#allocation5 + $0x1258] sm:$0xff]  ;;  %v6588_v39 = vld [vmem:[#allocation5 + $0x1050] sm:$0xff] }
 0x5f4   :  { %6763 = vmatprep.subr.bf16.mxu1 %v6675_v42  ;;  %v6652_v42 = vld [vmem:[#allocation5 + $0x1250] sm:$0xff]  ;;  %v6625_v44 = vld [vmem:[#allocation5 + $0x1178] sm:$0xff] }
 0x5f5   :  { %v6689_v58 = vld [vmem:[#allocation5 + $0x1378] sm:$0xff] }
 0x5f6   :  { %6723 = vmatpush1.bf16.msra.mxu0 %v6610_v61  ;;  %v6593_v61 = vld [vmem:[#allocation5 + $0x1078] sm:$0xff] }
 0x5f7   :  { %6764 = vmatpush1.bf16.msra.mxu1 %v6674_v60  ;;  %6724 = vmatprep.subr.bf16.mxu0 %v6615_v7  ;;  %v6657_v60 = vld [vmem:[#allocation5 + $0x1278] sm:$0xff]  ;;  %v6592_v7 = vld [vmem:[#allocation5 + $0x1070] sm:$0xff] }
 0x5f8   :  { %6765 = vmatprep.subr.bf16.mxu1 %v6679_v57  ;;  %v6656_v57 = vld [vmem:[#allocation5 + $0x1270] sm:$0xff] }
 0x5fa   :  { %6725 = vmatpush1.bf16.msra.mxu0 %v6614_v54  ;;  %v6597_v54 = vld [vmem:[#allocation5 + $0x1098] sm:$0xff] }
 0x5fb   :  { %6766 = vmatpush1.bf16.msra.mxu1 %v6678_v9  ;;  %6726 = vmatprep.subr.bf16.mxu0 %v6619_v3  ;;  %v6661_v9 = vld [vmem:[#allocation5 + $0x1298] sm:$0xff] }
 0x5fc   :  { %6767 = vmatprep.subr.bf16.mxu1 %v6683_v6  ;;  %v6601_v3 = vld [vmem:[#allocation5 + $0x10b8] sm:$0xff] }
 0x5fd   :  { %v6665_v6 = vld [vmem:[#allocation5 + $0x12b8] sm:$0xff] }
 0x5fe   :  { %6727 = vmatpush1.bf16.msra.mxu0 %v6618_v10  ;;  %v6600_v10 = vld [vmem:[#allocation5 + $0x10b0] sm:$0xff] }
 0x5ff   :  { %6768 = vmatpush1.bf16.msra.mxu1 %v6682_v2  ;;  %6728 = vmatprep.subr.bf16.mxu0 %v6623_v47  ;;  %v6664_v2 = vld [vmem:[#allocation5 + $0x12b0] sm:$0xff] }
 0x600   :  { %6769 = vmatprep.subr.bf16.mxu1 %v6687_v48 }
 0x602   :  { %6729 = vmatpush1.bf16.msra.mxu0 %v6622_v12  ;;  %v6605_v12 = vld [vmem:[#allocation5 + $0x10d8] sm:$0xff] }
 0x603   :  { %6770 = vmatpush1.bf16.msra.mxu1 %v6686_v31  ;;  %6730 = vmatprep.subr.bf16.mxu0 %v6627_v45  ;;  %v6669_v31 = vld [vmem:[#allocation5 + $0x12d8] sm:$0xff] }
 0x604   :  { %6771 = vmatprep.subr.bf16.mxu1 %v6691_v17 }
 0x606   :  { %6731 = vmatpush1.bf16.msra.mxu0 %v6626_v1 }
 0x607   :  { %6772 = vmatpush1.bf16.msra.mxu1 %v6690_v13  ;;  %6732 = vmatprep.subr.bf16.mxu0 %v6631_v36 }
 0x608   :  { %6773 = vmatprep.subr.bf16.mxu1 %v6695_v24 }
 0x60a   :  { %6733 = vmatpush1.bf16.msra.mxu0 %v6630_v8  ;;  %v6608_v8 = vld [vmem:[#allocation5 + $0x10f0] sm:$0xff] }
 0x60b   :  { %6774 = vmatpush1.bf16.msra.mxu1 %v6694_v59  ;;  %6734 = vmatprep.subr.bf16.mxu0 %v6635_v50  ;;  %v6672_v59 = vld [vmem:[#allocation5 + $0x12f0] sm:$0xff]  ;;  %v6613_v50 = vld [vmem:[#allocation5 + $0x1118] sm:$0xff] }
 0x60c   :  { %6775 = vmatprep.subr.bf16.mxu1 %v6699_v38  ;;  %v6612_v38 = vld [vmem:[#allocation5 + $0x1110] sm:$0xff] }
 0x60e   :  { %6735 = vmatpush1.bf16.msra.mxu0 %v6634_v33  ;;  %v6621_v33 = vld [vmem:[#allocation5 + $0x1158] sm:$0xff] }
 0x60f   :  { %6776 = vmatpush1.bf16.msra.mxu1 %v6698_v34  ;;  %6736 = vmatprep.subr.bf16.mxu0 %v6639_v35  ;;  %v6685_v34 = vld [vmem:[#allocation5 + $0x1358] sm:$0xff]  ;;  %v6620_v35 = vld [vmem:[#allocation5 + $0x1150] sm:$0xff] }
 0x610   :  { %6777 = vmatprep.subr.bf16.mxu1 %v6703_v4  ;;  %v6684_v4 = vld [vmem:[#allocation5 + $0x1350] sm:$0xff] }
 0x612   :  { %6737 = vmatpush1.bf16.msra.mxu0 %v6638_v49  ;;  %v6624_v49 = vld [vmem:[#allocation5 + $0x1170] sm:$0xff] }
 0x613   :  { %6778 = vmatpush1.bf16.msra.mxu1 %v6702_v51  ;;  %6788 = vmatprep.subr.bf16.mxu0 %v6581_v53  ;;  %v6688_v51 = vld [vmem:[#allocation5 + $0x1370] sm:$0xff]  ;;  %v6629_v53 = vld [vmem:[#allocation5 + $0x1198] sm:$0xff] }
 0x614   :  { %6829 = vmatprep.subr.bf16.mxu1 %v6645_v14  ;;  %v6693_v14 = vld [vmem:[#allocation5 + $0x1398] sm:$0xff] }
 0x615   :  { %6739 = vmatmul.mubr.bf16.vlgmr.msra.gmra.mrb[120].mxu0 %v9966_v15 }
 0x616   :  { %6780 = vmatmul.mubr.bf16.vlgmr.msra.gmra.mrb[120].mxu1 %v9968_v63  ;;  %6789 = vmatpush1.bf16.msra.mxu0 %v6580_v28  ;;  %v6628_v28 = vld [vmem:[#allocation5 + $0x1190] sm:$0xff] }
 0x617   :  { %6830 = vmatpush1.bf16.msra.mxu1 %v6644_v30  ;;  %6790 = vmatprep.subr.bf16.mxu0 %v6585_v16  ;;  %v6692_v30 = vld [vmem:[#allocation5 + $0x1390] sm:$0xff]  ;;  %v6633_v16 = vld [vmem:[#allocation5 + $0x11b8] sm:$0xff] }
 0x618   :  { %6831 = vmatprep.subr.bf16.mxu1 %v6649_v40  ;;  %6820 = vmatprep.mubr.bf16.mxu0 %v9952_v25  ;;  %v6596_v25 = vld [vmem:[#allocation5 + $0x1090] sm:$0xff]  ;;  %v6697_v40 = vld [vmem:[#allocation5 + $0x13b8] sm:$0xff] }
 0x619   :  { %6861 = vmatprep.mubr.bf16.mxu1 %v9954_v0  ;;  %v6660_v0 = vld [vmem:[#allocation5 + $0x1290] sm:$0xff] }
 0x61a   :  { %6791 = vmatpush1.bf16.msra.mxu0 %v6584_v46  ;;  %v6632_v46 = vld [vmem:[#allocation5 + $0x11b0] sm:$0xff] }
 0x61b   :  { %6832 = vmatpush1.bf16.msra.mxu1 %v6648_v52  ;;  %6792 = vmatprep.subr.bf16.mxu0 %v6589_v21  ;;  %v6696_v52 = vld [vmem:[#allocation5 + $0x13b0] sm:$0xff]  ;;  %v6637_v21 = vld [vmem:[#allocation5 + $0x11d8] sm:$0xff] }
 0x61c   :  { %6833 = vmatprep.subr.bf16.mxu1 %v6653_v26  ;;  %v6701_v26 = vld [vmem:[#allocation5 + $0x13d8] sm:$0xff] }
 0x61e   :  { %6793 = vmatpush1.bf16.msra.mxu0 %v6588_v39  ;;  %v6636_v39 = vld [vmem:[#allocation5 + $0x11d0] sm:$0xff] }
 0x61f   :  { %6834 = vmatpush1.bf16.msra.mxu1 %v6652_v42  ;;  %6794 = vmatprep.subr.bf16.mxu0 %v6593_v61  ;;  %v6700_v42 = vld [vmem:[#allocation5 + $0x13d0] sm:$0xff]  ;;  %v6641_v61 = vld [vmem:[#allocation5 + $0x11f8] sm:$0xff] }
 0x620   :  { %6835 = vmatprep.subr.bf16.mxu1 %v6657_v60  ;;  %v6705_v60 = vld [vmem:[#allocation5 + $0x13f8] sm:$0xff] }
 0x622   :  { %6795 = vmatpush1.bf16.msra.mxu0 %v6592_v7  ;;  %v6640_v7 = vld [vmem:[#allocation5 + $0x11f0] sm:$0xff] }
 0x623   :  { %6836 = vmatpush1.bf16.msra.mxu1 %v6656_v57  ;;  %6796 = vmatprep.subr.bf16.mxu0 %v6597_v54  ;;  %v6704_v57 = vld [vmem:[#allocation5 + $0x13f0] sm:$0xff]  ;;  %v6909_v54 = vld [vmem:[#allocation6 + $0x8] sm:$0xff] }
 0x624   :  { %6837 = vmatprep.subr.bf16.mxu1 %v6661_v9  ;;  %v6911_v9 = vld [vmem:[#allocation6 + $0x18] sm:$0xff] }
 0x626   :  { %6797 = vmatpush1.bf16.msra.mxu0 %v6596_v25  ;;  %v6908_v25 = vld [vmem:[#allocation6] sm:$0xff] }
 0x627   :  { %6838 = vmatpush1.bf16.msra.mxu1 %v6660_v0  ;;  %6798 = vmatprep.subr.bf16.mxu0 %v6601_v3  ;;  %v6910_v0 = vld [vmem:[#allocation6 + $0x10] sm:$0xff]  ;;  %v6913_v3 = vld [vmem:[#allocation6 + $0x28] sm:$0xff] }
 0x628   :  { %6839 = vmatprep.subr.bf16.mxu1 %v6665_v6  ;;  %v6230_v47 = vpop.f32.mrb[108].mxu0  ;;  %v6915_v6 = vld [vmem:[#allocation6 + $0x38] sm:$0xff] }
 0x629   :  { %v6271_v48 = vpop.f32.mrb[108].mxu1  ;;  %v6232_v17 = vpop.f32.mrb[109].mxu0 }
 0x62a   :  { %v6272_v45 = vadd.f32 %v6271_v48, %v6230_v47  ;;  %v6273_v1 = vpop.f32.mrb[109].mxu1  ;;  %v6234_v36 = vpop.f32.mrb[110].mxu0  ;;  %6799 = vmatpush1.bf16.msra.mxu0 %v6600_v10  ;;  %v6912_v10 = vld [vmem:[#allocation6 + $0x20] sm:$0xff]  ;;  %v6917_v47 = vld [vmem:[#allocation6 + $0x48] sm:$0xff]  ;;  %v6919_v48 = vld [vmem:[#allocation6 + $0x58] sm:$0xff] }
 0x62b   :  { %v6274_v13 = vadd.f32 %v6273_v1, %v6232_v17  ;;  %v6275_v24 = vpop.f32.mrb[110].mxu1  ;;  %6840 = vmatpush1.bf16.msra.mxu1 %v6664_v2  ;;  %v6235_v56 = vpop.f32.mrb[111].mxu0  ;;  %6800 = vmatprep.subr.bf16.mxu0 %v6605_v12  ;;  %v6914_v2 = vld [vmem:[#allocation6 + $0x30] sm:$0xff]  ;;  %v6916_v12 = vld [vmem:[#allocation6 + $0x40] sm:$0xff]  ;;  %v6923_v17 = vld [vmem:[#allocation6 + $0x78] sm:$0xff] }
 0x62c   :  { %v9975_v11 = vadd.f32 %v6272_v45, %v9948_v23  ;;  %v6276_v41 = vpop.f32.mrb[111].mxu1  ;;  %6841 = vmatprep.subr.bf16.mxu1 %v6669_v31  ;;  %v6677_v23 = vld [vmem:[#allocation5 + $0x1318] sm:$0xff]  ;;  %v6918_v31 = vld [vmem:[#allocation6 + $0x50] sm:$0xff]  ;;  %v6921_v45 = vld [vmem:[#allocation6 + $0x68] sm:$0xff] }
 0x62d   :  { %v9978_v18 = vadd.f32 %v6274_v13, %v9950_v19  ;;  %v6616_v19 = vld [vmem:[#allocation5 + $0x1130] sm:$0xff]  ;;  %v6925_v1 = vld [vmem:[#allocation6 + $0x88] sm:$0xff]  ;;  %v6927_v13 = vld [vmem:[#allocation6 + $0x98] sm:$0xff] }
 0x62e   :  { %6801 = vmatpush1.bf16.msra.mxu0 %v6604_v29  ;;  %v6924_v36 = vld [vmem:[#allocation6 + $0x80] sm:$0xff]  ;;  %v6926_v24 = vld [vmem:[#allocation6 + $0x90] sm:$0xff]  ;;  %v6929_v56 = vld [vmem:[#allocation6 + $0xa8] sm:$0xff] }
 0x62f   :  { %6842 = vmatpush1.bf16.msra.mxu1 %v6668_v5  ;;  %6802 = vmatprep.subr.bf16.mxu0 %v6609_v37  ;;  %v6931_v41 = vld [vmem:[#allocation6 + $0xb8] sm:$0xff]  ;;  %v6928_v29 = vld [vmem:[#allocation6 + $0xa0] sm:$0xff]  ;;  %v6930_v5 = vld [vmem:[#allocation6 + $0xb0] sm:$0xff] }
 0x630   :  { %6843 = vmatprep.subr.bf16.mxu1 %v6673_v27 }
 0x632   :  { %6803 = vmatpush1.bf16.msra.mxu0 %v6608_v8  ;;  %v6933_v8 = vld [vmem:[#allocation6 + $0xc8] sm:$0xff] }
 0x633   :  { %6844 = vmatpush1.bf16.msra.mxu1 %v6672_v59  ;;  %6804 = vmatprep.subr.bf16.mxu0 %v6613_v50  ;;  %v6935_v59 = vld [vmem:[#allocation6 + $0xd8] sm:$0xff] }
 0x634   :  { %6845 = vmatprep.subr.bf16.mxu1 %v6677_v23 }
 0x636   :  { %6805 = vmatpush1.bf16.msra.mxu0 %v6612_v38 }
 0x637   :  { %6846 = vmatpush1.bf16.msra.mxu1 %v6676_v22  ;;  %6806 = vmatprep.subr.bf16.mxu0 %v6617_v43 }
 0x638   :  { %6847 = vmatprep.subr.bf16.mxu1 %v6681_v62 }
 0x63a   :  { %6807 = vmatpush1.bf16.msra.mxu0 %v6616_v19 }
 0x63b   :  { %6848 = vmatpush1.bf16.msra.mxu1 %v6680_v32  ;;  %6808 = vmatprep.subr.bf16.mxu0 %v6621_v33 }
 0x63c   :  { %6849 = vmatprep.subr.bf16.mxu1 %v6685_v34  ;;  %v6932_v34 = vld [vmem:[#allocation6 + $0xc0] sm:$0xff] }
 0x63e   :  { %6809 = vmatpush1.bf16.msra.mxu0 %v6620_v35  ;;  %v6934_v35 = vld [vmem:[#allocation6 + $0xd0] sm:$0xff] }
 0x63f   :  { %6850 = vmatpush1.bf16.msra.mxu1 %v6684_v4  ;;  %6810 = vmatprep.subr.bf16.mxu0 %v6625_v44  ;;  %v6937_v44 = vld [vmem:[#allocation6 + $0xe8] sm:$0xff] }
 0x640   :  { %6851 = vmatprep.subr.bf16.mxu1 %v6689_v58  ;;  %v6939_v58 = vld [vmem:[#allocation6 + $0xf8] sm:$0xff] }
 0x642   :  { %6811 = vmatpush1.bf16.msra.mxu0 %v6624_v49  ;;  %v6936_v49 = vld [vmem:[#allocation6 + $0xe0] sm:$0xff] }
 0x643   :  { %6852 = vmatpush1.bf16.msra.mxu1 %v6688_v51  ;;  %6812 = vmatprep.subr.bf16.mxu0 %v6629_v53  ;;  %v6938_v51 = vld [vmem:[#allocation6 + $0xf0] sm:$0xff]  ;;  %v6941_v53 = vld [vmem:[#allocation6 + $0x108] sm:$0xff] }
 0x644   :  { %6853 = vmatprep.subr.bf16.mxu1 %v6693_v14  ;;  %v6940_v14 = vld [vmem:[#allocation6 + $0x100] sm:$0xff] }
 0x646   :  { %6813 = vmatpush1.bf16.msra.mxu0 %v6628_v28  ;;  %v6942_v28 = vld [vmem:[#allocation6 + $0x110] sm:$0xff] }
 0x647   :  { %6854 = vmatpush1.bf16.msra.mxu1 %v6692_v30  ;;  %6814 = vmatprep.subr.bf16.mxu0 %v6633_v16  ;;  %v6945_v30 = vld [vmem:[#allocation6 + $0x128] sm:$0xff]  ;;  %v6947_v16 = vld [vmem:[#allocation6 + $0x138] sm:$0xff] }
 0x648   :  { %6855 = vmatprep.subr.bf16.mxu1 %v6697_v40  ;;  %v6946_v40 = vld [vmem:[#allocation6 + $0x130] sm:$0xff] }
 0x64a   :  { %6815 = vmatpush1.bf16.msra.mxu0 %v6632_v46  ;;  %v6949_v46 = vld [vmem:[#allocation6 + $0x148] sm:$0xff] }
 0x64b   :  { %6856 = vmatpush1.bf16.msra.mxu1 %v6696_v52  ;;  %6816 = vmatprep.subr.bf16.mxu0 %v6637_v21  ;;  %v6951_v52 = vld [vmem:[#allocation6 + $0x158] sm:$0xff]  ;;  %v6948_v21 = vld [vmem:[#allocation6 + $0x140] sm:$0xff] }
 0x64c   :  { %6857 = vmatprep.subr.bf16.mxu1 %v6701_v26  ;;  %v6950_v26 = vld [vmem:[#allocation6 + $0x150] sm:$0xff] }
 0x64e   :  { %6817 = vmatpush1.bf16.msra.mxu0 %v6636_v39  ;;  %v6953_v39 = vld [vmem:[#allocation6 + $0x168] sm:$0xff] }
 0x64f   :  { %6858 = vmatpush1.bf16.msra.mxu1 %v6700_v42  ;;  %6818 = vmatprep.subr.bf16.mxu0 %v6641_v61  ;;  %v6955_v42 = vld [vmem:[#allocation6 + $0x178] sm:$0xff]  ;;  %v6952_v61 = vld [vmem:[#allocation6 + $0x160] sm:$0xff] }
 0x650   :  { %6859 = vmatprep.subr.bf16.mxu1 %v6705_v60  ;;  %v6954_v60 = vld [vmem:[#allocation6 + $0x170] sm:$0xff] }
 0x652   :  { %6819 = vmatpush1.bf16.msra.mxu0 %v6640_v7  ;;  %v6957_v7 = vld [vmem:[#allocation6 + $0x188] sm:$0xff] }
 0x653   :  { %6860 = vmatpush1.bf16.msra.mxu1 %v6704_v57  ;;  %7058 = vmatprep.subr.bf16.mxu0 %v6909_v54  ;;  %v6959_v57 = vld [vmem:[#allocation6 + $0x198] sm:$0xff]  ;;  %v6956_v54 = vld [vmem:[#allocation6 + $0x180] sm:$0xff] }
 0x654   :  { %7140 = vmatprep.subr.bf16.mxu1 %v6911_v9  ;;  %v6958_v9 = vld [vmem:[#allocation6 + $0x190] sm:$0xff] }
 0x655   :  { %6821 = vmatmul.mubr.bf16.vlgmr.msra.gmra.mrb[124].mxu0 %v9966_v15  ;;  %v6920_v15 = vld [vmem:[#allocation6 + $0x60] sm:$0xff] }
 0x656   :  { %6862 = vmatmul.mubr.bf16.vlgmr.msra.gmra.mrb[124].mxu1 %v9968_v63  ;;  %7059 = vmatpush1.bf16.msra.mxu0 %v6908_v25  ;;  %v6922_v63 = vld [vmem:[#allocation6 + $0x70] sm:$0xff]  ;;  %v6961_v25 = vld [vmem:[#allocation6 + $0x1a8] sm:$0xff] }
 0x657   :  { %7141 = vmatpush1.bf16.msra.mxu1 %v6910_v0  ;;  %7060 = vmatprep.subr.bf16.mxu0 %v6913_v3  ;;  %v6963_v0 = vld [vmem:[#allocation6 + $0x1b8] sm:$0xff]  ;;  %v6960_v3 = vld [vmem:[#allocation6 + $0x1a0] sm:$0xff] }
 0x658   :  { %7142 = vmatprep.subr.bf16.mxu1 %v6915_v6  ;;  %v6962_v6 = vld [vmem:[#allocation6 + $0x1b0] sm:$0xff] }
 0x65a   :  { %7061 = vmatpush1.bf16.msra.mxu0 %v6912_v10  ;;  %v6965_v10 = vld [vmem:[#allocation6 + $0x1c8] sm:$0xff] }
 0x65b   :  { %7143 = vmatpush1.bf16.msra.mxu1 %v6914_v2  ;;  %7062 = vmatprep.subr.bf16.mxu0 %v6917_v47  ;;  %v6967_v2 = vld [vmem:[#allocation6 + $0x1d8] sm:$0xff]  ;;  %v6964_v47 = vld [vmem:[#allocation6 + $0x1c0] sm:$0xff] }
 0x65c   :  { %7144 = vmatprep.subr.bf16.mxu1 %v6919_v48  ;;  %v6966_v48 = vld [vmem:[#allocation6 + $0x1d0] sm:$0xff] }
 0x65e   :  { %7063 = vmatpush1.bf16.msra.mxu0 %v6916_v12  ;;  %v6969_v12 = vld [vmem:[#allocation6 + $0x1e8] sm:$0xff] }
 0x65f   :  { %7145 = vmatpush1.bf16.msra.mxu1 %v6918_v31  ;;  %7064 = vmatprep.subr.bf16.mxu0 %v6921_v45  ;;  %v6971_v31 = vld [vmem:[#allocation6 + $0x1f8] sm:$0xff]  ;;  %v6968_v45 = vld [vmem:[#allocation6 + $0x1e0] sm:$0xff] }
 0x660   :  { %7146 = vmatprep.subr.bf16.mxu1 %v6923_v17  ;;  %v6970_v17 = vld [vmem:[#allocation6 + $0x1f0] sm:$0xff] }
 0x662   :  { %7065 = vmatpush1.bf16.msra.mxu0 %v6920_v15  ;;  %v6973_v15 = vld [vmem:[#allocation6 + $0x208] sm:$0xff] }
 0x663   :  { %7147 = vmatpush1.bf16.msra.mxu1 %v6922_v63  ;;  %7066 = vmatprep.subr.bf16.mxu0 %v6925_v1  ;;  %v6975_v63 = vld [vmem:[#allocation6 + $0x218] sm:$0xff] }
 0x664   :  { %7148 = vmatprep.subr.bf16.mxu1 %v6927_v13 }
 0x666   :  { %7067 = vmatpush1.bf16.msra.mxu0 %v6924_v36 }
 0x667   :  { %7149 = vmatpush1.bf16.msra.mxu1 %v6926_v24  ;;  %7068 = vmatprep.subr.bf16.mxu0 %v6929_v56 }
 0x668   :  { %7150 = vmatprep.subr.bf16.mxu1 %v6931_v41  ;;  %v6444_v37 = vpop.f32.mrb[112].mxu0 }
 0x669   :  { %v6485_v27 = vpop.f32.mrb[112].mxu1  ;;  %v6446_v23 = vpop.f32.mrb[113].mxu0 }
 0x66a   :  { %v6486_v50 = vadd.f32 %v6485_v27, %v6444_v37  ;;  %v6487_v38 = vpop.f32.mrb[113].mxu1  ;;  %v6448_v43 = vpop.f32.mrb[114].mxu0  ;;  %7069 = vmatpush1.bf16.msra.mxu0 %v6928_v29 }
 0x66b   :  { %v6488_v22 = vadd.f32 %v6487_v38, %v6446_v23  ;;  %v6489_v62 = vpop.f32.mrb[114].mxu1  ;;  %7151 = vmatpush1.bf16.msra.mxu1 %v6930_v5  ;;  %v6449_v32 = vpop.f32.mrb[115].mxu0  ;;  %7070 = vmatprep.subr.bf16.mxu0 %v6933_v8 }
 0x66c   :  { %v9983_v19 = vadd.f32 %v6486_v50, %v9961_v55  ;;  %v6490_v33 = vpop.f32.mrb[115].mxu1  ;;  %7152 = vmatprep.subr.bf16.mxu1 %v6935_v59  ;;  %v6943_v55 = vld [vmem:[#allocation6 + $0x118] sm:$0xff]  ;;  %v6876_v50 = vlaneseq }
 0x66d   :  { %v9986_v4 = vadd.f32 %v6488_v22, %v9964_v20  ;;  %v6944_v20 = vld [vmem:[#allocation6 + $0x120] sm:$0xff]  ;;  %v9997_v22 = vld [vmem:[#allocation16] sm:$0xf] }
 0x66e   :  { %7071 = vmatpush1.bf16.msra.mxu0 %v6932_v34  ;;  %v9994_v23 = vshrl.u32 %v6876_v50, 7  ;;  %v7010_v50 = vld [vmem:[#allocation6 + $0x330] sm:$0xff] }
 0x66f   :  { %7153 = vmatpush1.bf16.msra.mxu1 %v6934_v35  ;;  %7072 = vmatprep.subr.bf16.mxu0 %v6937_v44 }
 0x670   :  { %7154 = vmatprep.subr.bf16.mxu1 %v6939_v58  ;;  %v6878_v38 = vsub.s32 0, %v9994_v23  ;;  %v6882_v43 = vsub.s32 1, %v9994_v23 }
 0x672   :  { %7073 = vmatpush1.bf16.msra.mxu0 %v6936_v49  ;;  %v6883_v44 = vrot.slane %v9997_v22, %v6882_v43 }
 0x673   :  { %7155 = vmatpush1.bf16.msra.mxu1 %v6938_v51  ;;  %7074 = vmatprep.subr.bf16.mxu0 %v6941_v53 }
 0x674   :  { %7156 = vmatprep.subr.bf16.mxu1 %v6943_v55 }
 0x676   :  { %7075 = vmatpush1.bf16.msra.mxu0 %v6940_v14 }
 0x677   :  { %7157 = vmatpush1.bf16.msra.mxu1 %v6942_v28  ;;  %7076 = vmatprep.subr.bf16.mxu0 %v6945_v30 }
 0x678   :  { %7158 = vmatprep.subr.bf16.mxu1 %v6947_v16 }
 0x67a   :  { %7077 = vmatpush1.bf16.msra.mxu0 %v6944_v20 }
 0x67b   :  { %7159 = vmatpush1.bf16.msra.mxu1 %v6946_v40  ;;  %7078 = vmatprep.subr.bf16.mxu0 %v6949_v46 }
 0x67c   :  { %7160 = vmatprep.subr.bf16.mxu1 %v6951_v52  ;;  %v6972_v52 = vld [vmem:[#allocation6 + $0x200] sm:$0xff] }
 0x67e   :  { %7079 = vmatpush1.bf16.msra.mxu0 %v6948_v21  ;;  %v6974_v21 = vld [vmem:[#allocation6 + $0x210] sm:$0xff] }
 0x67f   :  { %7161 = vmatpush1.bf16.msra.mxu1 %v6950_v26  ;;  %7080 = vmatprep.subr.bf16.mxu0 %v6953_v39  ;;  %v6977_v26 = vld [vmem:[#allocation6 + $0x228] sm:$0xff]  ;;  %v6979_v39 = vld [vmem:[#allocation6 + $0x238] sm:$0xff] }
 0x680   :  { %7162 = vmatprep.subr.bf16.mxu1 %v6955_v42  ;;  %v6981_v42 = vld [vmem:[#allocation6 + $0x248] sm:$0xff] }
 0x682   :  { %7081 = vmatpush1.bf16.msra.mxu0 %v6952_v61  ;;  %v6983_v61 = vld [vmem:[#allocation6 + $0x258] sm:$0xff] }
 0x683   :  { %7163 = vmatpush1.bf16.msra.mxu1 %v6954_v60  ;;  %7082 = vmatprep.subr.bf16.mxu0 %v6957_v7  ;;  %v6980_v60 = vld [vmem:[#allocation6 + $0x240] sm:$0xff]  ;;  %v6982_v7 = vld [vmem:[#allocation6 + $0x250] sm:$0xff] }
 0x684   :  { %7164 = vmatprep.subr.bf16.mxu1 %v6959_v57  ;;  %v6985_v57 = vld [vmem:[#allocation6 + $0x268] sm:$0xff] }
 0x686   :  { %7083 = vmatpush1.bf16.msra.mxu0 %v6956_v54  ;;  %v6987_v54 = vld [vmem:[#allocation6 + $0x278] sm:$0xff] }
 0x687   :  { %7165 = vmatpush1.bf16.msra.mxu1 %v6958_v9  ;;  %7084 = vmatprep.subr.bf16.mxu0 %v6961_v25  ;;  %v6984_v9 = vld [vmem:[#allocation6 + $0x260] sm:$0xff]  ;;  %v6986_v25 = vld [vmem:[#allocation6 + $0x270] sm:$0xff] }
 0x688   :  { %7166 = vmatprep.subr.bf16.mxu1 %v6963_v0  ;;  %v6989_v0 = vld [vmem:[#allocation6 + $0x288] sm:$0xff] }
 0x68a   :  { %7085 = vmatpush1.bf16.msra.mxu0 %v6960_v3  ;;  %v6991_v3 = vld [vmem:[#allocation6 + $0x298] sm:$0xff] }
 0x68b   :  { %7167 = vmatpush1.bf16.msra.mxu1 %v6962_v6  ;;  %7086 = vmatprep.subr.bf16.mxu0 %v6965_v10  ;;  %v6988_v6 = vld [vmem:[#allocation6 + $0x280] sm:$0xff]  ;;  %v6990_v10 = vld [vmem:[#allocation6 + $0x290] sm:$0xff] }
 0x68c   :  { %7168 = vmatprep.subr.bf16.mxu1 %v6967_v2  ;;  %v6993_v2 = vld [vmem:[#allocation6 + $0x2a8] sm:$0xff] }
 0x68e   :  { %7087 = vmatpush1.bf16.msra.mxu0 %v6964_v47  ;;  %v6995_v47 = vld [vmem:[#allocation6 + $0x2b8] sm:$0xff] }
 0x68f   :  { %7169 = vmatpush1.bf16.msra.mxu1 %v6966_v48  ;;  %7088 = vmatprep.subr.bf16.mxu0 %v6969_v12  ;;  %v6992_v48 = vld [vmem:[#allocation6 + $0x2a0] sm:$0xff]  ;;  %v6994_v12 = vld [vmem:[#allocation6 + $0x2b0] sm:$0xff] }
 0x690   :  { %7170 = vmatprep.subr.bf16.mxu1 %v6971_v31  ;;  %v6997_v31 = vld [vmem:[#allocation6 + $0x2c8] sm:$0xff] }
 0x692   :  { %7089 = vmatpush1.bf16.msra.mxu0 %v6968_v45  ;;  %v6999_v45 = vld [vmem:[#allocation6 + $0x2d8] sm:$0xff] }
 0x693   :  { %7171 = vmatpush1.bf16.msra.mxu1 %v6970_v17  ;;  %7099 = vmatprep.subr.bf16.mxu0 %v6973_v15  ;;  %v6996_v17 = vld [vmem:[#allocation6 + $0x2c0] sm:$0xff]  ;;  %v6998_v15 = vld [vmem:[#allocation6 + $0x2d0] sm:$0xff] }
 0x694   :  { %7181 = vmatprep.subr.bf16.mxu1 %v6975_v63  ;;  %v7001_v63 = vld [vmem:[#allocation6 + $0x2e8] sm:$0xff] }
 0x6a8   :  { %v6526_v1 = vpop.f32.mrb[116].mxu0 }
 0x6a9   :  { %v6567_v13 = vpop.f32.mrb[116].mxu1  ;;  %v6528_v24 = vpop.f32.mrb[117].mxu0 }
 0x6aa   :  { %v6568_v36 = vadd.f32 %v6567_v13, %v6526_v1  ;;  %v6569_v56 = vpop.f32.mrb[117].mxu1  ;;  %v6530_v29 = vpop.f32.mrb[118].mxu0  ;;  %v7003_v1 = vld [vmem:[#allocation6 + $0x2f8] sm:$0xff]  ;;  %v7000_v13 = vld [vmem:[#allocation6 + $0x2e0] sm:$0xff] }
 0x6ab   :  { %v6570_v41 = vadd.f32 %v6569_v56, %v6528_v24  ;;  %v6571_v5 = vpop.f32.mrb[118].mxu1  ;;  %v6531_v27 = vpop.f32.mrb[119].mxu0  ;;  %v7005_v24 = vld [vmem:[#allocation6 + $0x308] sm:$0xff]  ;;  %v7007_v56 = vld [vmem:[#allocation6 + $0x318] sm:$0xff]  ;;  %v7006_v29 = vld [vmem:[#allocation6 + $0x310] sm:$0xff] }
 0x6ac   :  { %v9989_v37 = vadd.f32 %v6568_v36, %v9975_v11  ;;  %v6572_v8 = vpop.f32.mrb[119].mxu1  ;;  %v6879_v11 = vrot.slane %v9997_v22, %v6878_v38  ;;  %v7002_v36 = vld [vmem:[#allocation6 + $0x2f0] sm:$0xff]  ;;  %v7009_v5 = vld [vmem:[#allocation6 + $0x328] sm:$0xff]  ;;  %v7011_v27 = vld [vmem:[#allocation6 + $0x338] sm:$0xff] }
 0x6ad   :  { %v9992_v59 = vadd.f32 %v6570_v41, %v9978_v18  ;;  %v7004_v41 = vld [vmem:[#allocation6 + $0x300] sm:$0xff] }
 0x6ae   :  { %v7008_v8 = vld [vmem:[#allocation6 + $0x320] sm:$0xff] }
 0x6e8   :  { %v6740_v62 = vpop.f32.mrb[120].mxu0 }
 0x6e9   :  { %v6781_v32 = vpop.f32.mrb[120].mxu1  ;;  %v6742_v34 = vpop.f32.mrb[121].mxu0 }
 0x6ea   :  { %v6782_v33 = vadd.f32 %v6781_v32, %v6740_v62  ;;  %v6783_v35 = vpop.f32.mrb[121].mxu1  ;;  %v6744_v58 = vpop.f32.mrb[122].mxu0  ;;  %v7013_v62 = vld [vmem:[#allocation6 + $0x348] sm:$0xff]  ;;  %v7015_v32 = vld [vmem:[#allocation6 + $0x358] sm:$0xff] }
 0x6eb   :  { %v6784_v18 = vadd.f32 %v6783_v35, %v6742_v34  ;;  %v6785_v49 = vpop.f32.mrb[122].mxu1  ;;  %v6745_v53 = vpop.f32.mrb[123].mxu0  ;;  %v7017_v34 = vld [vmem:[#allocation6 + $0x368] sm:$0xff]  ;;  %v7019_v35 = vld [vmem:[#allocation6 + $0x378] sm:$0xff] }
 0x6ec   :  { %v6870_v51 = vadd.f32 %v6782_v33, %v9983_v19  ;;  %v6786_v55 = vpop.f32.mrb[123].mxu1  ;;  %v6976_v19 = vld [vmem:[#allocation6 + $0x220] sm:$0xff]  ;;  %v7021_v58 = vld [vmem:[#allocation6 + $0x388] sm:$0xff]  ;;  %v7023_v49 = vld [vmem:[#allocation6 + $0x398] sm:$0xff] }
 0x6ed   :  { %v6871_v14 = vadd.f32 %v6784_v18, %v9986_v4  ;;  %v6978_v4 = vld [vmem:[#allocation6 + $0x230] sm:$0xff]  ;;  %v7012_v33 = vld [vmem:[#allocation6 + $0x340] sm:$0xff]  ;;  %v7025_v55 = vld [vmem:[#allocation6 + $0x3a8] sm:$0xff] }
 0x6ee   :  { %v6896_v28 = vadd.f32 %v6879_v11, %v6870_v51  ;;  %v7014_v11 = vld [vmem:[#allocation6 + $0x350] sm:$0xff]  ;;  %v7016_v18 = vld [vmem:[#allocation6 + $0x360] sm:$0xff] }
 0x6ef   :  { %v6897_v30 = vadd.f32 %v6883_v44, %v6871_v14  ;;  %v7018_v44 = vld [vmem:[#allocation6 + $0x370] sm:$0xff]  ;;  %v7020_v51 = vld [vmem:[#allocation6 + $0x380] sm:$0xff]  ;;  %v7027_v14 = vld [vmem:[#allocation6 + $0x3b8] sm:$0xff] }
 0x6f0   :  { %v6900_v16 = vmax.f32 %v6896_v28, 0.0  ;;  %v7022_v53 = vld [vmem:[#allocation6 + $0x390] sm:$0xff]  ;;  %v6886_v28 = vsub.s32 2, %v9994_v23 }
 0x6f1   :  { %v6901_v20 = vmax.f32 %v6897_v30, 0.0  ;;  %v6890_v30 = vsub.s32 3, %v9994_v23 }
 0x6f2   :  { %v6904_v46 = vpack.c.bf16 %v6900_v16, %v6900_v16  ;;  %v7024_v16 = vld [vmem:[#allocation6 + $0x3a0] sm:$0xff] }
 0x6f3   :  { %v6905_v40 = vpack.c.bf16 %v6901_v20, %v6901_v20  ;;  %v7026_v20 = vld [vmem:[#allocation6 + $0x3b0] sm:$0xff] }
 0x6f5   :  { %7090 = vmatprep.mubr.bf16.mxu0 %v6905_v40  ;;  %7172 = vmatprep.mubr.bf16.mxu1 %v6905_v40 }
 0x6f6   :  { %7091 = vmatmul.mubr.bf16.vlgmr.msra.gmra.mrb[128].mxu0 %v6904_v46  ;;  %7173 = vmatmul.mubr.bf16.vlgmr.msra.gmra.mrb[128].mxu1 %v6904_v46 }
 0x6f7   :  { %7100 = vmatpush1.bf16.msra.mxu0 %v6972_v52  ;;  %7182 = vmatpush1.bf16.msra.mxu1 %v6974_v21  ;;  %v7029_v52 = vld [vmem:[#allocation6 + $0x3c8] sm:$0xff]  ;;  %v7031_v21 = vld [vmem:[#allocation6 + $0x3d8] sm:$0xff] }
 0x6f8   :  { %7101 = vmatprep.subr.bf16.mxu0 %v6977_v26  ;;  %7183 = vmatprep.subr.bf16.mxu1 %v6979_v39  ;;  %v6887_v39 = vrot.slane %v9997_v22, %v6886_v28 }
 0x6fb   :  { %7102 = vmatpush1.bf16.msra.mxu0 %v6976_v19  ;;  %7184 = vmatpush1.bf16.msra.mxu1 %v6978_v4 }
 0x6fc   :  { %7103 = vmatprep.subr.bf16.mxu0 %v6981_v42  ;;  %7185 = vmatprep.subr.bf16.mxu1 %v6983_v61  ;;  %v6891_v61 = vrot.slane %v9997_v22, %v6890_v30 }
 0x6ff   :  { %7104 = vmatpush1.bf16.msra.mxu0 %v6980_v60  ;;  %7186 = vmatpush1.bf16.msra.mxu1 %v6982_v7 }
 0x700   :  { %7105 = vmatprep.subr.bf16.mxu0 %v6985_v57  ;;  %7187 = vmatprep.subr.bf16.mxu1 %v6987_v54 }
 0x703   :  { %7106 = vmatpush1.bf16.msra.mxu0 %v6984_v9  ;;  %7188 = vmatpush1.bf16.msra.mxu1 %v6986_v25  ;;  %v7028_v25 = vld [vmem:[#allocation6 + $0x3c0] sm:$0xff] }
 0x704   :  { %7107 = vmatprep.subr.bf16.mxu0 %v6989_v0  ;;  %7189 = vmatprep.subr.bf16.mxu1 %v6991_v3  ;;  %v7030_v0 = vld [vmem:[#allocation6 + $0x3d0] sm:$0xff] }
 0x707   :  { %7108 = vmatpush1.bf16.msra.mxu0 %v6988_v6  ;;  %7190 = vmatpush1.bf16.msra.mxu1 %v6990_v10  ;;  %v7033_v6 = vld [vmem:[#allocation6 + $0x3e8] sm:$0xff]  ;;  %v7035_v10 = vld [vmem:[#allocation6 + $0x3f8] sm:$0xff] }
 0x708   :  { %7109 = vmatprep.subr.bf16.mxu0 %v6993_v2  ;;  %7191 = vmatprep.subr.bf16.mxu1 %v6995_v47 }
 0x70b   :  { %7110 = vmatpush1.bf16.msra.mxu0 %v6992_v48  ;;  %7192 = vmatpush1.bf16.msra.mxu1 %v6994_v12  ;;  %v7032_v48 = vld [vmem:[#allocation6 + $0x3e0] sm:$0xff]  ;;  %v7034_v12 = vld [vmem:[#allocation6 + $0x3f0] sm:$0xff] }
 0x70c   :  { %7111 = vmatprep.subr.bf16.mxu0 %v6997_v31  ;;  %7193 = vmatprep.subr.bf16.mxu1 %v6999_v45 }
 0x70f   :  { %7112 = vmatpush1.bf16.msra.mxu0 %v6996_v17  ;;  %7194 = vmatpush1.bf16.msra.mxu1 %v6998_v15  ;;  %v8915_v17 = vmov 1983009808  }
 0x710   :  { %7113 = vmatprep.subr.bf16.mxu0 %v7001_v63  ;;  %7195 = vmatprep.subr.bf16.mxu1 %v7003_v1  ;;  %v7229_v15 = vunpack.c.l.s4 %v8915_v17 }
 0x713   :  { %7114 = vmatpush1.bf16.msra.mxu0 %v7000_v13  ;;  %7196 = vmatpush1.bf16.msra.mxu1 %v7002_v36  ;;  %v7230_v36 = vunpack.c.0.s8 %v7229_v15 }
 0x714   :  { %7115 = vmatprep.subr.bf16.mxu0 %v7005_v24  ;;  %7197 = vmatprep.subr.bf16.mxu1 %v7007_v56 }
 0x717   :  { %7116 = vmatpush1.bf16.msra.mxu0 %v7004_v41  ;;  %7198 = vmatpush1.bf16.msra.mxu1 %v7006_v29 }
 0x718   :  { %7117 = vmatprep.subr.bf16.mxu0 %v7009_v5  ;;  %7199 = vmatprep.subr.bf16.mxu1 %v7011_v27 }
 0x71b   :  { %7118 = vmatpush1.bf16.msra.mxu0 %v7008_v8  ;;  %7200 = vmatpush1.bf16.msra.mxu1 %v7010_v50 }
 0x71c   :  { %7119 = vmatprep.subr.bf16.mxu0 %v7013_v62  ;;  %7201 = vmatprep.subr.bf16.mxu1 %v7015_v32  ;;  %v7233_v62 = vsub.s32 %v7230_v36, %v9994_v23 }
 0x71f   :  { %7120 = vmatpush1.bf16.msra.mxu0 %v7012_v33  ;;  %7202 = vmatpush1.bf16.msra.mxu1 %v7014_v11 }
 0x720   :  { %7121 = vmatprep.subr.bf16.mxu0 %v7017_v34  ;;  %7203 = vmatprep.subr.bf16.mxu1 %v7019_v35 }
 0x723   :  { %7122 = vmatpush1.bf16.msra.mxu0 %v7016_v18  ;;  %7204 = vmatpush1.bf16.msra.mxu1 %v7018_v44 }
 0x724   :  { %7123 = vmatprep.subr.bf16.mxu0 %v7021_v58  ;;  %7205 = vmatprep.subr.bf16.mxu1 %v7023_v49 }
 0x727   :  { %7124 = vmatpush1.bf16.msra.mxu0 %v7020_v51  ;;  %7206 = vmatpush1.bf16.msra.mxu1 %v7022_v53 }
 0x728   :  { %7125 = vmatprep.subr.bf16.mxu0 %v7025_v55  ;;  %7207 = vmatprep.subr.bf16.mxu1 %v7027_v14  ;;  %v6822_v40 = vpop.f32.mrb[124].mxu0 }
 0x729   :  { %v6863_v46 = vpop.f32.mrb[124].mxu1  ;;  %v6824_v19 = vpop.f32.mrb[125].mxu0 }
 0x72a   :  { %v6864_v26 = vadd.f32 %v6863_v46, %v6822_v40  ;;  %v6865_v4 = vpop.f32.mrb[125].mxu1  ;;  %v6826_v60 = vpop.f32.mrb[126].mxu0 }
 0x72b   :  { %v6866_v42 = vadd.f32 %v6865_v4, %v6824_v19  ;;  %v6867_v7 = vpop.f32.mrb[126].mxu1  ;;  %7126 = vmatpush1.bf16.msra.mxu0 %v7024_v16  ;;  %7208 = vmatpush1.bf16.msra.mxu1 %v7026_v20  ;;  %v6827_v54 = vpop.f32.mrb[127].mxu0 }
 0x72c   :  { %v6872_v57 = vadd.f32 %v6864_v26, %v9989_v37  ;;  %v6868_v9 = vpop.f32.mrb[127].mxu1  ;;  %7127 = vmatprep.subr.bf16.mxu0 %v7029_v52  ;;  %7209 = vmatprep.subr.bf16.mxu1 %v7031_v21 }
 0x72d   :  { %v6873_v3 = vadd.f32 %v6866_v42, %v9992_v59  ;;  %v7036_v59 = vld [vmem:[#allocation17] sm:$0xf] }
 0x72e   :  { %v6898_v2 = vadd.f32 %v6887_v39, %v6872_v57  ;;  %v7041_v63 = vrot.slane %v7036_v59, %v6878_v38  ;;  %v7049_v1 = vrot.slane %v7036_v59, %v6886_v28  ;;  %v7045_v13 = vrot.slane %v7036_v59, %v6882_v43 }
 0x72f   :  { %v6899_v47 = vadd.f32 %v6891_v61, %v6873_v3  ;;  %7128 = vmatpush1.bf16.msra.mxu0 %v7028_v25  ;;  %7210 = vmatpush1.bf16.msra.mxu1 %v7030_v0  ;;  %v7053_v24 = vrot.slane %v7036_v59, %v6890_v30 }
 0x730   :  { %v6902_v22 = vmax.f32 %v6898_v2, 0.0  ;;  %7129 = vmatprep.subr.bf16.mxu0 %v7033_v6  ;;  %7211 = vmatprep.subr.bf16.mxu1 %v7035_v10 }
 0x731   :  { %v6903_v37 = vmax.f32 %v6899_v47, 0.0 }
 0x732   :  { %v6906_v45 = vpack.c.bf16 %v6902_v22, %v6902_v22 }
 0x733   :  { %7130 = vmatpush1.bf16.msra.mxu0 %v7032_v48  ;;  %7212 = vmatpush1.bf16.msra.mxu1 %v7034_v12  ;;  %v6907_v31 = vpack.c.bf16 %v6903_v37, %v6903_v37 }
 0x735   :  { %7131 = vmatprep.mubr.bf16.mxu0 %v6907_v31  ;;  %7213 = vmatprep.mubr.bf16.mxu1 %v6907_v31 }
 0x736   :  { %7132 = vmatmul.mubr.bf16.vlgmr.msra.gmra.mrb[128].mxu0 %v6906_v45  ;;  %7214 = vmatmul.mubr.bf16.vlgmr.msra.gmra.mrb[128].mxu1 %v6906_v45 }
 0x809   :  { %v7133_v56 = vpop.f32.mrb[128].mxu0  ;;  %v7215_v41 = vpop.f32.mrb[128].mxu1 }
 0x80a   :  { %v8380_v29 = vadd.f32 %v7133_v56, %v7041_v63  ;;  %v8382_v5 = vadd.f32 %v7215_v41, %v7049_v1  ;;  %v7135_v27 = vpop.f32.mrb[129].mxu0  ;;  %v7217_v8 = vpop.f32.mrb[129].mxu1 }
 0x80b   :  { %v8381_v50 = vadd.f32 %v7135_v27, %v7045_v13  ;;  %v8383_v32 = vadd.f32 %v7217_v8, %v7053_v24  ;;  %v7137_v33 = vpop.f32.mrb[130].mxu0  ;;  %v7219_v11 = vpop.f32.mrb[130].mxu1 }
 0x80c   :  { %v7138_v34 = vpop.f32.mrb[131].mxu0  ;;  %v7220_v38 = vpop.f32.mrb[131].mxu1 }
 0x80d   :  { %v7226_v35 = vcombine.low %v8380_v29, %v8381_v50  ;;  %v7227_v18 = vcombine.low %v8382_v5, %v8383_v32 }
 0x80f   :  { %v7234_v43 = vrot.slane %v7226_v35, %v7233_v62  ;;  %v7241_v44 = vrot.slane %v7227_v18, %v7233_v62 }
 0x811   :  { %v7242_v58 = vcombine.low %v7234_v43, %v7241_v44 }
 0x813   :  { %7244 = vst [vmem:[#allocation19] sm:$0xff] %v7242_v58 }
 0x814   :  { %8870 = shalt.err (!%p8867_p10)
}
 0x815   :  { %s8871_s11 = scalar_lea.hbm %s10040_s9, 128 }
 0x816   :  { %p8872_p11 = scmp.ne.s32.totalorder %s10040_s9, %s8871_s11  ;;  %p8875_p12 = scmp.lt.u32.totalorder %s8871_s11, %s10040_s9 }
 0x818   :  { %p8877_p13 = pnand %p8875_p12, %p8872_p11 }
 0x81a   :  { %8880 = shalt.err (!%p8877_p13)
}
 0x81b   :  { %7254 = dma.vmem_to_hbm [thread:$0]  %s7252_s26, 128, %s10040_s9, [#allocation10]  }
 0x81c   :  { %8893 = dma.done.wait [#allocation10], 128  }
 0x81d   :  { %8894 = vsyncadd [#allocation10], 4294967168 }
 0x81e   :  { %7258 = vsyncpa [#allocation9], 1 }
 0x81f   :  { %7259 = vsyncpa [#allocation12], 1 }
 0x820   :  { %7260 = vsyncpa [#allocation15], 1 }
 0x821   :  { %7261 = vsyncpa [#allocation18], 1 }
 0x822   :  { %7262 = vsyncpa [#allocation10], 1 }
 0x823   :  { %7263 = vsyncmov [#allocation7] }
 0x826   :  { %s7264_s10 = vpop.sfrf %7263 }
 0x827   :  { %p7586_p0 = scmp.ne.s32.totalorder %s7264_s10, 0 }
 0x829   :  { %7268 = shalt.err (%p7586_p0)  }
 0x82a   :  { %7270 = vsyncmov [#allocation7 + $0x1] }
 0x82d   :  { %s7271_s14 = vpop.sfrf %7270 }
 0x82e   :  { %p7587_p1 = scmp.ne.s32.totalorder %s7271_s14, 0 }
 0x830   :  { %7275 = shalt.err (%p7587_p1)  }

</bundles_post_ra>
